<compile_context>
chip_gen: v6e
topology: v6e:2x2x1
jax: 0.10.0
libtpu: 0.0.40
codegen_flags: <defaults>
</compile_context>

<pallas_src>
import functools

import jax
import jax.numpy as jnp
from jax import lax
from jax.experimental import pallas as pl
from jax.experimental.pallas import tpu as pltpu

EPS = 1e-5                        # nn.BatchNorm2d default
VMEM_LIMIT = 48 * 1024 * 1024     # above 16/32 MiB scoped defaults, below v7x 64 MiB


# ----------------------------- Pallas kernels ------------------------------ #

def _assemble_patches(xp_ref, patch_ref, H, W, C):
    """Build the (H*W, 9C) im2col block in VMEM from a zero-padded (H+2,W+2,C) image."""
    for dy in range(3):
        for dx in range(3):
            t = dy * 3 + dx
            tap = xp_ref[dy:dy + H, dx:dx + W, :]                # (H, W, C) bf16
            patch_ref[:, t * C:(t + 1) * C] = tap.reshape(H * W, C)


def _conv_and_stats(patch_ref, w_ref, conv_ref, sum_ref, sq_ref, H, W, C):
    """One wide-K MXU matmul + per-image partial BN statistics (f32)."""
    conv = jnp.dot(patch_ref[...], w_ref[...],
                   preferred_element_type=jnp.float32)           # (H*W, C) f32
    conv_ref[0] = conv.reshape(H, W, C).astype(conv_ref.dtype)   # bf16 slab store
    sum_ref[0] = jnp.sum(conv, axis=0, keepdims=True)            # stats from f32 accum
    sq_ref[0] = jnp.sum(conv * conv, axis=0, keepdims=True)


def _conv1_kernel(x_ref, w_ref, conv_ref, sum_ref, sq_ref, xp_ref, patch_ref,
                  *, H, W, C):
    """Stage 1: zero-pad in VMEM, in-kernel im2col, conv matmul, partial stats."""
    xp_ref[...] = jnp.zeros_like(xp_ref)
    xp_ref[1:H + 1, 1:W + 1, :] = x_ref[0].astype(jnp.bfloat16)
    _assemble_patches(xp_ref, patch_ref, H, W, C)
    _conv_and_stats(patch_ref, w_ref, conv_ref, sum_ref, sq_ref, H, W, C)


def _conv2_fused_kernel(c1_ref, ss1_ref, w_ref, conv_ref, sum_ref, sq_ref,
                        yp_ref, patch_ref, *, H, W, C):
    """Stage 2 (fused): apply folded BN1 + PReLU on the fly, zero-pad, im2col, matmul."""
    scale = ss1_ref[0:1, :].reshape(1, 1, C)
    shift = ss1_ref[1:2, :].reshape(1, 1, C)
    alpha = ss1_ref[2:3, :].reshape(1, 1, C)
    y = c1_ref[0].astype(jnp.float32) * scale + shift            # BN1 (folded)
    y = jnp.where(y >= 0.0, y, alpha * y)                        # PReLU
    yp_ref[...] = jnp.zeros_like(yp_ref)                         # zero ring (SAME pad)
    yp_ref[1:H + 1, 1:W + 1, :] = y.astype(jnp.bfloat16)
    _assemble_patches(yp_ref, patch_ref, H, W, C)
    _conv_and_stats(patch_ref, w_ref, conv_ref, sum_ref, sq_ref, H, W, C)


def _bn_residual_kernel(c2_ref, res_ref, ss_ref, o_ref):
    """Final pass: folded BN2 + residual add, lane-dense (128-wide) tiles."""
    scale = ss_ref[0:1, :]
    shift = ss_ref[1:2, :]
    o_ref[...] = c2_ref[...].astype(jnp.float32) * scale + shift + res_ref[...]


# --------------------------- pallas_call wrappers --------------------------- #

def _image_spec(H, W, C):
    return pl.BlockSpec((1, H, W, C), lambda i: (i, 0, 0, 0))


def conv_stage(inp, weights, *, ss1=None, slab_dtype=jnp.bfloat16):
    """One conv stage over grid=(N,). ss1=None -> stage 1; else fused stage 2."""
    N, H, W, C = inp.shape
    K = weights.shape[0]                                    # 9*C

    stats_shape = jax.ShapeDtypeStruct((N, 1, C), jnp.float32)
    stats_spec = pl.BlockSpec((1, 1, C), lambda i: (i, 0, 0))
    scratch = [pltpu.VMEM((H + 2, W + 2, C), jnp.bfloat16),  # zero-padded image
               pltpu.VMEM((H * W, K), jnp.bfloat16)]         # im2col patches

    if ss1 is None:
        kern = functools.partial(_conv1_kernel, H=H, W=W, C=C)
        in_specs = [_image_spec(H, W, C),
                    pl.BlockSpec((K, C), lambda i: (0, 0))]  # weights resident
        args = (inp, weights)
    else:
        kern = functools.partial(_conv2_fused_kernel, H=H, W=W, C=C)
        in_specs = [_image_spec(H, W, C),
                    pl.BlockSpec((3, C), lambda i: (0, 0)),  # scale1/shift1/alpha
                    pl.BlockSpec((K, C), lambda i: (0, 0))]
        args = (inp, ss1, weights)

    return pl.pallas_call(
        kern,
        out_shape=(jax.ShapeDtypeStruct((N, H, W, C), slab_dtype),
                   stats_shape, stats_shape),
        grid=(N,),
        in_specs=in_specs,
        out_specs=(_image_spec(H, W, C), stats_spec, stats_spec),
        scratch_shapes=scratch,
        compiler_params=pltpu.CompilerParams(
            dimension_semantics=("parallel",),   # per-image partial stats -> no race
            vmem_limit_bytes=VMEM_LIMIT),
    )(*args)


def _pick_rows(m, target=2048):
    """Largest divisor of m that is <= target and (multiple of 8 or full)."""
    cap = min(m, target)
    for t in range(cap, 0, -1):
        if m % t == 0 and (t % 8 == 0 or t == m):
            return t
    return m


def bn_residual_add(conv2, residual_nhwc, scale, shift):
    """Lane-dense BN2 + residual: view (M, C) slabs as (M/r, r*C) with r*C == 128."""
    N, H, W, C = conv2.shape
    M = N * H * W
    r = 128 // C if (C <= 128 and 128 % C == 0) else 1
    while r > 1 and M % r:
        r //= 2
    Mr, Cr = M // r, C * r
    c2 = conv2.reshape(Mr, Cr)                               # free row-major reshape
    res = residual_nhwc.reshape(Mr, Cr)
    ss = jnp.tile(jnp.concatenate([scale, shift], axis=0), (1, r))   # (2, Cr)
    rows = _pick_rows(Mr)

    out = pl.pallas_call(
        _bn_residual_kernel,
        out_shape=jax.ShapeDtypeStruct((Mr, Cr), jnp.float32),
        grid=(Mr // rows,),
        in_specs=[pl.BlockSpec((rows, Cr), lambda i: (i, 0)),
                  pl.BlockSpec((rows, Cr), lambda i: (i, 0)),
                  pl.BlockSpec((2, Cr), lambda i: (0, 0))],
        out_specs=pl.BlockSpec((rows, Cr), lambda i: (i, 0)),
        compiler_params=pltpu.CompilerParams(
            dimension_semantics=("parallel",),
            vmem_limit_bytes=VMEM_LIMIT),
    )(c2, res, ss)
    return out.reshape(N, H, W, C)


# ------------------------------ JAX glue ----------------------------------- #

def _fold_bn(sum_p, sq_p, gamma, beta, m):
    """Reduce per-image partial stats and fold batch-stat BN into scale/shift."""
    s = jnp.sum(sum_p, axis=0)                               # (1, C)
    q = jnp.sum(sq_p, axis=0)
    mean = s / m
    # Single-pass variance; clamp guards the rare cancellation case.
    var = jnp.maximum(q / m - mean * mean, 0.0)
    scale = gamma * lax.rsqrt(var + EPS)
    shift = beta - mean * scale
    return scale, shift


def residual_block_forward(x_nchw, params, slab_dtype=jnp.bfloat16):
    N, C, H, W = x_nchw.shape
    M = N * H * W
    # TODO(synk): drop the NCHW<->NHWC transposes if the surrounding model is NHWC.
    x_nhwc = jnp.transpose(x_nchw, (0, 2, 3, 1)).astype(jnp.float32)

    w1 = params["w1_mat"].astype(jnp.bfloat16)
    w2 = params["w2_mat"].astype(jnp.bfloat16)

    # Conv biases omitted: batch-stat BatchNorm (train mode) cancels per-channel
    # biases exactly; eval-mode (running stats) would need them added back.
    conv1, s1, q1 = conv_stage(x_nhwc, w1, slab_dtype=slab_dtype)
    scale1, shift1 = _fold_bn(s1, q1, params["g1"], params["bt1"], M)
    alpha_row = jnp.broadcast_to(params["prelu_a"].reshape(1, 1), (1, C))
    ss1 = jnp.concatenate([scale1, shift1, alpha_row], axis=0)        # (3, C)

    conv2, s2, q2 = conv_stage(conv1, w2, ss1=ss1, slab_dtype=slab_dtype)
    scale2, shift2 = _fold_bn(s2, q2, params["g2"], params["bt2"], M)

    out_nhwc = bn_residual_add(conv2, x_nhwc, scale2, shift2)
    return jnp.transpose(out_nhwc, (0, 3, 1, 2))                      # NCHW


# -------------------------- pure-JAX reference ------------------------------ #

def _ref_conv_bn(x_nhwc, w_hwio, b, g, bt):
    # Same numerics family as the kernels: bf16 MXU inputs, f32 accumulation.
    y = lax.conv_general_dilated(
        x_nhwc.astype(jnp.bfloat16), w_hwio.astype(jnp.bfloat16),
        window_strides=(1, 1), padding="SAME",
        dimension_numbers=("NHWC", "HWIO", "NHWC"),
        preferred_element_type=jnp.float32) + b     # bias kept; BN cancels it
    mean = jnp.mean(y, axis=(0, 1, 2), keepdims=True)
    var = jnp.mean(jnp.square(y - mean), axis=(0, 1, 2), keepdims=True)
    return (y - mean) * lax.rsqrt(var + EPS) * g + bt


def residual_block_reference(x_nchw, params):
    x = jnp.transpose(x_nchw, (0, 2, 3, 1)).astype(jnp.float32)
    h = _ref_conv_bn(x, params["w1_hwio"], params["b1"], params["g1"], params["bt1"])
    a = params["prelu_a"][0]
    h = jnp.where(h >= 0.0, h, a * h)
    o = _ref_conv_bn(h, params["w2_hwio"], params["b2"], params["g2"], params["bt2"])
    o = o + x
    return jnp.transpose(o, (0, 3, 1, 2))


# --------------------------------- main ------------------------------------ #

def init_params(key, n_channels, k=3):
    ks = jax.random.split(key, 8)
    C = n_channels
    w1 = 0.05 * jax.random.normal(ks[0], (k, k, C, C), jnp.float32)   # HWIO
    w2 = 0.05 * jax.random.normal(ks[1], (k, k, C, C), jnp.float32)
    b1 = 0.02 * jax.random.normal(ks[2], (1, C), jnp.float32)
    b2 = 0.02 * jax.random.normal(ks[3], (1, C), jnp.float32)
    g1 = 1.0 + 0.1 * jax.random.normal(ks[4], (1, C), jnp.float32)    # BN gamma
    g2 = 1.0 + 0.1 * jax.random.normal(ks[5], (1, C), jnp.float32)
    bt1 = 0.1 * jax.random.normal(ks[6], (1, C), jnp.float32)         # BN beta
    bt2 = 0.1 * jax.random.normal(ks[7], (1, C), jnp.float32)
    prelu_a = jnp.full((1,), 0.25, jnp.float32)                       # nn.PReLU default
    return dict(
        w1_hwio=w1, w2_hwio=w2,
        w1_mat=w1.reshape(k * k * C, C), w2_mat=w2.reshape(k * k * C, C),
        b1=b1, b2=b2, g1=g1, g2=g2, bt1=bt1, bt2=bt2, prelu_a=prelu_a,
    )


if __name__ == "__main__":
    key = jax.random.PRNGKey(0)
    k_x, k_p = jax.random.split(key)

    N, C, H, W = 2, 64, 16, 16          # module default n_channels=64
    x = jax.random.normal(k_x, (N, C, H, W), jnp.float32)
    params = init_params(k_p, C)

    ref = jax.block_until_ready(residual_block_reference(x, params))

    # Tight correctness check: f32 intermediate slabs (same conv numerics as ref).
    fwd_f32 = jax.jit(functools.partial(residual_block_forward,
                                        slab_dtype=jnp.float32))
    out_f32 = jax.block_until_ready(fwd_f32(x, params))
    assert out_f32.shape == (N, C, H, W), out_f32.shape
    err_f32 = float(jnp.max(jnp.abs(out_f32 - ref)))
    assert err_f32 < 5e-3, f"f32-slab mismatch vs reference: {err_f32}"

    # Optimized path: bf16 intermediate slabs (halved HBM traffic).  Tolerance
    # covers a few bf16 ulps of O(3) conv activations amplified by the folded
    # BN scale; structural bugs produce errors >= 0.1.
    fwd = jax.jit(residual_block_forward)
    out = jax.block_until_ready(fwd(x, params))
    assert out.shape == (N, C, H, W), out.shape
    err_max = float(jnp.max(jnp.abs(out - ref)))
    err_mean = float(jnp.mean(jnp.abs(out - ref)))
    assert err_max < 4e-2 and err_mean < 1e-2, (err_max, err_mean)

    print("KERNEL_OK")
</pallas_src>

<mosaic_0001>
module attributes {stable_mosaic.version = 11 : i64} {
  func.func @_conv1_kernel(%arg0: i32, %arg1: memref<1x16x16x64xf32, #tpu.memory_space<vmem>>, %arg2: memref<576x64xbf16, #tpu.memory_space<vmem>>, %arg3: memref<1x16x16x64xf32, #tpu.memory_space<vmem>>, %arg4: memref<1x1x64xf32, #tpu.memory_space<vmem>>, %arg5: memref<1x1x64xf32, #tpu.memory_space<vmem>>, %arg6: memref<18x18x64xbf16, #tpu.memory_space<vmem>>, %arg7: memref<256x576xbf16, #tpu.memory_space<vmem>>) attributes {dimension_semantics = [#tpu.dimension_semantics<parallel>], iteration_bounds = array<i64: 2>, scalar_prefetch = 0 : i64, scratch_operands = 2 : i64, tpu.core_type = #tpu.core_type<tc>, window_params = [{transform_indices = @transform_0, window_bounds = array<i64: 1, 16, 16, 64>}, {pipeline_mode = #tpu.pipeline_mode<synchronous>, transform_indices = @transform_1, window_bounds = array<i64: 576, 64>}, {transform_indices = @transform_2, window_bounds = array<i64: 1, 16, 16, 64>}, {transform_indices = @transform_3, window_bounds = array<i64: 1, 1, 64>}, {transform_indices = @transform_4, window_bounds = array<i64: 1, 1, 64>}]} {
    %cst = arith.constant 0.000000e+00 : bf16
    %0 = vector.broadcast %cst : bf16 to vector<18x18x64xbf16>
    %c0 = arith.constant 0 : index
    %c0_0 = arith.constant 0 : index
    %c0_1 = arith.constant 0 : index
    %1 = vector.load %arg6[%c0, %c0_0, %c0_1] : memref<18x18x64xbf16, #tpu.memory_space<vmem>>, vector<18x18x64xbf16>
    tpu.vector_store %arg6[%c0, %c0_0, %c0_1], %0 {strides = array<i32>} : memref<18x18x64xbf16, #tpu.memory_space<vmem>>, vector<18x18x64xbf16>,
    %c0_2 = arith.constant 0 : index
    %c0_3 = arith.constant 0 : index
    %c0_4 = arith.constant 0 : index
    %c0_5 = arith.constant 0 : index
    %2 = vector.load %arg1[%c0_2, %c0_3, %c0_4, %c0_5] : memref<1x16x16x64xf32, #tpu.memory_space<vmem>>, vector<1x16x16x64xf32>
    %3 = vector.shape_cast %2 : vector<1x16x16x64xf32> to vector<16x16x64xf32>
    %4 = arith.truncf %3 : vector<16x16x64xf32> to vector<16x16x64xbf16>
    %c1 = arith.constant 1 : index
    %c1_6 = arith.constant 1 : index
    %c0_7 = arith.constant 0 : index
    %5 = vector.load %arg6[%c1, %c1_6, %c0_7] : memref<18x18x64xbf16, #tpu.memory_space<vmem>>, vector<16x16x64xbf16>
    tpu.vector_store %arg6[%c1, %c1_6, %c0_7], %4 {strides = array<i32>} : memref<18x18x64xbf16, #tpu.memory_space<vmem>>, vector<16x16x64xbf16>,
    %c0_8 = arith.constant 0 : index
    %c0_9 = arith.constant 0 : index
    %c0_10 = arith.constant 0 : index
    %6 = vector.load %arg6[%c0_8, %c0_9, %c0_10] : memref<18x18x64xbf16, #tpu.memory_space<vmem>>, vector<16x16x64xbf16>
    %7 = vector.shape_cast %6 : vector<16x16x64xbf16> to vector<256x64xbf16>
    %c0_11 = arith.constant 0 : index
    %c0_12 = arith.constant 0 : index
    %8 = vector.load %arg7[%c0_11, %c0_12] : memref<256x576xbf16, #tpu.memory_space<vmem>>, vector<256x64xbf16>
    tpu.vector_store %arg7[%c0_11, %c0_12], %7 {strides = array<i32>} : memref<256x576xbf16, #tpu.memory_space<vmem>>, vector<256x64xbf16>,
    %c0_13 = arith.constant 0 : index
    %c1_14 = arith.constant 1 : index
    %c0_15 = arith.constant 0 : index
    %9 = vector.load %arg6[%c0_13, %c1_14, %c0_15] : memref<18x18x64xbf16, #tpu.memory_space<vmem>>, vector<16x16x64xbf16>
    %10 = vector.shape_cast %9 : vector<16x16x64xbf16> to vector<256x64xbf16>
    %c0_16 = arith.constant 0 : index
    %c64 = arith.constant 64 : index
    %11 = vector.load %arg7[%c0_16, %c64] : memref<256x576xbf16, #tpu.memory_space<vmem>>, vector<256x64xbf16>
    tpu.vector_store %arg7[%c0_16, %c64], %10 {strides = array<i32>} : memref<256x576xbf16, #tpu.memory_space<vmem>>, vector<256x64xbf16>,
    %c0_17 = arith.constant 0 : index
    %c2 = arith.constant 2 : index
    %c0_18 = arith.constant 0 : index
    %12 = vector.load %arg6[%c0_17, %c2, %c0_18] : memref<18x18x64xbf16, #tpu.memory_space<vmem>>, vector<16x16x64xbf16>
    %13 = vector.shape_cast %12 : vector<16x16x64xbf16> to vector<256x64xbf16>
    %c0_19 = arith.constant 0 : index
    %c128 = arith.constant 128 : index
    %14 = vector.load %arg7[%c0_19, %c128] : memref<256x576xbf16, #tpu.memory_space<vmem>>, vector<256x64xbf16>
    tpu.vector_store %arg7[%c0_19, %c128], %13 {strides = array<i32>} : memref<256x576xbf16, #tpu.memory_space<vmem>>, vector<256x64xbf16>,
    %c1_20 = arith.constant 1 : index
    %c0_21 = arith.constant 0 : index
    %c0_22 = arith.constant 0 : index
    %15 = vector.load %arg6[%c1_20, %c0_21, %c0_22] : memref<18x18x64xbf16, #tpu.memory_space<vmem>>, vector<16x16x64xbf16>
    %16 = vector.shape_cast %15 : vector<16x16x64xbf16> to vector<256x64xbf16>
    %c0_23 = arith.constant 0 : index
    %c192 = arith.constant 192 : index
    %17 = vector.load %arg7[%c0_23, %c192] : memref<256x576xbf16, #tpu.memory_space<vmem>>, vector<256x64xbf16>
    tpu.vector_store %arg7[%c0_23, %c192], %16 {strides = array<i32>} : memref<256x576xbf16, #tpu.memory_space<vmem>>, vector<256x64xbf16>,
    %c1_24 = arith.constant 1 : index
    %c1_25 = arith.constant 1 : index
    %c0_26 = arith.constant 0 : index
    %18 = vector.load %arg6[%c1_24, %c1_25, %c0_26] : memref<18x18x64xbf16, #tpu.memory_space<vmem>>, vector<16x16x64xbf16>
    %19 = vector.shape_cast %18 : vector<16x16x64xbf16> to vector<256x64xbf16>
    %c0_27 = arith.constant 0 : index
    %c256 = arith.constant 256 : index
    %20 = vector.load %arg7[%c0_27, %c256] : memref<256x576xbf16, #tpu.memory_space<vmem>>, vector<256x64xbf16>
    tpu.vector_store %arg7[%c0_27, %c256], %19 {strides = array<i32>} : memref<256x576xbf16, #tpu.memory_space<vmem>>, vector<256x64xbf16>,
    %c1_28 = arith.constant 1 : index
    %c2_29 = arith.constant 2 : index
    %c0_30 = arith.constant 0 : index
    %21 = vector.load %arg6[%c1_28, %c2_29, %c0_30] : memref<18x18x64xbf16, #tpu.memory_space<vmem>>, vector<16x16x64xbf16>
    %22 = vector.shape_cast %21 : vector<16x16x64xbf16> to vector<256x64xbf16>
    %c0_31 = arith.constant 0 : index
    %c320 = arith.constant 320 : index
    %23 = vector.load %arg7[%c0_31, %c320] : memref<256x576xbf16, #tpu.memory_space<vmem>>, vector<256x64xbf16>
    tpu.vector_store %arg7[%c0_31, %c320], %22 {strides = array<i32>} : memref<256x576xbf16, #tpu.memory_space<vmem>>, vector<256x64xbf16>,
    %c2_32 = arith.constant 2 : index
    %c0_33 = arith.constant 0 : index
    %c0_34 = arith.constant 0 : index
    %24 = vector.load %arg6[%c2_32, %c0_33, %c0_34] : memref<18x18x64xbf16, #tpu.memory_space<vmem>>, vector<16x16x64xbf16>
    %25 = vector.shape_cast %24 : vector<16x16x64xbf16> to vector<256x64xbf16>
    %c0_35 = arith.constant 0 : index
    %c384 = arith.constant 384 : index
    %26 = vector.load %arg7[%c0_35, %c384] : memref<256x576xbf16, #tpu.memory_space<vmem>>, vector<256x64xbf16>
    tpu.vector_store %arg7[%c0_35, %c384], %25 {strides = array<i32>} : memref<256x576xbf16, #tpu.memory_space<vmem>>, vector<256x64xbf16>,
    %c2_36 = arith.constant 2 : index
    %c1_37 = arith.constant 1 : index
    %c0_38 = arith.constant 0 : index
    %27 = vector.load %arg6[%c2_36, %c1_37, %c0_38] : memref<18x18x64xbf16, #tpu.memory_space<vmem>>, vector<16x16x64xbf16>
    %28 = vector.shape_cast %27 : vector<16x16x64xbf16> to vector<256x64xbf16>
    %c0_39 = arith.constant 0 : index
    %c448 = arith.constant 448 : index
    %29 = vector.load %arg7[%c0_39, %c448] : memref<256x576xbf16, #tpu.memory_space<vmem>>, vector<256x64xbf16>
    tpu.vector_store %arg7[%c0_39, %c448], %28 {strides = array<i32>} : memref<256x576xbf16, #tpu.memory_space<vmem>>, vector<256x64xbf16>,
    %c2_40 = arith.constant 2 : index
    %c2_41 = arith.constant 2 : index
    %c0_42 = arith.constant 0 : index
    %30 = vector.load %arg6[%c2_40, %c2_41, %c0_42] : memref<18x18x64xbf16, #tpu.memory_space<vmem>>, vector<16x16x64xbf16>
    %31 = vector.shape_cast %30 : vector<16x16x64xbf16> to vector<256x64xbf16>
    %c0_43 = arith.constant 0 : index
    %c512 = arith.constant 512 : index
    %32 = vector.load %arg7[%c0_43, %c512] : memref<256x576xbf16, #tpu.memory_space<vmem>>, vector<256x64xbf16>
    tpu.vector_store %arg7[%c0_43, %c512], %31 {strides = array<i32>} : memref<256x576xbf16, #tpu.memory_space<vmem>>, vector<256x64xbf16>,
    %c0_44 = arith.constant 0 : index
    %c0_45 = arith.constant 0 : index
    %33 = vector.load %arg7[%c0_44, %c0_45] : memref<256x576xbf16, #tpu.memory_space<vmem>>, vector<256x576xbf16>
    %c0_46 = arith.constant 0 : index
    %c0_47 = arith.constant 0 : index
    %34 = vector.load %arg2[%c0_46, %c0_47] : memref<576x64xbf16, #tpu.memory_space<vmem>>, vector<576x64xbf16>
    %cst_48 = arith.constant dense<0.000000e+00> : vector<256x64xf32>
    %35 = tpu.matmul %33, %34, %cst_48 {dimension_numbers = #tpu.dot_dimension_numbers<[1], [0], [0], [1], [0, 0, 1, 1], [], []>} : vector<256x576xbf16>, vector<576x64xbf16>, vector<256x64xf32> -> vector<256x64xf32>
    %36 = vector.shape_cast %35 : vector<256x64xf32> to vector<16x16x64xf32>
    %c0_49 = arith.constant 0 : index
    %c0_50 = arith.constant 0 : index
    %c0_51 = arith.constant 0 : index
    %c0_52 = arith.constant 0 : index
    %37 = vector.load %arg3[%c0_49, %c0_50, %c0_51, %c0_52] : memref<1x16x16x64xf32, #tpu.memory_space<vmem>>, vector<1x16x16x64xf32>
    %38 = vector.shape_cast %37 : vector<1x16x16x64xf32> to vector<16x16x64xf32>
    %39 = vector.shape_cast %36 : vector<16x16x64xf32> to vector<1x16x16x64xf32>
    tpu.vector_store %arg3[%c0_49, %c0_50, %c0_51, %c0_52], %39 {strides = array<i32>} : memref<1x16x16x64xf32, #tpu.memory_space<vmem>>, vector<1x16x16x64xf32>,
    %cst_53 = arith.constant dense<0.000000e+00> : vector<64xf32>
    %40 = vector.multi_reduction <add>, %35, %cst_53 [0] : vector<256x64xf32> to vector<64xf32>
    %41 = vector.shape_cast %40 : vector<64xf32> to vector<1x64xf32>
    %c0_54 = arith.constant 0 : index
    %c0_55 = arith.constant 0 : index
    %c0_56 = arith.constant 0 : index
    %42 = vector.load %arg4[%c0_54, %c0_55, %c0_56] : memref<1x1x64xf32, #tpu.memory_space<vmem>>, vector<1x1x64xf32>
    %43 = vector.shape_cast %42 : vector<1x1x64xf32> to vector<1x64xf32>
    %44 = vector.shape_cast %41 : vector<1x64xf32> to vector<1x1x64xf32>
    tpu.vector_store %arg4[%c0_54, %c0_55, %c0_56], %44 {strides = array<i32>} : memref<1x1x64xf32, #tpu.memory_space<vmem>>, vector<1x1x64xf32>,
    %45 = arith.mulf %35, %35 : vector<256x64xf32>
    %cst_57 = arith.constant dense<0.000000e+00> : vector<64xf32>
    %46 = vector.multi_reduction <add>, %45, %cst_57 [0] : vector<256x64xf32> to vector<64xf32>
    %47 = vector.shape_cast %46 : vector<64xf32> to vector<1x64xf32>
    %c0_58 = arith.constant 0 : index
    %c0_59 = arith.constant 0 : index
    %c0_60 = arith.constant 0 : index
    %48 = vector.load %arg5[%c0_58, %c0_59, %c0_60] : memref<1x1x64xf32, #tpu.memory_space<vmem>>, vector<1x1x64xf32>
    %49 = vector.shape_cast %48 : vector<1x1x64xf32> to vector<1x64xf32>
    %50 = vector.shape_cast %47 : vector<1x64xf32> to vector<1x1x64xf32>
    tpu.vector_store %arg5[%c0_58, %c0_59, %c0_60], %50 {strides = array<i32>} : memref<1x1x64xf32, #tpu.memory_space<vmem>>, vector<1x1x64xf32>,
    return
  }
  func.func @transform_0(%arg0: i32) -> (i32, i32, i32, i32) {
    %c0_i32 = arith.constant 0 : i32
    %c0_i32_0 = arith.constant 0 : i32
    %c0_i32_1 = arith.constant 0 : i32
    %c0_i32_2 = arith.constant 0 : i32
    return %arg0, %c0_i32, %c0_i32_0, %c0_i32_1 : i32, i32, i32, i32
  }
  func.func @transform_1(%arg0: i32) -> (i32, i32) {
    %c0_i32 = arith.constant 0 : i32
    %c0_i32_0 = arith.constant 0 : i32
    %c0_i32_1 = arith.constant 0 : i32
    return %c0_i32, %c0_i32_0 : i32, i32
  }
  func.func @transform_2(%arg0: i32) -> (i32, i32, i32, i32) {
    %c0_i32 = arith.constant 0 : i32
    %c0_i32_0 = arith.constant 0 : i32
    %c0_i32_1 = arith.constant 0 : i32
    %c0_i32_2 = arith.constant 0 : i32
    return %arg0, %c0_i32, %c0_i32_0, %c0_i32_1 : i32, i32, i32, i32
  }
  func.func @transform_3(%arg0: i32) -> (i32, i32, i32) {
    %c0_i32 = arith.constant 0 : i32
    %c0_i32_0 = arith.constant 0 : i32
    %c0_i32_1 = arith.constant 0 : i32
    return %arg0, %c0_i32, %c0_i32_0 : i32, i32, i32
  }
  func.func @transform_4(%arg0: i32) -> (i32, i32, i32) {
    %c0_i32 = arith.constant 0 : i32
    %c0_i32_0 = arith.constant 0 : i32
    %c0_i32_1 = arith.constant 0 : i32
    return %arg0, %c0_i32, %c0_i32_0 : i32, i32, i32
  }
}

module attributes {stable_mosaic.version = 11 : i64} {
  func.func @_conv2_fused_kernel(%arg0: i32, %arg1: memref<1x16x16x64xf32, #tpu.memory_space<vmem>>, %arg2: memref<3x64xf32, #tpu.memory_space<vmem>>, %arg3: memref<576x64xbf16, #tpu.memory_space<vmem>>, %arg4: memref<1x16x16x64xf32, #tpu.memory_space<vmem>>, %arg5: memref<1x1x64xf32, #tpu.memory_space<vmem>>, %arg6: memref<1x1x64xf32, #tpu.memory_space<vmem>>, %arg7: memref<18x18x64xbf16, #tpu.memory_space<vmem>>, %arg8: memref<256x576xbf16, #tpu.memory_space<vmem>>) attributes {dimension_semantics = [#tpu.dimension_semantics<parallel>], iteration_bounds = array<i64: 2>, scalar_prefetch = 0 : i64, scratch_operands = 2 : i64, tpu.core_type = #tpu.core_type<tc>, window_params = [{transform_indices = @transform_0, window_bounds = array<i64: 1, 16, 16, 64>}, {pipeline_mode = #tpu.pipeline_mode<synchronous>, transform_indices = @transform_1, window_bounds = array<i64: 3, 64>}, {pipeline_mode = #tpu.pipeline_mode<synchronous>, transform_indices = @transform_2, window_bounds = array<i64: 576, 64>}, {transform_indices = @transform_3, window_bounds = array<i64: 1, 16, 16, 64>}, {transform_indices = @transform_4, window_bounds = array<i64: 1, 1, 64>}, {transform_indices = @transform_5, window_bounds = array<i64: 1, 1, 64>}]} {
    %c0 = arith.constant 0 : index
    %c0_0 = arith.constant 0 : index
    %0 = vector.load %arg2[%c0, %c0_0] : memref<3x64xf32, #tpu.memory_space<vmem>>, vector<1x64xf32>
    %1 = vector.shape_cast %0 : vector<1x64xf32> to vector<1x1x64xf32>
    %c1 = arith.constant 1 : index
    %c0_1 = arith.constant 0 : index
    %2 = vector.load %arg2[%c1, %c0_1] : memref<3x64xf32, #tpu.memory_space<vmem>>, vector<1x64xf32>
    %3 = vector.shape_cast %2 : vector<1x64xf32> to vector<1x1x64xf32>
    %c2 = arith.constant 2 : index
    %c0_2 = arith.constant 0 : index
    %4 = vector.load %arg2[%c2, %c0_2] : memref<3x64xf32, #tpu.memory_space<vmem>>, vector<1x64xf32>
    %5 = vector.shape_cast %4 : vector<1x64xf32> to vector<1x1x64xf32>
    %c0_3 = arith.constant 0 : index
    %c0_4 = arith.constant 0 : index
    %c0_5 = arith.constant 0 : index
    %c0_6 = arith.constant 0 : index
    %6 = vector.load %arg1[%c0_3, %c0_4, %c0_5, %c0_6] : memref<1x16x16x64xf32, #tpu.memory_space<vmem>>, vector<1x16x16x64xf32>
    %7 = vector.shape_cast %6 : vector<1x16x16x64xf32> to vector<16x16x64xf32>
    %8 = vector.broadcast %1 : vector<1x1x64xf32> to vector<16x16x64xf32>
    %9 = arith.mulf %7, %8 : vector<16x16x64xf32>
    %10 = vector.broadcast %3 : vector<1x1x64xf32> to vector<16x16x64xf32>
    %11 = arith.addf %9, %10 : vector<16x16x64xf32>
    %cst = arith.constant 0.000000e+00 : f32
    %12 = vector.broadcast %cst : f32 to vector<16x16x64xf32>
    %13 = arith.cmpf oge, %11, %12 : vector<16x16x64xf32>
    %14 = vector.broadcast %5 : vector<1x1x64xf32> to vector<16x16x64xf32>
    %15 = arith.mulf %14, %11 : vector<16x16x64xf32>
    %16 = arith.select %13, %11, %15 : vector<16x16x64xi1>, vector<16x16x64xf32>
    %cst_7 = arith.constant 0.000000e+00 : bf16
    %17 = vector.broadcast %cst_7 : bf16 to vector<18x18x64xbf16>
    %c0_8 = arith.constant 0 : index
    %c0_9 = arith.constant 0 : index
    %c0_10 = arith.constant 0 : index
    %18 = vector.load %arg7[%c0_8, %c0_9, %c0_10] : memref<18x18x64xbf16, #tpu.memory_space<vmem>>, vector<18x18x64xbf16>
    tpu.vector_store %arg7[%c0_8, %c0_9, %c0_10], %17 {strides = array<i32>} : memref<18x18x64xbf16, #tpu.memory_space<vmem>>, vector<18x18x64xbf16>,
    %19 = arith.truncf %16 : vector<16x16x64xf32> to vector<16x16x64xbf16>
    %c1_11 = arith.constant 1 : index
    %c1_12 = arith.constant 1 : index
    %c0_13 = arith.constant 0 : index
    %20 = vector.load %arg7[%c1_11, %c1_12, %c0_13] : memref<18x18x64xbf16, #tpu.memory_space<vmem>>, vector<16x16x64xbf16>
    tpu.vector_store %arg7[%c1_11, %c1_12, %c0_13], %19 {strides = array<i32>} : memref<18x18x64xbf16, #tpu.memory_space<vmem>>, vector<16x16x64xbf16>,
    %c0_14 = arith.constant 0 : index
    %c0_15 = arith.constant 0 : index
    %c0_16 = arith.constant 0 : index
    %21 = vector.load %arg7[%c0_14, %c0_15, %c0_16] : memref<18x18x64xbf16, #tpu.memory_space<vmem>>, vector<16x16x64xbf16>
    %22 = vector.shape_cast %21 : vector<16x16x64xbf16> to vector<256x64xbf16>
    %c0_17 = arith.constant 0 : index
    %c0_18 = arith.constant 0 : index
    %23 = vector.load %arg8[%c0_17, %c0_18] : memref<256x576xbf16, #tpu.memory_space<vmem>>, vector<256x64xbf16>
    tpu.vector_store %arg8[%c0_17, %c0_18], %22 {strides = array<i32>} : memref<256x576xbf16, #tpu.memory_space<vmem>>, vector<256x64xbf16>,
    %c0_19 = arith.constant 0 : index
    %c1_20 = arith.constant 1 : index
    %c0_21 = arith.constant 0 : index
    %24 = vector.load %arg7[%c0_19, %c1_20, %c0_21] : memref<18x18x64xbf16, #tpu.memory_space<vmem>>, vector<16x16x64xbf16>
    %25 = vector.shape_cast %24 : vector<16x16x64xbf16> to vector<256x64xbf16>
    %c0_22 = arith.constant 0 : index
    %c64 = arith.constant 64 : index
    %26 = vector.load %arg8[%c0_22, %c64] : memref<256x576xbf16, #tpu.memory_space<vmem>>, vector<256x64xbf16>
    tpu.vector_store %arg8[%c0_22, %c64], %25 {strides = array<i32>} : memref<256x576xbf16, #tpu.memory_space<vmem>>, vector<256x64xbf16>,
    %c0_23 = arith.constant 0 : index
    %c2_24 = arith.constant 2 : index
    %c0_25 = arith.constant 0 : index
    %27 = vector.load %arg7[%c0_23, %c2_24, %c0_25] : memref<18x18x64xbf16, #tpu.memory_space<vmem>>, vector<16x16x64xbf16>
    %28 = vector.shape_cast %27 : vector<16x16x64xbf16> to vector<256x64xbf16>
    %c0_26 = arith.constant 0 : index
    %c128 = arith.constant 128 : index
    %29 = vector.load %arg8[%c0_26, %c128] : memref<256x576xbf16, #tpu.memory_space<vmem>>, vector<256x64xbf16>
    tpu.vector_store %arg8[%c0_26, %c128], %28 {strides = array<i32>} : memref<256x576xbf16, #tpu.memory_space<vmem>>, vector<256x64xbf16>,
    %c1_27 = arith.constant 1 : index
    %c0_28 = arith.constant 0 : index
    %c0_29 = arith.constant 0 : index
    %30 = vector.load %arg7[%c1_27, %c0_28, %c0_29] : memref<18x18x64xbf16, #tpu.memory_space<vmem>>, vector<16x16x64xbf16>
    %31 = vector.shape_cast %30 : vector<16x16x64xbf16> to vector<256x64xbf16>
    %c0_30 = arith.constant 0 : index
    %c192 = arith.constant 192 : index
    %32 = vector.load %arg8[%c0_30, %c192] : memref<256x576xbf16, #tpu.memory_space<vmem>>, vector<256x64xbf16>
    tpu.vector_store %arg8[%c0_30, %c192], %31 {strides = array<i32>} : memref<256x576xbf16, #tpu.memory_space<vmem>>, vector<256x64xbf16>,
    %c1_31 = arith.constant 1 : index
    %c1_32 = arith.constant 1 : index
    %c0_33 = arith.constant 0 : index
    %33 = vector.load %arg7[%c1_31, %c1_32, %c0_33] : memref<18x18x64xbf16, #tpu.memory_space<vmem>>, vector<16x16x64xbf16>
    %34 = vector.shape_cast %33 : vector<16x16x64xbf16> to vector<256x64xbf16>
    %c0_34 = arith.constant 0 : index
    %c256 = arith.constant 256 : index
    %35 = vector.load %arg8[%c0_34, %c256] : memref<256x576xbf16, #tpu.memory_space<vmem>>, vector<256x64xbf16>
    tpu.vector_store %arg8[%c0_34, %c256], %34 {strides = array<i32>} : memref<256x576xbf16, #tpu.memory_space<vmem>>, vector<256x64xbf16>,
    %c1_35 = arith.constant 1 : index
    %c2_36 = arith.constant 2 : index
    %c0_37 = arith.constant 0 : index
    %36 = vector.load %arg7[%c1_35, %c2_36, %c0_37] : memref<18x18x64xbf16, #tpu.memory_space<vmem>>, vector<16x16x64xbf16>
    %37 = vector.shape_cast %36 : vector<16x16x64xbf16> to vector<256x64xbf16>
    %c0_38 = arith.constant 0 : index
    %c320 = arith.constant 320 : index
    %38 = vector.load %arg8[%c0_38, %c320] : memref<256x576xbf16, #tpu.memory_space<vmem>>, vector<256x64xbf16>
    tpu.vector_store %arg8[%c0_38, %c320], %37 {strides = array<i32>} : memref<256x576xbf16, #tpu.memory_space<vmem>>, vector<256x64xbf16>,
    %c2_39 = arith.constant 2 : index
    %c0_40 = arith.constant 0 : index
    %c0_41 = arith.constant 0 : index
    %39 = vector.load %arg7[%c2_39, %c0_40, %c0_41] : memref<18x18x64xbf16, #tpu.memory_space<vmem>>, vector<16x16x64xbf16>
    %40 = vector.shape_cast %39 : vector<16x16x64xbf16> to vector<256x64xbf16>
    %c0_42 = arith.constant 0 : index
    %c384 = arith.constant 384 : index
    %41 = vector.load %arg8[%c0_42, %c384] : memref<256x576xbf16, #tpu.memory_space<vmem>>, vector<256x64xbf16>
    tpu.vector_store %arg8[%c0_42, %c384], %40 {strides = array<i32>} : memref<256x576xbf16, #tpu.memory_space<vmem>>, vector<256x64xbf16>,
    %c2_43 = arith.constant 2 : index
    %c1_44 = arith.constant 1 : index
    %c0_45 = arith.constant 0 : index
    %42 = vector.load %arg7[%c2_43, %c1_44, %c0_45] : memref<18x18x64xbf16, #tpu.memory_space<vmem>>, vector<16x16x64xbf16>
    %43 = vector.shape_cast %42 : vector<16x16x64xbf16> to vector<256x64xbf16>
    %c0_46 = arith.constant 0 : index
    %c448 = arith.constant 448 : index
    %44 = vector.load %arg8[%c0_46, %c448] : memref<256x576xbf16, #tpu.memory_space<vmem>>, vector<256x64xbf16>
    tpu.vector_store %arg8[%c0_46, %c448], %43 {strides = array<i32>} : memref<256x576xbf16, #tpu.memory_space<vmem>>, vector<256x64xbf16>,
    %c2_47 = arith.constant 2 : index
    %c2_48 = arith.constant 2 : index
    %c0_49 = arith.constant 0 : index
    %45 = vector.load %arg7[%c2_47, %c2_48, %c0_49] : memref<18x18x64xbf16, #tpu.memory_space<vmem>>, vector<16x16x64xbf16>
    %46 = vector.shape_cast %45 : vector<16x16x64xbf16> to vector<256x64xbf16>
    %c0_50 = arith.constant 0 : index
    %c512 = arith.constant 512 : index
    %47 = vector.load %arg8[%c0_50, %c512] : memref<256x576xbf16, #tpu.memory_space<vmem>>, vector<256x64xbf16>
    tpu.vector_store %arg8[%c0_50, %c512], %46 {strides = array<i32>} : memref<256x576xbf16, #tpu.memory_space<vmem>>, vector<256x64xbf16>,
    %c0_51 = arith.constant 0 : index
    %c0_52 = arith.constant 0 : index
    %48 = vector.load %arg8[%c0_51, %c0_52] : memref<256x576xbf16, #tpu.memory_space<vmem>>, vector<256x576xbf16>
    %c0_53 = arith.constant 0 : index
    %c0_54 = arith.constant 0 : index
    %49 = vector.load %arg3[%c0_53, %c0_54] : memref<576x64xbf16, #tpu.memory_space<vmem>>, vector<576x64xbf16>
    %cst_55 = arith.constant dense<0.000000e+00> : vector<256x64xf32>
    %50 = tpu.matmul %48, %49, %cst_55 {dimension_numbers = #tpu.dot_dimension_numbers<[1], [0], [0], [1], [0, 0, 1, 1], [], []>} : vector<256x576xbf16>, vector<576x64xbf16>, vector<256x64xf32> -> vector<256x64xf32>
    %51 = vector.shape_cast %50 : vector<256x64xf32> to vector<16x16x64xf32>
    %c0_56 = arith.constant 0 : index
    %c0_57 = arith.constant 0 : index
    %c0_58 = arith.constant 0 : index
    %c0_59 = arith.constant 0 : index
    %52 = vector.load %arg4[%c0_56, %c0_57, %c0_58, %c0_59] : memref<1x16x16x64xf32, #tpu.memory_space<vmem>>, vector<1x16x16x64xf32>
    %53 = vector.shape_cast %52 : vector<1x16x16x64xf32> to vector<16x16x64xf32>
    %54 = vector.shape_cast %51 : vector<16x16x64xf32> to vector<1x16x16x64xf32>
    tpu.vector_store %arg4[%c0_56, %c0_57, %c0_58, %c0_59], %54 {strides = array<i32>} : memref<1x16x16x64xf32, #tpu.memory_space<vmem>>, vector<1x16x16x64xf32>,
    %cst_60 = arith.constant dense<0.000000e+00> : vector<64xf32>
    %55 = vector.multi_reduction <add>, %50, %cst_60 [0] : vector<256x64xf32> to vector<64xf32>
    %56 = vector.shape_cast %55 : vector<64xf32> to vector<1x64xf32>
    %c0_61 = arith.constant 0 : index
    %c0_62 = arith.constant 0 : index
    %c0_63 = arith.constant 0 : index
    %57 = vector.load %arg5[%c0_61, %c0_62, %c0_63] : memref<1x1x64xf32, #tpu.memory_space<vmem>>, vector<1x1x64xf32>
    %58 = vector.shape_cast %57 : vector<1x1x64xf32> to vector<1x64xf32>
    %59 = vector.shape_cast %56 : vector<1x64xf32> to vector<1x1x64xf32>
    tpu.vector_store %arg5[%c0_61, %c0_62, %c0_63], %59 {strides = array<i32>} : memref<1x1x64xf32, #tpu.memory_space<vmem>>, vector<1x1x64xf32>,
    %60 = arith.mulf %50, %50 : vector<256x64xf32>
    %cst_64 = arith.constant dense<0.000000e+00> : vector<64xf32>
    %61 = vector.multi_reduction <add>, %60, %cst_64 [0] : vector<256x64xf32> to vector<64xf32>
    %62 = vector.shape_cast %61 : vector<64xf32> to vector<1x64xf32>
    %c0_65 = arith.constant 0 : index
    %c0_66 = arith.constant 0 : index
    %c0_67 = arith.constant 0 : index
    %63 = vector.load %arg6[%c0_65, %c0_66, %c0_67] : memref<1x1x64xf32, #tpu.memory_space<vmem>>, vector<1x1x64xf32>
    %64 = vector.shape_cast %63 : vector<1x1x64xf32> to vector<1x64xf32>
    %65 = vector.shape_cast %62 : vector<1x64xf32> to vector<1x1x64xf32>
    tpu.vector_store %arg6[%c0_65, %c0_66, %c0_67], %65 {strides = array<i32>} : memref<1x1x64xf32, #tpu.memory_space<vmem>>, vector<1x1x64xf32>,
    return
  }
  func.func @transform_0(%arg0: i32) -> (i32, i32, i32, i32) {
    %c0_i32 = arith.constant 0 : i32
    %c0_i32_0 = arith.constant 0 : i32
    %c0_i32_1 = arith.constant 0 : i32
    %c0_i32_2 = arith.constant 0 : i32
    return %arg0, %c0_i32, %c0_i32_0, %c0_i32_1 : i32, i32, i32, i32
  }
  func.func @transform_1(%arg0: i32) -> (i32, i32) {
    %c0_i32 = arith.constant 0 : i32
    %c0_i32_0 = arith.constant 0 : i32
    %c0_i32_1 = arith.constant 0 : i32
    return %c0_i32, %c0_i32_0 : i32, i32
  }
  func.func @transform_2(%arg0: i32) -> (i32, i32) {
    %c0_i32 = arith.constant 0 : i32
    %c0_i32_0 = arith.constant 0 : i32
    %c0_i32_1 = arith.constant 0 : i32
    return %c0_i32, %c0_i32_0 : i32, i32
  }
  func.func @transform_3(%arg0: i32) -> (i32, i32, i32, i32) {
    %c0_i32 = arith.constant 0 : i32
    %c0_i32_0 = arith.constant 0 : i32
    %c0_i32_1 = arith.constant 0 : i32
    %c0_i32_2 = arith.constant 0 : i32
    return %arg0, %c0_i32, %c0_i32_0, %c0_i32_1 : i32, i32, i32, i32
  }
  func.func @transform_4(%arg0: i32) -> (i32, i32, i32) {
    %c0_i32 = arith.constant 0 : i32
    %c0_i32_0 = arith.constant 0 : i32
    %c0_i32_1 = arith.constant 0 : i32
    return %arg0, %c0_i32, %c0_i32_0 : i32, i32, i32
  }
  func.func @transform_5(%arg0: i32) -> (i32, i32, i32) {
    %c0_i32 = arith.constant 0 : i32
    %c0_i32_0 = arith.constant 0 : i32
    %c0_i32_1 = arith.constant 0 : i32
    return %arg0, %c0_i32, %c0_i32_0 : i32, i32, i32
  }
}

module attributes {stable_mosaic.version = 11 : i64} {
  func.func @_bn_residual_kernel(%arg0: i32, %arg1: memref<256x128xf32, #tpu.memory_space<vmem>>, %arg2: memref<256x128xf32, #tpu.memory_space<vmem>>, %arg3: memref<2x128xf32, #tpu.memory_space<vmem>>, %arg4: memref<256x128xf32, #tpu.memory_space<vmem>>) attributes {dimension_semantics = [#tpu.dimension_semantics<parallel>], iteration_bounds = array<i64: 1>, scalar_prefetch = 0 : i64, scratch_operands = 0 : i64, tpu.core_type = #tpu.core_type<tc>, window_params = [{transform_indices = @transform_0, window_bounds = array<i64: 256, 128>}, {transform_indices = @transform_1, window_bounds = array<i64: 256, 128>}, {pipeline_mode = #tpu.pipeline_mode<synchronous>, transform_indices = @transform_2, window_bounds = array<i64: 2, 128>}, {transform_indices = @transform_3, window_bounds = array<i64: 256, 128>}]} {
    %c0 = arith.constant 0 : index
    %c0_0 = arith.constant 0 : index
    %0 = vector.load %arg3[%c0, %c0_0] : memref<2x128xf32, #tpu.memory_space<vmem>>, vector<1x128xf32>
    %c1 = arith.constant 1 : index
    %c0_1 = arith.constant 0 : index
    %1 = vector.load %arg3[%c1, %c0_1] : memref<2x128xf32, #tpu.memory_space<vmem>>, vector<1x128xf32>
    %c0_2 = arith.constant 0 : index
    %c0_3 = arith.constant 0 : index
    %2 = vector.load %arg1[%c0_2, %c0_3] : memref<256x128xf32, #tpu.memory_space<vmem>>, vector<256x128xf32>
    %3 = vector.broadcast %0 : vector<1x128xf32> to vector<256x128xf32>
    %4 = arith.mulf %2, %3 : vector<256x128xf32>
    %5 = vector.broadcast %1 : vector<1x128xf32> to vector<256x128xf32>
    %6 = arith.addf %4, %5 : vector<256x128xf32>
    %c0_4 = arith.constant 0 : index
    %c0_5 = arith.constant 0 : index
    %7 = vector.load %arg2[%c0_4, %c0_5] : memref<256x128xf32, #tpu.memory_space<vmem>>, vector<256x128xf32>
    %8 = arith.addf %6, %7 : vector<256x128xf32>
    %c0_6 = arith.constant 0 : index
    %c0_7 = arith.constant 0 : index
    %9 = vector.load %arg4[%c0_6, %c0_7] : memref<256x128xf32, #tpu.memory_space<vmem>>, vector<256x128xf32>
    tpu.vector_store %arg4[%c0_6, %c0_7], %8 {strides = array<i32>} : memref<256x128xf32, #tpu.memory_space<vmem>>, vector<256x128xf32>,
    return
  }
  func.func @transform_0(%arg0: i32) -> (i32, i32) {
    %c0_i32 = arith.constant 0 : i32
    %c0_i32_0 = arith.constant 0 : i32
    return %arg0, %c0_i32 : i32, i32
  }
  func.func @transform_1(%arg0: i32) -> (i32, i32) {
    %c0_i32 = arith.constant 0 : i32
    %c0_i32_0 = arith.constant 0 : i32
    return %arg0, %c0_i32 : i32, i32
  }
  func.func @transform_2(%arg0: i32) -> (i32, i32) {
    %c0_i32 = arith.constant 0 : i32
    %c0_i32_0 = arith.constant 0 : i32
    %c0_i32_1 = arith.constant 0 : i32
    return %c0_i32, %c0_i32_0 : i32, i32
  }
  func.func @transform_3(%arg0: i32) -> (i32, i32) {
    %c0_i32 = arith.constant 0 : i32
    %c0_i32_0 = arith.constant 0 : i32
    return %arg0, %c0_i32 : i32, i32
  }
}

</mosaic_0001>

<bundles_post_ra>
// kernel: tile.9
= control target key start
LH: loop header
LB: loop body
LE: loop exit
PB: predicated region body
PF: predicated region fallthrough
CT: control target
= control target key end

     0   :  { %s11_s10 = smov 3  ;;  %vm13_vm0 = vcmask 523264   ;;  %s32_s11 = smov 64   ;;  %vm20_vm1 = vcmask 1048064   ;;  %s52_s0 = inlined_call_operand.vmem [shape: f32[2,2,64], index: 0, kind: input, shape index: {}]   ;;  %s53_s1 = inlined_call_operand.vmem [shape: f32[2,128], index: 1, kind: output, shape index: {}]  }
   0x1   :  { %v30_v0 = vld [vmem:[%s52_s0 + $0x2] sm:$0x3]  ;;  %v9_v1 = vld [vmem:[%s52_s0] sm:$0x3]  ;;  %s16_s0 = smov 3 }
   0x2   :  { %8 = vst [vmem:[#allocation1 + $0x8] sm:$0x3] %v30_v0  ;;  %10 = vst [vmem:[#allocation1] sm:$0x3] %v9_v1 }
   0x9   :  { %v17_v2 = vld [vmem:[#allocation1 + $0x1] ss:$8 sm:%s16_s0]   ;;  %v12_v3 = vld [vmem:[#allocation1] ss:$8 sm:%s11_s10]  }
   0xa   :  { %18 = vrot.lane.b32.xlu0 %v17_v2, %s32_s11  ;;  %14 = vst.msk [vmem:[#allocation0] sm:$0x3] %vm13_vm0, %v12_v3  }
  0x7c   :  { %v19_v4 = vpop.permute.xlu0 %18  }
  0x7d   :  { %21 = vst.msk [vmem:[#allocation0] sm:$0x3] %vm20_vm1, %v19_v4  }
  0x84   :  { %v26_v5 = vld [vmem:[#allocation0] sm:$0x3] }
  0x85   :  { %29 = vst [vmem:[%s53_s1] sm:$0x3] %v26_v5 }

// kernel: residual_block_forward.5
= control target key start
LH: loop header
LB: loop body
LE: loop exit
PB: predicated region body
PF: predicated region fallthrough
CT: control target
= control target key end

     0   :  { %s604_s0 = inlined_call_operand.vmem [shape: f32[256,128], index: 0, kind: input, shape index: {}]   ;;  %s605_s1 = inlined_call_operand.vmem [shape: f32[256,128], index: 1, kind: input, shape index: {}]   ;;  %s606_s2 = inlined_call_operand.vmem [shape: f32[2,128], index: 2, kind: input, shape index: {}]   ;;  %s607_s3 = inlined_call_operand.vmem [shape: f32[256,128], index: 3, kind: output, shape index: {}]  }
   0x1   :  { %v245_v0 = vld [vmem:[%s606_s2] ss:$0 sm:$0xff]  ;;  %v250_v1 = vld [vmem:[%s606_s2 + $0x1] ss:$0 sm:$0xff]  ;;  %v17_v4 = vld [vmem:[%s604_s0 + $0x8] sm:$0xff] }
   0x2   :  { %v16_v2 = vld [vmem:[%s604_s0] sm:$0xff]  ;;  %v53_v6 = vmul.f32 %v245_v0, %v17_v4  ;;  %v18_v7 = vld [vmem:[%s604_s0 + $0x10] sm:$0xff]  ;;  %v19_v8 = vld [vmem:[%s604_s0 + $0x18] sm:$0xff] }
   0x3   :  { %v52_v3 = vmul.f32 %v245_v0, %v16_v2  ;;  %v120_v5 = vld [vmem:[%s605_s1] sm:$0xff]  ;;  %v121_v10 = vld [vmem:[%s605_s1 + $0x8] sm:$0xff]  ;;  %v54_v11 = vmul.f32 %v245_v0, %v18_v7  ;;  %v122_v12 = vld [vmem:[%s605_s1 + $0x10] sm:$0xff]  ;;  %v55_v13 = vmul.f32 %v245_v0, %v19_v8 }
   0x4   :  { %v20_v14 = vld [vmem:[%s604_s0 + $0x20] sm:$0xff]  ;;  %v89_v15 = vadd.f32 %v250_v1, %v53_v6  ;;  %v123_v16 = vld [vmem:[%s605_s1 + $0x18] sm:$0xff]  ;;  %v21_v18 = vld [vmem:[%s604_s0 + $0x28] sm:$0xff] }
   0x5   :  { %v88_v9 = vadd.f32 %v250_v1, %v52_v3  ;;  %v56_v17 = vmul.f32 %v245_v0, %v20_v14  ;;  %v22_v19 = vld [vmem:[%s604_s0 + $0x30] sm:$0xff]  ;;  %v90_v21 = vadd.f32 %v250_v1, %v54_v11  ;;  %v91_v22 = vadd.f32 %v250_v1, %v55_v13  ;;  %v124_v23 = vld [vmem:[%s605_s1 + $0x20] sm:$0xff]  ;;  %v23_v25 = vld [vmem:[%s604_s0 + $0x38] sm:$0xff] }
   0x6   :  { %v57_v24 = vmul.f32 %v245_v0, %v21_v18  ;;  %v153_v26 = vadd.f32 %v121_v10, %v89_v15  ;;  %v125_v28 = vld [vmem:[%s605_s1 + $0x28] sm:$0xff]  ;;  %v58_v29 = vmul.f32 %v245_v0, %v22_v19  ;;  %v59_v30 = vmul.f32 %v245_v0, %v23_v25  ;;  %v24_v31 = vld [vmem:[%s604_s0 + $0x40] sm:$0xff]  ;;  %v126_v36 = vld [vmem:[%s605_s1 + $0x30] sm:$0xff] }
   0x7   :  { %v152_v20 = vadd.f32 %v120_v5, %v88_v9  ;;  %v92_v27 = vadd.f32 %v250_v1, %v56_v17  ;;  %v25_v32 = vld [vmem:[%s604_s0 + $0x48] sm:$0xff]  ;;  %v154_v33 = vadd.f32 %v122_v12, %v90_v21  ;;  %v155_v34 = vadd.f32 %v123_v16, %v91_v22  ;;  %v127_v37 = vld [vmem:[%s605_s1 + $0x38] sm:$0xff]  ;;  %v26_v39 = vld [vmem:[%s604_s0 + $0x50] sm:$0xff] }
   0x8   :  { %v93_v35 = vadd.f32 %v250_v1, %v57_v24  ;;  %v60_v38 = vmul.f32 %v245_v0, %v24_v31  ;;  %185 = vst [vmem:[%s607_s3 + $0x8] sm:$0xff] %v153_v26  ;;  %v94_v41 = vadd.f32 %v250_v1, %v58_v29  ;;  %v95_v42 = vadd.f32 %v250_v1, %v59_v30  ;;  %v128_v43 = vld [vmem:[%s605_s1 + $0x40] sm:$0xff]  ;;  %v27_v45 = vld [vmem:[%s604_s0 + $0x58] sm:$0xff]  ;;  %v129_v49 = vld [vmem:[%s605_s1 + $0x48] sm:$0xff] }
   0x9   :  { %184 = vst [vmem:[%s607_s3] sm:$0xff] %v152_v20  ;;  %v156_v40 = vadd.f32 %v124_v23, %v92_v27  ;;  %v61_v44 = vmul.f32 %v245_v0, %v25_v32  ;;  %v28_v46 = vld [vmem:[%s604_s0 + $0x60] sm:$0xff]  ;;  %186 = vst [vmem:[%s607_s3 + $0x10] sm:$0xff] %v154_v33  ;;  %v62_v50 = vmul.f32 %v245_v0, %v26_v39  ;;  %v130_v51 = vld [vmem:[%s605_s1 + $0x50] sm:$0xff] }
   0xa   :  { %187 = vst [vmem:[%s607_s3 + $0x18] sm:$0xff] %v155_v34  ;;  %v157_v47 = vadd.f32 %v125_v28, %v93_v35  ;;  %v96_v48 = vadd.f32 %v250_v1, %v60_v38  ;;  %v63_v52 = vmul.f32 %v245_v0, %v27_v45  ;;  %v29_v53 = vld [vmem:[%s604_s0 + $0x68] sm:$0xff]  ;;  %v158_v54 = vadd.f32 %v126_v36, %v94_v41  ;;  %v131_v57 = vld [vmem:[%s605_s1 + $0x58] sm:$0xff]  ;;  %v30_v59 = vld [vmem:[%s604_s0 + $0x70] sm:$0xff] }
   0xb   :  { %188 = vst [vmem:[%s607_s3 + $0x20] sm:$0xff] %v156_v40  ;;  %v159_v55 = vadd.f32 %v127_v37, %v95_v42  ;;  %v97_v56 = vadd.f32 %v250_v1, %v61_v44  ;;  %v64_v58 = vmul.f32 %v245_v0, %v28_v46  ;;  %v31_v60 = vld [vmem:[%s604_s0 + $0x78] sm:$0xff]  ;;  %v98_v62 = vadd.f32 %v250_v1, %v62_v50  ;;  %v132_v2 = vld [vmem:[%s605_s1 + $0x60] sm:$0xff]  ;;  %v133_v7 = vld [vmem:[%s605_s1 + $0x68] sm:$0xff] }
   0xc   :  { %189 = vst [vmem:[%s607_s3 + $0x28] sm:$0xff] %v157_v47  ;;  %v160_v61 = vadd.f32 %v128_v43, %v96_v48  ;;  %v99_v63 = vadd.f32 %v250_v1, %v63_v52  ;;  %v65_v3 = vmul.f32 %v245_v0, %v29_v53  ;;  %v32_v4 = vld [vmem:[%s604_s0 + $0x80] sm:$0xff]  ;;  %190 = vst [vmem:[%s607_s3 + $0x30] sm:$0xff] %v158_v54  ;;  %v33_v10 = vld [vmem:[%s604_s0 + $0x88] sm:$0xff] }
   0xd   :  { %191 = vst [vmem:[%s607_s3 + $0x38] sm:$0xff] %v159_v55  ;;  %v161_v5 = vadd.f32 %v129_v49, %v97_v56  ;;  %v100_v6 = vadd.f32 %v250_v1, %v64_v58  ;;  %v66_v8 = vmul.f32 %v245_v0, %v30_v59  ;;  %v67_v9 = vmul.f32 %v245_v0, %v31_v60  ;;  %v34_v11 = vld [vmem:[%s604_s0 + $0x90] sm:$0xff]  ;;  %v135_v16 = vld [vmem:[%s605_s1 + $0x78] sm:$0xff]  ;;  %v136_v22 = vld [vmem:[%s605_s1 + $0x80] sm:$0xff] }
   0xe   :  { %192 = vst [vmem:[%s607_s3 + $0x40] sm:$0xff] %v160_v61  ;;  %v162_v12 = vadd.f32 %v130_v51, %v98_v62  ;;  %v163_v13 = vadd.f32 %v131_v57, %v99_v63  ;;  %v101_v14 = vadd.f32 %v250_v1, %v65_v3  ;;  %v134_v15 = vld [vmem:[%s605_s1 + $0x70] sm:$0xff]  ;;  %v68_v17 = vmul.f32 %v245_v0, %v32_v4  ;;  %v35_v18 = vld [vmem:[%s604_s0 + $0x98] sm:$0xff]  ;;  %v36_v24 = vld [vmem:[%s604_s0 + $0xa0] sm:$0xff] }
   0xf   :  { %193 = vst [vmem:[%s607_s3 + $0x48] sm:$0xff] %v161_v5  ;;  %v164_v19 = vadd.f32 %v132_v2, %v100_v6  ;;  %v102_v20 = vadd.f32 %v250_v1, %v66_v8  ;;  %v103_v21 = vadd.f32 %v250_v1, %v67_v9  ;;  %v69_v23 = vmul.f32 %v245_v0, %v33_v10  ;;  %v37_v25 = vld [vmem:[%s604_s0 + $0xa8] sm:$0xff]  ;;  %v138_v30 = vld [vmem:[%s605_s1 + $0x90] sm:$0xff]  ;;  %v139_v36 = vld [vmem:[%s605_s1 + $0x98] sm:$0xff] }
  0x10   :  { %194 = vst [vmem:[%s607_s3 + $0x50] sm:$0xff] %v162_v12  ;;  %195 = vst [vmem:[%s607_s3 + $0x58] sm:$0xff] %v163_v13  ;;  %v165_v26 = vadd.f32 %v133_v7, %v101_v14  ;;  %v104_v27 = vadd.f32 %v250_v1, %v68_v17  ;;  %v137_v28 = vld [vmem:[%s605_s1 + $0x88] sm:$0xff]  ;;  %v70_v29 = vmul.f32 %v245_v0, %v34_v11  ;;  %v38_v32 = vld [vmem:[%s604_s0 + $0xb0] sm:$0xff] }
  0x11   :  { %v71_v31 = vmul.f32 %v245_v0, %v35_v18  ;;  %196 = vst [vmem:[%s607_s3 + $0x60] sm:$0xff] %v164_v19  ;;  %v166_v33 = vadd.f32 %v134_v15, %v102_v20  ;;  %v167_v34 = vadd.f32 %v135_v16, %v103_v21  ;;  %v105_v35 = vadd.f32 %v250_v1, %v69_v23  ;;  %v39_v38 = vld [vmem:[%s604_s0 + $0xb8] sm:$0xff]  ;;  %v40_v39 = vld [vmem:[%s604_s0 + $0xc0] sm:$0xff]  ;;  %v41_v45 = vld [vmem:[%s604_s0 + $0xc8] sm:$0xff] }
  0x12   :  { %v72_v37 = vmul.f32 %v245_v0, %v36_v24  ;;  %197 = vst [vmem:[%s607_s3 + $0x68] sm:$0xff] %v165_v26  ;;  %v168_v40 = vadd.f32 %v136_v22, %v104_v27  ;;  %v106_v41 = vadd.f32 %v250_v1, %v70_v29  ;;  %v140_v43 = vld [vmem:[%s605_s1 + $0xa0] sm:$0xff]  ;;  %v73_v44 = vmul.f32 %v245_v0, %v37_v25  ;;  %v141_v48 = vld [vmem:[%s605_s1 + $0xa8] sm:$0xff]  ;;  %v42_v51 = vld [vmem:[%s604_s0 + $0xd0] sm:$0xff] }
  0x13   :  { %v107_v42 = vadd.f32 %v250_v1, %v71_v31  ;;  %198 = vst [vmem:[%s607_s3 + $0x70] sm:$0xff] %v166_v33  ;;  %199 = vst [vmem:[%s607_s3 + $0x78] sm:$0xff] %v167_v34  ;;  %v169_v46 = vadd.f32 %v137_v28, %v105_v35  ;;  %v74_v49 = vmul.f32 %v245_v0, %v38_v32  ;;  %v43_v52 = vld [vmem:[%s604_s0 + $0xd8] sm:$0xff]  ;;  %v142_v56 = vld [vmem:[%s605_s1 + $0xb0] sm:$0xff] }
  0x14   :  { %v108_v47 = vadd.f32 %v250_v1, %v72_v37  ;;  %v75_v50 = vmul.f32 %v245_v0, %v39_v38  ;;  %200 = vst [vmem:[%s607_s3 + $0x80] sm:$0xff] %v168_v40  ;;  %v170_v53 = vadd.f32 %v138_v30, %v106_v41  ;;  %v109_v55 = vadd.f32 %v250_v1, %v73_v44  ;;  %v143_v57 = vld [vmem:[%s605_s1 + $0xb8] sm:$0xff]  ;;  %v44_v59 = vld [vmem:[%s604_s0 + $0xe0] sm:$0xff]  ;;  %v45_v3 = vld [vmem:[%s604_s0 + $0xe8] sm:$0xff] }
  0x15   :  { %v171_v54 = vadd.f32 %v139_v36, %v107_v42  ;;  %v76_v58 = vmul.f32 %v245_v0, %v40_v39  ;;  %201 = vst [vmem:[%s607_s3 + $0x88] sm:$0xff] %v169_v46  ;;  %v110_v61 = vadd.f32 %v250_v1, %v74_v49  ;;  %v144_v63 = vld [vmem:[%s605_s1 + $0xc0] sm:$0xff]  ;;  %v77_v2 = vmul.f32 %v245_v0, %v41_v45  ;;  %v145_v6 = vld [vmem:[%s605_s1 + $0xc8] sm:$0xff]  ;;  %v46_v9 = vld [vmem:[%s604_s0 + $0xf0] sm:$0xff] }
  0x16   :  { %v172_v60 = vadd.f32 %v140_v43, %v108_v47  ;;  %v111_v62 = vadd.f32 %v250_v1, %v75_v50  ;;  %202 = vst [vmem:[%s607_s3 + $0x90] sm:$0xff] %v170_v53  ;;  %v173_v4 = vadd.f32 %v141_v48, %v109_v55  ;;  %v78_v7 = vmul.f32 %v245_v0, %v42_v51  ;;  %v47_v10 = vld [vmem:[%s604_s0 + $0xf8] sm:$0xff]  ;;  %v146_v14 = vld [vmem:[%s605_s1 + $0xd0] sm:$0xff]  ;;  %v148_v20 = vld [vmem:[%s605_s1 + $0xe0] sm:$0xff] }
  0x17   :  { %203 = vst [vmem:[%s607_s3 + $0x98] sm:$0xff] %v171_v54  ;;  %v112_v5 = vadd.f32 %v250_v1, %v76_v58  ;;  %v79_v8 = vmul.f32 %v245_v0, %v43_v52  ;;  %v174_v11 = vadd.f32 %v142_v56, %v110_v61  ;;  %v113_v13 = vadd.f32 %v250_v1, %v77_v2  ;;  %v147_v15 = vld [vmem:[%s605_s1 + $0xd8] sm:$0xff]  ;;  %v149_v24 = vld [vmem:[%s605_s1 + $0xe8] sm:$0xff]  ;;  %v150_v30 = vld [vmem:[%s605_s1 + $0xf0] sm:$0xff] }
  0x18   :  { %204 = vst [vmem:[%s607_s3 + $0xa0] sm:$0xff] %v172_v60  ;;  %v175_v12 = vadd.f32 %v143_v57, %v111_v62  ;;  %v80_v16 = vmul.f32 %v245_v0, %v44_v59  ;;  %205 = vst [vmem:[%s607_s3 + $0xa8] sm:$0xff] %v173_v4  ;;  %v114_v18 = vadd.f32 %v250_v1, %v78_v7  ;;  %v151_v31 = vld [vmem:[%s605_s1 + $0xf8] sm:$0xff] }
  0x19   :  { %v176_v17 = vadd.f32 %v144_v63, %v112_v5  ;;  %v115_v19 = vadd.f32 %v250_v1, %v79_v8  ;;  %v81_v21 = vmul.f32 %v245_v0, %v45_v3  ;;  %206 = vst [vmem:[%s607_s3 + $0xb0] sm:$0xff] %v174_v11  ;;  %v177_v22 = vadd.f32 %v145_v6, %v113_v13 }
  0x1a   :  { %207 = vst [vmem:[%s607_s3 + $0xb8] sm:$0xff] %v175_v12  ;;  %v116_v23 = vadd.f32 %v250_v1, %v80_v16  ;;  %v82_v25 = vmul.f32 %v245_v0, %v46_v9  ;;  %v83_v26 = vmul.f32 %v245_v0, %v47_v10  ;;  %v178_v27 = vadd.f32 %v146_v14, %v114_v18 }
  0x1b   :  { %208 = vst [vmem:[%s607_s3 + $0xc0] sm:$0xff] %v176_v17  ;;  %v179_v28 = vadd.f32 %v147_v15, %v115_v19  ;;  %v117_v29 = vadd.f32 %v250_v1, %v81_v21  ;;  %209 = vst [vmem:[%s607_s3 + $0xc8] sm:$0xff] %v177_v22 }
  0x1c   :  { %v180_v0 = vadd.f32 %v148_v20, %v116_v23  ;;  %v118_v32 = vadd.f32 %v250_v1, %v82_v25  ;;  %v119_v33 = vadd.f32 %v250_v1, %v83_v26  ;;  %210 = vst [vmem:[%s607_s3 + $0xd0] sm:$0xff] %v178_v27 }
  0x1d   :  { %211 = vst [vmem:[%s607_s3 + $0xd8] sm:$0xff] %v179_v28  ;;  %v181_v34 = vadd.f32 %v149_v24, %v117_v29 }
  0x1e   :  { %212 = vst [vmem:[%s607_s3 + $0xe0] sm:$0xff] %v180_v0  ;;  %v182_v35 = vadd.f32 %v150_v30, %v118_v32  ;;  %v183_v36 = vadd.f32 %v151_v31, %v119_v33 }
  0x1f   :  { %213 = vst [vmem:[%s607_s3 + $0xe8] sm:$0xff] %v181_v34 }
  0x20   :  { %214 = vst [vmem:[%s607_s3 + $0xf0] sm:$0xff] %v182_v35  ;;  %215 = vst [vmem:[%s607_s3 + $0xf8] sm:$0xff] %v183_v36 }

// kernel: residual_block_forward.3
= control target key start
LH: loop header
LB: loop body
LE: loop exit
PB: predicated region body
PF: predicated region fallthrough
CT: control target
= control target key end

     0   :  { %s6013_s15 = smov 0   ;;  %s8246_s0 = inlined_call_operand.vmem [shape: f32[2,16,16,64], index: 0, kind: input, shape index: {}]   ;;  %s8247_s1 = inlined_call_operand.vmem [shape: bf16[576,64], index: 1, kind: input, shape index: {}]   ;;  %s8248_s2 = inlined_call_operand.vmem [shape: f32[2,16,16,64], index: 2, kind: output, shape index: {0}]   ;;  %s8249_s3 = inlined_call_operand.vmem [shape: f32[2,1,64], index: 3, kind: output, shape index: {1}]   ;;  %s8250_s4 = inlined_call_operand.vmem [shape: f32[2,1,64], index: 4, kind: output, shape index: {2}]  }
   0x1 LB: > { %s5290_s16 = sadd.s32 4294967295, %s5984_s15   ;;  %p5294_p0 = scmp.ge.s32.totalorder %s5984_s15, 1  ;;  %s5984_s15 = sphi %s6013_s15, %s15_s15  }
   0x2   : > { %p167_p1 = scmp.lt.s32.totalorder %s5984_s15, 3 }
   0x4   : > { %p168_p2 = pnand %p5294_p0, %p167_p1 }
   0x6   : > { %171 = sbr.rel (%p168_p2) target bundleno = 724 (0x2d4), region = 28 }
   0xb   : > { %vm216_vm0 = vcmask 519168   ;;  %v5986_v0 = vmov 0   ;;  %vm219_vm1 = vcmask 516096   ;;  %p6059_p3 = scmp.lt.s32.totalorder %s5290_s16, 1  ;;  %v5857_v1 = vld [vmem:[%s8247_s1 + $0x78] sm:$0xff]   ;;  %v5859_v3 = vld [vmem:[%s8247_s1 + $0x70] sm:$0xff]  }
   0xc   : > { %217 = vst.msk [vmem:[#allocation2] sm:$0xf] %vm216_vm0, %v5986_v0  ;;  %218 = vst.msk [vmem:[#allocation2 + $0x4] sm:$0xf] %vm216_vm0, %v5986_v0  ;;  %vm953_vm2 = vsmask.f32 3328  ;;  %5547 = vmatprep.subr.bf16.mxu0 %v5857_v1  ;;  %5831 = vmatprep.subr.bf16.mxu1 %v5857_v1 }
   0xd   : > { %221 = vst.msk [vmem:[#allocation2 + $0xc] sm:$0xf] %vm216_vm0, %v5986_v0  ;;  %222 = vst.msk [vmem:[#allocation2 + $0x10] sm:$0xf] %vm216_vm0, %v5986_v0  ;;  %s8297_s16 = smov (!%p6059_p3, %s5290_s16), 1  ;;  %v5858_v2 = vld [vmem:[%s8247_s1 + $0x38] sm:$0xff]  }
   0xe   : > { %224 = vst.msk [vmem:[#allocation2 + $0x18] sm:$0xf] %vm216_vm0, %v5986_v0  ;;  %225 = vst.msk [vmem:[#allocation2 + $0x1c] sm:$0xf] %vm216_vm0, %v5986_v0  ;;  %vm954_vm3 = vsmask.f32 7440  ;;  %5548 = vmatpush3.bf16.msra.mxu0 %v5858_v2  ;;  %5839 = vmatpush3.bf16.msra.mxu1 %v5858_v2  ;;  %s211_s7 = scalar_lea.vmem %s8249_s3, %s8297_s16  ;;  %s214_s10 = scalar_lea.vmem %s8250_s4, %s8297_s16 }
   0xf   : > { %227 = vst.msk [vmem:[#allocation2 + $0x24] sm:$0xf] %vm216_vm0, %v5986_v0  ;;  %228 = vst.msk [vmem:[#allocation2 + $0x28] sm:$0xf] %vm216_vm0, %v5986_v0  ;;  %s5513_s20 = sshll.u32 %s8297_s16, 8  ;;  %5549 = vmatprep.subr.bf16.mxu0 %v5859_v3  ;;  %5832 = vmatprep.subr.bf16.mxu1 %v5859_v3  ;;  %s5987_s28 = smov 64  }
  0x10   : > { %230 = vst.msk [vmem:[#allocation2 + $0x30] sm:$0xf] %vm216_vm0, %v5986_v0  ;;  %231 = vst.msk [vmem:[#allocation2 + $0x34] sm:$0xf] %vm216_vm0, %v5986_v0  ;;  %vm400_vm4 = vsmask.f32 256  ;;  %s6099_s25 = scalar_lea.vmem %s8246_s0, %s5513_s20  ;;  %s8011_s5 = scalar_lea.vmem %s8248_s2, %s5513_s20 }
  0x11   : > { %233 = vst.msk [vmem:[#allocation2 + $0x3c] sm:$0xf] %vm216_vm0, %v5986_v0  ;;  %234 = vst.msk [vmem:[#allocation2 + $0x40] sm:$0xf] %vm216_vm0, %v5986_v0  ;;  %v272_v4 = vld [vmem:[%s6099_s25] sm:$0xff]  ;;  %v273_v5 = vld [vmem:[%s6099_s25 + $0x8] sm:$0xff] }
  0x12   : > { %236 = vst.msk [vmem:[#allocation2 + $0x48] sm:$0xf] %vm216_vm0, %v5986_v0  ;;  %237 = vst.msk [vmem:[#allocation2 + $0x4c] sm:$0xf] %vm216_vm0, %v5986_v0  ;;  %vm401_vm5 = vsmask.f32 4368  ;;  %v5515_v9 = vpack.c.bf16 %v272_v4, %v272_v4  ;;  %v5516_v10 = vpack.c.bf16 %v273_v5, %v273_v5 }
  0x13   : > { %239 = vst.msk [vmem:[#allocation2 + $0x54] sm:$0xf] %vm216_vm0, %v5986_v0  ;;  %240 = vst.msk [vmem:[#allocation2 + $0x58] sm:$0xf] %vm216_vm0, %v5986_v0  ;;  %v296_v6 = vld [vmem:[%s6099_s25 + $0xc0] sm:$0xff]  ;;  %v297_v21 = vld [vmem:[%s6099_s25 + $0xc8] sm:$0xff] }
  0x14   : > { %242 = vst.msk [vmem:[#allocation2 + $0x60] sm:$0xf] %vm216_vm0, %v5986_v0  ;;  %243 = vst.msk [vmem:[#allocation2 + $0x64] sm:$0xf] %vm216_vm0, %v5986_v0  ;;  %v905_v7 = vld [vmem:[#allocation2] sm:$0xf]  ;;  %v5539_v11 = vpack.c.bf16 %v296_v6, %v296_v6  ;;  %v5540_v35 = vpack.c.bf16 %v297_v21, %v297_v21 }
  0x15   : > { %245 = vst.msk [vmem:[#allocation2 + $0x6c] sm:$0xf] %vm216_vm0, %v5986_v0  ;;  %246 = vst.msk [vmem:[#allocation2 + $0x70] sm:$0xf] %vm216_vm0, %v5986_v0  ;;  %v906_v8 = vld [vmem:[#allocation2 + $0x4] sm:$0xf] }
  0x16   : > { %248 = vst.msk [vmem:[#allocation2 + $0x78] sm:$0xf] %vm216_vm0, %v5986_v0  ;;  %249 = vst.msk [vmem:[#allocation2 + $0x7c] sm:$0xf] %vm216_vm0, %v5986_v0  ;;  %vm725_vm6 = vsmask.f32 7938 }
  0x17   : > { %251 = vst.msk [vmem:[#allocation2 + $0x84] sm:$0xf] %vm216_vm0, %v5986_v0  ;;  %252 = vst.msk [vmem:[#allocation2 + $0x88] sm:$0xf] %vm216_vm0, %v5986_v0  ;;  %v957_v12 = vshrl.u32 %v905_v7, 16  ;;  %v960_v13 = vshll.u32 %v905_v7, 16 }
  0x18   : > { %254 = vst.msk [vmem:[#allocation2 + $0x90] sm:$0xf] %vm216_vm0, %v5986_v0  ;;  %255 = vst.msk [vmem:[#allocation2 + $0x94] sm:$0xf] %vm216_vm0, %v5986_v0  ;;  %v966_v14 = vshll.u32 %v906_v8, 16  ;;  %v970_v15 = vshrl.u32 %v906_v8, 16 }
  0x19   : > { %257 = vst.msk [vmem:[#allocation2 + $0x9c] sm:$0xf] %vm216_vm0, %v5986_v0  ;;  %258 = vst.msk [vmem:[#allocation2 + $0xa0] sm:$0xf] %vm216_vm0, %v5986_v0  ;;  %v404_v18 = vshrl.u32 %v5515_v9, 16  ;;  %v412_v19 = vshrl.u32 %v5516_v10, 16 }
  0x1a   : > { %260 = vst.msk [vmem:[#allocation2 + $0xa8] sm:$0xf] %vm216_vm0, %v5986_v0  ;;  %261 = vst.msk [vmem:[#allocation2 + $0xac] sm:$0xf] %vm216_vm0, %v5986_v0  ;;  %v415_v20 = vshll.u32 %v5516_v10, 16  ;;  %v959_v22 = vrot.slane %v957_v12, 4 }
  0x1b   : > { %263 = vst.msk [vmem:[#allocation2 + $0xb4] sm:$0xf] %vm216_vm0, %v5986_v0  ;;  %264 = vst.msk [vmem:[#allocation2 + $0xb8] sm:$0xf] %vm216_vm0, %v5986_v0  ;;  %v962_v23 = vrot.slane %v960_v13, 5  ;;  %v968_v24 = vrot.slane %v966_v14, 5 }
  0x1c   : > { %266 = vst.msk [vmem:[#allocation2 + $0xc0] sm:$0xf] %vm216_vm0, %v5986_v0  ;;  %267 = vst.msk [vmem:[#allocation2 + $0xc4] sm:$0xf] %vm216_vm0, %v5986_v0  ;;  %v972_v25 = vrot.slane %v970_v15, 4  ;;  %v406_v28 = vrot.slane %v404_v18, 7 }
  0x1d   : > { %269 = vst.msk [vmem:[#allocation2 + $0xcc] sm:$0xf] %vm216_vm0, %v5986_v0  ;;  %270 = vst.msk [vmem:[#allocation2 + $0xd0] sm:$0xf] %vm216_vm0, %v5986_v0  ;;  %v6114_v29 = vrot.slane %v412_v19, 7  ;;  %v407_v30 = vshll.u32 %v5515_v9, 16  ;;  %v963_v31 = vor.u32 %v962_v23, %v959_v22 }
  0x1e   : > { %220 = vst.msk [vmem:[#allocation2 + $0x8] sm:$0x1] %vm219_vm1, %v5986_v0  ;;  %223 = vst.msk [vmem:[#allocation2 + $0x14] sm:$0x1] %vm219_vm1, %v5986_v0  ;;  %v973_v32 = vor.u32 %v972_v25, %v968_v24  ;;  %v727_v34 = vld [vmem:[#allocation2 + $0xc] sm:$0xf] }
  0x1f   : > { %226 = vst.msk [vmem:[#allocation2 + $0x20] sm:$0x1] %vm219_vm1, %v5986_v0  ;;  %229 = vst.msk [vmem:[#allocation2 + $0x2c] sm:$0x1] %vm219_vm1, %v5986_v0  ;;  %v608_v36 = vshrl.u32 %v5539_v11, 16  ;;  %v410_v38 = vrot.slane %v406_v28, 4  ;;  %v417_v39 = vor.u32 %v415_v20, %v6114_v29  ;;  %v409_v41 = vor.u32 %v407_v30, %v406_v28 }
  0x20   : > { %232 = vst.msk [vmem:[#allocation2 + $0x38] sm:$0x1] %vm219_vm1, %v5986_v0  ;;  %235 = vst.msk [vmem:[#allocation2 + $0x44] sm:$0x1] %vm219_vm1, %v5986_v0  ;;  %v419_v40 = vrot.slane %v6114_v29, 4  ;;  %v274_v42 = vld [vmem:[%s6099_s25 + $0x10] sm:$0xff] }
  0x21   : > { %238 = vst.msk [vmem:[#allocation2 + $0x50] sm:$0x1] %vm219_vm1, %v5986_v0  ;;  %241 = vst.msk [vmem:[#allocation2 + $0x5c] sm:$0x1] %vm219_vm1, %v5986_v0  ;;  %v964_v43 = vrot.slane %v963_v31, 4  ;;  %v974_v44 = vrot.slane %v973_v32, 4  ;;  %v5517_v61 = vpack.c.bf16 %v274_v42, %v274_v42 }
  0x22   : > { %244 = vst.msk [vmem:[#allocation2 + $0x68] sm:$0x1] %vm219_vm1, %v5986_v0  ;;  %247 = vst.msk [vmem:[#allocation2 + $0x74] sm:$0x1] %vm219_vm1, %v5986_v0  ;;  %v610_v45 = vrot.slane %v608_v36, 7  ;;  %v616_v46 = vshrl.u32 %v5540_v35, 16 }
  0x23   : > { %250 = vst.msk [vmem:[#allocation2 + $0x80] sm:$0x1] %vm219_vm1, %v5986_v0  ;;  %253 = vst.msk [vmem:[#allocation2 + $0x8c] sm:$0x1] %vm219_vm1, %v5986_v0  ;;  %v275_v47 = vld [vmem:[%s6099_s25 + $0x18] sm:$0xff]  ;;  %v298_v48 = vld [vmem:[%s6099_s25 + $0xd0] sm:$0xff] }
  0x24   : > { %256 = vst.msk [vmem:[#allocation2 + $0x98] sm:$0x1] %vm219_vm1, %v5986_v0  ;;  %259 = vst.msk [vmem:[#allocation2 + $0xa4] sm:$0x1] %vm219_vm1, %v5986_v0  ;;  %v619_v51 = vshll.u32 %v5540_v35, 16  ;;  %v611_v52 = vshll.u32 %v5539_v11, 16  ;;  %v5518_v62 = vpack.c.bf16 %v275_v47, %v275_v47  ;;  %v5541_v63 = vpack.c.bf16 %v298_v48, %v298_v48 }
  0x25   : > { %262 = vst.msk [vmem:[#allocation2 + $0xb0] sm:$0x1] %vm219_vm1, %v5986_v0  ;;  %265 = vst.msk [vmem:[#allocation2 + $0xbc] sm:$0x1] %vm219_vm1, %v5986_v0  ;;  %v907_v16 = vld [vmem:[#allocation2 + $0x8] sm:$0x1] }
  0x26   : > { %268 = vst.msk [vmem:[#allocation2 + $0xc8] sm:$0x1] %vm219_vm1, %v5986_v0  ;;  %271 = vst.msk [vmem:[#allocation2 + $0xd4] sm:$0x1] %vm219_vm1, %v5986_v0  ;;  %v976_v17 = vshll.u32 %v907_v16, 16  ;;  %v299_v53 = vld [vmem:[%s6099_s25 + $0xd8] sm:$0xff]  ;;  %v613_v60 = vor.u32 %v611_v52, %v610_v45 }
  0x27   : > { %vm6110_vm7 = vmor %vm400_vm4, %vm401_vm5  ;;  %v294_v54 = vld [vmem:[%s6099_s25 + $0xb0] sm:$0xff]  ;;  %v614_v57 = vrot.slane %v610_v45, 4  ;;  %v6144_v58 = vrot.slane %v616_v46, 7  ;;  %v813_v59 = vld [vmem:[#allocation2 + $0x9c] sm:$0xf]  ;;  %v5542_v2 = vpack.c.bf16 %v299_v53, %v299_v53  ;;  %v421_v5 = vshrl.u32 %v5517_v61, 16 }
  0x28   : > { %v978_v26 = vrot.slane %v976_v17, 5  ;;  %vm6118_vm8 = vmand %vm216_vm0, %vm725_vm6  ;;  %v418_v49 = vsel %vm6110_vm7, %v410_v38, %v417_v39  ;;  %v5537_v3 = vpack.c.bf16 %v294_v54, %v294_v54  ;;  %v429_v6 = vshrl.u32 %v5518_v62, 16  ;;  %v295_v8 = vld [vmem:[%s6099_s25 + $0xb8] sm:$0xff]  ;;  %v820_v20 = vld [vmem:[#allocation2 + $0xa8] sm:$0xf] }
  0x29   : > { %vm6124_vm9 = vmor %vm953_vm2, %vm954_vm3  ;;  %v728_v50 = vsel %vm6118_vm8, %v409_v41, %v727_v34  ;;  %730 = vst.msk [vmem:[#allocation2 + $0x10] sm:$0xf] %vm216_vm0, %v418_v49  ;;  %v621_v0 = vor.u32 %v619_v51, %v6144_v58  ;;  %v623_v1 = vrot.slane %v6144_v58, 4  ;;  %v814_v4 = vsel %vm6118_vm8, %v613_v60, %v813_v59  ;;  %v736_v15 = vld [vmem:[#allocation2 + $0x18] sm:$0xf]  ;;  %v5860_v58 = vld [vmem:[%s8247_s1 + $0x30] sm:$0xff]  }
  0x2a   : > { %v969_v55 = vsel %vm6124_vm9, %v964_v43, %v968_v24  ;;  %v979_v56 = vsel %vm6124_vm9, %v974_v44, %v978_v26  ;;  %729 = vst [vmem:[#allocation2 + $0xc] sm:$0xf] %v728_v50  ;;  %v432_v7 = vshll.u32 %v5518_v62, 16  ;;  %815 = vst [vmem:[#allocation2 + $0x9c] sm:$0xf] %v814_v4  ;;  %v424_v10 = vshll.u32 %v5517_v61, 16  ;;  %5550 = vmatpush3.bf16.msra.mxu0 %v5860_v58 }
  0x2b   : > { %1340 = vrot.lane.b32.xlu0 %v969_v55, %s5987_s28  ;;  %v622_v9 = vsel %vm6110_vm7, %v614_v57, %v621_v0  ;;  %v625_v11 = vshrl.u32 %v5541_v63, 16  ;;  %v633_v12 = vshrl.u32 %v5542_v2, 16  ;;  %v423_v13 = vrot.slane %v421_v5, 7  ;;  %v733_v44 = vld [vmem:[#allocation2 + $0x14] sm:$0x1]  ;;  %vm6177_vm10 = vmand %vm219_vm1, %vm400_vm4  ;;  %5840 = vmatpush3.bf16.msra.mxu1 %v5860_v58 }
  0x2c   : > { %816 = vst.msk [vmem:[#allocation2 + $0xa0] sm:$0xf] %vm216_vm0, %v622_v9  ;;  %v6156_v14 = vrot.slane %v429_v6, 7  ;;  %v636_v16 = vshll.u32 %v5542_v2, 16  ;;  %v628_v17 = vshll.u32 %v5541_v63, 16  ;;  %v5538_v21 = vpack.c.bf16 %v295_v8, %v295_v8 }
  0x2d   : > { %v627_v18 = vrot.slane %v625_v11, 7  ;;  %v6158_v19 = vrot.slane %v633_v12, 7  ;;  %v591_v22 = vshrl.u32 %v5537_v3, 16  ;;  %v427_v25 = vrot.slane %v423_v13, 4  ;;  %v806_v49 = vld [vmem:[#allocation2 + $0x90] sm:$0xf] }
  0x2e   : > { %v434_v26 = vor.u32 %v432_v7, %v6156_v14  ;;  %v436_v28 = vrot.slane %v6156_v14, 4  ;;  %v426_v30 = vor.u32 %v424_v10, %v423_v13  ;;  %v594_v42 = vshll.u32 %v5537_v3, 16  ;;  %v817_v50 = vld [vmem:[#allocation2 + $0xa4] sm:$0x1]  ;;  %v810_v57 = vld [vmem:[#allocation2 + $0x98] sm:$0x1] }
  0x2f   : > { %1342 = vrot.lane.b32.xlu0 %v979_v56, %s5987_s28  ;;  %v631_v31 = vrot.slane %v627_v18, 4  ;;  %v638_v32 = vor.u32 %v636_v16, %v6158_v19  ;;  %v640_v34 = vrot.slane %v6158_v19, 4  ;;  %v630_v35 = vor.u32 %v628_v17, %v627_v18  ;;  %v740_v9 = vld [vmem:[#allocation2 + $0x20] sm:$0x1]  ;;  %v824_v16 = vld [vmem:[#allocation2 + $0xb0] sm:$0x1] }
  0x30   : > { %v1745_v23 = vld [vmem:[#allocation2 + $0x10] sm:$0xf]  ;;  %v435_v38 = vsel %vm6110_vm7, %v427_v25, %v434_v26  ;;  %v737_v39 = vsel %vm6118_vm8, %v426_v30, %v736_v15  ;;  %v593_v41 = vrot.slane %v591_v22, 7  ;;  %v599_v47 = vshrl.u32 %v5538_v21, 16  ;;  %v276_v10 = vld [vmem:[%s6099_s25 + $0x20] sm:$0xff] }
  0x31   : > { %v1744_v24 = vld [vmem:[#allocation2 + $0xc] sm:$0xf]  ;;  %1810 = vrot.lane.b32.xlu1 %v1745_v23, %s5987_s28  ;;  %v909_v43 = vld [vmem:[#allocation2 + $0x10] sm:$0xf]  ;;  %739 = vst.msk [vmem:[#allocation2 + $0x1c] sm:$0xf] %vm216_vm0, %v435_v38  ;;  %v639_v45 = vsel %vm6110_vm7, %v631_v31, %v638_v32  ;;  %v821_v46 = vsel %vm6118_vm8, %v630_v35, %v820_v20  ;;  %v734_v63 = vsel %vm6177_vm10, %v419_v40, %v733_v44 }
  0x32   : > { %v908_v36 = vld [vmem:[#allocation2 + $0xc] sm:$0xf]  ;;  %738 = vst [vmem:[#allocation2 + $0x18] sm:$0xf] %v737_v39  ;;  %v602_v48 = vshll.u32 %v5538_v21, 16  ;;  %v596_v53 = vor.u32 %v594_v42, %v593_v41  ;;  %v597_v54 = vrot.slane %v593_v41, 4  ;;  %v818_v29 = vsel %vm6177_vm10, %v623_v1, %v817_v50 }
  0x33   : > { %1808 = vrot.lane.b32.xlu0 %v1744_v24, %s5987_s28  ;;  %v1768_v52 = vld [vmem:[#allocation2 + $0x9c] sm:$0xf]  ;;  %823 = vst.msk [vmem:[#allocation2 + $0xac] sm:$0xf] %vm216_vm0, %v639_v45  ;;  %822 = vst [vmem:[#allocation2 + $0xa8] sm:$0xf] %v821_v46  ;;  %v741_v26 = vsel %vm6177_vm10, %v436_v28, %v740_v9  ;;  %v825_v14 = vsel %vm6177_vm10, %v640_v34, %v824_v16 }
  0x34   : > { %v981_v55 = vshrl.u32 %v908_v36, 16  ;;  %v984_v56 = vshll.u32 %v908_v36, 16  ;;  %v1769_v59 = vld [vmem:[#allocation2 + $0xa0] sm:$0xf]  ;;  %v601_v60 = vrot.slane %v599_v47, 7  ;;  %v990_v61 = vshll.u32 %v909_v43, 16 }
  0x35   : > { %v994_v62 = vshrl.u32 %v909_v43, 16  ;;  %1858 = vrot.lane.b32.xlu1 %v1769_v59, %s5987_s28  ;;  %v807_v0 = vsel %vm6118_vm8, %v596_v53, %v806_v49  ;;  %v944_v4 = vld [vmem:[#allocation2 + $0x9c] sm:$0xf]  ;;  %v945_v5 = vld [vmem:[#allocation2 + $0xa0] sm:$0xf]  ;;  %v6215_v36 = vpack.c.bf16 %v276_v10, %v276_v10  ;;  %v277_v44 = vld [vmem:[%s6099_s25 + $0x28] sm:$0xff] }
  0x36   : > { %v983_v2 = vrot.slane %v981_v55, 4  ;;  %v986_v3 = vrot.slane %v984_v56, 5  ;;  %735 = vst [vmem:[#allocation2 + $0x14] sm:$0x1] %v734_v63  ;;  %v604_v6 = vor.u32 %v602_v48, %v601_v60  ;;  %808 = vst [vmem:[#allocation2 + $0x90] sm:$0xf] %v807_v0 }
  0x37   : > { %1856 = vrot.lane.b32.xlu0 %v1768_v52, %s5987_s28  ;;  %v6194_v40 = vrot.slane %v990_v61, 5  ;;  %v606_v7 = vrot.slane %v601_v60, 4  ;;  %v1269_v8 = vshrl.u32 %v944_v4, 16  ;;  %819 = vst [vmem:[#allocation2 + $0xa4] sm:$0x1] %v818_v29  ;;  %v1272_v12 = vshll.u32 %v944_v4, 16 }
  0x38   : > { %v987_v11 = vor.u32 %v986_v3, %v983_v2  ;;  %v1278_v13 = vshll.u32 %v945_v5, 16  ;;  %v1282_v15 = vshrl.u32 %v945_v5, 16  ;;  %v605_v1 = vsel %vm6110_vm7, %v597_v54, %v604_v6  ;;  %v300_v21 = vld [vmem:[%s6099_s25 + $0xe0] sm:$0xff]  ;;  %v1747_v22 = vld [vmem:[#allocation2 + $0x1c] sm:$0xf]  ;;  %v301_v48 = vld [vmem:[%s6099_s25 + $0xe8] sm:$0xff] }
  0x39   : > { %v811_v17 = vsel %vm6177_vm10, %v606_v7, %v810_v57  ;;  %v1271_v18 = vrot.slane %v1269_v8, 4  ;;  %v996_v20 = vrot.slane %v994_v62, 4  ;;  %v1746_v23 = vld [vmem:[#allocation2 + $0x18] sm:$0xf]  ;;  %809 = vst.msk [vmem:[#allocation2 + $0x94] sm:$0xf] %vm216_vm0, %v605_v1  ;;  %1814 = vrot.lane.b32.xlu1 %v1747_v22, %s5987_s28  ;;  %v6229_v43 = vpack.c.bf16 %v300_v21, %v300_v21 }
  0x3a   : > { %v6206_v24 = vrot.slane %v987_v11, 4  ;;  %812 = vst [vmem:[#allocation2 + $0x98] sm:$0x1] %v811_v17  ;;  %v1274_v25 = vrot.slane %v1272_v12, 5  ;;  %v1771_v30 = vld [vmem:[#allocation2 + $0xac] sm:$0xf]  ;;  %v6249_v3 = vpack.c.bf16 %v277_v44, %v277_v44  ;;  %v6257_v12 = vpack.c.bf16 %v301_v48, %v301_v48 }
  0x3b   : > { %1812 = vrot.lane.b32.xlu0 %v1746_v23, %s5987_s28  ;;  %v1770_v31 = vld [vmem:[#allocation2 + $0xa8] sm:$0xf]  ;;  %v997_v32 = vor.u32 %v996_v20, %v6194_v40  ;;  %v1284_v35 = vrot.slane %v1282_v15, 4  ;;  %742 = vst [vmem:[#allocation2 + $0x20] sm:$0x1] %v741_v26  ;;  %v6225_v39 = vrot.slane %v1278_v13, 5 }
  0x3c   : > { %v993_v28 = vsel %vm6124_vm9, %v6206_v24, %v6194_v40  ;;  %v1275_v38 = vor.u32 %v1274_v25, %v1271_v18  ;;  %v911_v41 = vld [vmem:[#allocation2 + $0x18] sm:$0xf]  ;;  %v6227_v42 = vld [vmem:[#allocation2 + $0x1c] sm:$0xf]  ;;  %826 = vst [vmem:[#allocation2 + $0xb0] sm:$0x1] %v825_v14 }
  0x3d   : > { %v910_v45 = vld [vmem:[#allocation2 + $0x14] sm:$0x1]  ;;  %v6232_v19 = vrot.slane %v997_v32, 4  ;;  %v1005_v46 = vshrl.u32 %v911_v41, 16  ;;  %v1008_v34 = vshll.u32 %v911_v41, 16  ;;  %v1014_v47 = vshll.u32 %v6227_v42, 16  ;;  %1862 = vrot.lane.b32.xlu1 %v1771_v30, %s5987_s28 }
  0x3e   : > { %v941_v49 = vld [vmem:[#allocation2 + $0x90] sm:$0xf]  ;;  %v1276_v50 = vrot.slane %v1275_v38, 4  ;;  %v1000_v52 = vshll.u32 %v910_v45, 16  ;;  %v1018_v53 = vshrl.u32 %v6227_v42, 16  ;;  %v1285_v54 = vor.u32 %v1284_v35, %v6225_v39  ;;  %v5861_v55 = vld [vmem:[%s8247_s1 + $0x68] sm:$0xff]  }
  0x3f   : > { %1860 = vrot.lane.b32.xlu0 %v1770_v31, %s5987_s28  ;;  %v1245_v56 = vshrl.u32 %v941_v49, 16  ;;  %v1248_v57 = vshll.u32 %v941_v49, 16  ;;  %v1007_v59 = vrot.slane %v1005_v46, 4  ;;  %v1010_v60 = vrot.slane %v1008_v34, 5  ;;  %v947_v61 = vld [vmem:[#allocation2 + $0xa8] sm:$0xf]  ;;  %5551 = vmatprep.subr.bf16.mxu0 %v5861_v55 }
  0x40   : > { %v6243_v62 = vrot.slane %v1000_v52, 5  ;;  %v6245_v63 = vrot.slane %v1014_v47, 5  ;;  %v946_v0 = vld [vmem:[#allocation2 + $0xa4] sm:$0x1]  ;;  %v6247_v2 = vrot.slane %v1285_v54, 4  ;;  %v5862_v4 = vld [vmem:[%s8247_s1 + $0x28] sm:$0xff]   ;;  %5833 = vmatprep.subr.bf16.mxu1 %v5861_v55  ;;  %v1281_v7 = vsel %vm6124_vm9, %v1276_v50, %v6225_v39 }
  0x41   : > { %v942_v5 = vld [vmem:[#allocation2 + $0x94] sm:$0xf]  ;;  %v1247_v29 = vrot.slane %v1245_v56, 4  ;;  %v1250_v6 = vrot.slane %v1248_v57, 5  ;;  %v943_v40 = vld [vmem:[#allocation2 + $0x98] sm:$0x1]  ;;  %v1011_v8 = vor.u32 %v1010_v60, %v1007_v59  ;;  %5552 = vmatpush3.bf16.msra.mxu0 %v5862_v4  ;;  %5841 = vmatpush3.bf16.msra.mxu1 %v5862_v4 }
  0x42   : > { %v1254_v9 = vshll.u32 %v942_v5, 16  ;;  %v1258_v10 = vshrl.u32 %v942_v5, 16  ;;  %v1264_v11 = vshll.u32 %v943_v40, 16  ;;  %v5863_v13 = vld [vmem:[%s8247_s1 + $0x60] sm:$0xff]   ;;  %v1288_v58 = vshll.u32 %v946_v0, 16  ;;  %v5865_v32 = vld [vmem:[%s8247_s1 + $0x58] sm:$0xff]  }
  0x43   : > { %v1251_v15 = vor.u32 %v1250_v6, %v1247_v29  ;;  %1344 = vrot.lane.b32.xlu0 %v993_v28, %s5987_s28  ;;  %v1012_v16 = vrot.slane %v1011_v8, 4  ;;  %v948_v1 = vld [vmem:[#allocation2 + $0xac] sm:$0xf]  ;;  %v1293_v17 = vshrl.u32 %v947_v61, 16  ;;  %v5864_v18 = vld [vmem:[%s8247_s1 + $0x20] sm:$0xff]   ;;  %v1003_v22 = vsel %vm6124_vm9, %v6232_v19, %v6243_v62  ;;  %5553 = vmatprep.subr.bf16.mxu0 %v5863_v13  ;;  %v5866_v49 = vld [vmem:[%s8247_s1 + $0x18] sm:$0xff]  }
  0x44   : > { %v1256_v20 = vrot.slane %v1254_v9, 5  ;;  %v1260_v21 = vrot.slane %v1258_v10, 4  ;;  %v1296_v23 = vshll.u32 %v947_v61, 16  ;;  %v913_v24 = vld [vmem:[#allocation2 + $0x20] sm:$0x1]  ;;  %5834 = vmatprep.subr.bf16.mxu1 %v5863_v13  ;;  %v1266_v26 = vrot.slane %v1264_v11, 5 }
  0x45   : > { %v1252_v25 = vrot.slane %v1251_v15, 4  ;;  %v1017_v30 = vsel %vm6124_vm9, %v1012_v16, %v6245_v63  ;;  %v1295_v31 = vrot.slane %v1293_v17, 4  ;;  %v1302_v28 = vshll.u32 %v948_v1, 16  ;;  %5554 = vmatpush3.bf16.msra.mxu0 %v5864_v18  ;;  %5842 = vmatpush3.bf16.msra.mxu1 %v5864_v18  ;;  %v949_v45 = vld [vmem:[#allocation2 + $0xb0] sm:$0x1]  ;;  %v279_v6 = vld [vmem:[%s6099_s25 + $0x38] sm:$0xff] }
  0x46   : > { %v1261_v35 = vor.u32 %v1260_v21, %v1256_v20  ;;  %v1298_v14 = vrot.slane %v1296_v23, 5  ;;  %v1306_v38 = vshrl.u32 %v948_v1, 16  ;;  %v6279_v41 = vrot.slane %v1288_v58, 5  ;;  %5555 = vmatprep.subr.bf16.mxu0 %v5865_v32  ;;  %5835 = vmatprep.subr.bf16.mxu1 %v5865_v32  ;;  %v5867_v55 = vld [vmem:[%s8247_s1 + $0x50] sm:$0xff]   ;;  %v743_v60 = vld [vmem:[#allocation2 + $0x24] sm:$0xf] }
  0x47   : > { %v1257_v39 = vsel %vm6124_vm9, %v1252_v25, %v1256_v20  ;;  %1392 = vrot.lane.b32.xlu0 %v1281_v7, %s5987_s28  ;;  %v1020_v42 = vrot.slane %v1018_v53, 4  ;;  %v1024_v44 = vshll.u32 %v913_v24, 16  ;;  %v1304_v47 = vrot.slane %v1302_v28, 5  ;;  %v278_v5 = vld [vmem:[%s6099_s25 + $0x30] sm:$0xff]  ;;  %v303_v11 = vld [vmem:[%s6099_s25 + $0xf8] sm:$0xff]  ;;  %v5869_v1 = vld [vmem:[%s8247_s1 + $0x48] sm:$0xff]  }
  0x48   : > { %1388 = vrot.lane.b32.xlu1 %v1257_v39, %s5987_s28  ;;  %v1262_v46 = vrot.slane %v1261_v35, 4  ;;  %v1299_v34 = vor.u32 %v1298_v14, %v1295_v31  ;;  %v438_v48 = vshrl.u32 %v6215_v36, 16  ;;  %v441_v53 = vshll.u32 %v6215_v36, 16  ;;  %v302_v29 = vld [vmem:[%s6099_s25 + $0xf0] sm:$0xff]  ;;  %v747_v23 = vld [vmem:[#allocation2 + $0x2c] sm:$0x1] }
  0x49   : > { %v1021_v50 = vor.u32 %v1020_v42, %v6245_v63  ;;  %v6287_v52 = vrot.slane %v1024_v44, 5  ;;  %v1308_v54 = vrot.slane %v1306_v38, 4  ;;  %v1312_v61 = vshll.u32 %v949_v45, 16  ;;  %5556 = vmatpush3.bf16.msra.mxu0 %v5866_v49  ;;  %5843 = vmatpush3.bf16.msra.mxu1 %v5866_v49  ;;  %v5868_v40 = vld [vmem:[%s8247_s1 + $0x10] sm:$0xff]   ;;  %v841_v14 = vld [vmem:[#allocation2] sm:$0xf] }
  0x4a   : > { %v1267_v56 = vsel %vm6124_vm9, %v1262_v46, %v1266_v26  ;;  %v1300_v57 = vrot.slane %v1299_v34, 4  ;;  %v6295_v59 = vrot.slane %v438_v48, 7  ;;  %v642_v0 = vshrl.u32 %v6229_v43, 16  ;;  %5557 = vmatprep.subr.bf16.mxu0 %v5867_v55  ;;  %v827_v10 = vld [vmem:[#allocation2 + $0xb4] sm:$0xf]  ;;  %5836 = vmatprep.subr.bf16.mxu1 %v5867_v55  ;;  %v5871_v28 = vld [vmem:[%s8247_s1 + $0x40] sm:$0xff]  }
  0x4b   : > { %1348 = vrot.lane.b32.xlu0 %v1017_v30, %s5987_s28  ;;  %v6298_v36 = vrot.slane %v1021_v50, 4  ;;  %v1309_v63 = vor.u32 %v1308_v54, %v1304_v47  ;;  %v645_v4 = vshll.u32 %v6229_v43, 16  ;;  %v6312_v9 = vrot.slane %v1312_v61, 5  ;;  %v831_v30 = vld [vmem:[#allocation2 + $0xbc] sm:$0x1]  ;;  %v5872_v45 = vld [vmem:[%s8247_s1] sm:$0xff]  }
  0x4c   : > { %1390 = vrot.lane.b32.xlu1 %v1267_v56, %s5987_s28  ;;  %v1305_v7 = vsel %vm6124_vm9, %v1300_v57, %v1304_v47  ;;  %v443_v8 = vor.u32 %v441_v53, %v6295_v59  ;;  %v444_v43 = vrot.slane %v6295_v59, 4  ;;  %v1291_v13 = vsel %vm6124_vm9, %v6247_v2, %v6279_v41  ;;  %v5870_v2 = vld [vmem:[%s8247_s1 + $0x8] sm:$0xff]   ;;  %873 = vst.msk [vmem:[#allocation3] sm:$0xf] %vm216_vm0, %v841_v14  ;;  %v750_v47 = vld [vmem:[#allocation2 + $0x30] sm:$0xf] }
  0x4d   : > { %v6320_v15 = vrot.slane %v1309_v63, 4  ;;  %v644_v16 = vrot.slane %v642_v0, 7  ;;  %v446_v58 = vshrl.u32 %v6249_v3, 16  ;;  %v449_v18 = vshll.u32 %v6249_v3, 16  ;;  %5558 = vmatpush3.bf16.msra.mxu0 %v5868_v40  ;;  %5844 = vmatpush3.bf16.msra.mxu1 %v5868_v40  ;;  %v842_v50 = vld [vmem:[#allocation2 + $0x4] sm:$0xf] }
  0x4e   : > { %v744_v17 = vsel %vm6118_vm8, %v443_v8, %v743_v60  ;;  %v650_v20 = vshrl.u32 %v6257_v12, 16  ;;  %v653_v21 = vshll.u32 %v6257_v12, 16  ;;  %v1027_v24 = vsel %vm6124_vm9, %v6298_v36, %v6287_v52  ;;  %5559 = vmatprep.subr.bf16.mxu0 %v5869_v1  ;;  %5837 = vmatprep.subr.bf16.mxu1 %v5869_v1  ;;  %v834_v55 = vld [vmem:[#allocation2 + $0xc0] sm:$0xf]  ;;  %874 = vst.msk [vmem:[#allocation3 + $0x14] sm:$0xf] %vm216_vm0, %v842_v50 }
  0x4f   : > { %1396 = vrot.lane.b32.xlu0 %v1305_v7, %s5987_s28  ;;  %745 = vst [vmem:[#allocation2 + $0x24] sm:$0xf] %v744_v17  ;;  %v647_v3 = vor.u32 %v645_v4, %v644_v16  ;;  %v448_v25 = vrot.slane %v446_v58, 7  ;;  %v648_v26 = vrot.slane %v644_v16, 4  ;;  %v5521_v31 = vpack.c.bf16 %v278_v5, %v278_v5  ;;  %v280_v16 = vld [vmem:[%s6099_s25 + $0x40] sm:$0xff] }
  0x50   : > { %1346 = vrot.lane.b32.xlu1 %v1003_v22, %s5987_s28  ;;  %v652_v12 = vrot.slane %v650_v20, 7  ;;  %v5545_v32 = vpack.c.bf16 %v302_v29, %v302_v29  ;;  %v5522_v35 = vpack.c.bf16 %v279_v6, %v279_v6  ;;  %v6350_v42 = vpack.c.bf16 %v303_v11, %v303_v11 }
  0x51   : > { %v828_v38 = vsel %vm6118_vm8, %v647_v3, %v827_v10  ;;  %v451_v39 = vor.u32 %v449_v18, %v448_v25  ;;  %v453_v41 = vrot.slane %v448_v25, 4  ;;  %v455_v22 = vshrl.u32 %v5521_v31, 16  ;;  %5560 = vmatpush3.bf16.msra.mxu0 %v5870_v2  ;;  %5845 = vmatpush3.bf16.msra.mxu1 %v5870_v2 }
  0x52   : > { %829 = vst [vmem:[#allocation2 + $0xb4] sm:$0xf] %v828_v38  ;;  %v655_v19 = vor.u32 %v653_v21, %v652_v12  ;;  %v657_v62 = vrot.slane %v652_v12, 4  ;;  %v458_v44 = vshll.u32 %v5521_v31, 16  ;;  %v659_v48 = vshrl.u32 %v5545_v32, 16  ;;  %5561 = vmatprep.subr.bf16.mxu0 %v5871_v28  ;;  %5838 = vmatprep.subr.bf16.mxu1 %v5871_v28 }
  0x53   : > { %v452_v46 = vsel %vm6110_vm7, %v444_v43, %v451_v39  ;;  %v748_v34 = vsel %vm6177_vm10, %v453_v41, %v747_v23  ;;  %v662_v49 = vshll.u32 %v5545_v32, 16  ;;  %v457_v53 = vrot.slane %v455_v22, 7 }
  0x54   : > { %1394 = vrot.lane.b32.xlu1 %v1291_v13, %s5987_s28  ;;  %746 = vst.msk [vmem:[#allocation2 + $0x28] sm:$0xf] %vm216_vm0, %v452_v46  ;;  %v656_v52 = vsel %vm6110_vm7, %v648_v26, %v655_v19  ;;  %749 = vst [vmem:[#allocation2 + $0x2c] sm:$0x1] %v748_v34  ;;  %v832_v54 = vsel %vm6177_vm10, %v657_v62, %v831_v30  ;;  %v463_v56 = vshrl.u32 %v5522_v35, 16  ;;  %v661_v57 = vrot.slane %v659_v48, 7 }
  0x55   : > { %830 = vst.msk [vmem:[#allocation2 + $0xb8] sm:$0xf] %vm216_vm0, %v656_v52  ;;  %833 = vst [vmem:[#allocation2 + $0xbc] sm:$0x1] %v832_v54  ;;  %v466_v59 = vshll.u32 %v5522_v35, 16  ;;  %v667_v60 = vshrl.u32 %v6350_v42, 16  ;;  %v460_v0 = vor.u32 %v458_v44, %v457_v53  ;;  %5562 = vmatpush3.bf16.msra.mxu0 %v5872_v45  ;;  %5846 = vmatpush3.bf16.msra.mxu1 %v5872_v45 }
  0x56   : > { %v670_v61 = vshll.u32 %v6350_v42, 16  ;;  %v1748_v36 = vld [vmem:[#allocation2 + $0x24] sm:$0xf]  ;;  %v461_v4 = vrot.slane %v457_v53, 4  ;;  %v465_v5 = vrot.slane %v463_v56, 7  ;;  %v664_v40 = vor.u32 %v662_v49, %v661_v57 }
  0x57   : > { %v914_v63 = vld [vmem:[#allocation2 + $0x24] sm:$0xf]  ;;  %1816 = vrot.lane.b32.xlu0 %v1748_v36, %s5987_s28  ;;  %v665_v7 = vrot.slane %v661_v57, 4  ;;  %v751_v8 = vsel %vm6118_vm8, %v460_v0, %v750_v47  ;;  %v6374_v11 = vrot.slane %v667_v60, 7  ;;  %v754_v13 = vld [vmem:[#allocation2 + $0x38] sm:$0x1]  ;;  %v1315_v58 = vsel %vm6124_vm9, %v6320_v15, %v6312_v9 }
  0x58   : > { %v1029_v29 = vshrl.u32 %v914_v63, 16  ;;  %v1032_v6 = vshll.u32 %v914_v63, 16  ;;  %1350 = vrot.lane.b32.xlu1 %v1027_v24, %s5987_s28  ;;  %v468_v10 = vor.u32 %v466_v59, %v465_v5  ;;  %v470_v43 = vrot.slane %v465_v5, 4  ;;  %752 = vst [vmem:[#allocation2 + $0x30] sm:$0xf] %v751_v8  ;;  %v281_v47 = vld [vmem:[%s6099_s25 + $0x48] sm:$0xff] }
  0x59   : > { %v1772_v1 = vld [vmem:[#allocation2 + $0xb4] sm:$0xf]  ;;  %v835_v21 = vsel %vm6118_vm8, %v664_v40, %v834_v55  ;;  %v672_v3 = vor.u32 %v670_v61, %v6374_v11  ;;  %v5523_v14 = vpack.c.bf16 %v280_v16, %v280_v16  ;;  %v5524_v63 = vpack.c.bf16 %v281_v47, %v281_v47 }
  0x5a   : > { %v1031_v17 = vrot.slane %v1029_v29, 4  ;;  %v1034_v18 = vrot.slane %v1032_v6, 5  ;;  %v950_v20 = vld [vmem:[#allocation2 + $0xb4] sm:$0xf]  ;;  %836 = vst [vmem:[#allocation2 + $0xc0] sm:$0xf] %v835_v21  ;;  %v469_v24 = vsel %vm6110_vm7, %v461_v4, %v468_v10  ;;  %v755_v26 = vsel %vm6177_vm10, %v470_v43, %v754_v13 }
  0x5b   : > { %v1317_v23 = vshrl.u32 %v950_v20, 16  ;;  %v1320_v2 = vshll.u32 %v950_v20, 16  ;;  %1864 = vrot.lane.b32.xlu0 %v1772_v1, %s5987_s28  ;;  %v915_v25 = vld [vmem:[#allocation2 + $0x28] sm:$0xf]  ;;  %v916_v15 = vld [vmem:[#allocation2 + $0x2c] sm:$0x1]  ;;  %v673_v35 = vsel %vm6110_vm7, %v665_v7, %v672_v3 }
  0x5c   : > { %v1035_v9 = vor.u32 %v1034_v18, %v1031_v17  ;;  %753 = vst.msk [vmem:[#allocation2 + $0x34] sm:$0xf] %vm216_vm0, %v469_v24  ;;  %1398 = vrot.lane.b32.xlu1 %v1315_v58, %s5987_s28  ;;  %v1749_v30 = vld [vmem:[#allocation2 + $0x28] sm:$0xf]  ;;  %v1038_v12 = vshll.u32 %v915_v25, 16  ;;  %v1042_v31 = vshrl.u32 %v915_v25, 16 }
  0x5d   : > { %v951_v32 = vld [vmem:[#allocation2 + $0xb8] sm:$0xf]  ;;  %756 = vst [vmem:[#allocation2 + $0x38] sm:$0x1] %v755_v26  ;;  %v1319_v38 = vrot.slane %v1317_v23, 4  ;;  %v1322_v39 = vrot.slane %v1320_v2, 5 }
  0x5e   : > { %v1036_v28 = vrot.slane %v1035_v9, 4  ;;  %v1326_v41 = vshll.u32 %v951_v32, 16  ;;  %v952_v42 = vld [vmem:[#allocation2 + $0xbc] sm:$0x1]  ;;  %837 = vst.msk [vmem:[#allocation2 + $0xc4] sm:$0xf] %vm216_vm0, %v673_v35 }
  0x5f   : > { %v1040_v19 = vrot.slane %v1038_v12, 5  ;;  %v1330_v62 = vshrl.u32 %v951_v32, 16  ;;  %v1044_v22 = vrot.slane %v1042_v31, 4  ;;  %v1048_v44 = vshll.u32 %v916_v15, 16  ;;  %v917_v53 = vld [vmem:[#allocation2 + $0x30] sm:$0xf] }
  0x60   : > { %v1323_v45 = vor.u32 %v1322_v39, %v1319_v38  ;;  %v1328_v46 = vrot.slane %v1326_v41, 5  ;;  %v1336_v34 = vshll.u32 %v952_v42, 16  ;;  %1818 = vrot.lane.b32.xlu1 %v1749_v30, %s5987_s28  ;;  %v1773_v54 = vld [vmem:[#allocation2 + $0xb8] sm:$0xf]  ;;  %v1053_v56 = vshrl.u32 %v917_v53, 16  ;;  %v282_v23 = vld [vmem:[%s6099_s25 + $0x50] sm:$0xff] }
  0x61   : > { %v1041_v48 = vsel %vm6124_vm9, %v1036_v28, %v1040_v19  ;;  %v1045_v49 = vor.u32 %v1044_v22, %v1040_v19  ;;  %v1050_v50 = vrot.slane %v1048_v44, 5  ;;  %v1332_v52 = vrot.slane %v1330_v62, 4  ;;  %v1750_v16 = vld [vmem:[#allocation2 + $0x30] sm:$0xf]  ;;  %v757_v58 = vld [vmem:[#allocation2 + $0x3c] sm:$0xf] }
  0x62   : > { %1352 = vrot.lane.b32.xlu0 %v1041_v48, %s5987_s28  ;;  %v1324_v55 = vrot.slane %v1323_v45, 4  ;;  %v1056_v57 = vshll.u32 %v917_v53, 16  ;;  %v472_v36 = vshrl.u32 %v5523_v14, 16  ;;  %v1055_v4 = vrot.slane %v1053_v56, 4  ;;  %v5887_v17 = vld [vmem:[%s8247_s1 + $0xf8] sm:$0xff]  }
  0x63   : > { %v1046_v59 = vrot.slane %v1045_v49, 4  ;;  %v1333_v60 = vor.u32 %v1332_v52, %v1328_v46  ;;  %v918_v61 = vld [vmem:[#allocation2 + $0x34] sm:$0xf]  ;;  %v1338_v6 = vrot.slane %v1336_v34, 5  ;;  %v475_v13 = vshll.u32 %v5523_v14, 16  ;;  %v283_v2 = vld [vmem:[%s6099_s25 + $0x58] sm:$0xff]  ;;  %5659 = vmatprep.subr.bf16.mxu1 %v5887_v17 }
  0x64   : > { %v1329_v0 = vsel %vm6124_vm9, %v1324_v55, %v1328_v46  ;;  %v1058_v5 = vrot.slane %v1056_v57, 5  ;;  %1866 = vrot.lane.b32.xlu1 %v1773_v54, %s5987_s28  ;;  %v1062_v40 = vshll.u32 %v918_v61, 16  ;;  %v1066_v7 = vshrl.u32 %v918_v61, 16  ;;  %v2833_v21 = vld [vmem:[#allocation2 + $0x18] sm:$0xf]  ;;  %v284_v46 = vld [vmem:[%s6099_s25 + $0x60] sm:$0xff] }
  0x65   : > { %v1051_v29 = vsel %vm6124_vm9, %v1046_v59, %v1050_v50  ;;  %v1334_v8 = vrot.slane %v1333_v60, 4  ;;  %v474_v43 = vrot.slane %v472_v36, 7  ;;  %v480_v1 = vshrl.u32 %v5524_v63, 16  ;;  %v2432_v15 = vld [vmem:[#allocation2 + $0xc] sm:$0xe] }
  0x66   : > { %1400 = vrot.lane.b32.xlu0 %v1329_v0, %s5987_s28  ;;  %v1059_v10 = vor.u32 %v1058_v5, %v1055_v4  ;;  %v483_v20 = vshll.u32 %v5524_v63, 16  ;;  %v1064_v24 = vrot.slane %v1062_v40, 5  ;;  %v1068_v3 = vrot.slane %v1066_v7, 4  ;;  %v2433_v26 = vld [vmem:[#allocation2 + $0x10] sm:$0xf] }
  0x67   : > { %v477_v18 = vor.u32 %v475_v13, %v474_v43  ;;  %v478_v25 = vrot.slane %v474_v43, 4  ;;  %v482_v9 = vrot.slane %v480_v1, 7  ;;  %v1339_v30 = vsel %vm6124_vm9, %v1334_v8, %v1338_v6  ;;  %v919_v31 = vld [vmem:[#allocation2 + $0x38] sm:$0x1]  ;;  %v1774_v35 = vld [vmem:[#allocation2 + $0xc0] sm:$0xf] }
  0x68   : > { %1354 = vrot.lane.b32.xlu1 %v1051_v29, %s5987_s28  ;;  %v1060_v12 = vrot.slane %v1059_v10, 4  ;;  %v2882_v38 = vshrl.u32 %v2833_v21, 16  ;;  %v761_v39 = vld [vmem:[#allocation2 + $0x44] sm:$0x1]  ;;  %v5525_v41 = vpack.c.bf16 %v282_v23, %v282_v23  ;;  %vm1565_vm11 = vcmask 1042432  }
  0x69   : > { %v758_v32 = vsel %vm6118_vm8, %v477_v18, %v757_v58  ;;  %v485_v14 = vor.u32 %v483_v20, %v482_v9  ;;  %v487_v28 = vrot.slane %v482_v9, 4  ;;  %vm1566_vm12 = vcmask 1046532   ;;  %v2834_v42 = vld [vmem:[#allocation2 + $0x1c] sm:$0xf]  ;;  %v1751_v34 = vld [vmem:[#allocation2 + $0x34] sm:$0xf] }
  0x6a   : > { %1820 = vrot.lane.b32.xlu0 %v1750_v16, %s5987_s28  ;;  %759 = vst [vmem:[#allocation2 + $0x3c] sm:$0xf] %v758_v32  ;;  %v2885_v19 = vshll.u32 %v2833_v21, 16  ;;  %v5526_v62 = vpack.c.bf16 %v283_v2, %v283_v2  ;;  %v1069_v22 = vor.u32 %v1068_v3, %v1064_v24  ;;  %v1072_v44 = vshll.u32 %v919_v31, 16  ;;  %v6424_v50 = vld [vmem:[#allocation2 + $0x14] sm:$0x1]  ;;  %vm6430_vm13 = vmor %vm1565_vm11, %vm1566_vm12 }
  0x6b   : > { %v486_v45 = vsel %vm6110_vm7, %v478_v25, %v485_v14  ;;  %v1065_v47 = vsel %vm6124_vm9, %v1060_v12, %v1064_v24  ;;  %v5347_v48 = vrot.slane %v2432_v15, 9  ;;  %v2530_v49 = vrot.slane %v2433_v26, 5  ;;  %v764_v60 = vld [vmem:[#allocation2 + $0x48] sm:$0xf]  ;;  %v1775_v63 = vld [vmem:[#allocation2 + $0xc4] sm:$0xf] }
  0x6c   : > { %1402 = vrot.lane.b32.xlu1 %v1339_v30, %s5987_s28  ;;  %760 = vst.msk [vmem:[#allocation2 + $0x40] sm:$0xf] %vm216_vm0, %v486_v45  ;;  %v762_v52 = vsel %vm6177_vm10, %v487_v28, %v761_v39  ;;  %v2884_v54 = vrot.slane %v2882_v38, 4  ;;  %v2887_v55 = vrot.slane %v2885_v19, 5  ;;  %v489_v56 = vshrl.u32 %v5525_v41, 16  ;;  %v285_v14 = vld [vmem:[%s6099_s25 + $0x68] sm:$0xff] }
  0x6d   : > { %763 = vst [vmem:[#allocation2 + $0x44] sm:$0x1] %v762_v52  ;;  %v492_v57 = vshll.u32 %v5525_v41, 16  ;;  %v2891_v59 = vshll.u32 %v2834_v42, 16  ;;  %v497_v61 = vshrl.u32 %v5526_v62, 16  ;;  %v500_v36 = vshll.u32 %v5526_v62, 16 }
  0x6e   : > { %1868 = vrot.lane.b32.xlu0 %v1774_v35, %s5987_s28  ;;  %v1074_v0 = vrot.slane %v1072_v44, 5  ;;  %v2895_v4 = vshrl.u32 %v2834_v42, 16  ;;  %v491_v5 = vrot.slane %v489_v56, 7  ;;  %v6435_v29 = vpack.c.bf16 %v284_v46, %v284_v46  ;;  %v2836_v43 = vld [vmem:[#allocation2 + $0x24] sm:$0xf] }
  0x6f   : > { %v1070_v6 = vrot.slane %v1069_v22, 4  ;;  %v2531_v40 = vsel %vm6430_vm13, %v5347_v48, %v2530_v49  ;;  %v2533_v7 = vrot.slane %v6424_v50, 5  ;;  %v499_v10 = vrot.slane %v497_v61, 7  ;;  %v2835_v58 = vld [vmem:[#allocation2 + $0x20] sm:$0x1] }
  0x70   : > { %1822 = vrot.lane.b32.xlu1 %v1751_v34, %s5987_s28  ;;  %v2888_v16 = vor.u32 %v2887_v55, %v2884_v54  ;;  %v494_v18 = vor.u32 %v492_v57, %v491_v5  ;;  %v2837_v20 = vld [vmem:[#allocation2 + $0x28] sm:$0xf]  ;;  %v2532_v21 = vrot.slane %v2530_v49, 4  ;;  %v2893_v23 = vrot.slane %v2891_v59, 5  ;;  %v768_v35 = vld [vmem:[#allocation2 + $0x50] sm:$0x1] }
  0x71   : > { %v920_v8 = vld [vmem:[#allocation2 + $0x3c] sm:$0xf]  ;;  %v495_v2 = vrot.slane %v491_v5, 4  ;;  %v502_v24 = vor.u32 %v500_v36, %v499_v10  ;;  %v2897_v3 = vrot.slane %v2895_v4, 4  ;;  %v1075_v30 = vsel %vm6124_vm9, %v1070_v6, %v1074_v0  ;;  %v6452_v62 = vld [vmem:[#allocation2 + $0x18] sm:$0xe] }
  0x72   : > { %1356 = vrot.lane.b32.xlu0 %v1065_v47, %s5987_s28  ;;  %v1752_v13 = vld [vmem:[#allocation2 + $0x3c] sm:$0xf]  ;;  %v1077_v1 = vshrl.u32 %v920_v8, 16  ;;  %v1080_v17 = vshll.u32 %v920_v8, 16  ;;  %v765_v26 = vsel %vm6118_vm8, %v494_v18, %v764_v60  ;;  %v2889_v28 = vrot.slane %v2888_v16, 4 }
  0x73   : > { %v921_v25 = vld [vmem:[#allocation2 + $0x40] sm:$0xf]  ;;  %766 = vst [vmem:[#allocation2 + $0x48] sm:$0xf] %v765_v26  ;;  %v503_v32 = vsel %vm6110_vm7, %v495_v2, %v502_v24  ;;  %v504_v39 = vrot.slane %v499_v10, 4  ;;  %v2906_v41 = vshrl.u32 %v2836_v43, 16  ;;  %v2898_v46 = vor.u32 %v2897_v3, %v2893_v23 }
  0x74   : > { %1870 = vrot.lane.b32.xlu1 %v1775_v63, %s5987_s28  ;;  %v1079_v9 = vrot.slane %v1077_v1, 4  ;;  %v1082_v15 = vrot.slane %v1080_v17, 5  ;;  %v1086_v12 = vshll.u32 %v921_v25, 16  ;;  %v1090_v31 = vshrl.u32 %v921_v25, 16  ;;  %767 = vst.msk [vmem:[#allocation2 + $0x4c] sm:$0xf] %vm216_vm0, %v503_v32 }
  0x75   : > { %v674_v42 = vrot.slane %v6374_v11, 4  ;;  %v2901_v19 = vshll.u32 %v2835_v58, 16  ;;  %v2909_v22 = vshll.u32 %v2836_v43, 16  ;;  %v2915_v44 = vshll.u32 %v2837_v20, 16  ;;  %v1753_v45 = vld [vmem:[#allocation2 + $0x40] sm:$0xf] }
  0x76   : > { %1824 = vrot.lane.b32.xlu0 %v1752_v13, %s5987_s28  ;;  %v1083_v38 = vor.u32 %v1082_v15, %v1079_v9  ;;  %v1088_v34 = vrot.slane %v1086_v12, 5  ;;  %v922_v47 = vld [vmem:[#allocation2 + $0x44] sm:$0x1]  ;;  %v1092_v48 = vrot.slane %v1090_v31, 4  ;;  %v6455_v49 = vpack.c.bf16 %v285_v14, %v285_v14  ;;  %v6462_v59 = vld [vmem:[#allocation2 + $0x1c] sm:$0xf] }
  0x77   : > { %v2908_v52 = vrot.slane %v2906_v41, 4  ;;  %v2911_v54 = vrot.slane %v2909_v22, 5  ;;  %v2919_v55 = vshrl.u32 %v2837_v20, 16  ;;  %v2534_v56 = vsel %vm6430_vm13, %v2532_v21, %v2533_v7  ;;  %v2838_v0 = vld [vmem:[#allocation2 + $0x2c] sm:$0x1]  ;;  %v286_v12 = vld [vmem:[%s6099_s25 + $0x70] sm:$0xff] }
  0x78   : > { %1358 = vrot.lane.b32.xlu1 %v1075_v30, %s5987_s28  ;;  %v1084_v50 = vrot.slane %v1083_v38, 4  ;;  %v2894_v57 = vsel %vm6124_vm9, %v2889_v28, %v2893_v23  ;;  %v769_v60 = vsel %vm6177_vm10, %v504_v39, %v768_v35  ;;  %v506_v61 = vshrl.u32 %v6435_v29, 16  ;;  %v2437_v8 = vld [vmem:[#allocation2 + $0x20] sm:$0x1]  ;;  %v771_v17 = vld [vmem:[#allocation2 + $0x54] sm:$0xf] }
  0x79   : > { %v1096_v36 = vshll.u32 %v922_v47, 16  ;;  %v6467_v63 = vrot.slane %v2915_v44, 5  ;;  %v2921_v4 = vrot.slane %v2919_v55, 4  ;;  %770 = vst [vmem:[#allocation2 + $0x50] sm:$0x1] %v769_v60  ;;  %v509_v5 = vshll.u32 %v6435_v29, 16 }
  0x7a   : > { %2640 = vrot.lane.b32.xlu0 %v2531_v40, %s5987_s28  ;;  %v2903_v6 = vrot.slane %v2901_v19, 5  ;;  %v1093_v40 = vor.u32 %v1092_v48, %v1088_v34  ;;  %v5348_v7 = vrot.slane %v6452_v62, 9  ;;  %v923_v10 = vld [vmem:[#allocation2 + $0x48] sm:$0xf]  ;;  %v6472_v43 = vrot.slane %v506_v61, 7  ;;  %v287_v38 = vld [vmem:[%s6099_s25 + $0x78] sm:$0xff] }
  0x7b   : > { %v2899_v13 = vrot.slane %v2898_v46, 4  ;;  %v1089_v16 = vsel %vm6124_vm9, %v1084_v50, %v1088_v34  ;;  %v2912_v58 = vor.u32 %v2911_v54, %v2908_v52  ;;  %v924_v1 = vld [vmem:[#allocation2 + $0x4c] sm:$0xf]  ;;  %v1101_v29 = vshrl.u32 %v923_v10, 16  ;;  %v2839_v28 = vld [vmem:[#allocation2 + $0x30] sm:$0xf] }
  0x7c   : > { %1826 = vrot.lane.b32.xlu1 %v1753_v45, %s5987_s28  ;;  %v1104_v18 = vshll.u32 %v923_v10, 16  ;;  %v1110_v20 = vshll.u32 %v924_v1, 16  ;;  %v1114_v21 = vshrl.u32 %v924_v1, 16  ;;  %v511_v23 = vor.u32 %v509_v5, %v6472_v43  ;;  %v1754_v39 = vld [vmem:[#allocation2 + $0x48] sm:$0xf] }
  0x7d   : > { %v1098_v2 = vrot.slane %v1096_v36, 5  ;;  %v2537_v24 = vrot.slane %v6462_v59, 5  ;;  %v2922_v3 = vor.u32 %v2921_v4, %v6467_v63  ;;  %v2925_v25 = vshll.u32 %v2838_v0, 16  ;;  %v6499_v47 = vld [vmem:[#allocation2 + $0x24] sm:$0xe] }
  0x7e   : > { %3265 = vrot.lane.b32.xlu0 %v2894_v57, %s5987_s28  ;;  %v1094_v9 = vrot.slane %v1093_v40, 4  ;;  %v1103_v15 = vrot.slane %v1101_v29, 4  ;;  %v1106_v26 = vrot.slane %v1104_v18, 5  ;;  %v772_v30 = vsel %vm6118_vm8, %v511_v23, %v771_v17  ;;  %v775_v48 = vld [vmem:[#allocation2 + $0x5c] sm:$0x1] }
  0x7f   : > { %v2904_v31 = vsel %vm6124_vm9, %v2899_v13, %v2903_v6  ;;  %v2540_v32 = vrot.slane %v2437_v8, 5  ;;  %773 = vst [vmem:[#allocation2 + $0x54] sm:$0xf] %v772_v30  ;;  %v514_v35 = vshrl.u32 %v6455_v49, 16  ;;  %v517_v14 = vshll.u32 %v6455_v49, 16 }
  0x80   : > { %2642 = vrot.lane.b32.xlu1 %v2534_v56, %s5987_s28  ;;  %v2539_v41 = vrot.slane %v2537_v24, 4  ;;  %v6490_v19 = vrot.slane %v2912_v58, 4  ;;  %v6492_v62 = vrot.slane %v1110_v20, 5  ;;  %v1116_v22 = vrot.slane %v1114_v21, 4  ;;  %v6504_v52 = vld [vmem:[#allocation2 + $0x28] sm:$0xf] }
  0x81   : > { %v6494_v44 = vrot.slane %v2922_v3, 4  ;;  %v6496_v45 = vrot.slane %v2925_v25, 5  ;;  %v512_v46 = vrot.slane %v6472_v43, 4  ;;  %v516_v34 = vrot.slane %v514_v35, 7  ;;  %v6506_v54 = vld [vmem:[#allocation2 + $0x2c] sm:$0x1] }
  0x82   : > { %1360 = vrot.lane.b32.xlu0 %v1089_v16, %s5987_s28  ;;  %v1099_v49 = vsel %vm6124_vm9, %v1094_v9, %v1098_v2  ;;  %v1107_v50 = vor.u32 %v1106_v26, %v1103_v15  ;;  %v2840_v55 = vld [vmem:[#allocation2 + $0x34] sm:$0xf]  ;;  %v5529_v56 = vpack.c.bf16 %v286_v12, %v286_v12  ;;  %v6508_v57 = vpack.c.bf16 %v287_v38, %v287_v38  ;;  %v865_v0 = vld [vmem:[#allocation2 + $0x90] sm:$0xf]  ;;  %v6524_v10 = vld [vmem:[#allocation2 + $0x4] sm:$0xf] }
  0x83   : > { %v519_v59 = vor.u32 %v517_v14, %v516_v34  ;;  %v521_v60 = vrot.slane %v516_v34, 4  ;;  %v2930_v61 = vshrl.u32 %v2839_v28, 16  ;;  %v2933_v36 = vshll.u32 %v2839_v28, 16  ;;  %v6521_v40 = vld [vmem:[#allocation2 + $0x50] sm:$0x1] }
  0x84   : > { %3267 = vrot.lane.b32.xlu1 %v2904_v31, %s5987_s28  ;;  %v2538_v4 = vsel %vm6430_vm13, %v5348_v7, %v2537_v24  ;;  %v6515_v5 = vsel %vm6430_vm13, %v2539_v41, %v2540_v32  ;;  %v2918_v6 = vsel %vm6124_vm9, %v6490_v19, %v6467_v63  ;;  %v1117_v8 = vor.u32 %v1116_v22, %v6492_v62  ;;  %v1471_v58 = vld [vmem:[#allocation2 + $0x8] sm:$0x1]  ;;  %v843_v63 = vld [vmem:[#allocation2 + $0xc] sm:$0xf]  ;;  %v866_v1 = vld [vmem:[#allocation2 + $0x94] sm:$0xf] }
  0x85   : > { %897 = vst.msk [vmem:[#allocation3 + $0x1e0] sm:$0xf] %vm216_vm0, %v865_v0  ;;  %v2928_v7 = vsel %vm6124_vm9, %v6494_v44, %v6496_v45  ;;  %v520_v43 = vsel %vm6110_vm7, %v512_v46, %v519_v59  ;;  %v2939_v13 = vshll.u32 %v2840_v55, 16  ;;  %v2943_v16 = vshrl.u32 %v2840_v55, 16  ;;  %875 = vst.msk [vmem:[#allocation3 + $0x28] sm:$0xf] %vm216_vm0, %v843_v63 }
  0x86   : > { %1828 = vrot.lane.b32.xlu0 %v1754_v39, %s5987_s28  ;;  %774 = vst.msk [vmem:[#allocation2 + $0x58] sm:$0xf] %vm216_vm0, %v520_v43  ;;  %v5349_v29 = vrot.slane %v6499_v47, 9  ;;  %v2544_v17 = vrot.slane %v6504_v52, 5  ;;  %v2547_v18 = vrot.slane %v6506_v54, 5  ;;  %v776_v21 = vsel %vm6177_vm10, %v521_v60, %v775_v48  ;;  %v288_v0 = vld [vmem:[%s6099_s25 + $0x80] sm:$0xff] }
  0x87   : > { %v926_v20 = vld [vmem:[#allocation2 + $0x54] sm:$0xf]  ;;  %898 = vst.msk [vmem:[#allocation3 + $0x1f4] sm:$0xf] %vm216_vm0, %v866_v1  ;;  %v1755_v23 = vld [vmem:[#allocation2 + $0x4c] sm:$0xf] }
  0x88   : > { %1362 = vrot.lane.b32.xlu1 %v1099_v49, %s5987_s28  ;;  %v1108_v2 = vrot.slane %v1107_v50, 4  ;;  %v2932_v24 = vrot.slane %v2930_v61, 4  ;;  %v2935_v3 = vrot.slane %v2933_v36, 5  ;;  %777 = vst [vmem:[#allocation2 + $0x5c] sm:$0x1] %v776_v21  ;;  %v523_v25 = vshrl.u32 %v5529_v56, 16 }
  0x89   : > { %v6543_v9 = vrot.slane %v1117_v8, 4  ;;  %v1120_v15 = vshll.u32 %v6521_v40, 16  ;;  %v2841_v26 = vld [vmem:[#allocation2 + $0x38] sm:$0x1]  ;;  %v526_v30 = vshll.u32 %v5529_v56, 16  ;;  %v1570_v31 = vrot.slane %v6524_v10, 5 }
  0x8a   : > { %2644 = vrot.lane.b32.xlu0 %v2538_v4, %s5987_s28  ;;  %v778_v12 = vld [vmem:[#allocation2 + $0x60] sm:$0xf]  ;;  %v6547_v32 = vrot.slane %v2939_v13, 5  ;;  %v2945_v35 = vrot.slane %v2943_v16, 4  ;;  %v1125_v14 = vshrl.u32 %v926_v20, 16  ;;  %v525_v28 = vrot.slane %v523_v25, 7 }
  0x8b   : > { %v1469_v38 = vld [vmem:[#allocation2] sm:$0xe]  ;;  %v1128_v39 = vshll.u32 %v926_v20, 16  ;;  %v1572_v41 = vrot.slane %v1570_v31, 4  ;;  %v1573_v19 = vrot.slane %v1471_v58, 5  ;;  %v531_v22 = vshrl.u32 %v6508_v57, 16 }
  0x8c   : > { %1830 = vrot.lane.b32.xlu1 %v1755_v23, %s5987_s28  ;;  %v867_v46 = vld [vmem:[#allocation2 + $0x9c] sm:$0xf]  ;;  %v1113_v34 = vsel %vm6124_vm9, %v1108_v2, %v6492_v62  ;;  %v2936_v48 = vor.u32 %v2935_v3, %v2932_v24  ;;  %v528_v49 = vor.u32 %v526_v30, %v525_v28  ;;  %v529_v50 = vrot.slane %v525_v28, 4  ;;  %v6555_v55 = vld [vmem:[#allocation2 + $0x94] sm:$0xf]  ;;  %v289_v2 = vld [vmem:[%s6099_s25 + $0x88] sm:$0xff] }
  0x8d   : > { %899 = vst.msk [vmem:[#allocation3 + $0x208] sm:$0xf] %vm216_vm0, %v867_v46  ;;  %v844_v56 = vld [vmem:[#allocation2 + $0x10] sm:$0xf]  ;;  %v1574_v59 = vsel %vm6430_vm13, %v1572_v41, %v1573_v19  ;;  %v6560_v60 = vrot.slane %v531_v22, 7  ;;  %v534_v61 = vshll.u32 %v6508_v57, 16  ;;  %v2946_v4 = vor.u32 %v2945_v35, %v6547_v32 }
  0x8e   : > { %3269 = vrot.lane.b32.xlu0 %v2918_v6, %s5987_s28  ;;  %v5331_v36 = vrot.slane %v1469_v38, 9  ;;  %876 = vst.msk [vmem:[#allocation3 + $0x3c] sm:$0xf] %vm216_vm0, %v844_v56  ;;  %v845_v62 = vld [vmem:[#allocation2 + $0x18] sm:$0xf]  ;;  %v2949_v6 = vshll.u32 %v2841_v26, 16  ;;  %v779_v10 = vsel %vm6118_vm8, %v528_v49, %v778_v12  ;;  %v6587_v30 = vpack.c.bf16 %v288_v0, %v288_v0 }
  0x8f   : > { %v927_v40 = vld [vmem:[#allocation2 + $0x58] sm:$0xf]  ;;  %v6566_v8 = vrot.slane %v1125_v14, 4  ;;  %1713 = vst.msk [vmem:[#allocation3 + $0x18] sm:$0xf] %vm216_vm0, %v1574_v59  ;;  %v1130_v57 = vrot.slane %v1128_v39, 5  ;;  %v536_v58 = vor.u32 %v534_v61, %v6560_v60  ;;  %v6606_v22 = vpack.c.bf16 %v289_v2, %v289_v2 }
  0x90   : > { %v1507_v43 = vld [vmem:[#allocation2 + $0x98] sm:$0x1]  ;;  %877 = vst.msk [vmem:[#allocation3 + $0x50] sm:$0xf] %vm216_vm0, %v845_v62  ;;  %2646 = vrot.lane.b32.xlu1 %v6515_v5, %s5987_s28  ;;  %v1134_v13 = vshll.u32 %v927_v40, 16  ;;  %v1138_v16 = vshrl.u32 %v927_v40, 16  ;;  %v1571_v21 = vsel %vm6430_vm13, %v5331_v36, %v1570_v31  ;;  %v2545_v44 = vsel %vm6430_vm13, %v5349_v29, %v2544_v17 }
  0x91   : > { %780 = vst [vmem:[#allocation2 + $0x60] sm:$0xf] %v779_v10  ;;  %v1505_v63 = vld [vmem:[#allocation2 + $0x90] sm:$0xe]  ;;  %v1122_v1 = vrot.slane %v1120_v15, 5  ;;  %v2546_v20 = vrot.slane %v2544_v17, 4  ;;  %v537_v25 = vsel %vm6110_vm7, %v529_v50, %v536_v58  ;;  %v1131_v38 = vor.u32 %v1130_v57, %v6566_v8 }
  0x92   : > { %1364 = vrot.lane.b32.xlu0 %v1113_v34, %s5987_s28  ;;  %v1654_v23 = vrot.slane %v6555_v55, 5  ;;  %v868_v5 = vld [vmem:[#allocation2 + $0xa0] sm:$0xf]  ;;  %v1756_v24 = vld [vmem:[#allocation2 + $0x54] sm:$0xf]  ;;  %v6582_v3 = vrot.slane %v2936_v48, 4 }
  0x93   : > { %1712 = vst.msk [vmem:[#allocation3 + $0x4] sm:$0xf] %vm216_vm0, %v1571_v21  ;;  %v1657_v26 = vrot.slane %v1507_v43, 5  ;;  %v2842_v15 = vld [vmem:[#allocation2 + $0x3c] sm:$0xf]  ;;  %v6590_v12 = vrot.slane %v2946_v4, 4  ;;  %v1123_v48 = vsel %vm6124_vm9, %v6543_v9, %v1122_v1  ;;  %v6622_v45 = vsel %vm6430_vm13, %v2546_v20, %v2547_v18 }
  0x94   : > { %900 = vst.msk [vmem:[#allocation3 + $0x21c] sm:$0xf] %vm216_vm0, %v868_v5  ;;  %v6592_v31 = vrot.slane %v2949_v6, 5  ;;  %v6594_v35 = vrot.slane %v1134_v13, 5  ;;  %v928_v14 = vld [vmem:[#allocation2 + $0x5c] sm:$0x1]  ;;  %3271 = vrot.lane.b32.xlu1 %v2928_v7, %s5987_s28  ;;  %v2942_v18 = vsel %vm6124_vm9, %v6582_v3, %v6547_v32 }
  0x95   : > { %781 = vst.msk [vmem:[#allocation2 + $0x64] sm:$0xf] %vm216_vm0, %v537_v25  ;;  %v1656_v28 = vrot.slane %v1654_v23, 4  ;;  %v1140_v39 = vrot.slane %v1138_v16, 4  ;;  %v6604_v41 = vld [vmem:[#allocation2 + $0x30] sm:$0xe] }
  0x96   : > { %v5343_v19 = vrot.slane %v1505_v63, 9  ;;  %v869_v46 = vld [vmem:[#allocation2 + $0xa8] sm:$0xf]  ;;  %v846_v34 = vld [vmem:[#allocation2 + $0x1c] sm:$0xf]  ;;  %1832 = vrot.lane.b32.xlu0 %v1756_v24, %s5987_s28  ;;  %v538_v47 = vrot.slane %v6560_v60, 4  ;;  %v2952_v55 = vsel %vm6124_vm9, %v6590_v12, %v6592_v31 }
  0x97   : > { %v1658_v7 = vsel %vm6430_vm13, %v1656_v28, %v1657_v26  ;;  %v6626_v49 = vld [vmem:[#allocation2 + $0x40] sm:$0xf]  ;;  %v1474_v9 = vld [vmem:[#allocation2 + $0x14] sm:$0x1]  ;;  %v1473_v50 = vld [vmem:[#allocation2 + $0x10] sm:$0xf]  ;;  %v1141_v36 = vor.u32 %v1140_v39, %v6594_v35 }
  0x98   : > { %901 = vst.msk [vmem:[#allocation3 + $0x230] sm:$0xf] %vm216_vm0, %v869_v46  ;;  %878 = vst.msk [vmem:[#allocation3 + $0x64] sm:$0xf] %vm216_vm0, %v846_v34  ;;  %v1655_v52 = vsel %vm6430_vm13, %v5343_v19, %v1654_v23  ;;  %v2954_v54 = vshrl.u32 %v2842_v15, 16  ;;  %v2957_v29 = vshll.u32 %v2842_v15, 16  ;;  %1366 = vrot.lane.b32.xlu1 %v1123_v48, %s5987_s28 }
  0x99   : > { %1737 = vst.msk [vmem:[#allocation3 + $0x1f8] sm:$0xf] %vm216_vm0, %v1658_v7  ;;  %v1472_v17 = vld [vmem:[#allocation2 + $0xc] sm:$0xe]  ;;  %vm1436_vm14 = vcmask 1043968   ;;  %v1144_v56 = vshll.u32 %v928_v14, 16 }
  0x9a   : > { %v6642_v59 = vld [vmem:[#allocation2 + $0x34] sm:$0xf]  ;;  %1736 = vst.msk [vmem:[#allocation3 + $0x1e4] sm:$0xf] %vm216_vm0, %v1655_v52  ;;  %v782_v60 = vld [vmem:[#allocation2 + $0x68] sm:$0x1]  ;;  %2648 = vrot.lane.b32.xlu0 %v2545_v44, %s5987_s28 }
  0x9b   : > { %v1132_v61 = vrot.slane %v1131_v38, 4  ;;  %v1580_v0 = vrot.slane %v1474_v9, 5  ;;  %v1577_v62 = vrot.slane %v1473_v50, 5  ;;  %v929_v32 = vld [vmem:[#allocation2 + $0x60] sm:$0xf]  ;;  %v6650_v40 = vld [vmem:[%s8247_s1 + $0x118] sm:$0xff]   ;;  %v783_v21 = vsel %vm6177_vm10, %v538_v47, %v782_v60 }
  0x9c   : > { %v1509_v4 = vld [vmem:[#allocation2 + $0xa0] sm:$0xf]  ;;  %v1510_v6 = vld [vmem:[#allocation2 + $0xa4] sm:$0x1]  ;;  %v1757_v8 = vld [vmem:[#allocation2 + $0x58] sm:$0xf]  ;;  %5791 = vmatprep.subr.bf16.mxu0 %v6650_v40 }
  0x9d   : > { %v5350_v10 = vrot.slane %v6604_v41, 9  ;;  %v2963_v43 = vshll.u32 %v6626_v49, 16  ;;  %v2967_v57 = vshrl.u32 %v6626_v49, 16  ;;  %v5332_v13 = vrot.slane %v1472_v17, 9  ;;  %v1508_v16 = vld [vmem:[#allocation2 + $0x9c] sm:$0xe]  ;;  %1834 = vrot.lane.b32.xlu1 %v1757_v8, %s5987_s28  ;;  %v1341_v25 = vpop.permute.xlu0 %1340 }
  0x9e   : > { %v6656_v58 = vrot.slane %v2954_v54, 4  ;;  %v6658_v63 = vrot.slane %v2957_v29, 5  ;;  %v1579_v1 = vrot.slane %v1577_v62, 4  ;;  %v930_v20 = vld [vmem:[#allocation2 + $0x64] sm:$0xf]  ;;  %v6663_v23 = vrot.slane %v1144_v56, 5  ;;  %3273 = vrot.lane.b32.xlu0 %v2942_v18, %s5987_s28 }
  0x9f   : > { %v2551_v2 = vrot.slane %v6642_v59, 5  ;;  %v1578_v5 = vsel %vm6430_vm13, %v5332_v13, %v1577_v62  ;;  %v1149_v24 = vshrl.u32 %v929_v32, 16  ;;  %784 = vst [vmem:[#allocation2 + $0x68] sm:$0x1] %v783_v21  ;;  %v870_v3 = vld [vmem:[#allocation2 + $0xac] sm:$0xf]  ;;  %v1137_v26 = vsel %vm6124_vm9, %v1132_v61, %v6594_v35 }
  0xa0   : > { %v6672_v15 = vrot.slane %v1141_v36, 4  ;;  %v1581_v14 = vsel %vm6430_vm13, %v1579_v1, %v1580_v0  ;;  %1714 = vst.msk [vmem:[#allocation3 + $0x2c] sm:$0xf] %vm216_vm0, %v1578_v5  ;;  %v1152_v28 = vshll.u32 %v929_v32, 16  ;;  %902 = vst.msk [vmem:[#allocation3 + $0x244] sm:$0xf] %vm216_vm0, %v870_v3  ;;  %v2960_v46 = vor.u32 %v6658_v63, %v6656_v58 }
  0xa1   : > { %1437 = vst.msk [vmem:[#allocation3] sm:$0xf] %vm1436_vm14, %v1341_v25  ;;  %v1158_v38 = vshll.u32 %v930_v20, 16  ;;  %v1162_v39 = vshrl.u32 %v930_v20, 16  ;;  %v1661_v19 = vrot.slane %v1509_v4, 5  ;;  %v1664_v35 = vrot.slane %v1510_v6, 5  ;;  %2650 = vrot.lane.b32.xlu1 %v6622_v45, %s5987_s28  ;;  %v1343_v52 = vpop.permute.xlu0 %1342 }
  0xa2   : > { %1715 = vst.msk [vmem:[#allocation3 + $0x40] sm:$0xf] %vm216_vm0, %v1581_v14  ;;  %v6683_v34 = vrot.slane %v2963_v43, 5  ;;  %v2969_v48 = vrot.slane %v2967_v57, 4  ;;  %v5344_v44 = vrot.slane %v1508_v16, 9  ;;  %v6685_v49 = vrot.slane %v1149_v24, 4  ;;  %1368 = vrot.lane.b32.xlu0 %v1137_v26, %s5987_s28 }
  0xa3   : > { %v2844_v7 = vld [vmem:[#allocation2 + $0x44] sm:$0x1]  ;;  %v1663_v9 = vrot.slane %v1661_v19, 4  ;;  %v540_v50 = vshrl.u32 %v6587_v30, 16  ;;  %v543_v47 = vshll.u32 %v6587_v30, 16  ;;  %v6691_v54 = vrot.slane %v1152_v28, 5  ;;  %v1811_v32 = vpop.permute.xlu1 %1810 }
  0xa4   : > { %v1662_v29 = vsel %vm6430_vm13, %v5344_v44, %v1661_v19  ;;  %v548_v17 = vshrl.u32 %v6606_v22, 16  ;;  %v551_v18 = vshll.u32 %v6606_v22, 16  ;;  %1438 = vst.msk [vmem:[#allocation3 + $0x14] sm:$0xf] %vm1436_vm14, %v1343_v52  ;;  %v6699_v56 = vrot.slane %v1158_v38, 5  ;;  %v290_v13 = vld [vmem:[%s6099_s25 + $0x90] sm:$0xff] }
  0xa5   : > { %v1665_v30 = vsel %vm6430_vm13, %v1663_v9, %v1664_v35  ;;  %v6703_v45 = vrot.slane %v1162_v39, 4  ;;  %1738 = vst.msk [vmem:[#allocation3 + $0x20c] sm:$0xf] %vm216_vm0, %v1662_v29  ;;  %v542_v60 = vrot.slane %v540_v50, 7  ;;  %v847_v61 = vld [vmem:[#allocation2 + $0x24] sm:$0xf]  ;;  %v2970_v6 = vor.u32 %v2969_v48, %v6683_v34  ;;  %3275 = vrot.lane.b32.xlu1 %v2952_v55, %s5987_s28  ;;  %v1809_v58 = vpop.permute.xlu0 %1808 }
  0xa6   : > { %v1758_v36 = vld [vmem:[#allocation2 + $0x60] sm:$0xf]  ;;  %v2973_v0 = vshll.u32 %v2844_v7, 16  ;;  %1739 = vst.msk [vmem:[#allocation3 + $0x220] sm:$0xf] %vm216_vm0, %v1665_v30  ;;  %v550_v62 = vrot.slane %v548_v17, 7  ;;  %v1155_v1 = vor.u32 %v6691_v54, %v6685_v49  ;;  %v1147_v3 = vsel %vm6124_vm9, %v6672_v15, %v6663_v23 }
  0xa7   : > { %v785_v22 = vld [vmem:[#allocation2 + $0x6c] sm:$0xf]  ;;  %879 = vst.msk [vmem:[#allocation3 + $0x78] sm:$0xf] %vm216_vm0, %v847_v61  ;;  %v6708_v4 = vld [vmem:[#allocation2 + $0x38] sm:$0x1]  ;;  %v545_v8 = vor.u32 %v543_v47, %v542_v60  ;;  %1836 = vrot.lane.b32.xlu0 %v1758_v36, %s5987_s28  ;;  %v2552_v12 = vsel %vm6430_vm13, %v5350_v10, %v2551_v2  ;;  %v1165_v31 = vor.u32 %v6703_v45, %v6699_v56 }
  0xa8   : > { %v546_v43 = vrot.slane %v542_v60, 4  ;;  %v2845_v57 = vld [vmem:[#allocation2 + $0x48] sm:$0xf]  ;;  %v291_v16 = vld [vmem:[%s6099_s25 + $0x98] sm:$0xff]  ;;  %1905 = vst.msk [vmem:[#allocation3 + $0x18] sm:$0xf] %vm1436_vm14, %v1811_v32  ;;  %v553_v20 = vor.u32 %v551_v18, %v550_v62  ;;  %v5533_v49 = vpack.c.bf16 %v290_v13, %v290_v13 }
  0xa9   : > { %v6720_v63 = vrot.slane %v2960_v46, 4  ;;  %v555_v21 = vrot.slane %v550_v62, 4  ;;  %v789_v5 = vld [vmem:[#allocation2 + $0x74] sm:$0x1]  ;;  %1904 = vst.msk [vmem:[#allocation3 + $0x4] sm:$0xf] %vm1436_vm14, %v1809_v58  ;;  %v786_v55 = vsel %vm6118_vm8, %v545_v8, %v785_v22  ;;  %1370 = vrot.lane.b32.xlu1 %v1147_v3, %s5987_s28  ;;  %v1857_v46 = vpop.permute.xlu0 %1856  ;;  %v5534_v9 = vpack.c.bf16 %v291_v16, %v291_v16 }
  0xaa   : > { %v871_v24 = vld [vmem:[#allocation2 + $0xb4] sm:$0xf]  ;;  %v6740_v25 = vld [vmem:[#allocation2 + $0x3c] sm:$0xe]  ;;  %v6742_v23 = vld [vmem:[#allocation2 + $0x40] sm:$0xf]  ;;  %v554_v10 = vsel %vm6110_vm7, %v546_v43, %v553_v20 }
  0xab   : > { %903 = vst.msk [vmem:[#allocation3 + $0x258] sm:$0xf] %vm216_vm0, %v871_v24  ;;  %v848_v26 = vld [vmem:[#allocation2 + $0x28] sm:$0xf]  ;;  %v2553_v15 = vrot.slane %v2551_v2, 4  ;;  %v2554_v41 = vrot.slane %v6708_v4, 5  ;;  %v790_v59 = vsel %vm6177_vm10, %v555_v21, %v789_v5  ;;  %v1859_v2 = vpop.permute.xlu1 %1858  ;;  %v2966_v48 = vsel %vm6124_vm9, %v6720_v63, %v6683_v34  ;;  %2652 = vrot.lane.b32.xlu0 %v2552_v12, %s5987_s28 }
  0xac   : > { %v6748_v14 = vrot.slane %v2973_v0, 5  ;;  %787 = vst [vmem:[#allocation2 + $0x6c] sm:$0xf] %v786_v55  ;;  %v2846_v28 = vld [vmem:[#allocation2 + $0x4c] sm:$0xf]  ;;  %v6753_v38 = vrot.slane %v2970_v6, 4 }
  0xad   : > { %880 = vst.msk [vmem:[#allocation3 + $0x8c] sm:$0xf] %vm216_vm0, %v848_v26  ;;  %v931_v39 = vld [vmem:[#allocation2 + $0x68] sm:$0x1]  ;;  %788 = vst.msk [vmem:[#allocation2 + $0x70] sm:$0xf] %vm216_vm0, %v554_v10  ;;  %v2555_v32 = vsel %vm6430_vm13, %v2553_v15, %v2554_v41  ;;  %v1813_v16 = vpop.permute.xlu0 %1812 }
  0xae   : > { %v2978_v19 = vshrl.u32 %v2845_v57, 16  ;;  %v2981_v35 = vshll.u32 %v2845_v57, 16  ;;  %v6763_v44 = vrot.slane %v1155_v1, 4  ;;  %v6765_v7 = vld [vmem:[#allocation2 + $0x44] sm:$0x1]  ;;  %v6770_v52 = vrot.slane %v1165_v31, 4 }
  0xaf   : > { %791 = vst [vmem:[#allocation2 + $0x74] sm:$0x1] %v790_v59  ;;  %v872_v50 = vld [vmem:[#allocation2 + $0xb8] sm:$0xf]  ;;  %v1759_v47 = vld [vmem:[#allocation2 + $0x64] sm:$0xf]  ;;  %3277 = vrot.lane.b32.xlu0 %v2966_v48, %s5987_s28  ;;  %v1815_v13 = vpop.permute.xlu1 %1814  ;;  %v2976_v59 = vsel %vm6124_vm9, %v6753_v38, %v6748_v14 }
  0xb0   : > { %1929 = vst.msk [vmem:[#allocation3 + $0x1f8] sm:$0xf] %vm1436_vm14, %v1859_v2  ;;  %1928 = vst.msk [vmem:[#allocation3 + $0x1e4] sm:$0xf] %vm1436_vm14, %v1857_v46  ;;  %v5351_v54 = vrot.slane %v6740_v25, 9  ;;  %v2987_v34 = vshll.u32 %v2846_v28, 16  ;;  %1838 = vrot.lane.b32.xlu1 %v1759_v47, %s5987_s28  ;;  %v1161_v4 = vsel %vm6124_vm9, %v6763_v44, %v6699_v56 }
  0xb1   : > { %v2991_v29 = vshrl.u32 %v2846_v28, 16  ;;  %904 = vst.msk [vmem:[#allocation3 + $0x26c] sm:$0xf] %vm216_vm0, %v872_v50  ;;  %v1168_v17 = vshll.u32 %v931_v39, 16  ;;  %v2558_v18 = vrot.slane %v6742_v23, 5  ;;  %v557_v45 = vshrl.u32 %v5533_v49, 16  ;;  %v1861_v46 = vpop.permute.xlu0 %1860 }
  0xb2   : > { %v6775_v30 = vld [vmem:[#allocation2 + $0x50] sm:$0x1]  ;;  %v565_v60 = vshrl.u32 %v5534_v9, 16  ;;  %v2561_v61 = vrot.slane %v6765_v7, 5  ;;  %v6778_v36 = vrot.slane %v2978_v19, 4  ;;  %v6780_v0 = vrot.slane %v2981_v35, 5 }
  0xb3   : > { %v560_v22 = vshll.u32 %v5533_v49, 16  ;;  %v6782_v62 = vld [vmem:[#allocation2 + $0x18] sm:$0xe]  ;;  %v5875_v8 = vld [vmem:[#allocation3 + $0x4] ss:$20 sps:$4 sm:$0xff]   ;;  %v568_v57 = vshll.u32 %v5534_v9, 16  ;;  %1372 = vrot.lane.b32.xlu0 %v1161_v4, %s5987_s28  ;;  %v1863_v2 = vpop.permute.xlu1 %1862  ;;  %v2559_v14 = vsel %vm6430_vm13, %v5351_v54, %v2558_v18 }
  0xb4   : > { %v5873_v6 = vld [vmem:[#allocation3] ss:$20 sps:$4 sm:$0xff]   ;;  %v6792_v58 = vrot.slane %v2987_v34, 5  ;;  %v2993_v63 = vrot.slane %v2991_v29, 4  ;;  %v559_v20 = vrot.slane %v557_v45, 7  ;;  %v6794_v21 = vrot.slane %v565_v60, 7  ;;  %4530 = vmatprep.mubr.bf16.mxu0 %v5875_v8  ;;  %2654 = vrot.lane.b32.xlu1 %v2555_v32, %s5987_s28 }
  0xb5   : > { %v792_v43 = vld [vmem:[#allocation2 + $0x78] sm:$0xf]  ;;  %v932_v1 = vld [vmem:[#allocation2 + $0x6c] sm:$0xf]  ;;  %1907 = vst.msk [vmem:[#allocation3 + $0x40] sm:$0xf] %vm1436_vm14, %v1815_v13  ;;  %4531 = vmatmul.mubr.bf16.vlgmr.msra.gmra.mxu0 %v5873_v6  ;;  %v2984_v31 = vor.u32 %v6780_v0, %v6778_v36 }
  0xb6   : > { %1906 = vst.msk [vmem:[#allocation3 + $0x2c] sm:$0xf] %vm1436_vm14, %v1813_v16  ;;  %v6798_v56 = vrot.slane %v1168_v17, 5  ;;  %v2560_v5 = vrot.slane %v2558_v18, 4  ;;  %v933_v24 = vld [vmem:[#allocation2 + $0x70] sm:$0xf]  ;;  %v562_v23 = vor.u32 %v560_v22, %v559_v20  ;;  %v570_v28 = vor.u32 %v568_v57, %v6794_v21  ;;  %5792 = vmatpush3.bf16.msra.mxu0 %v6650_v40 }
  0xb7   : > { %v1173_v3 = vshrl.u32 %v932_v1, 16  ;;  %v1176_v12 = vshll.u32 %v932_v1, 16  ;;  %v2997_v55 = vshll.u32 %v6775_v30, 16  ;;  %v563_v26 = vrot.slane %v559_v20, 4  ;;  %v1476_v15 = vld [vmem:[#allocation2 + $0x1c] sm:$0xf] }
  0xb8   : > { %v5333_v39 = vrot.slane %v6782_v62, 9  ;;  %v2848_v19 = vld [vmem:[#allocation2 + $0x54] sm:$0xf]  ;;  %v1760_v48 = vld [vmem:[#allocation2 + $0x6c] sm:$0xf]  ;;  %v2994_v44 = vor.u32 %v2993_v63, %v6792_v58  ;;  %v1182_v49 = vshll.u32 %v933_v24, 16  ;;  %v793_v40 = vsel %vm6118_vm8, %v562_v23, %v792_v43  ;;  %3279 = vrot.lane.b32.xlu1 %v2976_v59, %s5987_s28 }
  0xb9   : > { %v1175_v41 = vrot.slane %v1173_v3, 4  ;;  %v1178_v10 = vrot.slane %v1176_v12, 5  ;;  %v5925_v35 = vld [vmem:[%s8247_s1 + $0x110] sm:$0xff]   ;;  %v6818_v9 = vld [vmem:[#allocation2 + $0x58] sm:$0xf]  ;;  %v1186_v38 = vshrl.u32 %v933_v24, 16  ;;  %v571_v34 = vsel %vm6110_vm7, %v563_v26, %v570_v28  ;;  %1840 = vrot.lane.b32.xlu0 %v1760_v48, %s5987_s28 }
  0xba   : > { %v1511_v50 = vld [vmem:[#allocation2 + $0xa8] sm:$0xe]  ;;  %1931 = vst.msk [vmem:[#allocation3 + $0x220] sm:$0xf] %vm1436_vm14, %v1863_v2  ;;  %1930 = vst.msk [vmem:[#allocation3 + $0x20c] sm:$0xf] %vm1436_vm14, %v1861_v46  ;;  %5793 = vmatprep.subr.bf16.mxu0 %v5925_v35  ;;  %v1171_v17 = vsel %vm6124_vm9, %v6770_v52, %v6798_v56  ;;  %v6838_v25 = vsel %vm6430_vm13, %v2560_v5, %v2561_v61  ;;  %v1345_v61 = vpop.permute.xlu0 %1344 }
  0xbb   : > { %v6826_v47 = vld [vmem:[#allocation2 + $0x74] sm:$0x1]  ;;  %794 = vst [vmem:[#allocation2 + $0x78] sm:$0xf] %v793_v40  ;;  %v1584_v29 = vrot.slane %v1476_v15, 5  ;;  %v6840_v54 = vrot.slane %v2997_v55, 5  ;;  %v1179_v36 = vor.u32 %v1178_v10, %v1175_v41  ;;  %5794 = vmatpush3.bf16.msra.mxu0 %v5925_v35 }
  0xbc   : > { %795 = vst.msk [vmem:[#allocation2 + $0x7c] sm:$0xf] %vm216_vm0, %v571_v34  ;;  %v3002_v18 = vshrl.u32 %v2848_v19, 16  ;;  %v1512_v30 = vld [vmem:[#allocation2 + $0xac] sm:$0xf]  ;;  %v292_v45 = vld [vmem:[%s6099_s25 + $0xa0] sm:$0xff]  ;;  %1374 = vrot.lane.b32.xlu1 %v1171_v17, %s5987_s28 }
  0xbd   : > { %v6845_v60 = vrot.slane %v2984_v31, 4  ;;  %v1585_v7 = vsel %vm6430_vm13, %v5333_v39, %v1584_v29  ;;  %v3005_v52 = vshll.u32 %v2848_v19, 16  ;;  %v1477_v0 = vld [vmem:[#allocation2 + $0x20] sm:$0x1]  ;;  %v6850_v22 = vrot.slane %v2994_v44, 4  ;;  %v293_v57 = vld [vmem:[%s6099_s25 + $0xa8] sm:$0xff]  ;;  %2656 = vrot.lane.b32.xlu0 %v2559_v14, %s5987_s28  ;;  %v1389_v39 = vpop.permute.xlu1 %1388 }
  0xbe   : > { %v6852_v62 = vrot.slane %v1182_v49, 5  ;;  %v1192_v32 = vshll.u32 %v6826_v47, 16  ;;  %v572_v4 = vrot.slane %v6794_v21, 4  ;;  %v6856_v6 = vld [vmem:[#allocation2 + $0x48] sm:$0xe]  ;;  %v6863_v13 = vrot.slane %v1186_v38, 4  ;;  %v1393_v26 = vpop.permute.xlu0 %1392 }
  0xbf   : > { %v6858_v8 = vld [vmem:[#allocation2 + $0x4c] sm:$0xf]  ;;  %1716 = vst.msk [vmem:[#allocation3 + $0x54] sm:$0xf] %vm216_vm0, %v1585_v7  ;;  %v1513_v43 = vld [vmem:[#allocation2 + $0xb0] sm:$0x1]  ;;  %v5535_v55 = vpack.c.bf16 %v292_v45, %v292_v45  ;;  %v2990_v19 = vsel %vm6124_vm9, %v6845_v60, %v6792_v58  ;;  %v5536_v48 = vpack.c.bf16 %v293_v57, %v293_v57  ;;  %v3000_v14 = vsel %vm6124_vm9, %v6850_v22, %v6840_v54 }
  0xc0   : > { %1439 = vst.msk [vmem:[#allocation3 + $0x28] sm:$0xf] %vm1436_vm14, %v1345_v61  ;;  %v6865_v16 = vrot.slane %v3002_v18, 4  ;;  %v3011_v63 = vshll.u32 %v6818_v9, 16  ;;  %v5345_v1 = vrot.slane %v1511_v50, 9  ;;  %v3007_v56 = vrot.slane %v3005_v52, 5 }
  0xc1   : > { %v796_v20 = vld [vmem:[#allocation2 + $0x80] sm:$0x1]  ;;  %v1668_v21 = vrot.slane %v1512_v30, 5  ;;  %v1586_v5 = vrot.slane %v1584_v29, 4  ;;  %v1587_v24 = vrot.slane %v1477_v0, 5  ;;  %v6869_v3 = vrot.slane %v1179_v36, 4  ;;  %3281 = vrot.lane.b32.xlu0 %v2990_v19, %s5987_s28  ;;  %v1391_v36 = vpop.permute.xlu1 %1390 }
  0xc2   : > { %v3015_v12 = vshrl.u32 %v6818_v9, 16  ;;  %v1671_v31 = vrot.slane %v1513_v43, 5  ;;  %v1761_v23 = vld [vmem:[#allocation2 + $0x70] sm:$0xf]  ;;  %v797_v28 = vsel %vm6177_vm10, %v572_v4, %v796_v20  ;;  %1463 = vst.msk [vmem:[#allocation3 + $0x208] sm:$0xf] %vm1436_vm14, %v1393_v26  ;;  %v1189_v44 = vor.u32 %v6863_v13, %v6852_v62  ;;  %v1349_v17 = vpop.permute.xlu0 %1348 }
  0xc3   : > { %v1669_v15 = vsel %vm6430_vm13, %v5345_v1, %v1668_v21  ;;  %v1588_v41 = vsel %vm6430_vm13, %v1586_v5, %v1587_v24  ;;  %v1670_v10 = vrot.slane %v1668_v21, 4  ;;  %v5352_v35 = vrot.slane %v6856_v6, 9  ;;  %v935_v2 = vld [vmem:[#allocation2 + $0x78] sm:$0xf]  ;;  %v936_v46 = vld [vmem:[#allocation2 + $0x7c] sm:$0xf]  ;;  %1842 = vrot.lane.b32.xlu1 %v1761_v23, %s5987_s28 }
  0xc4   : > { %v2565_v59 = vrot.slane %v6858_v8, 5  ;;  %1740 = vst.msk [vmem:[#allocation3 + $0x234] sm:$0xf] %vm216_vm0, %v1669_v15  ;;  %1717 = vst.msk [vmem:[#allocation3 + $0x68] sm:$0xf] %vm216_vm0, %v1588_v41  ;;  %v6891_v58 = vrot.slane %v1192_v32, 5  ;;  %v3008_v49 = vor.u32 %v3007_v56, %v6865_v16  ;;  %v1185_v29 = vsel %vm6124_vm9, %v6869_v3, %v6852_v62 }
  0xc5   : > { %798 = vst [vmem:[#allocation2 + $0x80] sm:$0x1] %v797_v28  ;;  %1461 = vst.msk [vmem:[#allocation3 + $0x1e0] sm:$0xf] %vm1436_vm14, %v1389_v39  ;;  %v6894_v40 = vrot.slane %v3011_v63, 5  ;;  %v6903_v38 = vrot.slane %v3015_v12, 4  ;;  %v1672_v47 = vsel %vm6430_vm13, %v1670_v10, %v1671_v31  ;;  %1376 = vrot.lane.b32.xlu0 %v1185_v29, %s5987_s28 }
  0xc6   : > { %v6896_v9 = vld [vmem:[#allocation2 + $0x5c] sm:$0x1]  ;;  %v849_v50 = vld [vmem:[#allocation2 + $0x30] sm:$0xf]  ;;  %v574_v34 = vshrl.u32 %v5535_v55, 16  ;;  %v1197_v18 = vshrl.u32 %v935_v2, 16  ;;  %v1397_v24 = vpop.permute.xlu0 %1396  ;;  %v2566_v19 = vsel %vm6430_vm13, %v5352_v35, %v2565_v59 }
  0xc7   : > { %881 = vst.msk [vmem:[#allocation3 + $0xa0] sm:$0xf] %vm216_vm0, %v849_v50  ;;  %v1200_v30 = vshll.u32 %v935_v2, 16  ;;  %v1206_v45 = vshll.u32 %v936_v46, 16  ;;  %1741 = vst.msk [vmem:[#allocation3 + $0x248] sm:$0xf] %vm216_vm0, %v1672_v47  ;;  %2658 = vrot.lane.b32.xlu1 %v6838_v25, %s5987_s28  ;;  %v3018_v16 = vor.u32 %v6903_v38, %v6894_v40 }
  0xc8   : > { %v799_v54 = vld [vmem:[#allocation2 + $0x84] sm:$0xf]  ;;  %1441 = vst.msk [vmem:[#allocation3 + $0x50] sm:$0xf] %vm1436_vm14, %v1349_v17  ;;  %v6915_v7 = vld [vmem:[#allocation2 + $0x50] sm:$0x1] }
  0xc9   : > { %v1478_v60 = vld [vmem:[#allocation2 + $0x24] sm:$0xe]  ;;  %v1210_v52 = vshrl.u32 %v936_v46, 16  ;;  %v576_v0 = vrot.slane %v574_v34, 7  ;;  %v577_v61 = vshll.u32 %v5535_v55, 16  ;;  %v582_v22 = vshrl.u32 %v5536_v48, 16  ;;  %v1347_v55 = vpop.permute.xlu1 %1346 }
  0xca   : > { %v6917_v32 = vld [vmem:[#allocation2 + $0x28] sm:$0xf]  ;;  %1462 = vst.msk [vmem:[#allocation3 + $0x1f4] sm:$0xf] %vm1436_vm14, %v1391_v36  ;;  %v6920_v62 = vrot.slane %v1189_v44, 4  ;;  %v6922_v4 = vrot.slane %v3008_v49, 4 }
  0xcb   : > { %v3021_v43 = vshll.u32 %v6896_v9, 16  ;;  %v585_v57 = vshll.u32 %v5536_v48, 16  ;;  %v850_v13 = vld [vmem:[#allocation2 + $0x34] sm:$0xf]  ;;  %v579_v63 = vor.u32 %v577_v61, %v576_v0  ;;  %v580_v1 = vrot.slane %v576_v0, 4  ;;  %3283 = vrot.lane.b32.xlu1 %v3000_v14, %s5987_s28  ;;  %v5888_v9 = vld [vmem:[%s8247_s1 + $0xb8] sm:$0xff]  }
  0xcc   : > { %v584_v20 = vrot.slane %v582_v22, 7  ;;  %v6929_v56 = vld [vmem:[#allocation2 + $0x54] sm:$0xe]  ;;  %v6931_v21 = vld [vmem:[#allocation2 + $0x60] sm:$0xf]  ;;  %v6935_v3 = vrot.slane %v1197_v18, 4  ;;  %v1195_v6 = vsel %vm6124_vm9, %v6920_v62, %v6891_v58 }
  0xcd   : > { %882 = vst.msk [vmem:[#allocation3 + $0xb4] sm:$0xf] %vm216_vm0, %v850_v13  ;;  %v1762_v5 = vld [vmem:[#allocation2 + $0x78] sm:$0xf]  ;;  %v6937_v12 = vrot.slane %v1200_v30, 5  ;;  %v6939_v25 = vrot.slane %v1206_v45, 5  ;;  %v800_v26 = vsel %vm6118_vm8, %v579_v63, %v799_v54  ;;  %v1395_v29 = vpop.permute.xlu1 %1394  ;;  %v3014_v30 = vsel %vm6124_vm9, %v6922_v4, %v6894_v40  ;;  %v1817_v63 = vpop.permute.xlu0 %1816 }
  0xce   : > { %v5334_v31 = vrot.slane %v1478_v60, 9  ;;  %1465 = vst.msk [vmem:[#allocation3 + $0x230] sm:$0xf] %vm1436_vm14, %v1397_v24  ;;  %v6942_v23 = vrot.slane %v1210_v52, 4  ;;  %v587_v15 = vor.u32 %v585_v57, %v584_v20  ;;  %v589_v41 = vrot.slane %v584_v20, 4  ;;  %1844 = vrot.lane.b32.xlu0 %v1762_v5, %s5987_s28  ;;  %v5889_v34 = vld [vmem:[%s8247_s1 + $0xf0] sm:$0xff]  }
  0xcf   : > { %v6946_v10 = vld [vmem:[#allocation2 + $0x64] sm:$0xf]  ;;  %v1514_v28 = vld [vmem:[#allocation2 + $0xb4] sm:$0xe]  ;;  %v1515_v39 = vld [vmem:[#allocation2 + $0xb8] sm:$0xf]  ;;  %v1203_v14 = vor.u32 %v6937_v12, %v6935_v3  ;;  %1378 = vrot.lane.b32.xlu1 %v1195_v6, %s5987_s28 }
  0xd0   : > { %1440 = vst.msk [vmem:[#allocation3 + $0x3c] sm:$0xf] %vm1436_vm14, %v1347_v55  ;;  %v6957_v2 = vrot.slane %v2565_v59, 4  ;;  %v2568_v33 = vrot.slane %v6915_v7, 5  ;;  %801 = vst [vmem:[#allocation2 + $0x84] sm:$0xf] %v800_v26  ;;  %v588_v59 = vsel %vm6110_vm7, %v580_v1, %v587_v15  ;;  %v1213_v45 = vor.u32 %v6942_v23, %v6939_v25 }
  0xd1   : > { %v6960_v46 = vld [vmem:[#allocation2 + $0x58] sm:$0xf]  ;;  %v1591_v48 = vrot.slane %v6917_v32, 5  ;;  %v1480_v44 = vld [vmem:[#allocation2 + $0x2c] sm:$0x1]  ;;  %v6968_v35 = vrot.slane %v3018_v16, 4 }
  0xd2   : > { %v803_v49 = vld [vmem:[#allocation2 + $0x8c] sm:$0x1]  ;;  %v6970_v8 = vrot.slane %v3021_v43, 5  ;;  %v1516_v50 = vld [vmem:[#allocation2 + $0xbc] sm:$0x1]  ;;  %v5353_v58 = vrot.slane %v6929_v56, 9  ;;  %2660 = vrot.lane.b32.xlu0 %v2566_v19, %s5987_s28 }
  0xd3   : > { %v937_v38 = vld [vmem:[#allocation2 + $0x80] sm:$0x1]  ;;  %802 = vst.msk [vmem:[#allocation2 + $0x88] sm:$0xf] %vm216_vm0, %v588_v59  ;;  %v1592_v47 = vsel %vm6430_vm13, %v5334_v31, %v1591_v48  ;;  %v3026_v27 = vshrl.u32 %v6931_v21, 16  ;;  %v3029_v54 = vshll.u32 %v6931_v21, 16  ;;  %v804_v60 = vsel %vm6177_vm10, %v589_v41, %v803_v49  ;;  %v1351_v31 = vpop.permute.xlu1 %1350 }
  0xd4   : > { %v5876_v17 = vld [vmem:[#allocation3 + $0x1e0] ss:$20 sps:$4 sm:$0xff]   ;;  %v5878_v18 = vld [vmem:[#allocation3 + $0x1e4] ss:$20 sps:$4 sm:$0xff]   ;;  %1718 = vst.msk [vmem:[#allocation3 + $0x7c] sm:$0xf] %vm216_vm0, %v1592_v47 }
  0xd5   : > { %1464 = vst.msk [vmem:[#allocation3 + $0x21c] sm:$0xf] %vm1436_vm14, %v1395_v29  ;;  %v3035_v36 = vshll.u32 %v6946_v10, 16  ;;  %v3039_v52 = vshrl.u32 %v6946_v10, 16  ;;  %v5346_v0 = vrot.slane %v1514_v28, 9  ;;  %v1675_v61 = vrot.slane %v1515_v39, 5  ;;  %4626 = vmatprep.mubr.bf16.mxu1 %v5878_v18  ;;  %v1865_v29 = vpop.permute.xlu0 %1864 }
  0xd6   : > { %v7001_v22 = vld [vmem:[#allocation2 + $0x68] sm:$0x1]  ;;  %805 = vst [vmem:[#allocation2 + $0x8c] sm:$0x1] %v804_v60  ;;  %v1763_v32 = vld [vmem:[#allocation2 + $0x7c] sm:$0xf]  ;;  %4627 = vmatmul.mubr.bf16.vlgmr.msra.gmra.mxu1 %v5876_v17  ;;  %3285 = vrot.lane.b32.xlu0 %v3014_v30, %s5987_s28  ;;  %v3024_v17 = vsel %vm6124_vm9, %v6968_v35, %v6970_v8 }
  0xd7   : > { %v1216_v62 = vshll.u32 %v937_v38, 16  ;;  %v2572_v43 = vrot.slane %v6960_v46, 5  ;;  %v1593_v57 = vrot.slane %v1591_v48, 4  ;;  %v1594_v13 = vrot.slane %v1480_v44, 5  ;;  %v5890_v16 = vld [vmem:[%s8247_s1 + $0xb0] sm:$0xff]   ;;  %v3671_v1 = vld [vmem:[#allocation3 + $0x28] sm:$0xff]  ;;  %5660 = vmatpush3.bf16.msra.mxu1 %v5888_v9  ;;  %1846 = vrot.lane.b32.xlu1 %v1763_v32, %s5987_s28 }
  0xd8   : > { %v7009_v20 = vrot.slane %v1203_v14, 4  ;;  %v1676_v21 = vsel %vm6430_vm13, %v5346_v0, %v1675_v61  ;;  %v1677_v5 = vrot.slane %v1675_v61, 4  ;;  %v1678_v24 = vrot.slane %v1516_v50, 5  ;;  %v5891_v3 = vld [vmem:[%s8247_s1 + $0xe8] sm:$0xff]   ;;  %v7016_v12 = vld [vmem:[#allocation2 + $0x30] sm:$0xe]  ;;  %5661 = vmatprep.subr.bf16.mxu1 %v5889_v34 }
  0xd9   : > { %1908 = vst.msk [vmem:[#allocation3 + $0x54] sm:$0xf] %vm1436_vm14, %v1817_v63  ;;  %v3674_v55 = vld [vmem:[#allocation3 + $0x3c] sm:$0xff]  ;;  %v7019_v26 = vrot.slane %v1213_v45, 4  ;;  %v7021_v15 = vld [vmem:[#allocation2 + $0x5c] sm:$0x1]  ;;  %v1595_v28 = vsel %vm6430_vm13, %v1593_v57, %v1594_v13  ;;  %v2569_v34 = vsel %vm6430_vm13, %v6957_v2, %v2568_v33  ;;  %v1399_v2 = vpop.permute.xlu1 %1398  ;;  %v1353_v46 = vpop.permute.xlu0 %1352 }
  0xda   : > { %v5879_v23 = vld [vmem:[#allocation3 + $0x2c] ss:$20 sps:$4 sm:$0xff]   ;;  %v7023_v41 = vrot.slane %v3026_v27, 4  ;;  %v7025_v10 = vrot.slane %v3029_v54, 5  ;;  %1742 = vst.msk [vmem:[#allocation3 + $0x25c] sm:$0xf] %vm216_vm0, %v1676_v21  ;;  %v5384_v39 = vcombine.low %v3671_v1, %v3674_v55  ;;  %v1679_v49 = vsel %vm6430_vm13, %v1677_v5, %v1678_v24 }
  0xdb   : > { %1442 = vst.msk [vmem:[#allocation3 + $0x64] sm:$0xf] %vm1436_vm14, %v1351_v31  ;;  %v7031_v19 = vrot.slane %v3035_v36, 5  ;;  %v7034_v48 = vrot.slane %v3039_v52, 4  ;;  %v938_v44 = vld [vmem:[#allocation2 + $0x84] sm:$0xf]  ;;  %4538 = vmatprep.mubr.bf16.mxu0 %v5879_v23  ;;  %v1209_v40 = vsel %vm6124_vm9, %v7009_v20, %v6939_v25  ;;  %5662 = vmatpush3.bf16.msra.mxu1 %v5890_v16  ;;  %v2573_v21 = vsel %vm6430_vm13, %v5353_v58, %v2572_v43 }
  0xdc   : > { %1719 = vst.msk [vmem:[#allocation3 + $0x90] sm:$0xf] %vm216_vm0, %v1595_v28  ;;  %v1482_v6 = vld [vmem:[#allocation2 + $0x34] sm:$0xf]  ;;  %v3743_v59 = vld [vmem:[#allocation3 + $0x208] sm:$0xff]  ;;  %v7039_v9 = vrot.slane %v1216_v62, 5  ;;  %4539 = vmatmul.mubr.bf16.gmra.mxu0 %v5384_v39  ;;  %v3032_v36 = vor.u32 %v7025_v10, %v7023_v41  ;;  %5663 = vmatprep.subr.bf16.mxu1 %v5891_v3 }
  0xdd   : > { %v7043_v50 = vrot.slane %v2572_v43, 4  ;;  %v3045_v14 = vshll.u32 %v7001_v22, 16  ;;  %v939_v38 = vld [vmem:[#allocation2 + $0x88] sm:$0xf]  ;;  %v1221_v47 = vshrl.u32 %v938_v44, 16  ;;  %v1224_v18 = vshll.u32 %v938_v44, 16  ;;  %2662 = vrot.lane.b32.xlu1 %v2569_v34, %s5987_s28  ;;  %1380 = vrot.lane.b32.xlu0 %v1209_v40, %s5987_s28 }
  0xde   : > { %1743 = vst.msk [vmem:[#allocation3 + $0x270] sm:$0xf] %vm216_vm0, %v1679_v49  ;;  %v5892_v27 = vld [vmem:[%s8247_s1 + $0xa8] sm:$0xff]   ;;  %v1483_v45 = vld [vmem:[#allocation2 + $0x38] sm:$0x1]  ;;  %v1230_v4 = vshll.u32 %v939_v38, 16  ;;  %v3042_v52 = vor.u32 %v7034_v48, %v7031_v19  ;;  %v1219_v20 = vsel %vm6124_vm9, %v7019_v26, %v7039_v9 }
  0xdf   : > { %v5932_v7 = vld [vmem:[%s8247_s1 + $0x108] sm:$0xff]   ;;  %1932 = vst.msk [vmem:[#allocation3 + $0x234] sm:$0xf] %vm1436_vm14, %v1865_v29  ;;  %v3746_v33 = vld [vmem:[#allocation3 + $0x21c] sm:$0xff]  ;;  %v1234_v30 = vshrl.u32 %v939_v38, 16  ;;  %v5335_v35 = vrot.slane %v7016_v12, 9  ;;  %v1819_v12 = vpop.permute.xlu1 %1818  ;;  %5664 = vmatpush3.bf16.msra.mxu1 %v5892_v27 }
  0xe0   : > { %v5881_v54 = vld [vmem:[#allocation3 + $0x20c] ss:$20 sps:$4 sm:$0xff]   ;;  %1466 = vst.msk [vmem:[#allocation3 + $0x244] sm:$0xf] %vm1436_vm14, %v1399_v2  ;;  %v5444_v8 = vcombine.low %v3743_v59, %v3746_v33  ;;  %v2575_v60 = vrot.slane %v7021_v15, 5  ;;  %5795 = vmatprep.subr.bf16.mxu0 %v5932_v7  ;;  %v7084_v22 = vrot.slane %v3045_v14, 5  ;;  %v1401_v2 = vpop.permute.xlu0 %1400 }
  0xe1   : > { %v5895_v25 = vld [vmem:[%s8247_s1 + $0xe0] sm:$0xff]   ;;  %v1936_v0 = vld [vmem:[#allocation2 + $0xc] sm:$0xf]  ;;  %4634 = vmatprep.mubr.bf16.mxu1 %v5881_v54  ;;  %v7086_v32 = vrot.slane %v1221_v47, 4  ;;  %v7088_v62 = vrot.slane %v1224_v18, 5  ;;  %v1598_v13 = vrot.slane %v1482_v6, 5  ;;  %5796 = vmatpush3.bf16.msra.mxu0 %v5932_v7 }
  0xe2   : > { %v1764_v61 = vld [vmem:[#allocation2 + $0x84] sm:$0xf]  ;;  %v7090_v57 = vld [vmem:[#allocation2 + $0x8c] sm:$0x1]  ;;  %v7092_v16 = vld [vmem:[#allocation2 + $0x60] sm:$0xe]  ;;  %4635 = vmatmul.mubr.bf16.gmra.mxu1 %v5444_v8  ;;  %5665 = vmatprep.subr.bf16.mxu1 %v5895_v25 }
  0xe3   : > { %v7094_v63 = vld [vmem:[#allocation2 + $0x64] sm:$0xf]  ;;  %v1601_v5 = vrot.slane %v1483_v45, 5  ;;  %v1937_v24 = vld [vmem:[#allocation2 + $0x10] sm:$0xf]  ;;  %v1985_v3 = vshrl.u32 %v1936_v0, 16  ;;  %v1599_v23 = vsel %vm6430_vm13, %v5335_v35, %v1598_v13  ;;  %3287 = vrot.lane.b32.xlu1 %v3024_v17, %s5987_s28  ;;  %1848 = vrot.lane.b32.xlu0 %v1764_v61, %s5987_s28  ;;  %v1227_v59 = vor.u32 %v7088_v62, %v7086_v32  ;;  %v1867_v34 = vpop.permute.xlu1 %1866 }
  0xe4   : > { %v5896_v1 = vld [vmem:[%s8247_s1 + $0xa0] sm:$0xff]   ;;  %v7110_v31 = vrot.slane %v1230_v4, 5  ;;  %v7112_v55 = vrot.slane %v1234_v30, 4  ;;  %v1600_v26 = vrot.slane %v1598_v13, 4  ;;  %v5899_v56 = vld [vmem:[%s8247_s1 + $0xd8] sm:$0xff]   ;;  %v7120_v58 = vrot.slane %v3032_v36, 4 }
  0xe5   : > { %1909 = vst.msk [vmem:[#allocation3 + $0x68] sm:$0xf] %vm1436_vm14, %v1819_v12  ;;  %v7122_v43 = vrot.slane %v3042_v52, 4  ;;  %v1987_v41 = vrot.slane %v1985_v3, 4  ;;  %v1988_v10 = vshll.u32 %v1936_v0, 16  ;;  %v1240_v39 = vshll.u32 %v7090_v57, 16  ;;  %5666 = vmatpush3.bf16.msra.mxu1 %v5896_v1 }
  0xe6   : > { %1720 = vst.msk [vmem:[#allocation3 + $0xa4] sm:$0xf] %vm216_vm0, %v1599_v23  ;;  %v2854_v28 = vld [vmem:[#allocation2 + $0x6c] sm:$0xf]  ;;  %v1602_v48 = vsel %vm6430_vm13, %v1600_v26, %v1601_v5  ;;  %v1994_v44 = vshll.u32 %v1937_v24, 16  ;;  %v1998_v49 = vshrl.u32 %v1937_v24, 16  ;;  %v1237_v29 = vor.u32 %v7112_v55, %v7110_v31  ;;  %5667 = vmatprep.subr.bf16.mxu1 %v5899_v56 }
  0xe7   : > { %1443 = vst.msk [vmem:[#allocation3 + $0x78] sm:$0xf] %vm1436_vm14, %v1353_v46  ;;  %v7130_v6 = vld [vmem:[#allocation2 + $0x70] sm:$0xf]  ;;  %v5354_v9 = vrot.slane %v7092_v16, 9  ;;  %v2579_v14 = vrot.slane %v7094_v63, 5  ;;  %1382 = vrot.lane.b32.xlu1 %v1219_v20, %s5987_s28  ;;  %2664 = vrot.lane.b32.xlu0 %v2573_v21, %s5987_s28  ;;  %v3038_v61 = vsel %vm6124_vm9, %v7120_v58, %v7031_v19  ;;  %v1355_v1 = vpop.permute.xlu1 %1354  ;;  %v1821_v21 = vpop.permute.xlu0 %1820 }
  0xe8   : > { %1721 = vst.msk [vmem:[#allocation3 + $0xb8] sm:$0xf] %vm216_vm0, %v1602_v48  ;;  %v1990_v38 = vrot.slane %v1988_v10, 5  ;;  %v1938_v47 = vld [vmem:[#allocation2 + $0x14] sm:$0x1]  ;;  %v5900_v27 = vld [vmem:[%s8247_s1 + $0x98] sm:$0xff]  }
  0xe9   : > { %v1996_v17 = vrot.slane %v1994_v44, 5  ;;  %v3050_v18 = vshrl.u32 %v2854_v28, 16  ;;  %v3053_v45 = vshll.u32 %v2854_v28, 16  ;;  %v5901_v7 = vld [vmem:[%s8247_s1 + $0xd0] sm:$0xff]   ;;  %1933 = vst.msk [vmem:[#allocation3 + $0x248] sm:$0xf] %vm1436_vm14, %v1867_v34  ;;  %5668 = vmatpush3.bf16.msra.mxu1 %v5900_v27 }
  0xea   : > { %v1765_v33 = vld [vmem:[#allocation2 + $0x88] sm:$0xf]  ;;  %v1991_v54 = vor.u32 %v1990_v38, %v1987_v41  ;;  %v3059_v40 = vshll.u32 %v7130_v6, 16  ;;  %v2000_v4 = vrot.slane %v1998_v49, 4  ;;  %v2769_v30 = vld [vmem:[#allocation2 + $0x18] sm:$0xf]  ;;  %5669 = vmatprep.subr.bf16.mxu1 %v5901_v7  ;;  %v2576_v49 = vsel %vm6430_vm13, %v7043_v50, %v2575_v60 }
  0xeb   : > { %1467 = vst.msk [vmem:[#allocation3 + $0x258] sm:$0xf] %vm1436_vm14, %v1401_v2  ;;  %v3677_v35 = vld [vmem:[#allocation3 + $0x50] sm:$0xff]  ;;  %v3052_v8 = vrot.slane %v3050_v18, 4  ;;  %v3055_v36 = vrot.slane %v3053_v45, 5  ;;  %v3063_v52 = vshrl.u32 %v7130_v6, 16  ;;  %1850 = vrot.lane.b32.xlu1 %v1765_v33, %s5987_s28  ;;  %3289 = vrot.lane.b32.xlu0 %v3038_v61, %s5987_s28 }
  0xec   : > { %v2004_v25 = vshll.u32 %v1938_v47, 16  ;;  %2801 = vst.msk [vmem:[#allocation3 + $0xc] sm:$0xf] %vm216_vm0, %v2769_v30  ;;  %v5902_v0 = vld [vmem:[%s8247_s1 + $0x90] sm:$0xff]   ;;  %v7160_v32 = vrot.slane %v1240_v39, 5  ;;  %v1992_v62 = vrot.slane %v1991_v54, 4  ;;  %v2001_v57 = vor.u32 %v2000_v4, %v1996_v17  ;;  %v1403_v47 = vpop.permute.xlu1 %1402 }
  0xed   : > { %v2856_v13 = vld [vmem:[#allocation2 + $0x74] sm:$0x1]  ;;  %v3680_v20 = vld [vmem:[#allocation3 + $0x64] sm:$0xff]  ;;  %v1228_v24 = vrot.slane %v1227_v59, 4  ;;  %v7162_v3 = vrot.slane %v1237_v29, 4  ;;  %v3056_v12 = vor.u32 %v3055_v36, %v3052_v8  ;;  %v5905_v58 = vld [vmem:[%s8247_s1 + $0xc8] sm:$0xff]   ;;  %5670 = vmatpush3.bf16.msra.mxu1 %v5902_v0  ;;  %v1869_v29 = vpop.permute.xlu0 %1868  ;;  %v3048_v30 = vsel %vm6124_vm9, %v7122_v43, %v7084_v22 }
  0xee   : > { %v5883_v5 = vld [vmem:[#allocation3 + $0x54] ss:$20 sps:$4 sm:$0xff]   ;;  %v2006_v55 = vrot.slane %v2004_v25, 5  ;;  %1444 = vst.msk [vmem:[#allocation3 + $0x8c] sm:$0xf] %vm1436_vm14, %v1355_v1  ;;  %v5389_v23 = vcombine.low %v3677_v35, %v3680_v20  ;;  %v1997_v19 = vsel %vm6124_vm9, %v1992_v62, %v1996_v17  ;;  %v2002_v56 = vrot.slane %v2001_v57, 4  ;;  %5671 = vmatprep.subr.bf16.mxu1 %v5905_v58 }
  0xef   : > { %v7167_v26 = vld [vmem:[#allocation2 + $0x68] sm:$0x1]  ;;  %v3069_v46 = vshll.u32 %v2856_v13, 16  ;;  %1910 = vst.msk [vmem:[#allocation3 + $0x7c] sm:$0xf] %vm1436_vm14, %v1821_v21  ;;  %4546 = vmatprep.mubr.bf16.mxu0 %v5883_v5  ;;  %v7177_v10 = vrot.slane %v2579_v14, 4  ;;  %v1233_v50 = vsel %vm6124_vm9, %v1228_v24, %v7110_v31  ;;  %2666 = vrot.lane.b32.xlu1 %v2576_v49, %s5987_s28  ;;  %v1243_v20 = vsel %vm6124_vm9, %v7162_v3, %v7160_v32 }
  0xf0   : > { %v3749_v41 = vld [vmem:[#allocation3 + $0x230] sm:$0xff]  ;;  %2400 = vst.msk [vmem:[#allocation3 + $0x8] sm:$0xf] %vm216_vm0, %v1997_v19  ;;  %v7179_v28 = vrot.slane %v3059_v40, 5  ;;  %v7181_v39 = vrot.slane %v3063_v52, 4  ;;  %4547 = vmatmul.mubr.bf16.gmra.mxu0 %v5389_v23  ;;  %v2007_v6 = vsel %vm6124_vm9, %v2002_v56, %v2006_v55  ;;  %v5907_v38 = vld [vmem:[%s8247_s1 + $0xc0] sm:$0xff]   ;;  %1384 = vrot.lane.b32.xlu0 %v1233_v50, %s5987_s28  ;;  %v1823_v0 = vpop.permute.xlu1 %1822  ;;  %v2580_v32 = vsel %vm6430_vm13, %v5354_v9, %v2579_v14 }
  0xf1   : > { %v2770_v48 = vld [vmem:[#allocation2 + $0x1c] sm:$0xf]  ;;  %v5906_v44 = vld [vmem:[%s8247_s1 + $0x88] sm:$0xff]   ;;  %v7194_v59 = vld [vmem:[#allocation2 + $0x70] sm:$0xf]  ;;  %v2582_v60 = vrot.slane %v7167_v26, 5  ;;  %v1357_v62 = vpop.permute.xlu0 %1356 }
  0xf2   : > { %2802 = vst.msk [vmem:[#allocation3 + $0x20] sm:$0xf] %vm216_vm0, %v2770_v48  ;;  %v3752_v27 = vld [vmem:[#allocation3 + $0x244] sm:$0xff]  ;;  %2401 = vst.msk [vmem:[#allocation3 + $0x1c] sm:$0xf] %vm216_vm0, %v2007_v6  ;;  %v7206_v18 = vrot.slane %v3056_v12, 4  ;;  %v3066_v35 = vor.u32 %v7181_v39, %v7179_v28  ;;  %5672 = vmatpush3.bf16.msra.mxu1 %v5906_v44 }
  0xf3   : > { %v5885_v15 = vld [vmem:[#allocation3 + $0x234] ss:$20 sps:$4 sm:$0xff]   ;;  %v851_v34 = vld [vmem:[#allocation2 + $0x3c] sm:$0xf]  ;;  %1468 = vst.msk [vmem:[#allocation3 + $0x26c] sm:$0xf] %vm1436_vm14, %v1403_v47  ;;  %v5449_v17 = vcombine.low %v3749_v41, %v3752_v27  ;;  %5673 = vmatprep.subr.bf16.mxu1 %v5907_v38  ;;  %3291 = vrot.lane.b32.xlu1 %v3048_v30, %s5987_s28  ;;  %v2583_v38 = vsel %vm6430_vm13, %v7177_v10, %v2582_v60 }
  0xf4   : > { %v7208_v45 = vrot.slane %v3069_v46, 5  ;;  %883 = vst.msk [vmem:[#allocation3 + $0xc8] sm:$0xf] %vm216_vm0, %v851_v34  ;;  %4642 = vmatprep.mubr.bf16.mxu1 %v5885_v15  ;;  %v1766_v31 = vld [vmem:[#allocation2 + $0x90] sm:$0xf]  ;;  %v2586_v2 = vrot.slane %v7194_v59, 5  ;;  %v1871_v19 = vpop.permute.xlu1 %1870  ;;  %v3062_v47 = vsel %vm6124_vm9, %v7206_v18, %v7179_v28 }
  0xf5   : > { %1934 = vst.msk [vmem:[#allocation3 + $0x25c] sm:$0xf] %vm1436_vm14, %v1869_v29  ;;  %v7213_v7 = vld [vmem:[#allocation2 + $0x6c] sm:$0xe]  ;;  %v2857_v33 = vld [vmem:[#allocation2 + $0x78] sm:$0xf]  ;;  %4643 = vmatmul.mubr.bf16.gmra.mxu1 %v5449_v17  ;;  %1852 = vrot.lane.b32.xlu0 %v1766_v31, %s5987_s28  ;;  %v1825_v41 = vpop.permute.xlu0 %1824 }
  0xf6   : > { %v2858_v54 = vld [vmem:[#allocation2 + $0x7c] sm:$0xf]  ;;  %v5908_v40 = vld [vmem:[%s8247_s1 + $0x80] sm:$0xff]   ;;  %v7229_v8 = vld [vmem:[#allocation2 + $0x74] sm:$0x1]  ;;  %v3074_v36 = vshrl.u32 %v2857_v33, 16 }
  0xf7   : > { %v5939_v4 = vld [vmem:[%s8247_s1 + $0x100] sm:$0xff]   ;;  %v3077_v52 = vshll.u32 %v2857_v33, 16  ;;  %v1484_v61 = vld [vmem:[#allocation2 + $0x3c] sm:$0xe]  ;;  %1911 = vst.msk [vmem:[#allocation3 + $0x90] sm:$0xf] %vm1436_vm14, %v1823_v0  ;;  %5674 = vmatpush3.bf16.msra.mxu1 %v5908_v40  ;;  %1386 = vrot.lane.b32.xlu1 %v1243_v20, %s5987_s28 }
  0xf8   : > { %v852_v25 = vld [vmem:[#allocation2 + $0x40] sm:$0xf]  ;;  %5797 = vmatprep.subr.bf16.mxu0 %v5939_v4  ;;  %v3076_v22 = vrot.slane %v3074_v36, 4  ;;  %v3083_v57 = vshll.u32 %v2858_v54, 16  ;;  %v3087_v13 = vshrl.u32 %v2858_v54, 16  ;;  %v5336_v5 = vrot.slane %v1484_v61, 9  ;;  %v1359_v34 = vpop.permute.xlu1 %1358 }
  0xf9   : > { %884 = vst.msk [vmem:[#allocation3 + $0xdc] sm:$0xf] %vm216_vm0, %v852_v25  ;;  %v3079_v43 = vrot.slane %v3077_v52, 5  ;;  %v1485_v1 = vld [vmem:[#allocation2 + $0x40] sm:$0xf]  ;;  %5798 = vmatpush3.bf16.msra.mxu0 %v5939_v4  ;;  %v7240_v12 = vrot.slane %v3066_v35, 4  ;;  %2668 = vrot.lane.b32.xlu0 %v2580_v32, %s5987_s28  ;;  %v2641_v10 = vpop.permute.xlu0 %2640 }
  0xfa   : > { %1445 = vst.msk [vmem:[#allocation3 + $0xa0] sm:$0xf] %vm1436_vm14, %v1357_v62  ;;  %v1605_v24 = vrot.slane %v1485_v1, 5  ;;  %v5355_v55 = vrot.slane %v7213_v7, 9  ;;  %v7245_v21 = vrot.slane %v2586_v2, 4  ;;  %v2589_v23 = vrot.slane %v7229_v8, 5 }
  0xfb   : > { %v2859_v56 = vld [vmem:[#allocation2 + $0x80] sm:$0x1]  ;;  %v7256_v46 = vld [vmem:[#allocation2 + $0x78] sm:$0xe]  ;;  %v1486_v58 = vld [vmem:[#allocation2 + $0x44] sm:$0x1]  ;;  %v3080_v48 = vor.u32 %v3079_v43, %v3076_v22 }
  0xfc   : > { %v1606_v3 = vsel %vm6430_vm13, %v5336_v5, %v1605_v24  ;;  %1935 = vst.msk [vmem:[#allocation3 + $0x270] sm:$0xf] %vm1436_vm14, %v1871_v19  ;;  %v1767_v39 = vld [vmem:[#allocation2 + $0x94] sm:$0xf]  ;;  %v7259_v44 = vrot.slane %v3083_v57, 5  ;;  %v1607_v63 = vrot.slane %v1605_v24, 4  ;;  %v2587_v25 = vsel %vm6430_vm13, %v5355_v55, %v2586_v2  ;;  %v1827_v57 = vpop.permute.xlu1 %1826 }
  0xfd   : > { %1722 = vst.msk [vmem:[#allocation3 + $0xcc] sm:$0xf] %vm216_vm0, %v1606_v3  ;;  %v7262_v16 = vld [vmem:[#allocation2 + $0x7c] sm:$0xf]  ;;  %v3683_v9 = vld [vmem:[#allocation3 + $0x78] sm:$0xff]  ;;  %v7266_v14 = vrot.slane %v3087_v13, 4  ;;  %1854 = vrot.lane.b32.xlu1 %v1767_v39, %s5987_s28  ;;  %3293 = vrot.lane.b32.xlu0 %v3062_v47, %s5987_s28  ;;  %v3266_v32 = vpop.permute.xlu0 %3265 }
  0xfe   : > { %1912 = vst.msk [vmem:[#allocation3 + $0xa4] sm:$0xf] %vm1436_vm14, %v1825_v41  ;;  %v1608_v49 = vrot.slane %v1486_v58, 5  ;;  %v1939_v6 = vld [vmem:[#allocation2 + $0x18] sm:$0xf]  ;;  %v3093_v27 = vshll.u32 %v2859_v56, 16  ;;  %v3072_v58 = vsel %vm6124_vm9, %v7240_v12, %v7208_v45 }
  0xff   : > { %v1940_v15 = vld [vmem:[#allocation2 + $0x1c] sm:$0xf]  ;;  %v2009_v50 = vshrl.u32 %v1939_v6, 16  ;;  %v3686_v29 = vld [vmem:[#allocation3 + $0x8c] sm:$0xff]  ;;  %v2012_v7 = vshll.u32 %v1939_v6, 16  ;;  %v7281_v54 = vrot.slane %v3080_v48, 4  ;;  %v3090_v0 = vor.u32 %v7266_v14, %v7259_v44 }
 0x100   : > { %v5893_v17 = vld [vmem:[#allocation3 + $0x7c] ss:$20 sps:$4 sm:$0xff]   ;;  %v1609_v31 = vsel %vm6430_vm13, %v1607_v63, %v1608_v49  ;;  %v2018_v26 = vshll.u32 %v1940_v15, 16  ;;  %v2022_v33 = vshrl.u32 %v1940_v15, 16  ;;  %1446 = vst.msk [vmem:[#allocation3 + $0xb4] sm:$0xf] %vm1436_vm14, %v1359_v34  ;;  %v5394_v60 = vcombine.low %v3683_v9, %v3686_v29  ;;  %v2643_v47 = vpop.permute.xlu1 %2642 }
 0x101   : > { %v5356_v28 = vrot.slane %v7256_v46, 9  ;;  %1723 = vst.msk [vmem:[#allocation3 + $0xe0] sm:$0xf] %vm216_vm0, %v1609_v31  ;;  %v2011_v18 = vrot.slane %v2009_v50, 4  ;;  %4554 = vmatprep.mubr.bf16.mxu0 %v5893_v17  ;;  %v3755_v40 = vld [vmem:[#allocation3 + $0x258] sm:$0xff]  ;;  %v2593_v4 = vrot.slane %v7262_v16, 5  ;;  %2670 = vrot.lane.b32.xlu1 %v2583_v38, %s5987_s28  ;;  %v3086_v45 = vsel %vm6124_vm9, %v7281_v54, %v7259_v44  ;;  %v1361_v29 = vpop.permute.xlu0 %1360 }
 0x102   : > { %2736 = vst.msk [vmem:[#allocation3 + $0x8] sm:$0xf] %vm1436_vm14, %v2641_v10  ;;  %v2014_v30 = vrot.slane %v2012_v7, 5  ;;  %v2020_v35 = vrot.slane %v2018_v26, 5  ;;  %v2860_v36 = vld [vmem:[#allocation2 + $0x84] sm:$0xf]  ;;  %4555 = vmatmul.mubr.bf16.gmra.mxu0 %v5394_v60  ;;  %2672 = vrot.lane.b32.xlu0 %v2587_v25, %s5987_s28 }
 0x103   : > { %v2024_v52 = vrot.slane %v2022_v33, 4  ;;  %v2861_v61 = vld [vmem:[#allocation2 + $0x88] sm:$0xf]  ;;  %v3098_v62 = vshrl.u32 %v2860_v36, 16  ;;  %v3101_v22 = vshll.u32 %v2860_v36, 16  ;;  %v7295_v20 = vrot.slane %v3093_v27, 5 }
 0x104   : > { %v1941_v43 = vld [vmem:[#allocation2 + $0x20] sm:$0x1]  ;;  %v3758_v13 = vld [vmem:[#allocation3 + $0x26c] sm:$0xff]  ;;  %v2015_v5 = vor.u32 %v2014_v30, %v2011_v18  ;;  %v3107_v24 = vshll.u32 %v2861_v61, 16  ;;  %v3111_v19 = vshrl.u32 %v2861_v61, 16  ;;  %v7318_v12 = vrot.slane %v3090_v0, 4 }
 0x105   : > { %v5897_v1 = vld [vmem:[#allocation3 + $0x25c] ss:$20 sps:$4 sm:$0xff]   ;;  %1913 = vst.msk [vmem:[#allocation3 + $0xb8] sm:$0xf] %vm1436_vm14, %v1827_v57  ;;  %v5454_v59 = vcombine.low %v3755_v40, %v3758_v13  ;;  %v3100_v2 = vrot.slane %v3098_v62, 4  ;;  %v3103_v55 = vrot.slane %v3101_v22, 5  ;;  %v2025_v3 = vor.u32 %v2024_v52, %v2020_v35  ;;  %3295 = vrot.lane.b32.xlu1 %v3072_v58, %s5987_s28  ;;  %v3268_v52 = vpop.permute.xlu1 %3267 }
 0x106   : > { %v2771_v56 = vld [vmem:[#allocation2 + $0x24] sm:$0xf]  ;;  %4650 = vmatprep.mubr.bf16.mxu1 %v5897_v1  ;;  %3361 = vst.msk [vmem:[#allocation3 + $0xc] sm:$0xf] %vm1436_vm14, %v3266_v32  ;;  %v2016_v41 = vrot.slane %v2015_v5, 4  ;;  %v2028_v48 = vshll.u32 %v1941_v43, 16  ;;  %v2590_v33 = vsel %vm6430_vm13, %v7245_v21, %v2589_v23  ;;  %3297 = vrot.lane.b32.xlu0 %v3086_v45, %s5987_s28  ;;  %v2594_v8 = vsel %vm6430_vm13, %v5356_v28, %v2593_v4  ;;  %v1829_v28 = vpop.permute.xlu0 %1828 }
 0x107   : > { %v7304_v39 = vld [vmem:[#allocation2 + $0x80] sm:$0x1]  ;;  %2803 = vst.msk [vmem:[#allocation3 + $0x34] sm:$0xf] %vm216_vm0, %v2771_v56  ;;  %v7307_v63 = vld [vmem:[#allocation2 + $0x8c] sm:$0x1]  ;;  %4651 = vmatmul.mubr.bf16.gmra.mxu1 %v5454_v59  ;;  %v3104_v9 = vor.u32 %v3103_v55, %v3100_v2  ;;  %v3096_v16 = vsel %vm6124_vm9, %v7318_v12, %v7295_v20 }
 0x108   : > { %v7310_v14 = vrot.slane %v3107_v24, 5  ;;  %v2026_v49 = vrot.slane %v2025_v3, 4  ;;  %v3113_v6 = vrot.slane %v3111_v19, 4  ;;  %v7312_v38 = vld [vmem:[#allocation2 + $0x84] sm:$0xe]  ;;  %v2021_v27 = vsel %vm6124_vm9, %v2016_v41, %v2020_v35  ;;  %v3689_v10 = vld [vmem:[#allocation3 + $0xa0] sm:$0xff] }
 0x109   : > { %v2030_v15 = vrot.slane %v2028_v48, 5  ;;  %v2772_v50 = vld [vmem:[#allocation2 + $0x28] sm:$0xf]  ;;  %2737 = vst.msk [vmem:[#allocation3 + $0x1c] sm:$0xf] %vm1436_vm14, %v2643_v47  ;;  %v7326_v17 = vrot.slane %v2593_v4, 4  ;;  %2674 = vrot.lane.b32.xlu1 %v2590_v33, %s5987_s28  ;;  %v1363_v56 = vpop.permute.xlu1 %1362 }
 0x10a   : > { %v853_v34 = vld [vmem:[#allocation2 + $0x48] sm:$0xf]  ;;  %2402 = vst.msk [vmem:[#allocation3 + $0x30] sm:$0xf] %vm216_vm0, %v2021_v27  ;;  %v2596_v31 = vrot.slane %v7304_v39, 5  ;;  %v3117_v44 = vshll.u32 %v7307_v63, 16  ;;  %v3114_v21 = vor.u32 %v3113_v6, %v7310_v14  ;;  %2676 = vrot.lane.b32.xlu0 %v2594_v8, %s5987_s28  ;;  %v2645_v6 = vpop.permute.xlu0 %2644 }
 0x10b   : > { %v7330_v7 = vld [vmem:[#allocation2 + $0x88] sm:$0xf]  ;;  %v5357_v26 = vrot.slane %v7312_v38, 9  ;;  %2804 = vst.msk [vmem:[#allocation3 + $0x48] sm:$0xf] %vm216_vm0, %v2772_v50  ;;  %v2031_v60 = vsel %vm6124_vm9, %v2026_v49, %v2030_v15  ;;  %v3105_v30 = vrot.slane %v3104_v9, 4 }
 0x10c   : > { %885 = vst.msk [vmem:[#allocation3 + $0xf0] sm:$0xf] %vm216_vm0, %v853_v34  ;;  %v7344_v54 = vld [vmem:[#allocation2 + $0x8c] sm:$0x1]  ;;  %v2863_v18 = vld [vmem:[#allocation2 + $0x90] sm:$0xf] }
 0x10d   : > { %1447 = vst.msk [vmem:[#allocation3 + $0xc8] sm:$0xf] %vm1436_vm14, %v1361_v29  ;;  %v2864_v40 = vld [vmem:[#allocation2 + $0x94] sm:$0xf]  ;;  %v3122_v23 = vshrl.u32 %v2863_v18, 16  ;;  %v3692_v25 = vld [vmem:[#allocation3 + $0xb4] sm:$0xff]  ;;  %v3110_v58 = vsel %vm6124_vm9, %v3105_v30, %v7310_v14  ;;  %3299 = vrot.lane.b32.xlu1 %v3096_v16, %s5987_s28 }
 0x10e   : > { %2403 = vst.msk [vmem:[#allocation3 + $0x44] sm:$0xf] %vm216_vm0, %v2031_v60  ;;  %v854_v35 = vld [vmem:[#allocation2 + $0x4c] sm:$0xf]  ;;  %v1487_v36 = vld [vmem:[#allocation2 + $0x48] sm:$0xe]  ;;  %v5399_v4 = vcombine.low %v3689_v10, %v3692_v25  ;;  %3301 = vrot.lane.b32.xlu0 %v3110_v58, %s5987_s28 }
 0x10f   : > { %v5903_v0 = vld [vmem:[#allocation3 + $0xa4] ss:$20 sps:$4 sm:$0xff]   ;;  %v3125_v46 = vshll.u32 %v2863_v18, 16  ;;  %v3131_v61 = vshll.u32 %v2864_v40, 16  ;;  %v3135_v62 = vshrl.u32 %v2864_v40, 16  ;;  %v2600_v22 = vrot.slane %v7330_v7, 5  ;;  %v1831_v40 = vpop.permute.xlu1 %1830 }
 0x110   : > { %886 = vst.msk [vmem:[#allocation3 + $0x104] sm:$0xf] %vm216_vm0, %v854_v35  ;;  %v3124_v43 = vrot.slane %v3122_v23, 4  ;;  %v1488_v57 = vld [vmem:[#allocation2 + $0x4c] sm:$0xf]  ;;  %v5337_v13 = vrot.slane %v1487_v36, 9  ;;  %4562 = vmatprep.mubr.bf16.mxu0 %v5903_v0  ;;  %v2597_v7 = vsel %vm6430_vm13, %v7326_v17, %v2596_v31  ;;  %v3270_v23 = vpop.permute.xlu0 %3269 }
 0x111   : > { %3362 = vst.msk [vmem:[#allocation3 + $0x20] sm:$0xf] %vm1436_vm14, %v3268_v52  ;;  %1914 = vst.msk [vmem:[#allocation3 + $0xcc] sm:$0xf] %vm1436_vm14, %v1829_v28  ;;  %v3127_v1 = vrot.slane %v3125_v46, 5  ;;  %v7364_v20 = vrot.slane %v3131_v61, 5  ;;  %4563 = vmatmul.mubr.bf16.gmra.mxu0 %v5399_v4  ;;  %v2601_v17 = vsel %vm6430_vm13, %v5357_v26, %v2600_v22  ;;  %2678 = vrot.lane.b32.xlu1 %v2597_v7, %s5987_s28 }
 0x112   : > { %v1612_v5 = vrot.slane %v1488_v57, 5  ;;  %v2865_v24 = vld [vmem:[#allocation2 + $0x98] sm:$0x1]  ;;  %v3137_v19 = vrot.slane %v3135_v62, 4  ;;  %v7367_v59 = vrot.slane %v3114_v21, 4  ;;  %v7369_v32 = vrot.slane %v3117_v44, 5  ;;  %2680 = vrot.lane.b32.xlu0 %v2601_v17, %s5987_s28 }
 0x113   : > { %v2603_v2 = vrot.slane %v7344_v54, 5  ;;  %v3141_v55 = vshll.u32 %v2865_v24, 16  ;;  %v7372_v3 = vld [vmem:[#allocation2 + $0x90] sm:$0xe]  ;;  %v2602_v41 = vrot.slane %v2600_v22, 4  ;;  %v3128_v48 = vor.u32 %v3127_v1, %v3124_v43 }
 0x114   : > { %v1613_v63 = vsel %vm6430_vm13, %v5337_v13, %v1612_v5  ;;  %v1489_v9 = vld [vmem:[#allocation2 + $0x50] sm:$0x1]  ;;  %v1942_v49 = vld [vmem:[#allocation2 + $0x24] sm:$0xf]  ;;  %1448 = vst.msk [vmem:[#allocation3 + $0xdc] sm:$0xf] %vm1436_vm14, %v1363_v56  ;;  %v3138_v47 = vor.u32 %v3137_v19, %v7364_v20  ;;  %v3120_v39 = vsel %vm6124_vm9, %v7367_v59, %v7369_v32  ;;  %v2647_v13 = vpop.permute.xlu1 %2646  ;;  %v1365_v32 = vpop.permute.xlu0 %1364 }
 0x115   : > { %1724 = vst.msk [vmem:[#allocation3 + $0xf4] sm:$0xf] %vm216_vm0, %v1613_v63  ;;  %v5358_v45 = vrot.slane %v7372_v3, 9  ;;  %v1614_v12 = vrot.slane %v1612_v5, 4  ;;  %v1615_v27 = vrot.slane %v1489_v9, 5  ;;  %v7385_v14 = vrot.slane %v3128_v48, 4  ;;  %3303 = vrot.lane.b32.xlu1 %v3120_v39, %s5987_s28 }
 0x116   : > { %v1943_v15 = vld [vmem:[#allocation2 + $0x28] sm:$0xf]  ;;  %2738 = vst.msk [vmem:[#allocation3 + $0x30] sm:$0xf] %vm1436_vm14, %v2645_v6  ;;  %v7387_v50 = vrot.slane %v3141_v55, 5  ;;  %v2033_v29 = vshrl.u32 %v1942_v49, 16  ;;  %v7409_v31 = vsel %vm6430_vm13, %v2602_v41, %v2603_v2 }
 0x117   : > { %v7389_v34 = vld [vmem:[#allocation2 + $0x94] sm:$0xf]  ;;  %v2036_v44 = vshll.u32 %v1942_v49, 16  ;;  %v1616_v33 = vsel %vm6430_vm13, %v1614_v12, %v1615_v27  ;;  %v2042_v10 = vshll.u32 %v1943_v15, 16  ;;  %v2046_v60 = vshrl.u32 %v1943_v15, 16 }
 0x118   : > { %v2866_v54 = vld [vmem:[#allocation2 + $0x9c] sm:$0xf]  ;;  %v2867_v18 = vld [vmem:[#allocation2 + $0xa0] sm:$0xf]  ;;  %v5911_v30 = vld [vmem:[#allocation3 + $0xc] ss:$20 sps:$4 sm:$0xff]   ;;  %v3134_v62 = vsel %vm6124_vm9, %v7385_v14, %v7364_v20 }
 0x119   : > { %v5909_v8 = vld [vmem:[#allocation3 + $0x8] ss:$20 sps:$4 sm:$0xff]   ;;  %1725 = vst.msk [vmem:[#allocation3 + $0x108] sm:$0xf] %vm216_vm0, %v1616_v33  ;;  %v2035_v21 = vrot.slane %v2033_v29, 4  ;;  %v7413_v35 = vrot.slane %v3138_v47, 4  ;;  %4691 = vmatprep.mubr.bf16.mxu1 %v5911_v30  ;;  %3305 = vrot.lane.b32.xlu0 %v3134_v62, %s5987_s28  ;;  %v3272_v29 = vpop.permute.xlu1 %3271 }
 0x11a   : > { %1915 = vst.msk [vmem:[#allocation3 + $0xe0] sm:$0xf] %vm1436_vm14, %v1831_v40  ;;  %v2607_v36 = vrot.slane %v7389_v34, 5  ;;  %v2038_v52 = vrot.slane %v2036_v44, 5  ;;  %v2044_v25 = vrot.slane %v2042_v10, 5  ;;  %v3146_v26 = vshrl.u32 %v2866_v54, 16  ;;  %4692 = vmatmul.mubr.bf16.vlgmr.msra.gmra.mxu1 %v5909_v8  ;;  %2682 = vrot.lane.b32.xlu1 %v7409_v31, %s5987_s28 }
 0x11b   : > { %v7416_v38 = vld [vmem:[#allocation2 + $0x98] sm:$0x1]  ;;  %3363 = vst.msk [vmem:[#allocation3 + $0x34] sm:$0xf] %vm1436_vm14, %v3270_v23  ;;  %v3149_v0 = vshll.u32 %v2866_v54, 16  ;;  %v3155_v16 = vshll.u32 %v2867_v18, 16  ;;  %v3144_v23 = vsel %vm6124_vm9, %v7413_v35, %v7387_v50 }
 0x11c   : > { %v3159_v46 = vshrl.u32 %v2867_v18, 16  ;;  %v1944_v61 = vld [vmem:[#allocation2 + $0x2c] sm:$0x1]  ;;  %v2039_v28 = vor.u32 %v2038_v52, %v2035_v21  ;;  %v2048_v4 = vrot.slane %v2046_v60, 4  ;;  %v2773_v43 = vld [vmem:[#allocation2 + $0x30] sm:$0xf]  ;;  %v2608_v33 = vsel %vm6430_vm13, %v5358_v45, %v2607_v36  ;;  %v1833_v18 = vpop.permute.xlu0 %1832 }
 0x11d   : > { %v2052_v22 = vshll.u32 %v1944_v61, 16  ;;  %v2868_v57 = vld [vmem:[#allocation2 + $0xa4] sm:$0x1]  ;;  %v3148_v1 = vrot.slane %v3146_v26, 4  ;;  %v3151_v5 = vrot.slane %v3149_v0, 5  ;;  %v7425_v24 = vrot.slane %v3155_v16, 5  ;;  %2684 = vrot.lane.b32.xlu0 %v2608_v33, %s5987_s28  ;;  %v1367_v31 = vpop.permute.xlu1 %1366 }
 0x11e   : > { %2805 = vst.msk [vmem:[#allocation3 + $0x5c] sm:$0xf] %vm216_vm0, %v2773_v43  ;;  %v3161_v19 = vrot.slane %v3159_v46, 4  ;;  %v7428_v59 = vld [vmem:[#allocation2 + $0x9c] sm:$0xe]  ;;  %v2040_v2 = vrot.slane %v2039_v28, 4  ;;  %v2049_v20 = vor.u32 %v2048_v4, %v2044_v25  ;;  %3307 = vrot.lane.b32.xlu1 %v3144_v23, %s5987_s28 }
 0x11f   : > { %2739 = vst.msk [vmem:[#allocation3 + $0x44] sm:$0xf] %vm1436_vm14, %v2647_v13  ;;  %v2054_v55 = vrot.slane %v2052_v22, 5  ;;  %v3165_v56 = vshll.u32 %v2868_v57, 16  ;;  %v7431_v58 = vld [vmem:[#allocation2 + $0xa0] sm:$0xf]  ;;  %v3152_v63 = vor.u32 %v3151_v5, %v3148_v1 }
 0x120   : > { %1449 = vst.msk [vmem:[#allocation3 + $0xf0] sm:$0xf] %vm1436_vm14, %v1365_v32  ;;  %v2609_v41 = vrot.slane %v2607_v36, 4  ;;  %v2610_v48 = vrot.slane %v7416_v38, 5  ;;  %v3162_v9 = vor.u32 %v3161_v19, %v7425_v24  ;;  %v2774_v49 = vld [vmem:[#allocation2 + $0x34] sm:$0xf]  ;;  %v2045_v12 = vsel %vm6124_vm9, %v2040_v2, %v2044_v25  ;;  %v2649_v50 = vpop.permute.xlu0 %2648 }
 0x121   : > { %v855_v6 = vld [vmem:[#allocation2 + $0x54] sm:$0xf]  ;;  %v3695_v47 = vld [vmem:[#allocation3 + $0xc8] sm:$0xff]  ;;  %v2050_v27 = vrot.slane %v2049_v20, 4  ;;  %v5359_v15 = vrot.slane %v7428_v59, 9  ;;  %v2614_v14 = vrot.slane %v7431_v58, 5 }
 0x122   : > { %2806 = vst.msk [vmem:[#allocation3 + $0x70] sm:$0xf] %vm216_vm0, %v2774_v49  ;;  %887 = vst.msk [vmem:[#allocation3 + $0x118] sm:$0xf] %vm216_vm0, %v855_v6  ;;  %v2869_v34 = vld [vmem:[#allocation2 + $0xa8] sm:$0xf]  ;;  %v2611_v22 = vsel %vm6430_vm13, %v2609_v41, %v2610_v48 }
 0x123   : > { %v3698_v44 = vld [vmem:[#allocation3 + $0xdc] sm:$0xff]  ;;  %2404 = vst.msk [vmem:[#allocation3 + $0x58] sm:$0xf] %vm216_vm0, %v2045_v12  ;;  %v3153_v10 = vrot.slane %v3152_v63, 4  ;;  %v7449_v60 = vrot.slane %v3162_v9, 4  ;;  %v7451_v54 = vrot.slane %v3165_v56, 5  ;;  %v2055_v8 = vsel %vm6124_vm9, %v2050_v27, %v2054_v55  ;;  %v1835_v56 = vpop.permute.xlu1 %1834  ;;  %2686 = vrot.lane.b32.xlu1 %v2611_v22, %s5987_s28 }
 0x124   : > { %v5912_v7 = vld [vmem:[#allocation3 + $0xcc] ss:$20 sps:$4 sm:$0xff]   ;;  %3364 = vst.msk [vmem:[#allocation3 + $0x48] sm:$0xf] %vm1436_vm14, %v3272_v29  ;;  %v5404_v40 = vcombine.low %v3695_v47, %v3698_v44  ;;  %v7458_v3 = vrot.slane %v2614_v14, 4  ;;  %v3170_v45 = vshrl.u32 %v2869_v34, 16  ;;  %v2615_v19 = vsel %vm6430_vm13, %v5359_v15, %v2614_v14  ;;  %v3274_v47 = vpop.permute.xlu0 %3273 }
 0x125   : > { %v7456_v30 = vld [vmem:[#allocation2 + $0xa4] sm:$0x1]  ;;  %v2870_v39 = vld [vmem:[#allocation2 + $0xac] sm:$0xf]  ;;  %4570 = vmatprep.mubr.bf16.mxu0 %v5912_v7  ;;  %1916 = vst.msk [vmem:[#allocation3 + $0xf4] sm:$0xf] %vm1436_vm14, %v1833_v18  ;;  %v3158_v26 = vsel %vm6124_vm9, %v3153_v10, %v7425_v24  ;;  %v3168_v48 = vsel %vm6124_vm9, %v7449_v60, %v7451_v54 }
 0x126   : > { %2405 = vst.msk [vmem:[#allocation3 + $0x6c] sm:$0xf] %vm216_vm0, %v2055_v8  ;;  %v3173_v17 = vshll.u32 %v2869_v34, 16  ;;  %v3179_v21 = vshll.u32 %v2870_v39, 16  ;;  %4571 = vmatmul.mubr.bf16.gmra.mxu0 %v5404_v40  ;;  %v3172_v36 = vrot.slane %v3170_v45, 4  ;;  %v3183_v52 = vshrl.u32 %v2870_v39, 16  ;;  %3309 = vrot.lane.b32.xlu0 %v3158_v26, %s5987_s28 }
 0x127   : > { %v856_v25 = vld [vmem:[#allocation2 + $0x58] sm:$0xf]  ;;  %v1490_v38 = vld [vmem:[#allocation2 + $0x54] sm:$0xe]  ;;  %1450 = vst.msk [vmem:[#allocation3 + $0x104] sm:$0xf] %vm1436_vm14, %v1367_v31  ;;  %v2651_v8 = vpop.permute.xlu1 %2650  ;;  %3311 = vrot.lane.b32.xlu1 %v3168_v48, %s5987_s28 }
 0x128   : > { %v3175_v0 = vrot.slane %v3173_v17, 5  ;;  %v7472_v16 = vrot.slane %v3179_v21, 5  ;;  %888 = vst.msk [vmem:[#allocation3 + $0x12c] sm:$0xf] %vm216_vm0, %v856_v25  ;;  %v1491_v46 = vld [vmem:[#allocation2 + $0x58] sm:$0xf]  ;;  %v1369_v21 = vpop.permute.xlu0 %1368 }
 0x129   : > { %v5338_v61 = vrot.slane %v1490_v38, 9  ;;  %v1619_v35 = vrot.slane %v1491_v46, 5  ;;  %v2871_v62 = vld [vmem:[#allocation2 + $0xb0] sm:$0x1]  ;;  %v3185_v28 = vrot.slane %v3183_v52, 4  ;;  %v2617_v43 = vrot.slane %v7456_v30, 5 }
 0x12a   : > { %v7476_v4 = vld [vmem:[#allocation2 + $0xa8] sm:$0xe]  ;;  %2740 = vst.msk [vmem:[#allocation3 + $0x58] sm:$0xf] %vm1436_vm14, %v2649_v50  ;;  %v3176_v57 = vor.u32 %v3175_v0, %v3172_v36  ;;  %v3189_v13 = vshll.u32 %v2871_v62, 16  ;;  %2688 = vrot.lane.b32.xlu0 %v2615_v19, %s5987_s28  ;;  %vm4449_vm15 = vcmask 523264  }
 0x12b   : > { %v2472_v1 = vld [vmem:[#allocation2 + $0xac] sm:$0xf]  ;;  %v1492_v5 = vld [vmem:[#allocation2 + $0x5c] sm:$0x1]  ;;  %v1620_v59 = vsel %vm6430_vm13, %v5338_v61, %v1619_v35  ;;  %v3186_v32 = vor.u32 %v3185_v28, %v7472_v16  ;;  %v1621_v2 = vrot.slane %v1619_v35, 4  ;;  %v5360_v9 = vrot.slane %v7476_v4, 9 }
 0x12c   : > { %v3672_v24 = vld [vmem:[#allocation3 + $0x30] sm:$0xff]  ;;  %v1945_v20 = vld [vmem:[#allocation2 + $0x30] sm:$0xf]  ;;  %v1946_v55 = vld [vmem:[#allocation2 + $0x34] sm:$0xf]  ;;  %v3177_v63 = vrot.slane %v3176_v57, 4  ;;  %v2618_v14 = vsel %vm6430_vm13, %v7458_v3, %v2617_v43  ;;  %v3276_v57 = vpop.permute.xlu1 %3275 }
 0x12d   : > { %v3675_v58 = vld [vmem:[#allocation3 + $0x44] sm:$0xff]  ;;  %1726 = vst.msk [vmem:[#allocation3 + $0x11c] sm:$0xf] %vm216_vm0, %v1620_v59  ;;  %v1622_v49 = vrot.slane %v1492_v5, 5  ;;  %v7496_v12 = vrot.slane %v3189_v13, 5  ;;  %v2621_v27 = vrot.slane %v2472_v1, 5  ;;  %2690 = vrot.lane.b32.xlu1 %v2618_v14, %s5987_s28 }
 0x12e   : > { %v5914_v41 = vld [vmem:[#allocation3 + $0x34] ss:$20 sps:$4 sm:$0xff]   ;;  %1917 = vst.msk [vmem:[#allocation3 + $0x108] sm:$0xf] %vm1436_vm14, %v1835_v56  ;;  %v5386_v6 = vcombine.low %v3672_v24, %v3675_v58  ;;  %v2057_v15 = vshrl.u32 %v1945_v20, 16  ;;  %v2060_v29 = vshll.u32 %v1945_v20, 16  ;;  %v3182_v10 = vsel %vm6124_vm9, %v3177_v63, %v7472_v16 }
 0x12f   : > { %4699 = vmatprep.mubr.bf16.mxu1 %v5914_v41  ;;  %3365 = vst.msk [vmem:[#allocation3 + $0x5c] sm:$0xf] %vm1436_vm14, %v3274_v47  ;;  %v1623_v34 = vsel %vm6430_vm13, %v1621_v2, %v1622_v49  ;;  %v2066_v44 = vshll.u32 %v1946_v55, 16  ;;  %v2872_v7 = vld [vmem:[#allocation2 + $0xb4] sm:$0xf]  ;;  %v7509_v60 = vrot.slane %v3186_v32, 4  ;;  %v2622_v26 = vsel %vm6430_vm13, %v5360_v9, %v2621_v27  ;;  %3313 = vrot.lane.b32.xlu0 %v3182_v10, %s5987_s28  ;;  %v1837_v32 = vpop.permute.xlu0 %1836 }
 0x130   : > { %v2873_v33 = vld [vmem:[#allocation2 + $0xb8] sm:$0xf]  ;;  %4700 = vmatmul.mubr.bf16.gmra.mxu1 %v5386_v6  ;;  %1727 = vst.msk [vmem:[#allocation3 + $0x130] sm:$0xf] %vm216_vm0, %v1623_v34  ;;  %v2059_v54 = vrot.slane %v2057_v15, 4  ;;  %v2070_v18 = vshrl.u32 %v1946_v55, 16  ;;  %v1371_v34 = vpop.permute.xlu1 %1370 }
 0x131   : > { %v1947_v40 = vld [vmem:[#allocation2 + $0x38] sm:$0x1]  ;;  %v2062_v30 = vrot.slane %v2060_v29, 5  ;;  %v2068_v3 = vrot.slane %v2066_v44, 5  ;;  %v7512_v39 = vrot.slane %v2621_v27, 4  ;;  %v3194_v45 = vshrl.u32 %v2872_v7, 16 }
 0x132   : > { %v2775_v17 = vld [vmem:[#allocation2 + $0x3c] sm:$0xf]  ;;  %2741 = vst.msk [vmem:[#allocation3 + $0x6c] sm:$0xf] %vm1436_vm14, %v2651_v8  ;;  %v7515_v23 = vld [vmem:[#allocation2 + $0xb0] sm:$0x1]  ;;  %v3192_v5 = vsel %vm6124_vm9, %v7509_v60, %v7496_v12 }
 0x133   : > { %v3197_v36 = vshll.u32 %v2872_v7, 16  ;;  %v3203_v52 = vshll.u32 %v2873_v33, 16  ;;  %v3207_v25 = vshrl.u32 %v2873_v33, 16  ;;  %v2072_v38 = vrot.slane %v2070_v18, 4  ;;  %2807 = vst.msk [vmem:[#allocation3 + $0x84] sm:$0xf] %vm216_vm0, %v2775_v17  ;;  %2692 = vrot.lane.b32.xlu0 %v2622_v26, %s5987_s28  ;;  %v2653_v60 = vpop.permute.xlu0 %2652  ;;  %3315 = vrot.lane.b32.xlu1 %v3192_v5, %s5987_s28 }
 0x134   : > { %v2874_v31 = vld [vmem:[#allocation2 + $0xbc] sm:$0x1]  ;;  %1451 = vst.msk [vmem:[#allocation3 + $0x118] sm:$0xf] %vm1436_vm14, %v1369_v21  ;;  %v2063_v0 = vor.u32 %v2062_v30, %v2059_v54  ;;  %v3196_v16 = vrot.slane %v3194_v45, 4  ;;  %v2076_v46 = vshll.u32 %v1947_v40, 16 }
 0x135   : > { %v7522_v61 = vld [vmem:[#allocation2 + $0xb4] sm:$0xe]  ;;  %v7524_v50 = vld [vmem:[#allocation2 + $0xb8] sm:$0xf]  ;;  %v3701_v35 = vld [vmem:[#allocation3 + $0xf0] sm:$0xff]  ;;  %v3199_v62 = vrot.slane %v3197_v36, 5  ;;  %v2073_v4 = vor.u32 %v2072_v38, %v2068_v3 }
 0x136   : > { %v3205_v28 = vrot.slane %v3203_v52, 5  ;;  %v3209_v22 = vrot.slane %v3207_v25, 4  ;;  %v2776_v43 = vld [vmem:[#allocation2 + $0x40] sm:$0xf]  ;;  %v2064_v24 = vrot.slane %v2063_v0, 4  ;;  %v2078_v19 = vrot.slane %v2076_v46, 5  ;;  %v1839_v0 = vpop.permute.xlu1 %1838 }
 0x137   : > { %v3704_v13 = vld [vmem:[#allocation3 + $0x104] sm:$0xff]  ;;  %v3213_v59 = vshll.u32 %v2874_v31, 16  ;;  %2808 = vst.msk [vmem:[#allocation3 + $0x98] sm:$0xf] %vm216_vm0, %v2776_v43  ;;  %v3200_v20 = vor.u32 %v3199_v62, %v3196_v16  ;;  %v2074_v55 = vrot.slane %v2073_v4, 4  ;;  %v2624_v63 = vrot.slane %v7515_v23, 5 }
 0x138   : > { %v5916_v1 = vld [vmem:[#allocation3 + $0xf4] ss:$20 sps:$4 sm:$0xff]   ;;  %3366 = vst.msk [vmem:[#allocation3 + $0x70] sm:$0xf] %vm1436_vm14, %v3276_v57  ;;  %v5409_v2 = vcombine.low %v3701_v35, %v3704_v13  ;;  %v3210_v56 = vor.u32 %v3209_v22, %v3205_v28  ;;  %v2476_v41 = vld [vmem:[#allocation2 + $0xbc] sm:$0x1]  ;;  %v2069_v48 = vsel %vm6124_vm9, %v2064_v24, %v2068_v3  ;;  %v3278_v35 = vpop.permute.xlu0 %3277 }
 0x139   : > { %v857_v58 = vld [vmem:[#allocation2 + $0x60] sm:$0xf]  ;;  %4578 = vmatprep.mubr.bf16.mxu0 %v5916_v1  ;;  %1918 = vst.msk [vmem:[#allocation3 + $0x11c] sm:$0xf] %vm1436_vm14, %v1837_v32  ;;  %v7538_v9 = vrot.slane %v3213_v59, 5  ;;  %v2628_v49 = vrot.slane %v7524_v50, 5  ;;  %v2079_v12 = vsel %vm6124_vm9, %v2074_v55, %v2078_v19  ;;  %v2625_v3 = vsel %vm6430_vm13, %v7512_v39, %v2624_v63 }
 0x13a   : > { %889 = vst.msk [vmem:[#allocation3 + $0x140] sm:$0xf] %vm216_vm0, %v857_v58  ;;  %v2875_v6 = vld [vmem:[#allocation2 + $0xc0] sm:$0xf]  ;;  %4579 = vmatmul.mubr.bf16.gmra.mxu0 %v5409_v2  ;;  %2406 = vst.msk [vmem:[#allocation3 + $0x80] sm:$0xf] %vm216_vm0, %v2069_v48  ;;  %2694 = vrot.lane.b32.xlu1 %v2625_v3, %s5987_s28  ;;  %v2655_v55 = vpop.permute.xlu1 %2654 }
 0x13b   : > { %v3201_v47 = vrot.slane %v3200_v20, 4  ;;  %v7546_v27 = vrot.slane %v3210_v56, 4  ;;  %v5361_v15 = vrot.slane %v7522_v61, 9  ;;  %v2876_v14 = vld [vmem:[#allocation2 + $0xc4] sm:$0xf]  ;;  %v2630_v29 = vrot.slane %v2628_v49, 4 }
 0x13c   : > { %2407 = vst.msk [vmem:[#allocation3 + $0x94] sm:$0xf] %vm216_vm0, %v2079_v12  ;;  %v2631_v44 = vrot.slane %v2476_v41, 5  ;;  %v3218_v7 = vshrl.u32 %v2875_v6, 16  ;;  %v3221_v33 = vshll.u32 %v2875_v6, 16  ;;  %v3227_v18 = vshll.u32 %v2876_v14, 16 }
 0x13d   : > { %v858_v10 = vld [vmem:[#allocation2 + $0x64] sm:$0xf]  ;;  %1452 = vst.msk [vmem:[#allocation3 + $0x12c] sm:$0xf] %vm1436_vm14, %v1371_v34  ;;  %v3206_v54 = vsel %vm6124_vm9, %v3201_v47, %v3205_v28  ;;  %v3231_v40 = vshrl.u32 %v2876_v14, 16  ;;  %v3678_v36 = vld [vmem:[#allocation3 + $0x58] sm:$0xff]  ;;  %v3216_v39 = vsel %vm6124_vm9, %v7546_v27, %v7538_v9  ;;  %v2629_v61 = vsel %vm6430_vm13, %v5361_v15, %v2628_v49  ;;  %v1373_v9 = vpop.permute.xlu0 %1372 }
 0x13e   : > { %890 = vst.msk [vmem:[#allocation3 + $0x154] sm:$0xf] %vm216_vm0, %v858_v10  ;;  %v1493_v8 = vld [vmem:[#allocation2 + $0x60] sm:$0xe]  ;;  %v1494_v30 = vld [vmem:[#allocation2 + $0x64] sm:$0xf]  ;;  %3317 = vrot.lane.b32.xlu0 %v3206_v54, %s5987_s28  ;;  %v7572_v50 = vsel %vm6430_vm13, %v2630_v29, %v2631_v44  ;;  %3319 = vrot.lane.b32.xlu1 %v3216_v39, %s5987_s28 }
 0x13f   : > { %2742 = vst.msk [vmem:[#allocation3 + $0x80] sm:$0xf] %vm1436_vm14, %v2653_v60  ;;  %v3220_v45 = vrot.slane %v3218_v7, 4  ;;  %v3223_v17 = vrot.slane %v3221_v33, 5  ;;  %v5339_v21 = vrot.slane %v1493_v8, 9  ;;  %v3229_v52 = vrot.slane %v3227_v18, 5 }
 0x140   : > { %v838_v23 = vld [vmem:[#allocation2 + $0xc8] sm:$0x1]  ;;  %v1626_v25 = vrot.slane %v1494_v30, 5  ;;  %v3233_v31 = vrot.slane %v3231_v40, 4  ;;  %v2477_v26 = vld [vmem:[#allocation2 + $0xc0] sm:$0xe]  ;;  %v3280_v40 = vpop.permute.xlu1 %3279 }
 0x141   : > { %v839_v38 = vsel %vm6177_vm10, %v674_v42, %v838_v23  ;;  %v3681_v16 = vld [vmem:[#allocation3 + $0x6c] sm:$0xff]  ;;  %v3224_v11 = vor.u32 %v3223_v17, %v3220_v45  ;;  %1919 = vst.msk [vmem:[#allocation3 + $0x130] sm:$0xf] %vm1436_vm14, %v1839_v0  ;;  %v5362_v4 = vrot.slane %v2477_v26, 9  ;;  %v1948_v43 = vld [vmem:[#allocation2 + $0x3c] sm:$0xf]  ;;  %v1841_v23 = vpop.permute.xlu0 %1840 }
 0x142   : > { %v5919_v46 = vld [vmem:[#allocation3 + $0x5c] ss:$20 sps:$4 sm:$0xff]   ;;  %840 = vst [vmem:[#allocation2 + $0xc8] sm:$0x1] %v839_v38  ;;  %v2478_v51 = vld [vmem:[#allocation2 + $0xc4] sm:$0xf]  ;;  %v5391_v42 = vcombine.low %v3678_v36, %v3681_v16  ;;  %v1627_v62 = vsel %vm6430_vm13, %v5339_v21, %v1626_v25  ;;  %v3234_v28 = vor.u32 %v3233_v31, %v3229_v52  ;;  %2696 = vrot.lane.b32.xlu0 %v2629_v61, %s5987_s28 }
 0x143   : > { %v1495_v22 = vld [vmem:[#allocation2 + $0x68] sm:$0x1]  ;;  %4707 = vmatprep.mubr.bf16.mxu1 %v5919_v46  ;;  %3367 = vst.msk [vmem:[#allocation3 + $0x84] sm:$0xf] %vm1436_vm14, %v3278_v35  ;;  %v3225_v57 = vrot.slane %v3224_v11, 4  ;;  %v1628_v13 = vrot.slane %v1626_v25, 4  ;;  %2698 = vrot.lane.b32.xlu1 %v7572_v50, %s5987_s28 }
 0x144   : > { %1728 = vst.msk [vmem:[#allocation3 + $0x144] sm:$0xf] %vm216_vm0, %v1627_v62  ;;  %v1629_v1 = vrot.slane %v1495_v22, 5  ;;  %v1949_v5 = vld [vmem:[#allocation2 + $0x40] sm:$0xf]  ;;  %v2081_v24 = vshrl.u32 %v1948_v43, 16  ;;  %4708 = vmatmul.mubr.bf16.gmra.mxu1 %v5391_v42  ;;  %v1375_v35 = vpop.permute.xlu1 %1374 }
 0x145   : > { %v7581_v19 = vrot.slane %v3234_v28, 4  ;;  %v2635_v59 = vrot.slane %v2478_v51, 5  ;;  %v2084_v32 = vshll.u32 %v1948_v43, 16  ;;  %v2090_v2 = vshll.u32 %v1949_v5, 16  ;;  %v2878_v20 = vld [vmem:[#allocation2 + $0xcc] sm:$0xf] }
 0x146   : > { %v3230_v56 = vsel %vm6124_vm9, %v3225_v57, %v3229_v52  ;;  %v1630_v58 = vsel %vm6430_vm13, %v1628_v13, %v1629_v1  ;;  %v2083_v41 = vrot.slane %v2081_v24, 4  ;;  %v2094_v48 = vshrl.u32 %v1949_v5, 16  ;;  %v2879_v63 = vld [vmem:[#allocation2 + $0xd0] sm:$0xf]  ;;  %2743 = vst.msk [vmem:[#allocation3 + $0x94] sm:$0xf] %vm1436_vm14, %v2655_v55  ;;  %v2657_v57 = vpop.permute.xlu0 %2656 }
 0x147   : > { %1729 = vst.msk [vmem:[#allocation3 + $0x158] sm:$0xf] %vm216_vm0, %v1630_v58  ;;  %v2086_v49 = vrot.slane %v2084_v32, 5  ;;  %v2092_v6 = vrot.slane %v2090_v2, 5  ;;  %v7589_v47 = vrot.slane %v2635_v59, 4  ;;  %v3242_v12 = vshrl.u32 %v2878_v20, 16  ;;  %3321 = vrot.lane.b32.xlu0 %v3230_v56, %s5987_s28 }
 0x148   : > { %1453 = vst.msk [vmem:[#allocation3 + $0x140] sm:$0xf] %vm1436_vm14, %v1373_v9  ;;  %v3707_v27 = vld [vmem:[#allocation3 + $0x118] sm:$0xff]  ;;  %v3245_v15 = vshll.u32 %v2878_v20, 16  ;;  %v3251_v14 = vshll.u32 %v2879_v63, 16  ;;  %v3255_v34 = vshrl.u32 %v2879_v63, 16  ;;  %v2636_v33 = vsel %vm6430_vm13, %v5362_v4, %v2635_v59 }
 0x149   : > { %v1950_v29 = vld [vmem:[#allocation2 + $0x44] sm:$0x1]  ;;  %v2096_v44 = vrot.slane %v2094_v48, 4  ;;  %v2877_v7 = vld [vmem:[#allocation2 + $0xc8] sm:$0x1]  ;;  %v2087_v10 = vor.u32 %v2086_v49, %v2083_v41  ;;  %v3244_v54 = vrot.slane %v3242_v12, 4  ;;  %v1843_v49 = vpop.permute.xlu1 %1842 }
 0x14a   : > { %v2479_v60 = vld [vmem:[#allocation2 + $0xc8] sm:$0x1]  ;;  %v2100_v18 = vshll.u32 %v1950_v29, 16  ;;  %v3237_v3 = vshll.u32 %v2877_v7, 16  ;;  %v3247_v17 = vrot.slane %v3245_v15, 5  ;;  %v3253_v25 = vrot.slane %v3251_v14, 5 }
 0x14b   : > { %v3710_v8 = vld [vmem:[#allocation3 + $0x12c] sm:$0xff]  ;;  %v2638_v45 = vrot.slane %v2479_v60, 5  ;;  %v2097_v21 = vor.u32 %v2096_v44, %v2092_v6  ;;  %3368 = vst.msk [vmem:[#allocation3 + $0x98] sm:$0xf] %vm1436_vm14, %v3280_v40  ;;  %v2088_v52 = vrot.slane %v2087_v10, 4  ;;  %2700 = vrot.lane.b32.xlu0 %v2636_v33, %s5987_s28  ;;  %v3257_v11 = vrot.slane %v3255_v34, 4  ;;  %v3282_v34 = vpop.permute.xlu0 %3281 }
 0x14c   : > { %v5921_v30 = vld [vmem:[#allocation3 + $0x11c] ss:$20 sps:$4 sm:$0xff]   ;;  %v5414_v36 = vcombine.low %v3707_v27, %v3710_v8  ;;  %v2102_v38 = vrot.slane %v2100_v18, 5  ;;  %1920 = vst.msk [vmem:[#allocation3 + $0x144] sm:$0xf] %vm1436_vm14, %v1841_v23  ;;  %v3239_v26 = vrot.slane %v3237_v3, 5  ;;  %v3248_v0 = vor.u32 %v3247_v17, %v3244_v54 }
 0x14d   : > { %v2777_v31 = vld [vmem:[#allocation2 + $0x48] sm:$0xf]  ;;  %4586 = vmatprep.mubr.bf16.mxu0 %v5921_v30  ;;  %v2098_v16 = vrot.slane %v2097_v21, 4  ;;  %v2880_v46 = vld [vmem:[#allocation2 + $0xd4] sm:$0x1]  ;;  %v2093_v61 = vsel %vm6124_vm9, %v2088_v52, %v2092_v6  ;;  %v3258_v13 = vor.u32 %v3257_v11, %v3253_v25  ;;  %v3684_v56 = vld [vmem:[#allocation3 + $0x80] sm:$0xff]  ;;  %v2659_v3 = vpop.permute.xlu1 %2658 }
 0x14e   : > { %2809 = vst.msk [vmem:[#allocation3 + $0xac] sm:$0xf] %vm216_vm0, %v2777_v31  ;;  %v2778_v39 = vld [vmem:[#allocation2 + $0x4c] sm:$0xf]  ;;  %4587 = vmatmul.mubr.bf16.gmra.mxu0 %v5414_v36  ;;  %v3261_v51 = vshll.u32 %v2880_v46, 16  ;;  %v3240_v62 = vsel %vm6124_vm9, %v7581_v19, %v3239_v26  ;;  %v3249_v28 = vrot.slane %v3248_v0, 4  ;;  %v2639_v19 = vsel %vm6430_vm13, %v7589_v47, %v2638_v45 }
 0x14f   : > { %2810 = vst.msk [vmem:[#allocation3 + $0xc0] sm:$0xf] %vm216_vm0, %v2778_v39  ;;  %v859_v50 = vld [vmem:[#allocation2 + $0x6c] sm:$0xf]  ;;  %v860_v42 = vld [vmem:[#allocation2 + $0x70] sm:$0xf]  ;;  %v2103_v4 = vsel %vm6124_vm9, %v2098_v16, %v2102_v38  ;;  %3323 = vrot.lane.b32.xlu1 %v3240_v62, %s5987_s28  ;;  %v1377_v52 = vpop.permute.xlu0 %1376 }
 0x150   : > { %2408 = vst.msk [vmem:[#allocation3 + $0xa8] sm:$0xf] %vm216_vm0, %v2093_v61  ;;  %891 = vst.msk [vmem:[#allocation3 + $0x168] sm:$0xf] %vm216_vm0, %v859_v50  ;;  %v1496_v22 = vld [vmem:[#allocation2 + $0x6c] sm:$0xe]  ;;  %v3254_v59 = vsel %vm6124_vm9, %v3249_v28, %v3253_v25 }
 0x151   : > { %892 = vst.msk [vmem:[#allocation3 + $0x17c] sm:$0xf] %vm216_vm0, %v860_v42  ;;  %v1497_v43 = vld [vmem:[#allocation2 + $0x70] sm:$0xf]  ;;  %2409 = vst.msk [vmem:[#allocation3 + $0xbc] sm:$0xf] %vm216_vm0, %v2103_v4  ;;  %3325 = vrot.lane.b32.xlu0 %v3254_v59, %s5987_s28  ;;  %v3284_v62 = vpop.permute.xlu1 %3283 }
 0x152   : > { %1454 = vst.msk [vmem:[#allocation3 + $0x154] sm:$0xf] %vm1436_vm14, %v1375_v35  ;;  %v5340_v1 = vrot.slane %v1496_v22, 9  ;;  %v1633_v5 = vrot.slane %v1497_v43, 5  ;;  %v1498_v24 = vld [vmem:[#allocation2 + $0x74] sm:$0x1] }
 0x153   : > { %2744 = vst.msk [vmem:[#allocation3 + $0xa8] sm:$0xf] %vm1436_vm14, %v2657_v57  ;;  %v3263_v32 = vrot.slane %v3261_v51, 5  ;;  %v1636_v2 = vrot.slane %v1498_v24, 5  ;;  %v1951_v20 = vld [vmem:[#allocation2 + $0x48] sm:$0xf]  ;;  %2702 = vrot.lane.b32.xlu1 %v2639_v19, %s5987_s28 }
 0x154   : > { %v1952_v55 = vld [vmem:[#allocation2 + $0x4c] sm:$0xf]  ;;  %v3259_v58 = vrot.slane %v3258_v13, 4  ;;  %v1634_v41 = vsel %vm6430_vm13, %v5340_v1, %v1633_v5  ;;  %v1635_v48 = vrot.slane %v1633_v5, 4  ;;  %v2105_v63 = vshrl.u32 %v1951_v20, 16  ;;  %v3713_v28 = vld [vmem:[#allocation3 + $0x140] sm:$0xff]  ;;  %v1845_v5 = vpop.permute.xlu0 %1844 }
 0x155   : > { %v1953_v9 = vld [vmem:[#allocation2 + $0x50] sm:$0x1]  ;;  %1730 = vst.msk [vmem:[#allocation3 + $0x16c] sm:$0xf] %vm216_vm0, %v1634_v41  ;;  %v2108_v12 = vshll.u32 %v1951_v20, 16  ;;  %v2114_v27 = vshll.u32 %v1952_v55, 16 }
 0x156   : > { %v3687_v6 = vld [vmem:[#allocation3 + $0x94] sm:$0xff]  ;;  %v2118_v15 = vshrl.u32 %v1952_v55, 16  ;;  %1921 = vst.msk [vmem:[#allocation3 + $0x158] sm:$0xf] %vm1436_vm14, %v1843_v49  ;;  %v1637_v29 = vsel %vm6430_vm13, %v1635_v48, %v1636_v2  ;;  %v2107_v44 = vrot.slane %v2105_v63, 4  ;;  %v2124_v18 = vshll.u32 %v1953_v9, 16  ;;  %v1379_v49 = vpop.permute.xlu1 %1378 }
 0x157   : > { %v5923_v47 = vld [vmem:[#allocation3 + $0x84] ss:$20 sps:$4 sm:$0xff]   ;;  %v5396_v14 = vcombine.low %v3684_v56, %v3687_v6  ;;  %v2779_v7 = vld [vmem:[#allocation2 + $0x54] sm:$0xf]  ;;  %v2780_v33 = vld [vmem:[#allocation2 + $0x58] sm:$0xf]  ;;  %v3264_v8 = vsel %vm6124_vm9, %v3259_v58, %v3263_v32 }
 0x158   : > { %4715 = vmatprep.mubr.bf16.mxu1 %v5923_v47  ;;  %3369 = vst.msk [vmem:[#allocation3 + $0xac] sm:$0xf] %vm1436_vm14, %v3282_v34  ;;  %v2110_v10 = vrot.slane %v2108_v12, 5  ;;  %v2116_v60 = vrot.slane %v2114_v27, 5  ;;  %v2120_v54 = vrot.slane %v2118_v15, 4  ;;  %v2126_v21 = vrot.slane %v2124_v18, 5  ;;  %3327 = vrot.lane.b32.xlu1 %v3264_v8, %s5987_s28 }
 0x159   : > { %1731 = vst.msk [vmem:[#allocation3 + $0x180] sm:$0xf] %vm216_vm0, %v1637_v29  ;;  %2811 = vst.msk [vmem:[#allocation3 + $0xd4] sm:$0xf] %vm216_vm0, %v2779_v7  ;;  %v861_v40 = vld [vmem:[#allocation2 + $0x78] sm:$0xf]  ;;  %4716 = vmatmul.mubr.bf16.gmra.mxu1 %v5396_v14  ;;  %v2661_v14 = vpop.permute.xlu0 %2660 }
 0x15a   : > { %2812 = vst.msk [vmem:[#allocation3 + $0xe8] sm:$0xf] %vm216_vm0, %v2780_v33  ;;  %893 = vst.msk [vmem:[#allocation3 + $0x190] sm:$0xf] %vm216_vm0, %v861_v40  ;;  %v862_v30 = vld [vmem:[#allocation2 + $0x7c] sm:$0xf]  ;;  %v2111_v45 = vor.u32 %v2110_v10, %v2107_v44  ;;  %v2121_v17 = vor.u32 %v2120_v54, %v2116_v60 }
 0x15b   : > { %894 = vst.msk [vmem:[#allocation3 + $0x1a4] sm:$0xf] %vm216_vm0, %v862_v30  ;;  %v1499_v23 = vld [vmem:[#allocation2 + $0x78] sm:$0xe]  ;;  %v1500_v36 = vld [vmem:[#allocation2 + $0x7c] sm:$0xf] }
 0x15c   : > { %2745 = vst.msk [vmem:[#allocation3 + $0xbc] sm:$0xf] %vm1436_vm14, %v2659_v3  ;;  %v5341_v25 = vrot.slane %v1499_v23, 9  ;;  %v1640_v38 = vrot.slane %v1500_v36, 5  ;;  %v1501_v31 = vld [vmem:[#allocation2 + $0x80] sm:$0x1] }
 0x15d   : > { %v1954_v26 = vld [vmem:[#allocation2 + $0x54] sm:$0xf]  ;;  %1455 = vst.msk [vmem:[#allocation3 + $0x168] sm:$0xf] %vm1436_vm14, %v1377_v52  ;;  %v2112_v0 = vrot.slane %v2111_v45, 4  ;;  %v2122_v16 = vrot.slane %v2121_v17, 4  ;;  %v1847_v45 = vpop.permute.xlu1 %1846 }
 0x15e   : > { %v1643_v46 = vrot.slane %v1501_v31, 5  ;;  %v1955_v39 = vld [vmem:[#allocation2 + $0x58] sm:$0xf]  ;;  %v2129_v61 = vshrl.u32 %v1954_v26, 16  ;;  %v1641_v11 = vsel %vm6430_vm13, %v5341_v25, %v1640_v38  ;;  %v1642_v51 = vrot.slane %v1640_v38, 4  ;;  %v3716_v4 = vld [vmem:[#allocation3 + $0x154] sm:$0xff]  ;;  %v3286_v31 = vpop.permute.xlu0 %3285 }
 0x15f   : > { %v2132_v50 = vshll.u32 %v1954_v26, 16  ;;  %v2138_v42 = vshll.u32 %v1955_v39, 16  ;;  %v1956_v35 = vld [vmem:[#allocation2 + $0x5c] sm:$0x1]  ;;  %v2117_v43 = vsel %vm6124_vm9, %v2112_v0, %v2116_v60  ;;  %v2127_v57 = vsel %vm6124_vm9, %v2122_v16, %v2126_v21  ;;  %1732 = vst.msk [vmem:[#allocation3 + $0x194] sm:$0xf] %vm216_vm0, %v1641_v11 }
 0x160   : > { %v5926_v22 = vld [vmem:[#allocation3 + $0x144] ss:$20 sps:$4 sm:$0xff]   ;;  %v2131_v13 = vrot.slane %v2129_v61, 4  ;;  %v2142_v1 = vshrl.u32 %v1955_v39, 16  ;;  %3370 = vst.msk [vmem:[#allocation3 + $0xc0] sm:$0xf] %vm1436_vm14, %v3284_v62  ;;  %v5419_v24 = vcombine.low %v3713_v28, %v3716_v4  ;;  %v1644_v19 = vsel %vm6430_vm13, %v1642_v51, %v1643_v46 }
 0x161   : > { %2410 = vst.msk [vmem:[#allocation3 + $0xd0] sm:$0xf] %vm216_vm0, %v2117_v43  ;;  %2411 = vst.msk [vmem:[#allocation3 + $0xe4] sm:$0xf] %vm216_vm0, %v2127_v57  ;;  %v2134_v59 = vrot.slane %v2132_v50, 5  ;;  %v2140_v32 = vrot.slane %v2138_v42, 5  ;;  %4594 = vmatprep.mubr.bf16.mxu0 %v5926_v22  ;;  %v2663_v4 = vpop.permute.xlu1 %2662 }
 0x162   : > { %v2781_v2 = vld [vmem:[#allocation2 + $0x60] sm:$0xf]  ;;  %1922 = vst.msk [vmem:[#allocation3 + $0x16c] sm:$0xf] %vm1436_vm14, %v1845_v5  ;;  %v2144_v20 = vrot.slane %v2142_v1, 4  ;;  %v2148_v55 = vshll.u32 %v1956_v35, 16  ;;  %4595 = vmatmul.mubr.bf16.gmra.mxu0 %v5419_v24  ;;  %v1381_v5 = vpop.permute.xlu0 %1380 }
 0x163   : > { %1733 = vst.msk [vmem:[#allocation3 + $0x1a8] sm:$0xf] %vm216_vm0, %v1644_v19  ;;  %2813 = vst.msk [vmem:[#allocation3 + $0xfc] sm:$0xf] %vm216_vm0, %v2781_v2  ;;  %v2782_v56 = vld [vmem:[#allocation2 + $0x64] sm:$0xf]  ;;  %v2135_v41 = vor.u32 %v2134_v59, %v2131_v13 }
 0x164   : > { %v863_v58 = vld [vmem:[#allocation2 + $0x84] sm:$0xf]  ;;  %2814 = vst.msk [vmem:[#allocation3 + $0x110] sm:$0xf] %vm216_vm0, %v2782_v56  ;;  %v864_v48 = vld [vmem:[#allocation2 + $0x88] sm:$0xf]  ;;  %v2145_v6 = vor.u32 %v2144_v20, %v2140_v32 }
 0x165   : > { %895 = vst.msk [vmem:[#allocation3 + $0x1b8] sm:$0xf] %vm216_vm0, %v863_v58  ;;  %v1502_v63 = vld [vmem:[#allocation2 + $0x84] sm:$0xe]  ;;  %v1503_v9 = vld [vmem:[#allocation2 + $0x88] sm:$0xf] }
 0x166   : > { %v2150_v47 = vrot.slane %v2148_v55, 5  ;;  %896 = vst.msk [vmem:[#allocation3 + $0x1cc] sm:$0xf] %vm216_vm0, %v864_v48  ;;  %v5342_v12 = vrot.slane %v1502_v63, 9  ;;  %v1647_v27 = vrot.slane %v1503_v9, 5  ;;  %v2136_v34 = vrot.slane %v2135_v41, 4 }
 0x167   : > { %v1504_v15 = vld [vmem:[#allocation2 + $0x8c] sm:$0x1]  ;;  %1456 = vst.msk [vmem:[#allocation3 + $0x17c] sm:$0xf] %vm1436_vm14, %v1379_v49  ;;  %v1957_v44 = vld [vmem:[#allocation2 + $0x60] sm:$0xf] }
 0x168   : > { %v1650_v29 = vrot.slane %v1504_v15, 5  ;;  %v1958_v7 = vld [vmem:[#allocation2 + $0x64] sm:$0xf]  ;;  %2746 = vst.msk [vmem:[#allocation3 + $0xd0] sm:$0xf] %vm1436_vm14, %v2661_v14  ;;  %v2146_v33 = vrot.slane %v2145_v6, 4  ;;  %v1648_v10 = vsel %vm6430_vm13, %v5342_v12, %v1647_v27  ;;  %v2141_v40 = vsel %vm6124_vm9, %v2136_v34, %v2140_v32  ;;  %v3288_v12 = vpop.permute.xlu1 %3287 }
 0x169   : > { %v1649_v60 = vrot.slane %v1647_v27, 4  ;;  %v2153_v54 = vshrl.u32 %v1957_v44, 16  ;;  %v3690_v18 = vld [vmem:[#allocation3 + $0xa8] sm:$0xff]  ;;  %1734 = vst.msk [vmem:[#allocation3 + $0x1bc] sm:$0xf] %vm216_vm0, %v1648_v10  ;;  %v2156_v8 = vshll.u32 %v1957_v44, 16 }
 0x16a   : > { %v2162_v30 = vshll.u32 %v1958_v7, 16  ;;  %v2166_v3 = vshrl.u32 %v1958_v7, 16  ;;  %v3693_v17 = vld [vmem:[#allocation3 + $0xbc] sm:$0xff]  ;;  %2412 = vst.msk [vmem:[#allocation3 + $0xf8] sm:$0xf] %vm216_vm0, %v2141_v40  ;;  %v2151_v23 = vsel %vm6124_vm9, %v2146_v33, %v2150_v47  ;;  %v3719_v41 = vld [vmem:[#allocation3 + $0x168] sm:$0xff]  ;;  %v1849_v7 = vpop.permute.xlu0 %1848 }
 0x16b   : > { %v5928_v21 = vld [vmem:[#allocation3 + $0xac] ss:$20 sps:$4 sm:$0xff]   ;;  %v1651_v36 = vsel %vm6430_vm13, %v1649_v60, %v1650_v29  ;;  %v2155_v52 = vrot.slane %v2153_v54, 4  ;;  %v1959_v25 = vld [vmem:[#allocation2 + $0x68] sm:$0x1]  ;;  %v5401_v38 = vcombine.low %v3690_v18, %v3693_v17  ;;  %v2158_v26 = vrot.slane %v2156_v8, 5 }
 0x16c   : > { %1923 = vst.msk [vmem:[#allocation3 + $0x180] sm:$0xf] %vm1436_vm14, %v1847_v45  ;;  %v2164_v0 = vrot.slane %v2162_v30, 5  ;;  %v2168_v16 = vrot.slane %v2166_v3, 4  ;;  %v2783_v46 = vld [vmem:[#allocation2 + $0x6c] sm:$0xf]  ;;  %4723 = vmatprep.mubr.bf16.mxu1 %v5928_v21 }
 0x16d   : > { %2413 = vst.msk [vmem:[#allocation3 + $0x10c] sm:$0xf] %vm216_vm0, %v2151_v23  ;;  %1735 = vst.msk [vmem:[#allocation3 + $0x1d0] sm:$0xf] %vm216_vm0, %v1651_v36  ;;  %v2172_v39 = vshll.u32 %v1959_v25, 16  ;;  %4724 = vmatmul.mubr.bf16.gmra.mxu1 %v5401_v38  ;;  %v2159_v51 = vor.u32 %v2158_v26, %v2155_v52  ;;  %v1383_v25 = vpop.permute.xlu1 %1382 }
 0x16e   : > { %3371 = vst.msk [vmem:[#allocation3 + $0xd4] sm:$0xf] %vm1436_vm14, %v3286_v31  ;;  %v2784_v61 = vld [vmem:[#allocation2 + $0x70] sm:$0xf]  ;;  %v1960_v11 = vld [vmem:[#allocation2 + $0x6c] sm:$0xf]  ;;  %v2169_v50 = vor.u32 %v2168_v16, %v2164_v0 }
 0x16f   : > { %2815 = vst.msk [vmem:[#allocation3 + $0x124] sm:$0xf] %vm216_vm0, %v2783_v46  ;;  %2816 = vst.msk [vmem:[#allocation3 + $0x138] sm:$0xf] %vm216_vm0, %v2784_v61  ;;  %v1961_v42 = vld [vmem:[#allocation2 + $0x70] sm:$0xf] }
 0x170   : > { %v2177_v35 = vshrl.u32 %v1960_v11, 16  ;;  %v2180_v62 = vshll.u32 %v1960_v11, 16  ;;  %v1962_v28 = vld [vmem:[#allocation2 + $0x74] sm:$0x1]  ;;  %v2174_v22 = vrot.slane %v2172_v39, 5  ;;  %v2186_v43 = vshll.u32 %v1961_v42, 16  ;;  %v2665_v39 = vpop.permute.xlu0 %2664 }
 0x171   : > { %v2190_v57 = vshrl.u32 %v1961_v42, 16  ;;  %v2196_v13 = vshll.u32 %v1962_v28, 16  ;;  %v2785_v1 = vld [vmem:[#allocation2 + $0x78] sm:$0xf]  ;;  %2747 = vst.msk [vmem:[#allocation3 + $0xe4] sm:$0xf] %vm1436_vm14, %v2663_v4 }
 0x172   : > { %v2160_v24 = vrot.slane %v2159_v51, 4  ;;  %v2170_v19 = vrot.slane %v2169_v50, 4  ;;  %v2179_v59 = vrot.slane %v2177_v35, 4  ;;  %v2182_v32 = vrot.slane %v2180_v62, 5  ;;  %2817 = vst.msk [vmem:[#allocation3 + $0x14c] sm:$0xf] %vm216_vm0, %v2785_v1 }
 0x173   : > { %v2786_v2 = vld [vmem:[#allocation2 + $0x7c] sm:$0xf]  ;;  %1457 = vst.msk [vmem:[#allocation3 + $0x190] sm:$0xf] %vm1436_vm14, %v1381_v5  ;;  %v2188_v20 = vrot.slane %v2186_v43, 5  ;;  %v2192_v55 = vrot.slane %v2190_v57, 4 }
 0x174   : > { %v2198_v56 = vrot.slane %v2196_v13, 5  ;;  %2818 = vst.msk [vmem:[#allocation3 + $0x160] sm:$0xf] %vm216_vm0, %v2786_v2  ;;  %v1963_v58 = vld [vmem:[#allocation2 + $0x78] sm:$0xf]  ;;  %v2165_v48 = vsel %vm6124_vm9, %v2160_v24, %v2164_v0  ;;  %v2175_v63 = vsel %vm6124_vm9, %v2170_v19, %v2174_v22  ;;  %v2183_v9 = vor.u32 %v2182_v32, %v2179_v59  ;;  %v1851_v19 = vpop.permute.xlu1 %1850 }
 0x175   : > { %v1964_v49 = vld [vmem:[#allocation2 + $0x7c] sm:$0xf]  ;;  %v2201_v6 = vshrl.u32 %v1963_v58, 16  ;;  %v3393_v47 = vld [vmem:[#allocation2 + $0x18] sm:$0xe]  ;;  %v2193_v14 = vor.u32 %v2192_v55, %v2188_v20  ;;  %v2204_v34 = vshll.u32 %v1963_v58, 16 }
 0x176   : > { %v3722_v27 = vld [vmem:[#allocation3 + $0x17c] sm:$0xff]  ;;  %2414 = vst.msk [vmem:[#allocation3 + $0x120] sm:$0xf] %vm216_vm0, %v2165_v48  ;;  %2415 = vst.msk [vmem:[#allocation3 + $0x134] sm:$0xf] %vm216_vm0, %v2175_v63  ;;  %v2210_v29 = vshll.u32 %v1964_v49, 16 }
 0x177   : > { %v5930_v15 = vld [vmem:[#allocation3 + $0x16c] ss:$20 sps:$4 sm:$0xff]   ;;  %v2214_v44 = vshrl.u32 %v1964_v49, 16  ;;  %3372 = vst.msk [vmem:[#allocation3 + $0xe8] sm:$0xf] %vm1436_vm14, %v3288_v12  ;;  %v5424_v33 = vcombine.low %v3719_v41, %v3722_v27  ;;  %v2184_v10 = vrot.slane %v2183_v9, 4  ;;  %v3290_v41 = vpop.permute.xlu0 %3289 }
 0x178   : > { %v2203_v60 = vrot.slane %v2201_v6, 4  ;;  %v3394_v54 = vld [vmem:[#allocation2 + $0x1c] sm:$0xf]  ;;  %v5363_v18 = vrot.slane %v3393_v47, 9  ;;  %4602 = vmatprep.mubr.bf16.mxu0 %v5930_v15  ;;  %1924 = vst.msk [vmem:[#allocation3 + $0x194] sm:$0xf] %vm1436_vm14, %v1849_v7 }
 0x179   : > { %v2194_v40 = vrot.slane %v2193_v14, 4  ;;  %v2206_v8 = vrot.slane %v2204_v34, 5  ;;  %v2212_v30 = vrot.slane %v2210_v29, 5  ;;  %v3395_v3 = vld [vmem:[#allocation2 + $0x20] sm:$0x1]  ;;  %v3491_v45 = vrot.slane %v3394_v54, 5  ;;  %4603 = vmatmul.mubr.bf16.gmra.mxu0 %v5424_v33  ;;  %v2667_v33 = vpop.permute.xlu1 %2666 }
 0x17a   : > { %v2189_v17 = vsel %vm6124_vm9, %v2184_v10, %v2188_v20  ;;  %v3494_v21 = vrot.slane %v3395_v3, 5  ;;  %v1965_v23 = vld [vmem:[#allocation2 + $0x80] sm:$0x1]  ;;  %v2216_v36 = vrot.slane %v2214_v44, 4  ;;  %v2787_v52 = vld [vmem:[#allocation2 + $0x84] sm:$0xf] }
 0x17b   : > { %2416 = vst.msk [vmem:[#allocation3 + $0x148] sm:$0xf] %vm216_vm0, %v2189_v17  ;;  %v2199_v38 = vsel %vm6124_vm9, %v2194_v40, %v2198_v56  ;;  %v2207_v31 = vor.u32 %v2206_v8, %v2203_v60  ;;  %v3492_v26 = vsel %vm6430_vm13, %v5363_v18, %v3491_v45  ;;  %v3493_v0 = vrot.slane %v3491_v45, 4  ;;  %2819 = vst.msk [vmem:[#allocation3 + $0x174] sm:$0xf] %vm216_vm0, %v2787_v52  ;;  %v3696_v43 = vld [vmem:[#allocation3 + $0xd0] sm:$0xff]  ;;  %v1385_v18 = vpop.permute.xlu0 %1384 }
 0x17c   : > { %v3396_v16 = vld [vmem:[#allocation2 + $0x24] sm:$0xe]  ;;  %v3397_v46 = vld [vmem:[#allocation2 + $0x28] sm:$0xf]  ;;  %1458 = vst.msk [vmem:[#allocation3 + $0x1a4] sm:$0xf] %vm1436_vm14, %v1383_v25  ;;  %v2217_v61 = vor.u32 %v2216_v36, %v2212_v30 }
 0x17d   : > { %2417 = vst.msk [vmem:[#allocation3 + $0x15c] sm:$0xf] %vm216_vm0, %v2199_v38  ;;  %3633 = vst.msk [vmem:[#allocation3 + $0x10] sm:$0xf] %vm216_vm0, %v3492_v26  ;;  %v2220_v11 = vshll.u32 %v1965_v23, 16  ;;  %v5364_v50 = vrot.slane %v3396_v16, 9  ;;  %v3495_v62 = vsel %vm6430_vm13, %v3493_v0, %v3494_v21  ;;  %v3292_v38 = vpop.permute.xlu1 %3291 }
 0x17e   : > { %v3398_v51 = vld [vmem:[#allocation2 + $0x2c] sm:$0x1]  ;;  %v3498_v42 = vrot.slane %v3397_v46, 5  ;;  %2748 = vst.msk [vmem:[#allocation3 + $0xf8] sm:$0xf] %vm1436_vm14, %v2665_v39  ;;  %v2208_v35 = vrot.slane %v2207_v31, 4 }
 0x17f   : > { %v3501_v28 = vrot.slane %v3398_v51, 5  ;;  %v2788_v4 = vld [vmem:[#allocation2 + $0x88] sm:$0xf]  ;;  %v1966_v22 = vld [vmem:[#allocation2 + $0x84] sm:$0xf]  ;;  %v2218_v57 = vrot.slane %v2217_v61, 4  ;;  %v1853_v61 = vpop.permute.xlu0 %1852 }
 0x180   : > { %3634 = vst.msk [vmem:[#allocation3 + $0x24] sm:$0xf] %vm216_vm0, %v3495_v62  ;;  %v2222_v13 = vrot.slane %v2220_v11, 5  ;;  %v3499_v1 = vsel %vm6430_vm13, %v5364_v50, %v3498_v42  ;;  %v3500_v5 = vrot.slane %v3498_v42, 4  ;;  %2820 = vst.msk [vmem:[#allocation3 + $0x188] sm:$0xf] %vm216_vm0, %v2788_v4  ;;  %v2213_v2 = vsel %vm6124_vm9, %v2208_v35, %v2212_v30 }
 0x181   : > { %v1967_v24 = vld [vmem:[#allocation2 + $0x88] sm:$0xf]  ;;  %v3699_v59 = vld [vmem:[#allocation3 + $0xe4] sm:$0xff]  ;;  %3635 = vst.msk [vmem:[#allocation3 + $0x38] sm:$0xf] %vm216_vm0, %v3499_v1  ;;  %v2225_v20 = vshrl.u32 %v1966_v22, 16 }
 0x182   : > { %v5933_v32 = vld [vmem:[#allocation3 + $0xd4] ss:$20 sps:$4 sm:$0xff]   ;;  %v2228_v55 = vshll.u32 %v1966_v22, 16  ;;  %v2234_v56 = vshll.u32 %v1967_v24, 16  ;;  %1925 = vst.msk [vmem:[#allocation3 + $0x1a8] sm:$0xf] %vm1436_vm14, %v1851_v19  ;;  %v5406_v58 = vcombine.low %v3696_v43, %v3699_v59  ;;  %v2223_v48 = vsel %vm6124_vm9, %v2218_v57, %v2222_v13  ;;  %v1387_v57 = vpop.permute.xlu1 %1386 }
 0x183   : > { %2418 = vst.msk [vmem:[#allocation3 + $0x170] sm:$0xf] %vm216_vm0, %v2213_v2  ;;  %v3502_v63 = vsel %vm6430_vm13, %v3500_v5, %v3501_v28  ;;  %v2238_v9 = vshrl.u32 %v1967_v24, 16  ;;  %v3399_v49 = vld [vmem:[#allocation2 + $0x30] sm:$0xe]  ;;  %4731 = vmatprep.mubr.bf16.mxu1 %v5933_v32  ;;  %v2227_v47 = vrot.slane %v2225_v20, 4  ;;  %v2669_v59 = vpop.permute.xlu0 %2668 }
 0x184   : > { %v3400_v6 = vld [vmem:[#allocation2 + $0x34] sm:$0xf]  ;;  %3373 = vst.msk [vmem:[#allocation3 + $0xfc] sm:$0xf] %vm1436_vm14, %v3290_v41  ;;  %v2230_v12 = vrot.slane %v2228_v55, 5  ;;  %v2236_v27 = vrot.slane %v2234_v56, 5  ;;  %4732 = vmatmul.mubr.bf16.gmra.mxu1 %v5406_v58 }
 0x185   : > { %2419 = vst.msk [vmem:[#allocation3 + $0x184] sm:$0xf] %vm216_vm0, %v2223_v48  ;;  %3636 = vst.msk [vmem:[#allocation3 + $0x4c] sm:$0xf] %vm216_vm0, %v3502_v63  ;;  %v3401_v15 = vld [vmem:[#allocation2 + $0x38] sm:$0x1] }
 0x186   : > { %v5365_v14 = vrot.slane %v3399_v49, 9  ;;  %v3505_v34 = vrot.slane %v3400_v6, 5  ;;  %v3508_v29 = vrot.slane %v3401_v15, 5  ;;  %v1968_v44 = vld [vmem:[#allocation2 + $0x8c] sm:$0x1]  ;;  %v2240_v7 = vrot.slane %v2238_v9, 4 }
 0x187   : > { %v2231_v10 = vor.u32 %v2230_v12, %v2227_v47  ;;  %v2244_v60 = vshll.u32 %v1968_v44, 16  ;;  %v2789_v54 = vld [vmem:[#allocation2 + $0x90] sm:$0xf]  ;;  %2749 = vst.msk [vmem:[#allocation3 + $0x10c] sm:$0xf] %vm1436_vm14, %v2667_v33  ;;  %v3725_v31 = vld [vmem:[#allocation3 + $0x190] sm:$0xff]  ;;  %v1855_v12 = vpop.permute.xlu1 %1854  ;;  %v3294_v44 = vpop.permute.xlu0 %3293 }
 0x188   : > { %v3506_v40 = vsel %vm6430_vm13, %v5365_v14, %v3505_v34  ;;  %v3507_v8 = vrot.slane %v3505_v34, 4  ;;  %v2241_v30 = vor.u32 %v2240_v7, %v2236_v27  ;;  %2821 = vst.msk [vmem:[#allocation3 + $0x19c] sm:$0xf] %vm216_vm0, %v2789_v54  ;;  %v3402_v3 = vld [vmem:[#allocation2 + $0x3c] sm:$0xe] }
 0x189   : > { %v3403_v45 = vld [vmem:[#allocation2 + $0x40] sm:$0xf]  ;;  %1459 = vst.msk [vmem:[#allocation3 + $0x1b8] sm:$0xf] %vm1436_vm14, %v1385_v18  ;;  %v2232_v17 = vrot.slane %v2231_v10, 4  ;;  %v2246_v21 = vrot.slane %v2244_v60, 5 }
 0x18a   : > { %3637 = vst.msk [vmem:[#allocation3 + $0x60] sm:$0xf] %vm216_vm0, %v3506_v40  ;;  %v3509_v23 = vsel %vm6430_vm13, %v3507_v8, %v3508_v29  ;;  %v2242_v36 = vrot.slane %v2241_v30, 4  ;;  %v3404_v52 = vld [vmem:[#allocation2 + $0x44] sm:$0x1]  ;;  %v5366_v25 = vrot.slane %v3402_v3, 9 }
 0x18b   : > { %v3728_v26 = vld [vmem:[#allocation3 + $0x1a4] sm:$0xff]  ;;  %v2237_v16 = vsel %vm6124_vm9, %v2232_v17, %v2236_v27  ;;  %3638 = vst.msk [vmem:[#allocation3 + $0x74] sm:$0xf] %vm216_vm0, %v3509_v23  ;;  %v3512_v46 = vrot.slane %v3403_v45, 5  ;;  %v3515_v39 = vrot.slane %v3404_v52, 5  ;;  %v3702_v63 = vld [vmem:[#allocation3 + $0xf8] sm:$0xff]  ;;  %v2671_v17 = vpop.permute.xlu1 %2670 }
 0x18c   : > { %v5935_v0 = vld [vmem:[#allocation3 + $0x194] ss:$20 sps:$4 sm:$0xff]   ;;  %3374 = vst.msk [vmem:[#allocation3 + $0x110] sm:$0xf] %vm1436_vm14, %v3292_v38  ;;  %v5429_v11 = vcombine.low %v3725_v31, %v3728_v26  ;;  %v2247_v51 = vsel %vm6124_vm9, %v2242_v36, %v2246_v21  ;;  %1926 = vst.msk [vmem:[#allocation3 + $0x1bc] sm:$0xf] %vm1436_vm14, %v1853_v61  ;;  %v2673_v36 = vpop.permute.xlu0 %2672 }
 0x18d   : > { %2420 = vst.msk [vmem:[#allocation3 + $0x198] sm:$0xf] %vm216_vm0, %v2237_v16  ;;  %4610 = vmatprep.mubr.bf16.mxu0 %v5935_v0  ;;  %2421 = vst.msk [vmem:[#allocation3 + $0x1ac] sm:$0xf] %vm216_vm0, %v2247_v51  ;;  %v3513_v50 = vsel %vm6430_vm13, %v5366_v25, %v3512_v46  ;;  %v3514_v42 = vrot.slane %v3512_v46, 4 }
 0x18e   : > { %v2790_v35 = vld [vmem:[#allocation2 + $0x94] sm:$0xf]  ;;  %v1969_v62 = vld [vmem:[#allocation2 + $0x90] sm:$0xf]  ;;  %4611 = vmatmul.mubr.bf16.gmra.mxu0 %v5429_v11  ;;  %3639 = vst.msk [vmem:[#allocation3 + $0x88] sm:$0xf] %vm216_vm0, %v3513_v50 }
 0x18f   : > { %2822 = vst.msk [vmem:[#allocation3 + $0x1b0] sm:$0xf] %vm216_vm0, %v2790_v35  ;;  %v1970_v28 = vld [vmem:[#allocation2 + $0x94] sm:$0xf]  ;;  %v2249_v4 = vshrl.u32 %v1969_v62, 16  ;;  %v2252_v22 = vshll.u32 %v1969_v62, 16  ;;  %v3516_v13 = vsel %vm6430_vm13, %v3514_v42, %v3515_v39  ;;  %v3296_v35 = vpop.permute.xlu1 %3295 }
 0x190   : > { %v3405_v43 = vld [vmem:[#allocation2 + $0x48] sm:$0xe]  ;;  %v2258_v1 = vshll.u32 %v1970_v28, 16  ;;  %v2262_v5 = vshrl.u32 %v1970_v28, 16  ;;  %v3406_v24 = vld [vmem:[#allocation2 + $0x4c] sm:$0xf] }
 0x191   : > { %v3407_v19 = vld [vmem:[#allocation2 + $0x50] sm:$0x1]  ;;  %1460 = vst.msk [vmem:[#allocation3 + $0x1cc] sm:$0xf] %vm1436_vm14, %v1387_v57  ;;  %v2251_v32 = vrot.slane %v2249_v4, 4  ;;  %v2254_v2 = vrot.slane %v2252_v22, 5  ;;  %v3298_v57 = vpop.permute.xlu0 %3297 }
 0x192   : > { %3640 = vst.msk [vmem:[#allocation3 + $0x9c] sm:$0xf] %vm216_vm0, %v3516_v13  ;;  %v5367_v20 = vrot.slane %v3405_v43, 9  ;;  %v3519_v55 = vrot.slane %v3406_v24, 5  ;;  %v2260_v56 = vrot.slane %v2258_v1, 5  ;;  %v3522_v58 = vrot.slane %v3407_v19, 5 }
 0x193   : > { %2750 = vst.msk [vmem:[#allocation3 + $0x120] sm:$0xf] %vm1436_vm14, %v2669_v59  ;;  %v1971_v41 = vld [vmem:[#allocation2 + $0x98] sm:$0x1]  ;;  %v2264_v48 = vrot.slane %v2262_v5, 4  ;;  %v2255_v9 = vor.u32 %v2254_v2, %v2251_v32  ;;  %v3705_v27 = vld [vmem:[#allocation3 + $0x10c] sm:$0xff] }
 0x194   : > { %v3520_v49 = vsel %vm6430_vm13, %v5367_v20, %v3519_v55  ;;  %v3521_v6 = vrot.slane %v3519_v55, 4  ;;  %v2268_v47 = vshll.u32 %v1971_v41, 16  ;;  %v5937_v15 = vld [vmem:[#allocation3 + $0xfc] ss:$20 sps:$4 sm:$0xff]   ;;  %v2791_v34 = vld [vmem:[#allocation2 + $0x9c] sm:$0xf]  ;;  %v5411_v29 = vcombine.low %v3702_v63, %v3705_v27 }
 0x195   : > { %3641 = vst.msk [vmem:[#allocation3 + $0xb0] sm:$0xf] %vm216_vm0, %v3520_v49  ;;  %v2265_v14 = vor.u32 %v2264_v48, %v2260_v56  ;;  %v2256_v7 = vrot.slane %v2255_v9, 4  ;;  %2823 = vst.msk [vmem:[#allocation3 + $0x1c4] sm:$0xf] %vm216_vm0, %v2791_v34  ;;  %4739 = vmatprep.mubr.bf16.mxu1 %v5937_v15  ;;  %v3731_v26 = vld [vmem:[#allocation3 + $0x1b8] sm:$0xff] }
 0x196   : > { %1927 = vst.msk [vmem:[#allocation3 + $0x1d0] sm:$0xf] %vm1436_vm14, %v1855_v12  ;;  %v3523_v33 = vsel %vm6430_vm13, %v3521_v6, %v3522_v58  ;;  %v2270_v10 = vrot.slane %v2268_v47, 5  ;;  %v3408_v60 = vld [vmem:[#allocation2 + $0x54] sm:$0xe]  ;;  %4740 = vmatmul.mubr.bf16.gmra.mxu1 %v5411_v29  ;;  %v2677_v6 = vpop.permute.xlu0 %2676 }
 0x197   : > { %3375 = vst.msk [vmem:[#allocation3 + $0x124] sm:$0xf] %vm1436_vm14, %v3294_v44  ;;  %v2266_v54 = vrot.slane %v2265_v14, 4  ;;  %v3409_v18 = vld [vmem:[#allocation2 + $0x58] sm:$0xf]  ;;  %v5368_v40 = vrot.slane %v3408_v60, 9  ;;  %v2261_v8 = vsel %vm6124_vm9, %v2256_v7, %v2260_v56  ;;  %v2675_v56 = vpop.permute.xlu1 %2674 }
 0x198   : > { %3642 = vst.msk [vmem:[#allocation3 + $0xc4] sm:$0xf] %vm216_vm0, %v3523_v33  ;;  %v3410_v30 = vld [vmem:[#allocation2 + $0x5c] sm:$0x1]  ;;  %v3526_v3 = vrot.slane %v3409_v18, 5 }
 0x199   : > { %v2792_v45 = vld [vmem:[#allocation2 + $0xa0] sm:$0xf]  ;;  %2422 = vst.msk [vmem:[#allocation3 + $0x1c0] sm:$0xf] %vm216_vm0, %v2261_v8  ;;  %v2271_v21 = vsel %vm6124_vm9, %v2266_v54, %v2270_v10  ;;  %v3529_v23 = vrot.slane %v3410_v30, 5 }
 0x19a   : > { %2824 = vst.msk [vmem:[#allocation3 + $0x1d8] sm:$0xf] %vm216_vm0, %v2792_v45  ;;  %2423 = vst.msk [vmem:[#allocation3 + $0x1d4] sm:$0xf] %vm216_vm0, %v2271_v21  ;;  %v3527_v52 = vsel %vm6430_vm13, %v5368_v40, %v3526_v3  ;;  %v3528_v25 = vrot.slane %v3526_v3, 4 }
 0x19b   : > { %2751 = vst.msk [vmem:[#allocation3 + $0x134] sm:$0xf] %vm1436_vm14, %v2671_v17  ;;  %v1972_v38 = vld [vmem:[#allocation2 + $0x9c] sm:$0xf]  ;;  %v1973_v31 = vld [vmem:[#allocation2 + $0xa0] sm:$0xf]  ;;  %v3300_v8 = vpop.permute.xlu1 %3299 }
 0x19c   : > { %2752 = vst.msk [vmem:[#allocation3 + $0x148] sm:$0xf] %vm1436_vm14, %v2673_v36  ;;  %v5944_v0 = vld [vmem:[#allocation3 + $0x10] ss:$20 sps:$4 sm:$0xff]   ;;  %v2273_v16 = vshrl.u32 %v1972_v38, 16  ;;  %v2276_v46 = vshll.u32 %v1972_v38, 16  ;;  %v3530_v51 = vsel %vm6430_vm13, %v3528_v25, %v3529_v23  ;;  %v3302_v36 = vpop.permute.xlu0 %3301 }
 0x19d   : > { %3643 = vst.msk [vmem:[#allocation3 + $0xd8] sm:$0xf] %vm216_vm0, %v3527_v52  ;;  %v2282_v39 = vshll.u32 %v1973_v31, 16  ;;  %v2286_v61 = vshrl.u32 %v1973_v31, 16  ;;  %v3411_v11 = vld [vmem:[#allocation2 + $0x60] sm:$0xe]  ;;  %v5563_v52 = vpop.f32.mrf.mxu0 }
 0x19e   : > { %v3412_v50 = vld [vmem:[#allocation2 + $0x64] sm:$0xf]  ;;  %v3413_v42 = vld [vmem:[#allocation2 + $0x68] sm:$0x1]  ;;  %3644 = vst.msk [vmem:[#allocation3 + $0xec] sm:$0xf] %vm216_vm0, %v3530_v51 }
 0x19f   : > { %v3734_v62 = vld [vmem:[#allocation3 + $0x1cc] sm:$0xff]  ;;  %v2275_v4 = vrot.slane %v2273_v16, 4  ;;  %v2278_v22 = vrot.slane %v2276_v46, 5  ;;  %v2284_v43 = vrot.slane %v2282_v39, 5  ;;  %3376 = vst.msk [vmem:[#allocation3 + $0x138] sm:$0xf] %vm1436_vm14, %v3296_v35 }
 0x1a0   : > { %v5940_v28 = vld [vmem:[#allocation3 + $0x1bc] ss:$20 sps:$4 sm:$0xff]   ;;  %v5434_v13 = vcombine.low %v3731_v26, %v3734_v62  ;;  %v5369_v1 = vrot.slane %v3411_v11, 9  ;;  %3377 = vst.msk [vmem:[#allocation3 + $0x14c] sm:$0xf] %vm1436_vm14, %v3298_v57  ;;  %v3533_v24 = vrot.slane %v3412_v50, 5  ;;  %v2679_v62 = vpop.permute.xlu1 %2678 }
 0x1a1   : > { %4618 = vmatprep.mubr.bf16.mxu0 %v5940_v28  ;;  %v2279_v5 = vor.u32 %v2278_v22, %v2275_v4  ;;  %v3536_v19 = vrot.slane %v3413_v42, 5  ;;  %v1974_v59 = vld [vmem:[#allocation2 + $0xa4] sm:$0x1]  ;;  %v2288_v32 = vrot.slane %v2286_v61, 4  ;;  %v2793_v20 = vld [vmem:[#allocation2 + $0xa8] sm:$0xf]  ;;  %v5564_v61 = vpop.f32.mrf.mxu0 }
 0x1a2   : > { %4619 = vmatmul.mubr.bf16.gmra.mxu0 %v5434_v13  ;;  %v2292_v2 = vshll.u32 %v1974_v59, 16  ;;  %v3414_v55 = vld [vmem:[#allocation2 + $0x6c] sm:$0xe]  ;;  %v3534_v41 = vsel %vm6430_vm13, %v5369_v1, %v3533_v24  ;;  %v3535_v48 = vrot.slane %v3533_v24, 4  ;;  %2825 = vst.msk [vmem:[#allocation3 + $0x1ec] sm:$0xf] %vm216_vm0, %v2793_v20  ;;  %v7798_v28 = vadd.f32 %v5564_v61, %v5563_v52  ;;  %v2681_v13 = vpop.permute.xlu0 %2680 }
 0x1a3   : > { %5799 = vmatprep.mubr.msk.bf16.mxu0 %vm4449_vm15, %v5944_v0  ;;  %v2280_v58 = vrot.slane %v2279_v5, 4  ;;  %v2289_v63 = vor.u32 %v2288_v32, %v2284_v43  ;;  %v3415_v9 = vld [vmem:[#allocation2 + $0x70] sm:$0xf]  ;;  %v3416_v49 = vld [vmem:[#allocation2 + $0x74] sm:$0x1]  ;;  %v5370_v27 = vrot.slane %v3414_v55, 9  ;;  %v5566_v5 = vpop.f32.mrf.mxu0 }
 0x1a4   : > { %2753 = vst.msk [vmem:[#allocation3 + $0x15c] sm:$0xf] %vm1436_vm14, %v2675_v56  ;;  %v5945_v47 = vld [vmem:[#allocation3 + $0x38] ss:$20 sps:$4 sm:$0xff]   ;;  %v2294_v12 = vrot.slane %v2292_v2, 5  ;;  %v3540_v15 = vrot.slane %v3415_v9, 5  ;;  %v3537_v44 = vsel %vm6430_vm13, %v3535_v48, %v3536_v19 }
 0x1a5   : > { %3645 = vst.msk [vmem:[#allocation3 + $0x100] sm:$0xf] %vm216_vm0, %v3534_v41  ;;  %v3543_v14 = vrot.slane %v3416_v49, 5  ;;  %v5948_v34 = vld [vmem:[#allocation3 + $0x60] ss:$20 sps:$4 sm:$0xff]   ;;  %v2285_v29 = vsel %vm6124_vm9, %v2280_v58, %v2284_v43  ;;  %v2290_v7 = vrot.slane %v2289_v63, 4  ;;  %v5567_v58 = vpop.f32.mrf.mxu0  ;;  %v3304_v49 = vpop.permute.xlu1 %3303 }
 0x1a6   : > { %2754 = vst.msk [vmem:[#allocation3 + $0x170] sm:$0xf] %vm1436_vm14, %v2677_v6  ;;  %v2794_v33 = vld [vmem:[#allocation2 + $0xac] sm:$0xf]  ;;  %v1975_v10 = vld [vmem:[#allocation2 + $0xa8] sm:$0xf]  ;;  %v3541_v54 = vsel %vm6430_vm13, %v5370_v27, %v3540_v15  ;;  %v7808_v27 = vadd.f32 %v5567_v58, %v5566_v5 }
 0x1a7   : > { %v3708_v60 = vld [vmem:[#allocation3 + $0x120] sm:$0xff]  ;;  %2424 = vst.msk [vmem:[#allocation3 + $0x1e8] sm:$0xf] %vm216_vm0, %v2285_v29  ;;  %3646 = vst.msk [vmem:[#allocation3 + $0x114] sm:$0xf] %vm216_vm0, %v3537_v44  ;;  %v3542_v18 = vrot.slane %v3540_v15, 4  ;;  %v2295_v45 = vsel %vm6124_vm9, %v2290_v7, %v2294_v12  ;;  %v3306_v44 = vpop.permute.xlu0 %3305 }
 0x1a8   : > { %2826 = vst.msk [vmem:[#allocation3 + $0x200] sm:$0xf] %vm216_vm0, %v2794_v33  ;;  %v2297_v40 = vshrl.u32 %v1975_v10, 16  ;;  %v3711_v30 = vld [vmem:[#allocation3 + $0x134] sm:$0xff]  ;;  %3647 = vst.msk [vmem:[#allocation3 + $0x128] sm:$0xf] %vm216_vm0, %v3541_v54 }
 0x1a9   : > { %v5942_v3 = vld [vmem:[#allocation3 + $0x124] ss:$20 sps:$4 sm:$0xff]   ;;  %v1976_v17 = vld [vmem:[#allocation2 + $0xac] sm:$0xf]  ;;  %v2300_v21 = vshll.u32 %v1975_v10, 16  ;;  %v5416_v23 = vcombine.low %v3708_v60, %v3711_v30  ;;  %v3544_v25 = vsel %vm6430_vm13, %v3542_v18, %v3543_v14  ;;  %v3714_v6 = vld [vmem:[#allocation3 + $0x148] sm:$0xff] }
 0x1aa   : > { %3378 = vst.msk [vmem:[#allocation3 + $0x160] sm:$0xf] %vm1436_vm14, %v3300_v8  ;;  %v2299_v38 = vrot.slane %v2297_v40, 4  ;;  %v2306_v31 = vshll.u32 %v1976_v17, 16  ;;  %v3417_v26 = vld [vmem:[#allocation2 + $0x78] sm:$0xe]  ;;  %4747 = vmatprep.mubr.bf16.mxu1 %v5942_v3  ;;  %5800 = vmatmul.mubr.msk.bf16.vlgmr.msra.gmra.mxu0 %vm4449_vm15, %v5945_v47 }
 0x1ab   : > { %2425 = vst.msk [vmem:[#allocation3 + $0x1fc] sm:$0xf] %vm216_vm0, %v2295_v45  ;;  %3648 = vst.msk [vmem:[#allocation3 + $0x13c] sm:$0xf] %vm216_vm0, %v3544_v25  ;;  %v2302_v0 = vrot.slane %v2300_v21, 5  ;;  %v2310_v16 = vshrl.u32 %v1976_v17, 16  ;;  %4748 = vmatmul.mubr.bf16.gmra.mxu1 %v5416_v23  ;;  %5803 = vmatprep.mubr.msk.bf16.mxu0 %vm4449_vm15, %v5948_v34  ;;  %v2683_v17 = vpop.permute.xlu1 %2682  ;;  %v2685_v25 = vpop.permute.xlu0 %2684 }
 0x1ac   : > { %3379 = vst.msk [vmem:[#allocation3 + $0x174] sm:$0xf] %vm1436_vm14, %v3302_v36  ;;  %v3418_v46 = vld [vmem:[#allocation2 + $0x7c] sm:$0xf]  ;;  %v3419_v39 = vld [vmem:[#allocation2 + $0x80] sm:$0x1] }
 0x1ad   : > { %v2308_v11 = vrot.slane %v2306_v31, 5  ;;  %v5371_v51 = vrot.slane %v3417_v26, 9  ;;  %v3547_v50 = vrot.slane %v3418_v46, 5  ;;  %v3550_v42 = vrot.slane %v3419_v39, 5  ;;  %v1977_v35 = vld [vmem:[#allocation2 + $0xb0] sm:$0x1] }
 0x1ae   : > { %v2303_v4 = vor.u32 %v2302_v0, %v2299_v38  ;;  %v2312_v22 = vrot.slane %v2310_v16, 4  ;;  %v2316_v43 = vshll.u32 %v1977_v35, 16  ;;  %v2795_v57 = vld [vmem:[#allocation2 + $0xb4] sm:$0xf]  ;;  %2755 = vst.msk [vmem:[#allocation3 + $0x184] sm:$0xf] %vm1436_vm14, %v2679_v62 }
 0x1af   : > { %v5949_v1 = vld [vmem:[#allocation3 + $0x88] ss:$20 sps:$4 sm:$0xff]   ;;  %v3548_v24 = vsel %vm6430_vm13, %v5371_v51, %v3547_v50  ;;  %v3549_v19 = vrot.slane %v3547_v50, 4  ;;  %2827 = vst.msk [vmem:[#allocation3 + $0x214] sm:$0xf] %vm216_vm0, %v2795_v57 }
 0x1b0   : > { %v3420_v59 = vld [vmem:[#allocation2 + $0x84] sm:$0xe]  ;;  %v3421_v32 = vld [vmem:[#allocation2 + $0x88] sm:$0xf]  ;;  %2756 = vst.msk [vmem:[#allocation3 + $0x198] sm:$0xf] %vm1436_vm14, %v2681_v13  ;;  %v2313_v55 = vor.u32 %v2312_v22, %v2308_v11  ;;  %v3308_v22 = vpop.permute.xlu1 %3307 }
 0x1b1   : > { %v5952_v2 = vld [vmem:[#allocation3 + $0xb0] ss:$20 sps:$4 sm:$0xff]   ;;  %v2304_v20 = vrot.slane %v2303_v4, 4  ;;  %3649 = vst.msk [vmem:[#allocation3 + $0x150] sm:$0xf] %vm216_vm0, %v3548_v24  ;;  %v2318_v56 = vrot.slane %v2316_v43, 5  ;;  %v3551_v41 = vsel %vm6430_vm13, %v3549_v19, %v3550_v42  ;;  %v3310_v24 = vpop.permute.xlu0 %3309 }
 0x1b2   : > { %v3422_v48 = vld [vmem:[#allocation2 + $0x8c] sm:$0x1]  ;;  %v5372_v63 = vrot.slane %v3420_v59, 9  ;;  %v3554_v9 = vrot.slane %v3421_v32, 5  ;;  %v3717_v47 = vld [vmem:[#allocation3 + $0x15c] sm:$0xff]  ;;  %v2314_v14 = vrot.slane %v2313_v55, 4  ;;  %5804 = vmatmul.mubr.msk.bf16.gmra.mxu0 %vm4449_vm15, %v5949_v1 }
 0x1b3   : > { %v5946_v12 = vld [vmem:[#allocation3 + $0x14c] ss:$20 sps:$4 sm:$0xff]   ;;  %v2309_v15 = vsel %vm6124_vm9, %v2304_v20, %v2308_v11  ;;  %3650 = vst.msk [vmem:[#allocation3 + $0x164] sm:$0xf] %vm216_vm0, %v3551_v41  ;;  %v3557_v34 = vrot.slane %v3422_v48, 5  ;;  %v5421_v29 = vcombine.low %v3714_v6, %v3717_v47  ;;  %5807 = vmatprep.mubr.msk.bf16.mxu0 %vm4449_vm15, %v5952_v2  ;;  %v3720_v50 = vld [vmem:[#allocation3 + $0x170] sm:$0xff] }
 0x1b4   : > { %3380 = vst.msk [vmem:[#allocation3 + $0x188] sm:$0xf] %vm1436_vm14, %v3304_v49  ;;  %v3555_v7 = vsel %vm6430_vm13, %v5372_v63, %v3554_v9  ;;  %v3556_v33 = vrot.slane %v3554_v9, 4  ;;  %4755 = vmatprep.mubr.bf16.mxu1 %v5946_v12  ;;  %3381 = vst.msk [vmem:[#allocation3 + $0x19c] sm:$0xf] %vm1436_vm14, %v3306_v44  ;;  %v2319_v10 = vsel %vm6124_vm9, %v2314_v14, %v2318_v56  ;;  %v2687_v63 = vpop.permute.xlu1 %2686 }
 0x1b5   : > { %2426 = vst.msk [vmem:[#allocation3 + $0x210] sm:$0xf] %vm216_vm0, %v2309_v15  ;;  %3651 = vst.msk [vmem:[#allocation3 + $0x178] sm:$0xf] %vm216_vm0, %v3555_v7  ;;  %v2796_v60 = vld [vmem:[#allocation2 + $0xb8] sm:$0xf]  ;;  %4756 = vmatmul.mubr.bf16.gmra.mxu1 %v5421_v29  ;;  %v2689_v12 = vpop.permute.xlu0 %2688 }
 0x1b6   : > { %v1978_v54 = vld [vmem:[#allocation2 + $0xb4] sm:$0xf]  ;;  %v1979_v18 = vld [vmem:[#allocation2 + $0xb8] sm:$0xf]  ;;  %2427 = vst.msk [vmem:[#allocation3 + $0x224] sm:$0xf] %vm216_vm0, %v2319_v10  ;;  %v3558_v40 = vsel %vm6430_vm13, %v3556_v33, %v3557_v34 }
 0x1b7   : > { %2828 = vst.msk [vmem:[#allocation3 + $0x228] sm:$0xf] %vm216_vm0, %v2796_v60  ;;  %v2321_v8 = vshrl.u32 %v1978_v54, 16  ;;  %v2324_v30 = vshll.u32 %v1978_v54, 16  ;;  %v2330_v3 = vshll.u32 %v1979_v18, 16  ;;  %v2334_v21 = vshrl.u32 %v1979_v18, 16 }
 0x1b8   : > { %v3423_v45 = vld [vmem:[#allocation2 + $0x90] sm:$0xe]  ;;  %3652 = vst.msk [vmem:[#allocation3 + $0x18c] sm:$0xf] %vm216_vm0, %v3558_v40  ;;  %v3424_v23 = vld [vmem:[#allocation2 + $0x94] sm:$0xf] }
 0x1b9   : > { %v3425_v36 = vld [vmem:[#allocation2 + $0x98] sm:$0x1]  ;;  %v5373_v52 = vrot.slane %v3423_v45, 9  ;;  %2757 = vst.msk [vmem:[#allocation3 + $0x1ac] sm:$0xf] %vm1436_vm14, %v2683_v17  ;;  %v2323_v31 = vrot.slane %v2321_v8, 4  ;;  %v3312_v17 = vpop.permute.xlu1 %3311 }
 0x1ba   : > { %v5953_v38 = vld [vmem:[#allocation3 + $0xd8] ss:$20 sps:$4 sm:$0xff]   ;;  %v2326_v26 = vrot.slane %v2324_v30, 5  ;;  %v2332_v0 = vrot.slane %v2330_v3, 5  ;;  %v3561_v16 = vrot.slane %v3424_v23, 5  ;;  %v3564_v39 = vrot.slane %v3425_v36, 5 }
 0x1bb   : > { %2758 = vst.msk [vmem:[#allocation3 + $0x1c0] sm:$0xf] %vm1436_vm14, %v2685_v25  ;;  %v5956_v46 = vld [vmem:[#allocation3 + $0x100] ss:$20 sps:$4 sm:$0xff]   ;;  %v1980_v61 = vld [vmem:[#allocation2 + $0xbc] sm:$0x1]  ;;  %5808 = vmatmul.mubr.msk.bf16.gmra.mxu0 %vm4449_vm15, %v5953_v38 }
 0x1bc   : > { %v2336_v11 = vrot.slane %v2334_v21, 4  ;;  %v2797_v51 = vld [vmem:[#allocation2 + $0xc0] sm:$0xf]  ;;  %v2327_v42 = vor.u32 %v2326_v26, %v2323_v31  ;;  %v3562_v35 = vsel %vm6430_vm13, %v5373_v52, %v3561_v16  ;;  %v3563_v62 = vrot.slane %v3561_v16, 4  ;;  %v3426_v1 = vld [vmem:[#allocation2 + $0x9c] sm:$0xe]  ;;  %5811 = vmatprep.mubr.msk.bf16.mxu0 %vm4449_vm15, %v5956_v46  ;;  %v3314_v31 = vpop.permute.xlu0 %3313 }
 0x1bd   : > { %v2340_v4 = vshll.u32 %v1980_v61, 16  ;;  %2829 = vst.msk [vmem:[#allocation3 + $0x23c] sm:$0xf] %vm216_vm0, %v2797_v51  ;;  %v3723_v43 = vld [vmem:[#allocation3 + $0x184] sm:$0xff]  ;;  %3653 = vst.msk [vmem:[#allocation3 + $0x1a0] sm:$0xf] %vm216_vm0, %v3562_v35 }
 0x1be   : > { %v5950_v57 = vld [vmem:[#allocation3 + $0x174] ss:$20 sps:$4 sm:$0xff]   ;;  %v2337_v13 = vor.u32 %v2336_v11, %v2332_v0  ;;  %3382 = vst.msk [vmem:[#allocation3 + $0x1b0] sm:$0xf] %vm1436_vm14, %v3308_v22  ;;  %v5426_v5 = vcombine.low %v3720_v50, %v3723_v43  ;;  %v2328_v19 = vrot.slane %v2327_v42, 4  ;;  %v3565_v59 = vsel %vm6430_vm13, %v3563_v62, %v3564_v39  ;;  %v3726_v40 = vld [vmem:[#allocation3 + $0x198] sm:$0xff]  ;;  %v5635_v11 = vpop.f32.mrf.mxu1 }
 0x1bf   : > { %v2342_v32 = vrot.slane %v2340_v4, 5  ;;  %4763 = vmatprep.mubr.bf16.mxu1 %v5950_v57  ;;  %3383 = vst.msk [vmem:[#allocation3 + $0x1c4] sm:$0xf] %vm1436_vm14, %v3310_v24  ;;  %v3427_v20 = vld [vmem:[#allocation2 + $0xa0] sm:$0xf]  ;;  %v5374_v56 = vrot.slane %v3426_v1, 9  ;;  %v2691_v4 = vpop.permute.xlu1 %2690 }
 0x1c0   : > { %3654 = vst.msk [vmem:[#allocation3 + $0x1b4] sm:$0xf] %vm216_vm0, %v3565_v59  ;;  %v2338_v2 = vrot.slane %v2337_v13, 4  ;;  %v3428_v55 = vld [vmem:[#allocation2 + $0xa4] sm:$0x1]  ;;  %4764 = vmatmul.mubr.bf16.gmra.mxu1 %v5426_v5  ;;  %v2333_v58 = vsel %vm6124_vm9, %v2328_v19, %v2332_v0  ;;  %v3568_v41 = vrot.slane %v3427_v20, 5  ;;  %v5636_v5 = vpop.f32.mrf.mxu1  ;;  %v2693_v24 = vpop.permute.xlu0 %2692 }
 0x1c1   : > { %v3571_v48 = vrot.slane %v3428_v55, 5  ;;  %2428 = vst.msk [vmem:[#allocation3 + $0x238] sm:$0xf] %vm216_vm0, %v2333_v58  ;;  %v2798_v49 = vld [vmem:[#allocation2 + $0xc4] sm:$0xf]  ;;  %v7871_v55 = vadd.f32 %v5636_v5, %v5635_v11 }
 0x1c2   : > { %v2343_v9 = vsel %vm6124_vm9, %v2338_v2, %v2342_v32  ;;  %v1981_v6 = vld [vmem:[#allocation2 + $0xc0] sm:$0xf]  ;;  %v1982_v47 = vld [vmem:[#allocation2 + $0xc4] sm:$0xf]  ;;  %2759 = vst.msk [vmem:[#allocation3 + $0x1d4] sm:$0xf] %vm1436_vm14, %v2687_v63  ;;  %v3569_v14 = vsel %vm6430_vm13, %v5374_v56, %v3568_v41 }
 0x1c3   : > { %v5957_v15 = vld [vmem:[#allocation3 + $0x128] ss:$20 sps:$4 sm:$0xff]   ;;  %2429 = vst.msk [vmem:[#allocation3 + $0x24c] sm:$0xf] %vm216_vm0, %v2343_v9  ;;  %v3570_v34 = vrot.slane %v3568_v41, 4  ;;  %v2345_v29 = vshrl.u32 %v1981_v6, 16  ;;  %v5638_v9 = vpop.f32.mrf.mxu1 }
 0x1c4   : > { %2830 = vst.msk [vmem:[#allocation3 + $0x250] sm:$0xf] %vm216_vm0, %v2798_v49  ;;  %v2348_v44 = vshll.u32 %v1981_v6, 16  ;;  %v3429_v7 = vld [vmem:[#allocation2 + $0xa8] sm:$0xe]  ;;  %v2354_v10 = vshll.u32 %v1982_v47, 16  ;;  %5812 = vmatmul.mubr.msk.bf16.gmra.mxu0 %vm4449_vm15, %v5957_v15  ;;  %v5569_v49 = vpop.f32.mrf.mxu0  ;;  %v3316_v15 = vpop.permute.xlu1 %3315 }
 0x1c5   : > { %2760 = vst.msk [vmem:[#allocation3 + $0x1e8] sm:$0xf] %vm1436_vm14, %v2689_v12  ;;  %v5960_v33 = vld [vmem:[#allocation3 + $0x150] ss:$20 sps:$4 sm:$0xff]   ;;  %v2358_v60 = vshrl.u32 %v1982_v47, 16  ;;  %v3572_v8 = vsel %vm6430_vm13, %v3570_v34, %v3571_v48  ;;  %v2347_v30 = vrot.slane %v2345_v29, 4 }
 0x1c6   : > { %3655 = vst.msk [vmem:[#allocation3 + $0x1c8] sm:$0xf] %vm216_vm0, %v3569_v14  ;;  %v3430_v54 = vld [vmem:[#allocation2 + $0xac] sm:$0xf]  ;;  %v3431_v18 = vld [vmem:[#allocation2 + $0xb0] sm:$0x1]  ;;  %5815 = vmatprep.mubr.msk.bf16.mxu0 %vm4449_vm15, %v5960_v33 }
 0x1c7   : > { %v2350_v3 = vrot.slane %v2348_v44, 5  ;;  %v5375_v45 = vrot.slane %v3429_v7, 9  ;;  %v3729_v21 = vld [vmem:[#allocation3 + $0x1ac] sm:$0xff]  ;;  %3656 = vst.msk [vmem:[#allocation3 + $0x1dc] sm:$0xf] %vm216_vm0, %v3572_v8  ;;  %v2356_v36 = vrot.slane %v2354_v10, 5  ;;  %v5570_v10 = vpop.f32.mrf.mxu0 }
 0x1c8   : > { %v5954_v23 = vld [vmem:[#allocation3 + $0x19c] ss:$20 sps:$4 sm:$0xff]   ;;  %v3575_v52 = vrot.slane %v3430_v54, 5  ;;  %v3578_v25 = vrot.slane %v3431_v18, 5  ;;  %3384 = vst.msk [vmem:[#allocation3 + $0x1d8] sm:$0xf] %vm1436_vm14, %v3312_v17  ;;  %v5431_v38 = vcombine.low %v3726_v40, %v3729_v21  ;;  %v7885_v40 = vadd.f32 %v5570_v10, %v5569_v49 }
 0x1c9   : > { %v2351_v26 = vor.u32 %v2350_v3, %v2347_v30  ;;  %v2360_v0 = vrot.slane %v2358_v60, 4  ;;  %4771 = vmatprep.mubr.bf16.mxu1 %v5954_v23  ;;  %3385 = vst.msk [vmem:[#allocation3 + $0x1ec] sm:$0xf] %vm1436_vm14, %v3314_v31  ;;  %v1983_v39 = vld [vmem:[#allocation2 + $0xc8] sm:$0x1]  ;;  %8262 = vst [vmem:[#allocation4_spill] sm:$0xff] %v7871_v55  ;;  %v5639_v60 = vpop.f32.mrf.mxu1  ;;  %v3318_v30 = vpop.permute.xlu0 %3317 }
 0x1ca   : > { %v3576_v16 = vsel %vm6430_vm13, %v5375_v45, %v3575_v52  ;;  %v3577_v46 = vrot.slane %v3575_v52, 4  ;;  %v2799_v61 = vld [vmem:[#allocation2 + $0xcc] sm:$0xf]  ;;  %4772 = vmatmul.mubr.bf16.gmra.mxu1 %v5431_v38  ;;  %v2364_v42 = vshll.u32 %v1983_v39, 16  ;;  %v3432_v35 = vld [vmem:[#allocation2 + $0xb4] sm:$0xe]  ;;  %v7887_v8 = vadd.f32 %v5639_v60, %v5638_v9  ;;  %v5572_v23 = vpop.f32.mrf.mxu0  ;;  %v2695_v38 = vpop.permute.xlu1 %2694 }
 0x1cb   : > { %v2352_v51 = vrot.slane %v2351_v26, 4  ;;  %3657 = vst.msk [vmem:[#allocation3 + $0x1f0] sm:$0xf] %vm216_vm0, %v3576_v16  ;;  %v2361_v50 = vor.u32 %v2360_v0, %v2356_v36  ;;  %2831 = vst.msk [vmem:[#allocation3 + $0x264] sm:$0xf] %vm216_vm0, %v2799_v61  ;;  %v5376_v57 = vrot.slane %v3432_v35, 9  ;;  %v5641_v21 = vpop.f32.mrf.mxu1 }
 0x1cc   : > { %v3433_v62 = vld [vmem:[#allocation2 + $0xb8] sm:$0xf]  ;;  %v3579_v22 = vsel %vm6430_vm13, %v3577_v46, %v3578_v25  ;;  %v3434_v43 = vld [vmem:[#allocation2 + $0xbc] sm:$0x1]  ;;  %v2800_v1 = vld [vmem:[#allocation2 + $0xd0] sm:$0xf]  ;;  %v5573_v26 = vpop.f32.mrf.mxu0 }
 0x1cd   : > { %v3582_v13 = vrot.slane %v3433_v62, 5  ;;  %2761 = vst.msk [vmem:[#allocation3 + $0x1fc] sm:$0xf] %vm1436_vm14, %v2691_v4  ;;  %v5961_v19 = vld [vmem:[#allocation3 + $0x178] ss:$20 sps:$4 sm:$0xff]   ;;  %v2357_v59 = vsel %vm6124_vm9, %v2352_v51, %v2356_v36  ;;  %v2362_v32 = vrot.slane %v2361_v50, 4  ;;  %v5642_v0 = vpop.f32.mrf.mxu1  ;;  %v7901_v39 = vadd.f32 %v5573_v26, %v5572_v23  ;;  %v2697_v11 = vpop.permute.xlu0 %2696 }
 0x1ce   : > { %3658 = vst.msk [vmem:[#allocation3 + $0x204] sm:$0xf] %vm216_vm0, %v3579_v22  ;;  %v2366_v2 = vrot.slane %v2364_v42, 5  ;;  %v3585_v20 = vrot.slane %v3434_v43, 5  ;;  %2832 = vst.msk [vmem:[#allocation3 + $0x278] sm:$0xf] %vm216_vm0, %v2800_v1  ;;  %5816 = vmatmul.mubr.msk.bf16.gmra.mxu0 %vm4449_vm15, %v5961_v19  ;;  %v7903_v61 = vadd.f32 %v5642_v0, %v5641_v21  ;;  %v3320_v4 = vpop.permute.xlu1 %3319  ;;  %v5575_v19 = vpop.f32.mrf.mxu0 }
 0x1cf   : > { %2762 = vst.msk [vmem:[#allocation3 + $0x210] sm:$0xf] %vm1436_vm14, %v2693_v24  ;;  %v3732_v56 = vld [vmem:[#allocation3 + $0x1c0] sm:$0xff]  ;;  %v3583_v58 = vsel %vm6430_vm13, %v5376_v57, %v3582_v13  ;;  %v3584_v41 = vrot.slane %v3582_v13, 4  ;;  %v3435_v48 = vld [vmem:[#allocation2 + $0xc0] sm:$0xe]  ;;  %v5644_v51 = vpop.f32.mrf.mxu1 }
 0x1d0   : > { %2430 = vst.msk [vmem:[#allocation3 + $0x260] sm:$0xf] %vm216_vm0, %v2357_v59  ;;  %v3436_v63 = vld [vmem:[#allocation2 + $0xc4] sm:$0xf]  ;;  %v5964_v6 = vld [vmem:[#allocation3 + $0x1a0] ss:$20 sps:$4 sm:$0xff]   ;;  %v2367_v47 = vsel %vm6124_vm9, %v2362_v32, %v2366_v2 }
 0x1d1   : > { %3659 = vst.msk [vmem:[#allocation3 + $0x218] sm:$0xf] %vm216_vm0, %v3583_v58  ;;  %v3437_v12 = vld [vmem:[#allocation2 + $0xc8] sm:$0x1]  ;;  %v3735_v14 = vld [vmem:[#allocation3 + $0x1d4] sm:$0xff]  ;;  %v3586_v29 = vsel %vm6430_vm13, %v3584_v41, %v3585_v20  ;;  %v5377_v44 = vrot.slane %v3435_v48, 9  ;;  %5819 = vmatprep.mubr.msk.bf16.mxu0 %vm4449_vm15, %v5964_v6  ;;  %v5645_v57 = vpop.f32.mrf.mxu1  ;;  %v3322_v5 = vpop.permute.xlu0 %3321 }
 0x1d2   : > { %v5958_v34 = vld [vmem:[#allocation3 + $0x1c4] ss:$20 sps:$4 sm:$0xff]   ;;  %2431 = vst.msk [vmem:[#allocation3 + $0x274] sm:$0xf] %vm216_vm0, %v2367_v47  ;;  %v3589_v7 = vrot.slane %v3436_v63, 5  ;;  %v3592_v33 = vrot.slane %v3437_v12, 5  ;;  %v5436_v37 = vcombine.low %v3732_v56, %v3735_v14  ;;  %v7911_v1 = vadd.f32 %v5645_v57, %v5644_v51  ;;  %v2699_v53 = vpop.permute.xlu1 %2698  ;;  %v5576_v41 = vpop.f32.mrf.mxu0 }
 0x1d3   : > { %3386 = vst.msk [vmem:[#allocation3 + $0x200] sm:$0xf] %vm1436_vm14, %v3316_v15  ;;  %v3438_v54 = vld [vmem:[#allocation2 + $0xcc] sm:$0xe]  ;;  %v3439_v18 = vld [vmem:[#allocation2 + $0xd0] sm:$0xf]  ;;  %4779 = vmatprep.mubr.bf16.mxu1 %v5958_v34  ;;  %v7919_v63 = vadd.f32 %v5576_v41, %v5575_v19  ;;  %v5647_v49 = vpop.f32.mrf.mxu1 }
 0x1d4   : > { %3660 = vst.msk [vmem:[#allocation3 + $0x22c] sm:$0xf] %vm216_vm0, %v3586_v29  ;;  %8263 = vst [vmem:[#allocation5_spill] sm:$0xff] %v7887_v8  ;;  %v3590_v3 = vsel %vm6430_vm13, %v5377_v44, %v3589_v7  ;;  %v3591_v45 = vrot.slane %v3589_v7, 4  ;;  %v3440_v17 = vld [vmem:[#allocation2 + $0xd4] sm:$0x1]  ;;  %4780 = vmatmul.mubr.bf16.gmra.mxu1 %v5436_v37  ;;  %v5578_v6 = vpop.f32.mrf.mxu0 }
 0x1d5   : > { %3387 = vst.msk [vmem:[#allocation3 + $0x214] sm:$0xf] %vm1436_vm14, %v3318_v30  ;;  %v5378_v36 = vrot.slane %v3438_v54, 9  ;;  %v3596_v52 = vrot.slane %v3439_v18, 5  ;;  %v3599_v25 = vrot.slane %v3440_v17, 5  ;;  %8264 = vst [vmem:[#allocation6_spill] sm:$0xff] %v7903_v61  ;;  %v2701_v24 = vpop.permute.xlu0 %2700  ;;  %v5648_v15 = vpop.f32.mrf.mxu1 }
 0x1d6   : > { %3661 = vst.msk [vmem:[#allocation3 + $0x240] sm:$0xf] %vm216_vm0, %v3590_v3  ;;  %v3593_v31 = vsel %vm6430_vm13, %v3591_v45, %v3592_v33  ;;  %v3738_v50 = vld [vmem:[#allocation3 + $0x1e8] sm:$0xff]  ;;  %v5968_v35 = vld [vmem:[#allocation3 + $0x1f0] ss:$20 sps:$4 sm:$0xff]   ;;  %8265 = vst [vmem:[#allocation7_spill] sm:$0xff] %v7911_v1  ;;  %v3324_v2 = vpop.permute.xlu1 %3323  ;;  %v5579_v12 = vpop.f32.mrf.mxu0  ;;  %v7927_v34 = vadd.f32 %v5648_v15, %v5647_v49 }
 0x1d7   : > { %2763 = vst.msk [vmem:[#allocation3 + $0x224] sm:$0xf] %vm1436_vm14, %v2695_v38  ;;  %v3597_v16 = vsel %vm6430_vm13, %v5378_v36, %v3596_v52  ;;  %v3598_v46 = vrot.slane %v3596_v52, 4  ;;  %2764 = vst.msk [vmem:[#allocation3 + $0x238] sm:$0xf] %vm1436_vm14, %v2697_v11  ;;  %v7925_v14 = vadd.f32 %v5579_v12, %v5578_v6  ;;  %v5650_v29 = vpop.f32.mrf.mxu1 }
 0x1d8   : > { %3662 = vst.msk [vmem:[#allocation3 + $0x254] sm:$0xf] %vm216_vm0, %v3593_v31  ;;  %3663 = vst.msk [vmem:[#allocation3 + $0x268] sm:$0xf] %vm216_vm0, %v3597_v16  ;;  %v5965_v42 = vld [vmem:[#allocation3 + $0x1c8] ss:$20 sps:$4 sm:$0xff]   ;;  %v5581_v54 = vpop.f32.mrf.mxu0 }
 0x1d9   : > { %v3600_v62 = vsel %vm6430_vm13, %v3598_v46, %v3599_v25  ;;  %3388 = vst.msk [vmem:[#allocation3 + $0x228] sm:$0xf] %vm1436_vm14, %v3320_v4  ;;  %3389 = vst.msk [vmem:[#allocation3 + $0x23c] sm:$0xf] %vm1436_vm14, %v3322_v5  ;;  %5820 = vmatmul.mubr.msk.bf16.gmra.mxu0 %vm4449_vm15, %v5965_v42  ;;  %v3326_v9 = vpop.permute.xlu0 %3325  ;;  %v5651_v60 = vpop.f32.mrf.mxu1 }
 0x1da   : > { %v3741_v22 = vld [vmem:[#allocation3 + $0x1fc] sm:$0xff]  ;;  %3664 = vst.msk [vmem:[#allocation3 + $0x27c] sm:$0xf] %vm216_vm0, %v3600_v62  ;;  %5823 = vmatprep.mubr.msk.bf16.mxu0 %vm4449_vm15, %v5968_v35  ;;  %v2703_v47 = vpop.permute.xlu1 %2702  ;;  %8266 = vst [vmem:[#allocation8_spill] sm:$0xff] %v7927_v34  ;;  %v7930_v37 = vadd.f32 %v5651_v60, %v5650_v29  ;;  %v5582_v3 = vpop.f32.mrf.mxu0 }
 0x1db   : > { %v5962_v43 = vld [vmem:[#allocation3 + $0x1ec] ss:$20 sps:$4 sm:$0xff]   ;;  %v5441_v13 = vcombine.low %v3738_v50, %v3741_v22  ;;  %2765 = vst.msk [vmem:[#allocation3 + $0x24c] sm:$0xf] %vm1436_vm14, %v2699_v53  ;;  %2766 = vst.msk [vmem:[#allocation3 + $0x260] sm:$0xf] %vm1436_vm14, %v2701_v24  ;;  %v7933_v45 = vadd.f32 %v5582_v3, %v5581_v54  ;;  %v5653_v21 = vpop.f32.mrf.mxu1 }
 0x1dc   : > { %4787 = vmatprep.mubr.bf16.mxu1 %v5962_v43  ;;  %v3744_v59 = vld [vmem:[#allocation3 + $0x210] sm:$0xff]  ;;  %v5969_v32 = vld [vmem:[#allocation3 + $0x218] ss:$20 sps:$4 sm:$0xff]   ;;  %3390 = vst.msk [vmem:[#allocation3 + $0x250] sm:$0xf] %vm1436_vm14, %v3324_v2  ;;  %8267 = vst [vmem:[#allocation9_spill] sm:$0xff] %v7930_v37  ;;  %v5584_v17 = vpop.f32.mrf.mxu0 }
 0x1dd   : > { %4788 = vmatmul.mubr.bf16.gmra.mxu1 %v5441_v13  ;;  %3391 = vst.msk [vmem:[#allocation3 + $0x264] sm:$0xf] %vm1436_vm14, %v3326_v9  ;;  %2767 = vst.msk [vmem:[#allocation3 + $0x274] sm:$0xf] %vm1436_vm14, %v2703_v47  ;;  %v5654_v36 = vpop.f32.mrf.mxu1 }
 0x1de   : > { %v3328_v7 = vpop.permute.xlu1 %3327  ;;  %v5585_v23 = vpop.f32.mrf.mxu0  ;;  %v7937_v25 = vadd.f32 %v5654_v36, %v5653_v21 }
 0x1df   : > { %v5973_v58 = vld [vmem:[#allocation3 + $0x240] ss:$20 sps:$4 sm:$0xff]   ;;  %3392 = vst.msk [vmem:[#allocation3 + $0x278] sm:$0xf] %vm1436_vm14, %v3328_v7  ;;  %v7935_v52 = vadd.f32 %v5585_v23, %v5584_v17  ;;  %v5656_v38 = vpop.f32.mrf.mxu1 }
 0x1e0   : > { %v3747_v20 = vld [vmem:[#allocation3 + $0x224] sm:$0xff]  ;;  %8268 = vst [vmem:[#allocation10_spill] sm:$0xff] %v7937_v25  ;;  %v5587_v0 = vpop.f32.mrf.mxu0 }
 0x1e1   : > { %v5966_v56 = vld [vmem:[#allocation3 + $0x214] ss:$20 sps:$4 sm:$0xff]   ;;  %v5446_v48 = vcombine.low %v3744_v59, %v3747_v20  ;;  %5824 = vmatmul.mubr.msk.bf16.gmra.mxu0 %vm4449_vm15, %v5969_v32  ;;  %v5657_v31 = vpop.f32.mrf.mxu1 }
 0x1e2   : > { %4795 = vmatprep.mubr.bf16.mxu1 %v5966_v56  ;;  %5827 = vmatprep.mubr.msk.bf16.mxu0 %vm4449_vm15, %v5973_v58  ;;  %v5974_v44 = vld [vmem:[#allocation3 + $0x268] ss:$20 sps:$4 sm:$0xff]   ;;  %v5972_v10 = vld [vmem:[#allocation3 + $0x238] ss:$20 sps:$4 sm:$0xff]   ;;  %v7939_v26 = vadd.f32 %v5657_v31, %v5656_v38  ;;  %v5588_v16 = vpop.f32.mrf.mxu0 }
 0x1e3   : > { %v5970_v33 = vld [vmem:[#allocation3 + $0x23c] ss:$20 sps:$4 sm:$0xff]   ;;  %v7941_v46 = vadd.f32 %v5588_v16, %v5587_v0  ;;  %v5675_v22 = vpop.f32.mrf.mxu1 }
 0x1e4   : > { %v5977_v30 = vld [vmem:[#allocation3 + $0x260] ss:$20 sps:$4 sm:$0xff]   ;;  %8269 = vst [vmem:[#allocation11_spill] sm:$0xff] %v7939_v26  ;;  %v5590_v11 = vpop.f32.mrf.mxu0 }
 0x1e5   : > { %4796 = vmatmul.mubr.bf16.gmra.mxu1 %v5446_v48  ;;  %v5676_v13 = vpop.f32.mrf.mxu1 }
 0x1e6   : > { %4803 = vmatprep.mubr.bf16.mxu1 %v5970_v33  ;;  %v5975_v18 = vld [vmem:[#allocation3 + $0x264] ss:$20 sps:$4 sm:$0xff]   ;;  %v5591_v51 = vpop.f32.mrf.mxu0  ;;  %v5677_v8 = vadd.f32 %v5676_v13, %v5675_v22 }
 0x1e7   : > { %v7943_v50 = vadd.f32 %v5591_v51, %v5590_v11  ;;  %v5678_v5 = vpop.f32.mrf.mxu1 }
 0x1e8   : > { %v5593_v42 = vpop.f32.mrf.mxu0  ;;  %v4694_v22 = vadd.f32 %v5677_v8, %v7798_v28 }
 0x1e9   : > { %5828 = vmatmul.mubr.msk.bf16.gmra.mxu0 %vm4449_vm15, %v5974_v44  ;;  %v5679_v24 = vpop.f32.mrf.mxu1 }
 0x1ea   : > { %v5594_v35 = vpop.f32.mrf.mxu0  ;;  %v5680_v13 = vadd.f32 %v5679_v24, %v5678_v5 }
 0x1eb   : > { %v7945_v62 = vadd.f32 %v5594_v35, %v5593_v42 }
 0x1ec   : > { %v5596_v4 = vpop.f32.mrf.mxu0  ;;  %v4697_v5 = vadd.f32 %v5680_v13, %v7808_v27 }
 0x1ed   : > { %4804 = vmatmul.mubr.bf16.gmra.mxu1 %v5972_v10 }
 0x1ee   : > { %4811 = vmatprep.mubr.bf16.mxu1 %v5975_v18  ;;  %v5597_v43 = vpop.f32.mrf.mxu0 }
 0x1ef   : > { %v7947_v57 = vadd.f32 %v5597_v43, %v5596_v4 }
 0x1f0   : > { %v5681_v32 = vpop.f32.mrf.mxu1 }
 0x1f2   : > { %v5682_v58 = vpop.f32.mrf.mxu1 }
 0x1f3   : > { %v5683_v34 = vadd.f32 %v5682_v58, %v5681_v32 }
 0x1f4   : > { %v5684_v41 = vpop.f32.mrf.mxu1 }
 0x1f5   : > { %4812 = vmatmul.mubr.bf16.gmra.mxu1 %v5977_v30 }
 0x1f6   : > { %v5685_v48 = vpop.f32.mrf.mxu1 }
 0x1fa   : > { %v5599_v53 = vpop.f32.mrf.mxu0 }
 0x1fc   : > { %v5600_v19 = vpop.f32.mrf.mxu0 }
 0x1fd   : > { %v7949_v59 = vadd.f32 %v5600_v19, %v5599_v53 }
 0x1fe   : > { %v5602_v2 = vpop.f32.mrf.mxu0 }
 0x1ff   : > { %8270 = vst [vmem:[#allocation12_spill] sm:$0xff] %v7949_v59 }
 0x200   : > { %v5603_v20 = vpop.f32.mrf.mxu0 }
 0x201   : > { %v7951_v56 = vadd.f32 %v5603_v20, %v5602_v2 }
 0x203   : > { %8271 = vst [vmem:[#allocation13_spill] sm:$0xff] %v7951_v56  ;;  %v4702_v56 = vadd.f32 %v5683_v34, %v7885_v40 }
 0x204   : > { %v5687_v9 = vpop.f32.mrf.mxu1 }
 0x206   : > { %v5688_v49 = vpop.f32.mrf.mxu1 }
 0x208   : > { %v5690_v47 = vpop.f32.mrf.mxu1 }
 0x20a   : > { %v5691_v15 = vpop.f32.mrf.mxu1 }
 0x20b   : > { %v5692_v40 = vadd.f32 %v5691_v15, %v5690_v47 }
 0x20e   : > { %v7953_v6 = vpop.f32.mrf.mxu0 }
 0x210   : > { %v7955_v12 = vpop.f32.mrf.mxu0 }
 0x212   : > { %v7957_v29 = vpop.f32.mrf.mxu0 }
 0x214   : > { %v5609_v7 = vpop.f32.mrf.mxu0 }
 0x219   : > { %v5693_v44 = vpop.f32.mrf.mxu1 }
 0x21b   : > { %v5694_v33 = vpop.f32.mrf.mxu1 }
 0x21c   : > { %v5695_v34 = vadd.f32 %v5694_v33, %v5693_v44 }
 0x21d   : > { %v5696_v60 = vpop.f32.mrf.mxu1 }
 0x21e   : > { %v4718_v47 = vadd.f32 %v5695_v34, %v7933_v45 }
 0x21f   : > { %v5697_v18 = vpop.f32.mrf.mxu1 }
 0x222   : > { %v7959_v10 = vpop.f32.mrf.mxu0 }
 0x224   : > { %v5612_v54 = vpop.f32.mrf.mxu0 }
 0x225   : > { %v8039_v15 = vadd.f32 %v5612_v54, %v7959_v10 }
 0x226   : > { %v7961_v30 = vpop.f32.mrf.mxu0 }
 0x228   : > { %v7963_v17 = vpop.f32.mrf.mxu0 }
 0x22d   : > { %v5699_v3 = vpop.f32.mrf.mxu1 }
 0x22f   : > { %v5700_v21 = vpop.f32.mrf.mxu1 }
 0x231   : > { %v5702_v36 = vpop.f32.mrf.mxu1 }
 0x233   : > { %v5703_v31 = vpop.f32.mrf.mxu1 }
 0x239   : > { %v7965_v23 = vpop.f32.mrf.mxu0 }
 0x23b   : > { %v7967_v38 = vpop.f32.mrf.mxu0 }
 0x23d   : > { %v7969_v0 = vpop.f32.mrf.mxu0 }
 0x23f   : > { %v7973_v11 = vpop.f32.mrf.mxu0 }
 0x244   : > { %v7971_v16 = vpop.f32.mrf.mxu1 }
 0x246   : > { %v7975_v51 = vpop.f32.mrf.mxu1 }
 0x248   : > { %v7979_v35 = vpop.f32.mrf.mxu1 }
 0x24a   : > { %v5709_v43 = vpop.f32.mrf.mxu1 }
 0x24e   : > { %v7977_v42 = vpop.f32.mrf.mxu0 }
 0x250   : > { %v7981_v4 = vpop.f32.mrf.mxu0 }
 0x251   : > { %8272 = vst [vmem:[#allocation14_spill] sm:$0xff] %v7981_v4 }
 0x252   : > { %v7983_v53 = vpop.f32.mrf.mxu0 }
 0x253   : > { %8273 = vst [vmem:[#allocation15_spill] sm:$0xff] %v7983_v53  ;;  %v5686_v53 = vadd.f32 %v5685_v48, %v5684_v41 }
 0x254   : > { %v7987_v2 = vpop.f32.mrf.mxu0 }
 0x255   : > { %8274 = vst [vmem:[#allocation16_spill] sm:$0xff] %v7987_v2 }
 0x256   : > { %v7985_v19 = vpop.f32.mrf.mxu1 }
 0x258   : > { %v7989_v20 = vpop.f32.mrf.mxu1 }
 0x25a   : > { %v7993_v25 = vpop.f32.mrf.mxu1 }
 0x25c   : > { %v7999_v61 = vpop.f32.mrf.mxu1 }
 0x262   : > { %v7991_v26 = vpop.f32.mrf.mxu0 }
 0x263   : > { %8275 = vst [vmem:[#allocation17_spill] sm:$0xff] %v7991_v26  ;;  %v5698_v26 = vadd.f32 %v5697_v18, %v5696_v60  ;;  %v5710_v18 = vadd.f32 %v5709_v43, %v7979_v35  ;;  %v8068_v43 = vadd.f32 %v7967_v38, %v7965_v23 }
 0x264   : > { %v7995_v37 = vpop.f32.mrf.mxu0 }
 0x265   : > { %8276 = vst [vmem:[#allocation18_spill] sm:$0xff] %v7995_v37  ;;  %v4705_v37 = vadd.f32 %v5686_v53, %v7901_v39  ;;  %v8032_v39 = vadd.f32 %v5609_v7, %v7957_v29  ;;  %v5704_v29 = vadd.f32 %v5703_v31, %v5702_v36 }
 0x266   : > { %v7997_v1 = vpop.f32.mrf.mxu0 }
 0x267   : > { %8277 = vst [vmem:[#allocation19_spill] sm:$0xff] %v7997_v1  ;;  %v5689_v1 = vadd.f32 %v5688_v49, %v5687_v9  ;;  %v8029_v49 = vadd.f32 %v7955_v12, %v7953_v6  ;;  %v4721_v6 = vadd.f32 %v5698_v26, %v7935_v52  ;;  %v8046_v12 = vadd.f32 %v7963_v17, %v7961_v30 }
 0x268   : > { %v8001_v55 = vpop.f32.mrf.mxu0  ;;  %v5707_v26 = vadd.f32 %v7975_v51, %v7971_v16  ;;  %v4729_v35 = vadd.f32 %v5704_v29, %v7943_v50 }
 0x269   : > { %8278 = vst [vmem:[#allocation20_spill] sm:$0xff] %v8001_v55  ;;  %v4710_v9 = vadd.f32 %v5689_v1, %v7919_v63 }
 0x26a   : > { %v5801_v32 = vpop.f32.mrf.mxu0  ;;  %v4734_v23 = vadd.f32 %v5707_v26, %v7945_v62 }
 0x26b   : > { %v8004_v2 = vpop.f32.mrf.mxu1  ;;  %v4863_v58 = vadd.f32 %v5801_v32, %v4702_v56  ;;  %v5701_v56 = vadd.f32 %v5700_v21, %v5699_v3 }
 0x26c   : > { %v4854_v41 = vpop.f32.mrf.mxu0 }
 0x26d   : > { %v8014_v55 = vpop.f32.mrf.mxu1  ;;  %4983 = vst.msk [vmem:[%s8011_s5 + $0x10] sm:$0xff] %vm4449_vm15, %v4863_v58  ;;  %v4855_v48 = vadd.f32 %v4854_v41, %v4694_v22  ;;  %v4726_v45 = vadd.f32 %v5701_v56, %v7941_v46  ;;  %v5016_v30 = vsel %vm4449_vm15, %v4863_v58, 0.0 }
 0x26e   : > { %v5802_v4 = vpop.f32.mrf.mxu0  ;;  %v5719_v29 = vadd.f32 %v8014_v55, %v8004_v2  ;;  %v8279_v2 = vld [vmem:[#allocation14_spill] sm:$0xff] }
 0x26f   : > { %v8019_v59 = vpop.f32.mrf.mxu1  ;;  %4981 = vst.msk [vmem:[%s8011_s5] sm:$0xff] %vm4449_vm15, %v4855_v48  ;;  %v4866_v28 = vadd.f32 %v5802_v4, %v4705_v37  ;;  %v4713_v37 = vadd.f32 %v5692_v40, %v7925_v14  ;;  %v5083_v27 = vmul.f32 %v4855_v48, %v4855_v48  ;;  %v5085_v14 = vmul.f32 %v4863_v58, %v4863_v58 }
 0x270   : > { %v4857_v24 = vpop.f32.mrf.mxu0  ;;  %v5013_v33 = vsel %vm4449_vm15, %v4855_v48, 0.0  ;;  %v8078_v40 = vadd.f32 %v7973_v11, %v7969_v0  ;;  %v5713_v0 = vadd.f32 %v7989_v20, %v7985_v19 }
 0x271   : > { %v8023_v8 = vpop.f32.mrf.mxu1  ;;  %4984 = vst.msk [vmem:[%s8011_s5 + $0x18] sm:$0xff] %vm4449_vm15, %v4866_v28  ;;  %v4858_v44 = vadd.f32 %v4857_v24, %v4697_v5  ;;  %v5115_v3 = vsel %vm4449_vm15, %v5083_v27, 0.0  ;;  %v5086_v17 = vmul.f32 %v4866_v28, %v4866_v28  ;;  %v5118_v32 = vsel %vm4449_vm15, %v5085_v14, 0.0 }
 0x272   : > { %v5805_v63 = vpop.f32.mrf.mxu0  ;;  %v5018_v58 = vsel %vm4449_vm15, %v4866_v28, 0.0  ;;  %v4737_v24 = vadd.f32 %v5710_v18, %v7947_v57  ;;  %v5716_v57 = vadd.f32 %v7999_v61, %v7993_v25  ;;  %v5722_v61 = vadd.f32 %v8023_v8, %v8019_v59  ;;  %v8280_v8 = vld [vmem:[#allocation12_spill] sm:$0xff] }
 0x273   : > { %v4879_v7 = vadd.f32 %v5805_v63, %v4718_v47  ;;  %4982 = vst.msk [vmem:[%s8011_s5 + $0x8] sm:$0xff] %vm4449_vm15, %v4858_v44  ;;  %v5014_v10 = vsel %vm4449_vm15, %v4858_v44, 0.0  ;;  %v5084_v60 = vmul.f32 %v4858_v44, %v4858_v44  ;;  %v5120_v38 = vsel %vm4449_vm15, %v5086_v17, 0.0 }
 0x274   : > { %v4870_v52 = vpop.f32.mrf.mxu0  ;;  %v5015_v46 = vadd.f32 %v5014_v10, %v5013_v33  ;;  %v4750_v59 = vadd.f32 %v5719_v29, %v8029_v49 }
 0x275   : > { %v8041_v1 = vpop.f32.mrf.mxu1  ;;  %4987 = vst.msk [vmem:[%s8011_s5 + $0x30] sm:$0xff] %vm4449_vm15, %v4879_v7  ;;  %v5116_v21 = vsel %vm4449_vm15, %v5084_v60, 0.0  ;;  %v4871_v36 = vadd.f32 %v4870_v52, %v4710_v9  ;;  %v5089_v27 = vmul.f32 %v4879_v7, %v4879_v7  ;;  %v5024_v14 = vsel %vm4449_vm15, %v4879_v7, 0.0 }
 0x276   : > { %v5806_v4 = vpop.f32.mrf.mxu0  ;;  %v5017_v53 = vadd.f32 %v5016_v30, %v5015_v46  ;;  %v5117_v16 = vadd.f32 %v5116_v21, %v5115_v3  ;;  %v8104_v30 = vadd.f32 %v8279_v2, %v7977_v42 }
 0x277   : > { %v8053_v54 = vpop.f32.mrf.mxu1  ;;  %v4882_v51 = vadd.f32 %v5806_v4, %v4721_v6  ;;  %4985 = vst.msk [vmem:[%s8011_s5 + $0x20] sm:$0xff] %vm4449_vm15, %v4871_v36  ;;  %v5087_v22 = vmul.f32 %v4871_v36, %v4871_v36  ;;  %v5020_v48 = vsel %vm4449_vm15, %v4871_v36, 0.0  ;;  %v5126_v46 = vsel %vm4449_vm15, %v5089_v27, 0.0 }
 0x278   : > { %v4873_v41 = vpop.f32.mrf.mxu0  ;;  %v5119_v34 = vadd.f32 %v5118_v32, %v5117_v16  ;;  %v5019_v50 = vadd.f32 %v5018_v58, %v5017_v53  ;;  %v4742_v4 = vadd.f32 %v5713_v0, %v8280_v8  ;;  %v8281_v58 = vld [vmem:[#allocation13_spill] sm:$0xff] }
 0x279   : > { %v8063_v31 = vpop.f32.mrf.mxu1  ;;  %4988 = vst.msk [vmem:[%s8011_s5 + $0x38] sm:$0xff] %vm4449_vm15, %v4882_v51  ;;  %v4874_v56 = vadd.f32 %v4873_v41, %v4713_v37  ;;  %v5122_v44 = vsel %vm4449_vm15, %v5087_v22, 0.0  ;;  %v5090_v33 = vmul.f32 %v4882_v51, %v4882_v51  ;;  %v5026_v7 = vsel %vm4449_vm15, %v4882_v51, 0.0 }
 0x27a   : > { %v5021_v11 = vadd.f32 %v5020_v48, %v5019_v50  ;;  %v5121_v9 = vadd.f32 %v5120_v38, %v5119_v34  ;;  %v4745_v22 = vadd.f32 %v5716_v57, %v8281_v58 }
 0x27b   : > { %v8074_v13 = vpop.f32.mrf.mxu1  ;;  %v5809_v5 = vpop.f32.mrf.mxu0  ;;  %4986 = vst.msk [vmem:[%s8011_s5 + $0x28] sm:$0xff] %vm4449_vm15, %v4874_v56  ;;  %v5022_v62 = vsel %vm4449_vm15, %v4874_v56, 0.0  ;;  %v5088_v63 = vmul.f32 %v4874_v56, %v4874_v56  ;;  %v5128_v42 = vsel %vm4449_vm15, %v5090_v33, 0.0 }
 0x27c   : > { %v4895_v47 = vadd.f32 %v5809_v5, %v4734_v23  ;;  %v5123_v19 = vadd.f32 %v5122_v44, %v5121_v9  ;;  %v5023_v20 = vadd.f32 %v5022_v62, %v5021_v11  ;;  %v4753_v23 = vadd.f32 %v5722_v61, %v8032_v39 }
 0x27d   : > { %v4886_v6 = vpop.f32.mrf.mxu0  ;;  %v5124_v10 = vsel %vm4449_vm15, %v5088_v63, 0.0 }
 0x27e   : > { %4991 = vst.msk [vmem:[%s8011_s5 + $0x50] sm:$0xff] %vm4449_vm15, %v4895_v47  ;;  %v4887_v60 = vadd.f32 %v4886_v6, %v4726_v45  ;;  %v5025_v25 = vadd.f32 %v5024_v14, %v5023_v20  ;;  %v5125_v18 = vadd.f32 %v5124_v10, %v5123_v19  ;;  %v5093_v38 = vmul.f32 %v4895_v47, %v4895_v47 }
 0x27f   : > { %v5810_v26 = vpop.f32.mrf.mxu0  ;;  %v5032_v39 = vsel %vm4449_vm15, %v4895_v47, 0.0 }
 0x280   : > { %v5729_v28 = vpop.f32.mrf.mxu1  ;;  %v4898_v55 = vadd.f32 %v5810_v26, %v4737_v24  ;;  %4989 = vst.msk [vmem:[%s8011_s5 + $0x40] sm:$0xff] %vm4449_vm15, %v4887_v60  ;;  %v5091_v45 = vmul.f32 %v4887_v60, %v4887_v60  ;;  %v5127_v21 = vadd.f32 %v5126_v46, %v5125_v18  ;;  %v5027_v36 = vadd.f32 %v5026_v7, %v5025_v25 }
 0x281   : > { %v4889_v17 = vpop.f32.mrf.mxu0  ;;  %v5028_v53 = vsel %vm4449_vm15, %v4887_v60, 0.0  ;;  %v5725_v24 = vadd.f32 %v8053_v54, %v8041_v1  ;;  %v8282_v54 = vld [vmem:[#allocation17_spill] sm:$0xff]  ;;  %v5134_v20 = vsel %vm4449_vm15, %v5093_v38, 0.0  ;;  %v5728_v25 = vadd.f32 %v8074_v13, %v8063_v31 }
 0x282   : > { %v5730_v37 = vpop.f32.mrf.mxu1  ;;  %4992 = vst.msk [vmem:[%s8011_s5 + $0x58] sm:$0xff] %vm4449_vm15, %v4898_v55  ;;  %v4890_v16 = vadd.f32 %v4889_v17, %v4729_v35  ;;  %v5029_v41 = vadd.f32 %v5028_v53, %v5027_v36  ;;  %v5129_v34 = vadd.f32 %v5128_v42, %v5127_v21  ;;  %v5130_v49 = vsel %vm4449_vm15, %v5091_v45, 0.0 }
 0x283   : > { %v5731_v0 = vadd.f32 %v5730_v37, %v5729_v28  ;;  %v5094_v27 = vmul.f32 %v4898_v55, %v4898_v55  ;;  %v8283_v28 = vld [vmem:[#allocation18_spill] sm:$0xff]  ;;  %v5034_v14 = vsel %vm4449_vm15, %v4898_v55, 0.0  ;;  %v4758_v61 = vadd.f32 %v5725_v24, %v8039_v15 }
 0x284   : > { %v5732_v52 = vpop.f32.mrf.mxu1  ;;  %v5813_v32 = vpop.f32.mrf.mxu0  ;;  %4990 = vst.msk [vmem:[%s8011_s5 + $0x48] sm:$0xff] %vm4449_vm15, %v4890_v16  ;;  %v5030_v48 = vsel %vm4449_vm15, %v4890_v16, 0.0  ;;  %v5092_v56 = vmul.f32 %v4890_v16, %v4890_v16  ;;  %v5131_v11 = vadd.f32 %v5130_v49, %v5129_v34  ;;  %v5631_v37 = vadd.f32 %v8283_v28, %v8282_v54  ;;  %v8284_v34 = vld [vmem:[#allocation19_spill] sm:$0xff] }
 0x285   : > { %v4911_v50 = vadd.f32 %v5813_v32, %v4750_v59  ;;  %v5031_v9 = vadd.f32 %v5030_v48, %v5029_v41  ;;  %v5136_v18 = vsel %vm4449_vm15, %v5094_v27, 0.0  ;;  %v4761_v24 = vadd.f32 %v5728_v25, %v8046_v12 }
 0x286   : > { %v5733_v3 = vpop.f32.mrf.mxu1  ;;  %v4902_v35 = vpop.f32.mrf.mxu0  ;;  %v5132_v44 = vsel %vm4449_vm15, %v5092_v56, 0.0 }
 0x287   : > { %4995 = vst.msk [vmem:[%s8011_s5 + $0x70] sm:$0xff] %vm4449_vm15, %v4911_v50  ;;  %v4903_v62 = vadd.f32 %v4902_v35, %v4742_v4  ;;  %v5734_v57 = vadd.f32 %v5733_v3, %v5732_v52  ;;  %v5033_v29 = vadd.f32 %v5032_v39, %v5031_v9  ;;  %v5133_v19 = vadd.f32 %v5132_v44, %v5131_v11 }
 0x288   : > { %v5814_v6 = vpop.f32.mrf.mxu0  ;;  %v4766_v52 = vadd.f32 %v5731_v0, %v8068_v43  ;;  %v5097_v36 = vmul.f32 %v4911_v50, %v4911_v50  ;;  %v5040_v8 = vsel %vm4449_vm15, %v4911_v50, 0.0 }
 0x289   : > { %v4914_v1 = vadd.f32 %v5814_v6, %v4753_v23  ;;  %4993 = vst.msk [vmem:[%s8011_s5 + $0x60] sm:$0xff] %vm4449_vm15, %v4903_v62  ;;  %v5095_v47 = vmul.f32 %v4903_v62, %v4903_v62  ;;  %v5135_v60 = vadd.f32 %v5134_v20, %v5133_v19  ;;  %v5035_v26 = vadd.f32 %v5034_v14, %v5033_v29  ;;  %v8285_v23 = vld [vmem:[#allocation20_spill] sm:$0xff] }
 0x28a   : > { %v5735_v51 = vpop.f32.mrf.mxu1  ;;  %v4905_v10 = vpop.f32.mrf.mxu0  ;;  %v5036_v55 = vsel %vm4449_vm15, %v4903_v62, 0.0  ;;  %v4769_v21 = vadd.f32 %v5734_v57, %v8078_v40  ;;  %v5634_v38 = vadd.f32 %v8285_v23, %v8284_v34  ;;  %v8288_v34 = vld [vmem:[#allocation4_spill] sm:$0xff] }
 0x28b   : > { %4996 = vst.msk [vmem:[%s8011_s5 + $0x78] sm:$0xff] %vm4449_vm15, %v4914_v1  ;;  %v4906_v2 = vadd.f32 %v4905_v10, %v4745_v22  ;;  %v5037_v45 = vadd.f32 %v5036_v55, %v5035_v26  ;;  %v5137_v3 = vadd.f32 %v5136_v18, %v5135_v60  ;;  %v5138_v43 = vsel %vm4449_vm15, %v5095_v47, 0.0  ;;  %v8286_v60 = vld [vmem:[#allocation15_spill] sm:$0xff]  ;;  %v8287_v26 = vld [vmem:[#allocation16_spill] sm:$0xff] }
 0x28c   : > { %v5736_v5 = vpop.f32.mrf.mxu1  ;;  %v5098_v16 = vmul.f32 %v4914_v1, %v4914_v1  ;;  %v5042_v56 = vsel %vm4449_vm15, %v4914_v1, 0.0 }
 0x28d   : > { %4994 = vst.msk [vmem:[%s8011_s5 + $0x68] sm:$0xff] %vm4449_vm15, %v4906_v2  ;;  %v5038_v15 = vsel %vm4449_vm15, %v4906_v2, 0.0  ;;  %v5096_v31 = vmul.f32 %v4906_v2, %v4906_v2  ;;  %v5737_v4 = vadd.f32 %v5736_v5, %v5735_v51  ;;  %v5139_v42 = vadd.f32 %v5138_v43, %v5137_v3 }
 0x28e   : > { %v8128_v63 = vpop.f32.mrf.mxu1  ;;  %v5817_v7 = vpop.f32.mrf.mxu0  ;;  %v5039_v53 = vadd.f32 %v5038_v15, %v5037_v45  ;;  %v5142_v51 = vsel %vm4449_vm15, %v5097_v36, 0.0  ;;  %v5144_v44 = vsel %vm4449_vm15, %v5098_v16, 0.0 }
 0x28f   : > { %v4927_v17 = vadd.f32 %v5817_v7, %v4766_v52  ;;  %v5140_v40 = vsel %vm4449_vm15, %v5096_v31, 0.0  ;;  %v4774_v27 = vadd.f32 %v5737_v4, %v8104_v30  ;;  %v5628_v52 = vadd.f32 %v8287_v26, %v8286_v60 }
 0x290   : > { %v5739_v33 = vpop.f32.mrf.mxu1  ;;  %v4918_v59 = vpop.f32.mrf.mxu0  ;;  %v5041_v49 = vadd.f32 %v5040_v8, %v5039_v53  ;;  %v5141_v48 = vadd.f32 %v5140_v40, %v5139_v42 }
 0x291   : > { %4999 = vst.msk [vmem:[%s8011_s5 + $0x90] sm:$0xff] %vm4449_vm15, %v4927_v17  ;;  %v4919_v58 = vadd.f32 %v4918_v59, %v4758_v61  ;;  %v5740_v12 = vadd.f32 %v5739_v33, %v8128_v63  ;;  %v5101_v20 = vmul.f32 %v4927_v17, %v4927_v17  ;;  %v5048_v33 = vsel %vm4449_vm15, %v4927_v17, 0.0 }
 0x292   : > { %v5818_v41 = vpop.f32.mrf.mxu0  ;;  %v5143_v11 = vadd.f32 %v5142_v51, %v5141_v48  ;;  %v5043_v9 = vadd.f32 %v5042_v56, %v5041_v49 }
 0x293   : > { %v4930_v50 = vadd.f32 %v5818_v41, %v4769_v21  ;;  %4997 = vst.msk [vmem:[%s8011_s5 + $0x80] sm:$0xff] %vm4449_vm15, %v4919_v58  ;;  %v5099_v5 = vmul.f32 %v4919_v58, %v4919_v58  ;;  %v5044_v62 = vsel %vm4449_vm15, %v4919_v58, 0.0  ;;  %v5150_v43 = vsel %vm4449_vm15, %v5101_v20, 0.0  ;;  %v8290_v20 = vld [vmem:[#allocation5_spill] sm:$0xff] }
 0x294   : > { %v5741_v46 = vpop.f32.mrf.mxu1  ;;  %v4921_v0 = vpop.f32.mrf.mxu0  ;;  %v5045_v1 = vadd.f32 %v5044_v62, %v5043_v9  ;;  %v5145_v54 = vadd.f32 %v5144_v44, %v5143_v11  ;;  %v4777_v17 = vadd.f32 %v5740_v12, %v5628_v52 }
 0x295   : > { %5000 = vst.msk [vmem:[%s8011_s5 + $0x98] sm:$0xff] %vm4449_vm15, %v4930_v50  ;;  %v4922_v57 = vadd.f32 %v4921_v0, %v4761_v24  ;;  %v5146_v14 = vsel %vm4449_vm15, %v5099_v5, 0.0  ;;  %v5102_v18 = vmul.f32 %v4930_v50, %v4930_v50  ;;  %v5050_v15 = vsel %vm4449_vm15, %v4930_v50, 0.0 }
 0x296   : > { %v5742_v13 = vpop.f32.mrf.mxu1  ;;  %v5147_v61 = vadd.f32 %v5146_v14, %v5145_v54 }
 0x297   : > { %v5743_v32 = vadd.f32 %v5742_v13, %v5741_v46  ;;  %4998 = vst.msk [vmem:[%s8011_s5 + $0x88] sm:$0xff] %vm4449_vm15, %v4922_v57  ;;  %v5046_v30 = vsel %vm4449_vm15, %v4922_v57, 0.0  ;;  %v5152_v42 = vsel %vm4449_vm15, %v5102_v18, 0.0  ;;  %v8291_v18 = vld [vmem:[#allocation7_spill] sm:$0xff] }
 0x298   : > { %v5744_v22 = vpop.f32.mrf.mxu1  ;;  %v5047_v25 = vadd.f32 %v5046_v30, %v5045_v1 }
 0x299   : > { %v4782_v39 = vadd.f32 %v5743_v32, %v5631_v37  ;;  %v5821_v19 = vpop.f32.mrf.mxu0  ;;  %v5100_v37 = vmul.f32 %v4922_v57, %v4922_v57  ;;  %v8289_v57 = vld [vmem:[#allocation6_spill] sm:$0xff] }
 0x29a   : > { %v5745_v35 = vpop.f32.mrf.mxu1  ;;  %v5049_v45 = vadd.f32 %v5048_v33, %v5047_v25 }
 0x29b   : > { %v5746_v6 = vadd.f32 %v5745_v35, %v5744_v22  ;;  %v4943_v28 = vadd.f32 %v5821_v19, %v4782_v39  ;;  %v4934_v10 = vpop.f32.mrf.mxu0  ;;  %v5148_v55 = vsel %vm4449_vm15, %v5100_v37, 0.0 }
 0x29c   : > { %v4935_v2 = vadd.f32 %v4934_v10, %v4774_v27  ;;  %v5149_v3 = vadd.f32 %v5148_v55, %v5147_v61  ;;  %v5051_v4 = vadd.f32 %v5050_v15, %v5049_v45 }
 0x29d   : > { %v5747_v29 = vpop.f32.mrf.mxu1  ;;  %5003 = vst.msk [vmem:[%s8011_s5 + $0xb0] sm:$0xff] %vm4449_vm15, %v4943_v28  ;;  %v4785_v63 = vadd.f32 %v5746_v6, %v5634_v38  ;;  %v5822_v7 = vpop.f32.mrf.mxu0  ;;  %v5105_v58 = vmul.f32 %v4943_v28, %v4943_v28  ;;  %v5056_v11 = vsel %vm4449_vm15, %v4943_v28, 0.0 }
 0x29e   : > { %5001 = vst.msk [vmem:[%s8011_s5 + $0xa0] sm:$0xff] %vm4449_vm15, %v4935_v2  ;;  %v5103_v31 = vmul.f32 %v4935_v2, %v4935_v2  ;;  %v5151_v8 = vadd.f32 %v5150_v43, %v5149_v3  ;;  %v5052_v53 = vsel %vm4449_vm15, %v4935_v2, 0.0 }
 0x29f   : > { %v5748_v47 = vpop.f32.mrf.mxu1  ;;  %v4946_v36 = vadd.f32 %v5822_v7, %v4785_v63  ;;  %v4937_v59 = vpop.f32.mrf.mxu0  ;;  %v5053_v22 = vadd.f32 %v5052_v53, %v5051_v4  ;;  %v5158_v19 = vsel %vm4449_vm15, %v5105_v58, 0.0 }
 0x2a0   : > { %v5749_v21 = vadd.f32 %v5748_v47, %v5747_v29  ;;  %v4938_v16 = vadd.f32 %v4937_v59, %v4777_v17  ;;  %v5153_v41 = vadd.f32 %v5152_v42, %v5151_v8  ;;  %v5154_v38 = vsel %vm4449_vm15, %v5103_v31, 0.0 }
 0x2a1   : > { %v5750_v46 = vpop.f32.mrf.mxu1  ;;  %5004 = vst.msk [vmem:[%s8011_s5 + $0xb8] sm:$0xff] %vm4449_vm15, %v4946_v36  ;;  %v5825_v32 = vpop.f32.mrf.mxu0  ;;  %v5106_v9 = vmul.f32 %v4946_v36, %v4946_v36  ;;  %v5058_v12 = vsel %vm4449_vm15, %v4946_v36, 0.0 }
 0x2a2   : > { %v4790_v23 = vadd.f32 %v5749_v21, %v8288_v34  ;;  %5002 = vst.msk [vmem:[%s8011_s5 + $0xa8] sm:$0xff] %vm4449_vm15, %v4938_v16  ;;  %v5054_v48 = vsel %vm4449_vm15, %v4938_v16, 0.0  ;;  %v5104_v50 = vmul.f32 %v4938_v16, %v4938_v16  ;;  %v5155_v5 = vadd.f32 %v5154_v38, %v5153_v41 }
 0x2a3   : > { %v5751_v13 = vpop.f32.mrf.mxu1  ;;  %v4950_v56 = vpop.f32.mrf.mxu0  ;;  %v5055_v35 = vadd.f32 %v5054_v48, %v5053_v22  ;;  %v5160_v60 = vsel %vm4449_vm15, %v5106_v9, 0.0 }
 0x2a4   : > { %v5752_v49 = vadd.f32 %v5751_v13, %v5750_v46  ;;  %v4951_v0 = vadd.f32 %v4950_v56, %v4790_v23  ;;  %v5156_v39 = vsel %vm4449_vm15, %v5104_v50, 0.0 }
 0x2a5   : > { %v5753_v40 = vpop.f32.mrf.mxu1  ;;  %v5826_v44 = vpop.f32.mrf.mxu0  ;;  %v5057_v62 = vadd.f32 %v5056_v11, %v5055_v35  ;;  %v5157_v6 = vadd.f32 %v5156_v39, %v5155_v5 }
 0x2a6   : > { %5005 = vst.msk [vmem:[%s8011_s5 + $0xc0] sm:$0xff] %vm4449_vm15, %v4951_v0  ;;  %v5107_v1 = vmul.f32 %v4951_v0, %v4951_v0  ;;  %v4793_v28 = vadd.f32 %v5752_v49, %v8290_v20  ;;  %v5060_v26 = vsel %vm4449_vm15, %v4951_v0, 0.0 }
 0x2a7   : > { %v5754_v51 = vpop.f32.mrf.mxu1  ;;  %v4953_v14 = vpop.f32.mrf.mxu0  ;;  %v5159_v30 = vadd.f32 %v5158_v19, %v5157_v6  ;;  %v5059_v47 = vadd.f32 %v5058_v12, %v5057_v62 }
 0x2a8   : > { %v5755_v24 = vadd.f32 %v5754_v51, %v5753_v40  ;;  %v4954_v52 = vadd.f32 %v4953_v14, %v4793_v28  ;;  %v5162_v46 = vsel %vm4449_vm15, %v5107_v1, 0.0  ;;  %v8292_v40 = vld [vmem:[#allocation8_spill] sm:$0xff]  ;;  %v8293_v51 = vld [vmem:[#allocation9_spill] sm:$0xff] }
 0x2a9   : > { %v5756_v27 = vpop.f32.mrf.mxu1  ;;  %v5829_v25 = vpop.f32.mrf.mxu0  ;;  %v5061_v63 = vadd.f32 %v5060_v26, %v5059_v47  ;;  %v5161_v33 = vadd.f32 %v5160_v60, %v5159_v30  ;;  %v8295_v47 = vld [vmem:[#allocation11_spill] sm:$0xff] }
 0x2aa   : > { %v4798_v29 = vadd.f32 %v5755_v24, %v8289_v57  ;;  %5006 = vst.msk [vmem:[%s8011_s5 + $0xc8] sm:$0xff] %vm4449_vm15, %v4954_v52  ;;  %v5062_v7 = vsel %vm4449_vm15, %v4954_v52, 0.0  ;;  %v5108_v45 = vmul.f32 %v4954_v52, %v4954_v52 }
 0x2ab   : > { %v5757_v54 = vpop.f32.mrf.mxu1  ;;  %v4966_v21 = vpop.f32.mrf.mxu0  ;;  %v5163_v36 = vadd.f32 %v5162_v46, %v5161_v33  ;;  %v5063_v15 = vadd.f32 %v5062_v7, %v5061_v63 }
 0x2ac   : > { %v4959_v37 = vadd.f32 %v5825_v32, %v4798_v29  ;;  %v5758_v10 = vadd.f32 %v5757_v54, %v5756_v27  ;;  %v5164_v13 = vsel %vm4449_vm15, %v5108_v45, 0.0  ;;  %v8294_v29 = vld [vmem:[#allocation10_spill] sm:$0xff] }
 0x2ad   : > { %v5759_v61 = vpop.f32.mrf.mxu1  ;;  %v5165_v42 = vadd.f32 %v5164_v13, %v5163_v36  ;;  %v5830_v22 = vpop.f32.mrf.mxu0 }
 0x2ae   : > { %5007 = vst.msk [vmem:[%s8011_s5 + $0xd0] sm:$0xff] %vm4449_vm15, %v4959_v37  ;;  %v4801_v55 = vadd.f32 %v5758_v10, %v8291_v18  ;;  %v5109_v2 = vmul.f32 %v4959_v37, %v4959_v37  ;;  %v5064_v31 = vsel %vm4449_vm15, %v4959_v37, 0.0 }
 0x2af   : > { %v5760_v3 = vpop.f32.mrf.mxu1  ;;  %v5065_v4 = vadd.f32 %v5064_v31, %v5063_v15  ;;  %v4969_v24 = vpop.f32.mrf.mxu0 }
 0x2b0   : > { %v4962_v43 = vadd.f32 %v5826_v44, %v4801_v55  ;;  %v5761_v17 = vadd.f32 %v5760_v3, %v5759_v61  ;;  %v5166_v16 = vsel %vm4449_vm15, %v5109_v2, 0.0 }
 0x2b1   : > { %v5762_v59 = vpop.f32.mrf.mxu1  ;;  %v5167_v41 = vadd.f32 %v5166_v16, %v5165_v42 }
 0x2b2   : > { %5008 = vst.msk [vmem:[%s8011_s5 + $0xd8] sm:$0xff] %vm4449_vm15, %v4962_v43  ;;  %v5110_v8 = vmul.f32 %v4962_v43, %v4962_v43  ;;  %v5066_v53 = vsel %vm4449_vm15, %v4962_v43, 0.0  ;;  %v4806_v32 = vadd.f32 %v5761_v17, %v8292_v40 }
 0x2b3   : > { %v5763_v58 = vpop.f32.mrf.mxu1  ;;  %v5067_v34 = vadd.f32 %v5066_v53, %v5065_v4 }
 0x2b4   : > { %v5168_v23 = vsel %vm4449_vm15, %v5110_v8, 0.0  ;;  %v5764_v38 = vadd.f32 %v5763_v58, %v5762_v59  ;;  %v4967_v49 = vadd.f32 %v4966_v21, %v4806_v32 }
 0x2b5   : > { %v5765_v48 = vpop.f32.mrf.mxu1  ;;  %v5169_v50 = vadd.f32 %v5168_v23, %v5167_v41 }
 0x2b6   : > { %v4809_v56 = vadd.f32 %v5764_v38, %v8293_v51  ;;  %5009 = vst.msk [vmem:[%s8011_s5 + $0xe0] sm:$0xff] %vm4449_vm15, %v4967_v49  ;;  %v5068_v5 = vsel %vm4449_vm15, %v4967_v49, 0.0  ;;  %v5111_v35 = vmul.f32 %v4967_v49, %v4967_v49 }
 0x2b7   : > { %v5766_v0 = vpop.f32.mrf.mxu1  ;;  %v5069_v11 = vadd.f32 %v5068_v5, %v5067_v34 }
 0x2b8   : > { %v4970_v9 = vadd.f32 %v4969_v24, %v4809_v56  ;;  %v5767_v39 = vadd.f32 %v5766_v0, %v5765_v48  ;;  %v5170_v27 = vsel %vm4449_vm15, %v5111_v35, 0.0 }
 0x2b9   : > { %v5768_v44 = vpop.f32.mrf.mxu1  ;;  %v5171_v62 = vadd.f32 %v5170_v27, %v5169_v50 }
 0x2ba   : > { %5010 = vst.msk [vmem:[%s8011_s5 + $0xe8] sm:$0xff] %vm4449_vm15, %v4970_v9  ;;  %v5070_v6 = vsel %vm4449_vm15, %v4970_v9, 0.0  ;;  %v5112_v57 = vmul.f32 %v4970_v9, %v4970_v9  ;;  %v4814_v19 = vadd.f32 %v5767_v39, %v8294_v29 }
 0x2bb   : > { %v5071_v12 = vadd.f32 %v5070_v6, %v5069_v11  ;;  %v5769_v1 = vpop.f32.mrf.mxu1 }
 0x2bc   : > { %v5172_v54 = vsel %vm4449_vm15, %v5112_v57, 0.0  ;;  %v4975_v20 = vadd.f32 %v5829_v25, %v4814_v19  ;;  %v5770_v28 = vadd.f32 %v5769_v1, %v5768_v44 }
 0x2bd   : > { %v5173_v14 = vadd.f32 %v5172_v54, %v5171_v62 }
 0x2be   : > { %5011 = vst.msk [vmem:[%s8011_s5 + $0xf0] sm:$0xff] %vm4449_vm15, %v4975_v20  ;;  %v5072_v30 = vsel %vm4449_vm15, %v4975_v20, 0.0  ;;  %v5113_v37 = vmul.f32 %v4975_v20, %v4975_v20  ;;  %v4817_v10 = vadd.f32 %v5770_v28, %v8295_v47 }
 0x2bf   : > { %v5073_v60 = vadd.f32 %v5072_v30, %v5071_v12 }
 0x2c0   : > { %v5174_v26 = vsel %vm4449_vm15, %v5113_v37, 0.0  ;;  %v4978_v52 = vadd.f32 %v5830_v22, %v4817_v10 }
 0x2c1   : > { %v5175_v61 = vadd.f32 %v5174_v26, %v5173_v14 }
 0x2c2   : > { %5012 = vst.msk [vmem:[%s8011_s5 + $0xf8] sm:$0xff] %vm4449_vm15, %v4978_v52  ;;  %v5074_v63 = vsel %vm4449_vm15, %v4978_v52, 0.0  ;;  %v5114_v25 = vmul.f32 %v4978_v52, %v4978_v52 }
 0x2c3   : > { %v5075_v33 = vadd.f32 %v5074_v63, %v5073_v60 }
 0x2c4   : > { %v5176_v18 = vsel %vm4449_vm15, %v5114_v25, 0.0 }
 0x2c5   : > { %v5076_v55 = vrot.slane %v5075_v33, 4  ;;  %v5177_v2 = vadd.f32 %v5176_v18, %v5175_v61 }
 0x2c7   : > { %v5077_v46 = vadd.f32 %v5076_v55, %v5075_v33  ;;  %v5178_v7 = vrot.slane %v5177_v2, 4 }
 0x2c9   : > { %v5078_v45 = vrot.slane %v5077_v46, 2  ;;  %v5179_v3 = vadd.f32 %v5178_v7, %v5177_v2 }
 0x2cb   : > { %v5079_v21 = vadd.f32 %v5078_v45, %v5077_v46  ;;  %v5180_v36 = vrot.slane %v5179_v3, 2 }
 0x2cd   : > { %v5080_v43 = vrot.slane %v5079_v21, 1  ;;  %v5181_v15 = vadd.f32 %v5180_v36, %v5179_v3 }
 0x2cf   : > { %v5081_v31 = vadd.f32 %v5080_v43, %v5079_v21  ;;  %v5182_v13 = vrot.slane %v5181_v15, 1 }
 0x2d1   : > { %5082 = vst.msk [vmem:[%s211_s7] sm:$0x1] %vm219_vm1, %v5081_v31  ;;  %v5183_v17 = vadd.f32 %v5182_v13, %v5181_v15 }
 0x2d3   : > { %5184 = vst.msk [vmem:[%s214_s10] sm:$0x1] %vm219_vm1, %v5183_v17 }
 0x2d4 PF: > { %s15_s15 = sadd.s32 1, %s5984_s15  }
 0x2d5   : > { %p12_p4 = scmp.ge.s32.totalorder %s15_s15, 4  }
 0x2d7   :  { %14 = sbr.rel (!%p12_p4) target bundleno = 1 (0x1), region = 84 }

// kernel: residual_block_forward.4
= control target key start
LH: loop header
LB: loop body
LE: loop exit
PB: predicated region body
PF: predicated region fallthrough
CT: control target
= control target key end

     0   :  { %s6229_s18 = smov 0   ;;  %s8647_s0 = inlined_call_operand.vmem [shape: f32[2,16,16,64], index: 0, kind: input, shape index: {}]   ;;  %s8648_s1 = inlined_call_operand.vmem [shape: f32[3,64], index: 1, kind: input, shape index: {}]   ;;  %s8649_s2 = inlined_call_operand.vmem [shape: bf16[576,64], index: 2, kind: input, shape index: {}]   ;;  %s8650_s3 = inlined_call_operand.vmem [shape: f32[2,16,16,64], index: 3, kind: output, shape index: {0}]   ;;  %s8651_s4 = inlined_call_operand.vmem [shape: f32[2,1,64], index: 4, kind: output, shape index: {1}]   ;;  %s8652_s5 = inlined_call_operand.vmem [shape: f32[2,1,64], index: 5, kind: output, shape index: {2}]  }
   0x1 LB: > { %s5492_s19 = sadd.s32 4294967295, %s6195_s18   ;;  %p5496_p0 = scmp.ge.s32.totalorder %s6195_s18, 1  ;;  %s6195_s18 = sphi %s6229_s18, %s16_s18  }
   0x2   : > { %p192_p1 = scmp.lt.s32.totalorder %s6195_s18, 3 }
   0x4   : > { %p193_p2 = pnand %p5496_p0, %p192_p1 }
   0x6   : > { %196 = sbr.rel (%p193_p2) target bundleno = 755 (0x2f3), region = 32 }
   0xb   : > { %vm450_vm0 = vcmask 519168   ;;  %v6197_v0 = vmov 0   ;;  %vm453_vm1 = vcmask 516096   ;;  %p6275_p3 = scmp.lt.s32.totalorder %s5492_s19, 1  ;;  %vm1155_vm2 = vsmask.f32 3328 }
   0xc   : > { %451 = vst.msk [vmem:[#allocation2] sm:$0xf] %vm450_vm0, %v6197_v0  ;;  %452 = vst.msk [vmem:[#allocation2 + $0x4] sm:$0xf] %vm450_vm0, %v6197_v0  ;;  %v6306_v1 = vld [vmem:[%s8648_s1] ss:$0 sm:$0xff] }
   0xd   : > { %455 = vst.msk [vmem:[#allocation2 + $0xc] sm:$0xf] %vm450_vm0, %v6197_v0  ;;  %456 = vst.msk [vmem:[#allocation2 + $0x10] sm:$0xf] %vm450_vm0, %v6197_v0  ;;  %s8699_s19 = smov (!%p6275_p3, %s5492_s19), 1  ;;  %s6198_s6 = smov 64  }
   0xe   : > { %458 = vst.msk [vmem:[#allocation2 + $0x18] sm:$0xf] %vm450_vm0, %v6197_v0  ;;  %459 = vst.msk [vmem:[#allocation2 + $0x1c] sm:$0xf] %vm450_vm0, %v6197_v0  ;;  %s5718_s23 = sshll.u32 %s8699_s19, 8  ;;  %s238_s12 = scalar_lea.vmem %s8651_s4, %s8699_s19 }
   0xf   : > { %461 = vst.msk [vmem:[#allocation2 + $0x24] sm:$0xf] %vm450_vm0, %v6197_v0  ;;  %462 = vst.msk [vmem:[#allocation2 + $0x28] sm:$0xf] %vm450_vm0, %v6197_v0  ;;  %s6314_s26 = scalar_lea.vmem %s8647_s0, %s5718_s23  ;;  %v6319_v2 = vld [vmem:[%s8648_s1 + $0x1] ss:$0 sm:$0xff]  ;;  %s8412_s10 = scalar_lea.vmem %s8650_s3, %s5718_s23 }
  0x10   : > { %464 = vst.msk [vmem:[#allocation2 + $0x30] sm:$0xf] %vm450_vm0, %v6197_v0  ;;  %465 = vst.msk [vmem:[#allocation2 + $0x34] sm:$0xf] %vm450_vm0, %v6197_v0  ;;  %vm1156_vm3 = vsmask.f32 7440  ;;  %s241_s15 = scalar_lea.vmem %s8652_s5, %s8699_s19 }
  0x11   : > { %467 = vst.msk [vmem:[#allocation2 + $0x3c] sm:$0xf] %vm450_vm0, %v6197_v0  ;;  %468 = vst.msk [vmem:[#allocation2 + $0x40] sm:$0xf] %vm450_vm0, %v6197_v0  ;;  %v246_v3 = vld [vmem:[%s6314_s26] sm:$0xff]  ;;  %v247_v4 = vld [vmem:[%s6314_s26 + $0x8] sm:$0xff] }
  0x12   : > { %470 = vst.msk [vmem:[#allocation2 + $0x48] sm:$0xf] %vm450_vm0, %v6197_v0  ;;  %471 = vst.msk [vmem:[#allocation2 + $0x4c] sm:$0xf] %vm450_vm0, %v6197_v0  ;;  %v270_v5 = vld [vmem:[%s6314_s26 + $0xc0] sm:$0xff]  ;;  %v282_v9 = vmul.f32 %v6306_v1, %v246_v3  ;;  %v283_v10 = vmul.f32 %v6306_v1, %v247_v4  ;;  %v271_v20 = vld [vmem:[%s6314_s26 + $0xc8] sm:$0xff] }
  0x13   : > { %473 = vst.msk [vmem:[#allocation2 + $0x54] sm:$0xf] %vm450_vm0, %v6197_v0  ;;  %474 = vst.msk [vmem:[#allocation2 + $0x58] sm:$0xf] %vm450_vm0, %v6197_v0  ;;  %v1107_v6 = vld [vmem:[#allocation2] sm:$0xf]  ;;  %v306_v11 = vmul.f32 %v6306_v1, %v270_v5  ;;  %v307_v32 = vmul.f32 %v6306_v1, %v271_v20 }
  0x14   : > { %476 = vst.msk [vmem:[#allocation2 + $0x60] sm:$0xf] %vm450_vm0, %v6197_v0  ;;  %477 = vst.msk [vmem:[#allocation2 + $0x64] sm:$0xf] %vm450_vm0, %v6197_v0  ;;  %v1108_v7 = vld [vmem:[#allocation2 + $0x4] sm:$0xf]  ;;  %v318_v18 = vadd.f32 %v6319_v2, %v282_v9  ;;  %v319_v19 = vadd.f32 %v6319_v2, %v283_v10 }
  0x15   : > { %479 = vst.msk [vmem:[#allocation2 + $0x6c] sm:$0xf] %vm450_vm0, %v6197_v0  ;;  %480 = vst.msk [vmem:[#allocation2 + $0x70] sm:$0xf] %vm450_vm0, %v6197_v0  ;;  %v6327_v8 = vld [vmem:[%s8648_s1 + $0x2] ss:$0 sm:$0xff]  ;;  %v342_v21 = vadd.f32 %v6319_v2, %v306_v11  ;;  %v343_v43 = vadd.f32 %v6319_v2, %v307_v32 }
  0x16   : > { %482 = vst.msk [vmem:[#allocation2 + $0x78] sm:$0xf] %vm450_vm0, %v6197_v0  ;;  %483 = vst.msk [vmem:[#allocation2 + $0x7c] sm:$0xf] %vm450_vm0, %v6197_v0  ;;  %v1159_v12 = vshrl.u32 %v1107_v6, 16  ;;  %v1162_v13 = vshll.u32 %v1107_v6, 16  ;;  %v386_v28 = vmul.f32 %v6327_v8, %v318_v18  ;;  %v387_v31 = vmul.f32 %v6327_v8, %v319_v19 }
  0x17   : > { %485 = vst.msk [vmem:[#allocation2 + $0x84] sm:$0xf] %vm450_vm0, %v6197_v0  ;;  %486 = vst.msk [vmem:[#allocation2 + $0x88] sm:$0xf] %vm450_vm0, %v6197_v0  ;;  %v1168_v14 = vshll.u32 %v1108_v7, 16  ;;  %v1172_v15 = vshrl.u32 %v1108_v7, 16  ;;  %v410_v36 = vmul.f32 %v6327_v8, %v342_v21  ;;  %v411_v52 = vmul.f32 %v6327_v8, %v343_v43 }
  0x18   : > { %488 = vst.msk [vmem:[#allocation2 + $0x90] sm:$0xf] %vm450_vm0, %v6197_v0  ;;  %489 = vst.msk [vmem:[#allocation2 + $0x94] sm:$0xf] %vm450_vm0, %v6197_v0  ;;  %vm602_vm4 = vsmask.f32 256 }
  0x19   : > { %491 = vst.msk [vmem:[#allocation2 + $0x9c] sm:$0xf] %vm450_vm0, %v6197_v0  ;;  %492 = vst.msk [vmem:[#allocation2 + $0xa0] sm:$0xf] %vm450_vm0, %v6197_v0  ;;  %vm603_vm5 = vsmask.f32 4368 }
  0x1a   : > { %494 = vst.msk [vmem:[#allocation2 + $0xa8] sm:$0xf] %vm450_vm0, %v6197_v0  ;;  %495 = vst.msk [vmem:[#allocation2 + $0xac] sm:$0xf] %vm450_vm0, %v6197_v0  ;;  %v1161_v22 = vrot.slane %v1159_v12, 4  ;;  %v1164_v23 = vrot.slane %v1162_v13, 5 }
  0x1b   : > { %497 = vst.msk [vmem:[#allocation2 + $0xb4] sm:$0xf] %vm450_vm0, %v6197_v0  ;;  %498 = vst.msk [vmem:[#allocation2 + $0xb8] sm:$0xf] %vm450_vm0, %v6197_v0  ;;  %v1170_v24 = vrot.slane %v1168_v14, 5  ;;  %v1174_v25 = vrot.slane %v1172_v15, 4 }
  0x1c   : > { %500 = vst.msk [vmem:[#allocation2 + $0xc0] sm:$0xf] %vm450_vm0, %v6197_v0  ;;  %501 = vst.msk [vmem:[#allocation2 + $0xc4] sm:$0xf] %vm450_vm0, %v6197_v0  ;;  %v248_v26 = vld [vmem:[%s6314_s26 + $0x10] sm:$0xff]  ;;  %vm350_vm6 = vcmp.ge.f32.partialorder %v318_v18, 0.0  ;;  %v1165_v29 = vor.u32 %v1164_v23, %v1161_v22 }
  0x1d   : > { %503 = vst.msk [vmem:[#allocation2 + $0xcc] sm:$0xf] %vm450_vm0, %v6197_v0  ;;  %504 = vst.msk [vmem:[#allocation2 + $0xd0] sm:$0xf] %vm450_vm0, %v6197_v0  ;;  %vm351_vm7 = vcmp.ge.f32.partialorder %v319_v19, 0.0  ;;  %v1175_v30 = vor.u32 %v1174_v25, %v1170_v24  ;;  %v249_v33 = vld [vmem:[%s6314_s26 + $0x18] sm:$0xff]  ;;  %v418_v35 = vsel %vm350_vm6, %v318_v18, %v386_v28  ;;  %v284_v37 = vmul.f32 %v6306_v1, %v248_v26 }
  0x1e   : > { %454 = vst.msk [vmem:[#allocation2 + $0x8] sm:$0x1] %vm453_vm1, %v6197_v0  ;;  %457 = vst.msk [vmem:[#allocation2 + $0x14] sm:$0x1] %vm453_vm1, %v6197_v0  ;;  %vm374_vm9 = vcmp.ge.f32.partialorder %v342_v21, 0.0  ;;  %v1166_v38 = vrot.slane %v1165_v29, 4  ;;  %v419_v40 = vsel %vm351_vm7, %v319_v19, %v387_v31  ;;  %v5720_v41 = vpack.c.bf16 %v418_v35, %v418_v35 }
  0x1f   : > { %460 = vst.msk [vmem:[#allocation2 + $0x20] sm:$0x1] %vm453_vm1, %v6197_v0  ;;  %463 = vst.msk [vmem:[#allocation2 + $0x2c] sm:$0x1] %vm453_vm1, %v6197_v0  ;;  %v1176_v39 = vrot.slane %v1175_v30, 4  ;;  %v5721_v42 = vpack.c.bf16 %v419_v40, %v419_v40  ;;  %v442_v44 = vsel %vm374_vm9, %v342_v21, %v410_v36  ;;  %v285_v45 = vmul.f32 %v6306_v1, %v249_v33  ;;  %v272_v49 = vld [vmem:[%s6314_s26 + $0xd0] sm:$0xff] }
  0x20   : > { %466 = vst.msk [vmem:[#allocation2 + $0x38] sm:$0x1] %vm453_vm1, %v6197_v0  ;;  %469 = vst.msk [vmem:[#allocation2 + $0x44] sm:$0x1] %vm453_vm1, %v6197_v0  ;;  %v606_v47 = vshrl.u32 %v5720_v41, 16  ;;  %v609_v48 = vshll.u32 %v5720_v41, 16  ;;  %v5744_v55 = vpack.c.bf16 %v442_v44, %v442_v44  ;;  %v320_v56 = vadd.f32 %v6319_v2, %v284_v37 }
  0x21   : > { %472 = vst.msk [vmem:[#allocation2 + $0x50] sm:$0x1] %vm453_vm1, %v6197_v0  ;;  %475 = vst.msk [vmem:[#allocation2 + $0x5c] sm:$0x1] %vm453_vm1, %v6197_v0  ;;  %vm927_vm10 = vsmask.f32 7938  ;;  %v321_v62 = vadd.f32 %v6319_v2, %v285_v45  ;;  %v308_v63 = vmul.f32 %v6306_v1, %v272_v49 }
  0x22   : > { %478 = vst.msk [vmem:[#allocation2 + $0x68] sm:$0x1] %vm453_vm1, %v6197_v0  ;;  %481 = vst.msk [vmem:[#allocation2 + $0x74] sm:$0x1] %vm453_vm1, %v6197_v0  ;;  %v614_v50 = vshrl.u32 %v5721_v42, 16  ;;  %v617_v51 = vshll.u32 %v5721_v42, 16  ;;  %v388_v18 = vmul.f32 %v6327_v8, %v320_v56 }
  0x23   : > { %484 = vst.msk [vmem:[#allocation2 + $0x80] sm:$0x1] %vm453_vm1, %v6197_v0  ;;  %487 = vst.msk [vmem:[#allocation2 + $0x8c] sm:$0x1] %vm453_vm1, %v6197_v0  ;;  %vm375_vm11 = vcmp.ge.f32.partialorder %v343_v43, 0.0  ;;  %v608_v54 = vrot.slane %v606_v47, 7  ;;  %v389_v19 = vmul.f32 %v6327_v8, %v321_v62 }
  0x24   : > { %490 = vst.msk [vmem:[#allocation2 + $0x98] sm:$0x1] %vm453_vm1, %v6197_v0  ;;  %493 = vst.msk [vmem:[#allocation2 + $0xa4] sm:$0x1] %vm453_vm1, %v6197_v0  ;;  %v273_v57 = vld [vmem:[%s6314_s26 + $0xd8] sm:$0xff]  ;;  %v6360_v58 = vrot.slane %v614_v50, 7  ;;  %v443_v61 = vsel %vm375_vm11, %v343_v43, %v411_v52 }
  0x25   : > { %496 = vst.msk [vmem:[#allocation2 + $0xb0] sm:$0x1] %vm453_vm1, %v6197_v0  ;;  %499 = vst.msk [vmem:[#allocation2 + $0xbc] sm:$0x1] %vm453_vm1, %v6197_v0  ;;  %v1109_v16 = vld [vmem:[#allocation2 + $0x8] sm:$0x1]  ;;  %v611_v4 = vor.u32 %v609_v48, %v608_v54  ;;  %v5745_v5 = vpack.c.bf16 %v443_v61, %v443_v61  ;;  %v309_v10 = vmul.f32 %v6306_v1, %v273_v57 }
  0x26   : > { %502 = vst.msk [vmem:[#allocation2 + $0xc8] sm:$0x1] %vm453_vm1, %v6197_v0  ;;  %505 = vst.msk [vmem:[#allocation2 + $0xd4] sm:$0x1] %vm453_vm1, %v6197_v0  ;;  %v1178_v17 = vshll.u32 %v1109_v16, 16  ;;  %v612_v3 = vrot.slane %v608_v54, 4  ;;  %v619_v7 = vor.u32 %v617_v51, %v6360_v58 }
  0x27   : > { %vm6343_vm8 = vmor %vm1155_vm2, %vm1156_vm3  ;;  %v929_v60 = vld [vmem:[#allocation2 + $0xc] sm:$0xf]  ;;  %v810_v6 = vshrl.u32 %v5744_v55, 16  ;;  %v813_v9 = vshll.u32 %v5744_v55, 16  ;;  %vm352_vm14 = vcmp.ge.f32.partialorder %v320_v56, 0.0  ;;  %v818_v13 = vshrl.u32 %v5745_v5, 16 }
  0x28   : > { %v1180_v27 = vrot.slane %v1178_v17, 5  ;;  %v1171_v46 = vsel %vm6343_vm8, %v1166_v38, %v1170_v24  ;;  %vm6363_vm12 = vmand %vm450_vm0, %vm927_vm10  ;;  %v821_v14 = vshll.u32 %v5745_v5, 16  ;;  %v250_v15 = vld [vmem:[%s6314_s26 + $0x20] sm:$0xff]  ;;  %v1015_v17 = vld [vmem:[#allocation2 + $0x9c] sm:$0xf]  ;;  %vm353_vm15 = vcmp.ge.f32.partialorder %v321_v62, 0.0 }
  0x29   : > { %1542 = vrot.lane.b32.xlu0 %v1171_v46, %s6198_s6  ;;  %vm6371_vm13 = vmor %vm602_vm4, %vm603_vm5  ;;  %v930_v11 = vsel %vm6363_vm12, %v611_v4, %v929_v60  ;;  %v812_v12 = vrot.slane %v810_v6, 7  ;;  %v6062_v20 = vld [vmem:[%s8649_s2 + $0x78] sm:$0xff]   ;;  %v6389_v22 = vrot.slane %v818_v13, 7  ;;  %v344_v24 = vadd.f32 %v6319_v2, %v308_v63  ;;  %v6064_v30 = vld [vmem:[%s8649_s2 + $0x70] sm:$0xff]  }
  0x2a   : > { %v1181_v53 = vsel %vm6343_vm8, %v1176_v39, %v1180_v27  ;;  %v620_v16 = vsel %vm6371_vm13, %v612_v3, %v619_v7  ;;  %931 = vst [vmem:[#allocation2 + $0xc] sm:$0xf] %v930_v11  ;;  %v6063_v25 = vld [vmem:[%s8649_s2 + $0x38] sm:$0xff]   ;;  %v420_v26 = vsel %vm352_vm14, %v320_v56, %v388_v18  ;;  %v421_v27 = vsel %vm353_vm15, %v321_v62, %v389_v19  ;;  %v251_v36 = vld [vmem:[%s6314_s26 + $0x28] sm:$0xff]  ;;  %v6065_v37 = vld [vmem:[%s8649_s2 + $0x30] sm:$0xff]  }
  0x2b   : > { %932 = vst.msk [vmem:[#allocation2 + $0x10] sm:$0xf] %vm450_vm0, %v620_v16  ;;  %v816_v21 = vrot.slane %v812_v12, 4  ;;  %v815_v23 = vor.u32 %v813_v9, %v812_v12  ;;  %v345_v28 = vadd.f32 %v6319_v2, %v309_v10  ;;  %v286_v29 = vmul.f32 %v6306_v1, %v250_v15  ;;  %5752 = vmatprep.subr.bf16.mxu0 %v6062_v20  ;;  %v268_v44 = vld [vmem:[%s6314_s26 + $0xb0] sm:$0xff]  ;;  %v6066_v45 = vld [vmem:[%s8649_s2 + $0x68] sm:$0xff]   ;;  %v6068_v3 = vld [vmem:[%s8649_s2 + $0x60] sm:$0xff]  }
  0x2c   : > { %v621_v31 = vrot.slane %v6360_v58, 4  ;;  %v823_v32 = vor.u32 %v821_v14, %v6389_v22  ;;  %v5722_v35 = vpack.c.bf16 %v420_v26, %v420_v26  ;;  %5753 = vmatpush3.bf16.msra.mxu0 %v6063_v25  ;;  %6036 = vmatprep.subr.bf16.mxu1 %v6062_v20  ;;  %v5723_v38 = vpack.c.bf16 %v421_v27, %v421_v27  ;;  %v6067_v55 = vld [vmem:[%s8649_s2 + $0x28] sm:$0xff]   ;;  %v938_v60 = vld [vmem:[#allocation2 + $0x18] sm:$0xf]  ;;  %vm6515_vm10 = vmand %vm453_vm1, %vm602_vm4 }
  0x2d   : > { %1544 = vrot.lane.b32.xlu0 %v1181_v53, %s6198_s6  ;;  %v1016_v33 = vsel %vm6363_vm12, %v815_v23, %v1015_v17  ;;  %vm376_vm2 = vcmp.ge.f32.partialorder %v344_v24, 0.0  ;;  %vm377_vm3 = vcmp.ge.f32.partialorder %v345_v28, 0.0  ;;  %v412_v39 = vmul.f32 %v6327_v8, %v344_v24  ;;  %5754 = vmatprep.subr.bf16.mxu0 %v6064_v30  ;;  %v269_v13 = vld [vmem:[%s6314_s26 + $0xb8] sm:$0xff]  ;;  %v6069_v17 = vld [vmem:[%s8649_s2 + $0x20] sm:$0xff]   ;;  %v1022_v20 = vld [vmem:[#allocation2 + $0xa8] sm:$0xf] }
  0x2e   : > { %1017 = vst [vmem:[#allocation2 + $0x9c] sm:$0xf] %v1016_v33  ;;  %6044 = vmatpush3.bf16.msra.mxu1 %v6063_v25  ;;  %v824_v40 = vsel %vm6371_vm13, %v816_v21, %v823_v32  ;;  %v623_v41 = vshrl.u32 %v5722_v35, 16  ;;  %v626_v42 = vshll.u32 %v5722_v35, 16  ;;  %v413_v43 = vmul.f32 %v6327_v8, %v345_v28  ;;  %v6071_v32 = vld [vmem:[%s8649_s2 + $0x18] sm:$0xff]   ;;  %v6077_v58 = vld [vmem:[%s8649_s2] sm:$0xff]  }
  0x2f   : > { %6037 = vmatprep.subr.bf16.mxu1 %v6064_v30  ;;  %1018 = vst.msk [vmem:[#allocation2 + $0xa0] sm:$0xf] %vm450_vm0, %v824_v40  ;;  %v631_v46 = vshrl.u32 %v5723_v38, 16  ;;  %v634_v47 = vshll.u32 %v5723_v38, 16  ;;  %v444_v48 = vsel %vm376_vm2, %v344_v24, %v412_v39  ;;  %v287_v49 = vmul.f32 %v6306_v1, %v251_v36  ;;  %v6070_v24 = vld [vmem:[%s8649_s2 + $0x58] sm:$0xff]   ;;  %v6072_v39 = vld [vmem:[%s8649_s2 + $0x50] sm:$0xff]  }
  0x30   : > { %v625_v51 = vrot.slane %v623_v41, 7  ;;  %v445_v52 = vsel %vm377_vm3, %v345_v28, %v413_v43  ;;  %v5746_v53 = vpack.c.bf16 %v444_v48, %v444_v48  ;;  %v322_v54 = vadd.f32 %v6319_v2, %v286_v29  ;;  %5755 = vmatpush3.bf16.msra.mxu0 %v6065_v37  ;;  %v1043_v38 = vld [vmem:[#allocation2] sm:$0xf]  ;;  %v1044_v48 = vld [vmem:[#allocation2 + $0x4] sm:$0xf] }
  0x31   : > { %v1946_v50 = vld [vmem:[#allocation2 + $0xc] sm:$0xf]  ;;  %v6425_v57 = vrot.slane %v631_v46, 7  ;;  %v5747_v61 = vpack.c.bf16 %v445_v52, %v445_v52  ;;  %v323_v62 = vadd.f32 %v6319_v2, %v287_v49  ;;  %v304_v63 = vmul.f32 %v6306_v1, %v268_v44  ;;  %5756 = vmatprep.subr.bf16.mxu0 %v6066_v45  ;;  %1075 = vst.msk [vmem:[#allocation3] sm:$0xf] %vm450_vm0, %v1043_v38 }
  0x32   : > { %v1947_v56 = vld [vmem:[#allocation2 + $0x10] sm:$0xf]  ;;  %2010 = vrot.lane.b32.xlu0 %v1946_v50, %s6198_s6  ;;  %v629_v4 = vrot.slane %v625_v51, 4  ;;  %v628_v5 = vor.u32 %v626_v42, %v625_v51  ;;  %v827_v6 = vshrl.u32 %v5746_v53, 16  ;;  %v830_v7 = vshll.u32 %v5746_v53, 16  ;;  %6045 = vmatpush3.bf16.msra.mxu1 %v6065_v37 }
  0x33   : > { %2012 = vrot.lane.b32.xlu1 %v1947_v56, %s6198_s6  ;;  %v825_v9 = vrot.slane %v6389_v22, 4  ;;  %v636_v10 = vor.u32 %v634_v47, %v6425_v57  ;;  %v835_v11 = vshrl.u32 %v5747_v61, 16  ;;  %v838_v12 = vshll.u32 %v5747_v61, 16  ;;  %6038 = vmatprep.subr.bf16.mxu1 %v6066_v45  ;;  %v6454_v30 = vld [vmem:[#allocation2 + $0xc] sm:$0xf] }
  0x34   : > { %v939_v15 = vsel %vm6363_vm12, %v628_v5, %v938_v60  ;;  %v829_v16 = vrot.slane %v827_v6, 7  ;;  %vm354_vm5 = vcmp.ge.f32.partialorder %v322_v54, 0.0  ;;  %vm355_vm6 = vcmp.ge.f32.partialorder %v323_v62, 0.0  ;;  %5757 = vmatpush3.bf16.msra.mxu0 %v6067_v55  ;;  %v6470_v44 = vld [vmem:[#allocation2 + $0x10] sm:$0xf] }
  0x35   : > { %v1970_v14 = vld [vmem:[#allocation2 + $0x9c] sm:$0xf]  ;;  %v637_v18 = vsel %vm6371_vm13, %v629_v4, %v636_v10  ;;  %940 = vst [vmem:[#allocation2 + $0x18] sm:$0xf] %v939_v15  ;;  %v6444_v19 = vrot.slane %v835_v11, 7  ;;  %v390_v21 = vmul.f32 %v6327_v8, %v322_v54  ;;  %v391_v23 = vmul.f32 %v6327_v8, %v323_v62  ;;  %5758 = vmatprep.subr.bf16.mxu0 %v6068_v3  ;;  %v6073_v5 = vld [vmem:[%s8649_s2 + $0x10] sm:$0xff]  }
  0x36   : > { %2058 = vrot.lane.b32.xlu0 %v1970_v14, %s6198_s6  ;;  %v1971_v25 = vld [vmem:[#allocation2 + $0xa0] sm:$0xf]  ;;  %941 = vst.msk [vmem:[#allocation2 + $0x1c] sm:$0xf] %vm450_vm0, %v637_v18  ;;  %v833_v26 = vrot.slane %v829_v16, 4  ;;  %v832_v27 = vor.u32 %v830_v7, %v829_v16  ;;  %v305_v28 = vmul.f32 %v6306_v1, %v269_v13  ;;  %v340_v29 = vadd.f32 %v6319_v2, %v304_v63  ;;  %v6074_v13 = vld [vmem:[%s8649_s2 + $0x48] sm:$0xff]  }
  0x37   : > { %6046 = vmatpush3.bf16.msra.mxu1 %v6067_v55  ;;  %2060 = vrot.lane.b32.xlu1 %v1971_v25, %s6198_s6  ;;  %v638_v33 = vrot.slane %v6425_v57, 4  ;;  %v840_v35 = vor.u32 %v838_v12, %v6444_v19  ;;  %v422_v36 = vsel %vm354_vm5, %v322_v54, %v390_v21  ;;  %v423_v37 = vsel %vm355_vm6, %v323_v62, %v391_v23  ;;  %v945_v54 = vld [vmem:[#allocation2 + $0x24] sm:$0xf]  ;;  %v6482_v60 = vld [vmem:[#allocation2 + $0x9c] sm:$0xf] }
  0x38   : > { %6039 = vmatprep.subr.bf16.mxu1 %v6068_v3  ;;  %v1023_v40 = vsel %vm6363_vm12, %v832_v27, %v1022_v20  ;;  %v5724_v41 = vpack.c.bf16 %v422_v36, %v422_v36  ;;  %v5725_v42 = vpack.c.bf16 %v423_v37, %v423_v37  ;;  %v341_v43 = vadd.f32 %v6319_v2, %v305_v28  ;;  %v935_v18 = vld [vmem:[#allocation2 + $0x14] sm:$0x1]  ;;  %v6499_v25 = vld [vmem:[#allocation2 + $0xa0] sm:$0xf]  ;;  %v1026_v22 = vld [vmem:[#allocation2 + $0xb0] sm:$0x1] }
  0x39   : > { %5759 = vmatpush3.bf16.msra.mxu0 %v6069_v17  ;;  %v841_v45 = vsel %vm6371_vm13, %v833_v26, %v840_v35  ;;  %1024 = vst [vmem:[#allocation2 + $0xa8] sm:$0xf] %v1023_v40  ;;  %vm372_vm7 = vcmp.ge.f32.partialorder %v340_v29, 0.0  ;;  %v408_v46 = vmul.f32 %v6327_v8, %v340_v29  ;;  %v1183_v47 = vshrl.u32 %v6454_v30, 16  ;;  %1076 = vst.msk [vmem:[#allocation3 + $0x14] sm:$0xf] %vm450_vm0, %v1044_v48 }
  0x3a   : > { %5760 = vmatprep.subr.bf16.mxu0 %v6070_v24  ;;  %1025 = vst.msk [vmem:[#allocation2 + $0xac] sm:$0xf] %vm450_vm0, %v841_v45  ;;  %v640_v49 = vshrl.u32 %v5724_v41, 16  ;;  %v648_v50 = vshrl.u32 %v5725_v42, 16  ;;  %v651_v51 = vshll.u32 %v5725_v42, 16  ;;  %v643_v52 = vshll.u32 %v5724_v41, 16 }
  0x3b   : > { %6047 = vmatpush3.bf16.msra.mxu1 %v6069_v17  ;;  %v842_v53 = vrot.slane %v6444_v19, 4  ;;  %vm373_vm9 = vcmp.ge.f32.partialorder %v341_v43, 0.0  ;;  %v409_v55 = vmul.f32 %v6327_v8, %v341_v43  ;;  %v440_v56 = vsel %vm372_vm7, %v340_v29, %v408_v46  ;;  %v6075_v26 = vld [vmem:[%s8649_s2 + $0x8] sm:$0xff]  }
  0x3c   : > { %6040 = vmatprep.subr.bf16.mxu1 %v6070_v24  ;;  %v1948_v61 = vld [vmem:[#allocation2 + $0x18] sm:$0xf]  ;;  %v642_v62 = vrot.slane %v640_v49, 7  ;;  %v6484_v63 = vrot.slane %v648_v50, 7  ;;  %v5742_v3 = vpack.c.bf16 %v440_v56, %v440_v56  ;;  %v1186_v4 = vshll.u32 %v6454_v30, 16 }
  0x3d   : > { %5761 = vmatpush3.bf16.msra.mxu0 %v6071_v32  ;;  %v1949_v6 = vld [vmem:[#allocation2 + $0x1c] sm:$0xf]  ;;  %2014 = vrot.lane.b32.xlu0 %v1948_v61, %s6198_s6  ;;  %v441_v7 = vsel %vm373_vm9, %v341_v43, %v409_v55  ;;  %v1185_v10 = vrot.slane %v1183_v47, 4  ;;  %v1192_v11 = vshll.u32 %v6470_v44, 16  ;;  %v1196_v12 = vshrl.u32 %v6470_v44, 16  ;;  %v6076_v43 = vld [vmem:[%s8649_s2 + $0x40] sm:$0xff]  }
  0x3e   : > { %5762 = vmatprep.subr.bf16.mxu0 %v6072_v39  ;;  %2016 = vrot.lane.b32.xlu1 %v1949_v6, %s6198_s6  ;;  %v646_v14 = vrot.slane %v642_v62, 4  ;;  %v653_v15 = vor.u32 %v651_v51, %v6484_v63  ;;  %v645_v16 = vor.u32 %v643_v52, %v642_v62  ;;  %v1471_v17 = vshrl.u32 %v6482_v60, 16  ;;  %v6511_v36 = vld [vmem:[#allocation2 + $0x18] sm:$0xf]  ;;  %v1019_v55 = vld [vmem:[#allocation2 + $0xa4] sm:$0x1] }
  0x3f   : > { %6048 = vmatpush3.bf16.msra.mxu1 %v6071_v32  ;;  %v5743_v20 = vpack.c.bf16 %v441_v7, %v441_v7  ;;  %v793_v21 = vshrl.u32 %v5742_v3, 16  ;;  %v796_v23 = vshll.u32 %v5742_v3, 16  ;;  %v1188_v24 = vrot.slane %v1186_v4, 5  ;;  %v1008_v32 = vld [vmem:[#allocation2 + $0x90] sm:$0xf] }
  0x40   : > { %6041 = vmatprep.subr.bf16.mxu1 %v6072_v39  ;;  %v1972_v27 = vld [vmem:[#allocation2 + $0xa8] sm:$0xf]  ;;  %v654_v28 = vsel %vm6371_vm13, %v646_v14, %v653_v15  ;;  %v655_v29 = vrot.slane %v6484_v63, 4  ;;  %v946_v30 = vsel %vm6363_vm12, %v645_v16, %v945_v54  ;;  %v6509_v35 = vrot.slane %v1192_v11, 5  ;;  %v1012_v44 = vld [vmem:[#allocation2 + $0x98] sm:$0x1] }
  0x41   : > { %5763 = vmatpush3.bf16.msra.mxu0 %v6073_v5  ;;  %v1973_v38 = vld [vmem:[#allocation2 + $0xac] sm:$0xf]  ;;  %2062 = vrot.lane.b32.xlu0 %v1972_v27, %s6198_s6  ;;  %948 = vst.msk [vmem:[#allocation2 + $0x28] sm:$0xf] %vm450_vm0, %v654_v28  ;;  %947 = vst [vmem:[#allocation2 + $0x24] sm:$0xf] %v946_v30  ;;  %v1189_v42 = vor.u32 %v1188_v24, %v1185_v10  ;;  %v936_v48 = vsel %vm6515_vm10, %v621_v31, %v935_v18 }
  0x42   : > { %v795_v39 = vrot.slane %v793_v21, 7  ;;  %v801_v40 = vshrl.u32 %v5743_v20, 16  ;;  %v804_v41 = vshll.u32 %v5743_v20, 16  ;;  %5764 = vmatprep.subr.bf16.mxu0 %v6074_v13  ;;  %2064 = vrot.lane.b32.xlu1 %v1973_v38, %s6198_s6  ;;  %v1473_v45 = vrot.slane %v1471_v17, 4  ;;  %937 = vst [vmem:[#allocation2 + $0x14] sm:$0x1] %v936_v48 }
  0x43   : > { %v1474_v46 = vshll.u32 %v6482_v60, 16  ;;  %v1480_v47 = vshll.u32 %v6499_v25, 16  ;;  %6049 = vmatpush3.bf16.msra.mxu1 %v6073_v5  ;;  %v6531_v52 = vrot.slane %v1189_v42, 4  ;;  %v1114_v54 = vld [vmem:[#allocation2 + $0x1c] sm:$0xf]  ;;  %v1484_v60 = vshrl.u32 %v6499_v25, 16 }
  0x44   : > { %v798_v49 = vor.u32 %v796_v23, %v795_v39  ;;  %v799_v50 = vrot.slane %v795_v39, 4  ;;  %v803_v51 = vrot.slane %v801_v40, 7  ;;  %6042 = vmatprep.subr.bf16.mxu1 %v6074_v13  ;;  %v1198_v61 = vrot.slane %v1196_v12, 4  ;;  %v942_v6 = vld [vmem:[#allocation2 + $0x20] sm:$0x1] }
  0x45   : > { %v1476_v56 = vrot.slane %v1474_v46, 5  ;;  %v1207_v62 = vshrl.u32 %v6511_v36, 16  ;;  %5765 = vmatpush3.bf16.msra.mxu0 %v6075_v26  ;;  %v6540_v5 = vrot.slane %v1480_v47, 5  ;;  %v1195_v7 = vsel %vm6343_vm8, %v6531_v52, %v6509_v35  ;;  %v1149_v13 = vld [vmem:[#allocation2 + $0xa8] sm:$0xf]  ;;  %v274_v20 = vld [vmem:[%s6314_s26 + $0xe0] sm:$0xff] }
  0x46   : > { %v806_v31 = vor.u32 %v804_v41, %v803_v51  ;;  %v1009_v3 = vsel %vm6363_vm12, %v798_v49, %v1008_v32  ;;  %v808_v4 = vrot.slane %v803_v51, 4  ;;  %5766 = vmatprep.subr.bf16.mxu0 %v6076_v43  ;;  %v1199_v11 = vor.u32 %v1198_v61, %v6509_v35  ;;  %v1150_v18 = vld [vmem:[#allocation2 + $0xac] sm:$0xf] }
  0x47   : > { %1010 = vst [vmem:[#allocation2 + $0x90] sm:$0xf] %v1009_v3  ;;  %v1477_v10 = vor.u32 %v1476_v56, %v1473_v45  ;;  %v1210_v12 = vshll.u32 %v6511_v36, 16  ;;  %6050 = vmatpush3.bf16.msra.mxu1 %v6075_v26  ;;  %v1209_v16 = vrot.slane %v1207_v62, 4  ;;  %v1216_v17 = vshll.u32 %v1114_v54, 16 }
  0x48   : > { %v807_v14 = vsel %vm6371_vm13, %v799_v50, %v806_v31  ;;  %v1013_v15 = vsel %vm6515_vm10, %v808_v4, %v1012_v44  ;;  %6043 = vmatprep.subr.bf16.mxu1 %v6076_v43  ;;  %v1951_v21 = vld [vmem:[#allocation2 + $0x28] sm:$0xf]  ;;  %v1950_v23 = vld [vmem:[#allocation2 + $0x24] sm:$0xf]  ;;  %v1220_v25 = vshrl.u32 %v1114_v54, 16  ;;  %v1020_v26 = vsel %vm6515_vm10, %v825_v9, %v1019_v55 }
  0x49   : > { %1011 = vst.msk [vmem:[#allocation2 + $0x94] sm:$0xf] %vm450_vm0, %v807_v14  ;;  %1014 = vst [vmem:[#allocation2 + $0x98] sm:$0x1] %v1013_v15  ;;  %v1478_v24 = vrot.slane %v1477_v10, 4  ;;  %v943_v27 = vsel %vm6515_vm10, %v638_v33, %v942_v6  ;;  %5767 = vmatpush3.bf16.msra.mxu0 %v6077_v58  ;;  %2020 = vrot.lane.b32.xlu1 %v1951_v21, %s6198_s6  ;;  %v6564_v28 = vrot.slane %v1199_v11, 4 }
  0x4a   : > { %2018 = vrot.lane.b32.xlu0 %v1950_v23, %s6198_s6  ;;  %v1212_v30 = vrot.slane %v1210_v12, 5  ;;  %1021 = vst [vmem:[#allocation2 + $0xa4] sm:$0x1] %v1020_v26  ;;  %v1486_v32 = vrot.slane %v1484_v60, 4  ;;  %v1495_v35 = vshrl.u32 %v1149_v13, 16  ;;  %v1218_v36 = vrot.slane %v1216_v17, 5 }
  0x4b   : > { %944 = vst [vmem:[#allocation2 + $0x20] sm:$0x1] %v943_v27  ;;  %v1483_v57 = vsel %vm6343_vm8, %v1478_v24, %v6540_v5  ;;  %v1112_v9 = vld [vmem:[#allocation2 + $0x14] sm:$0x1]  ;;  %v1498_v33 = vshll.u32 %v1149_v13, 16  ;;  %v1504_v38 = vshll.u32 %v1150_v18, 16  ;;  %6051 = vmatpush3.bf16.msra.mxu1 %v6077_v58  ;;  %v310_v46 = vmul.f32 %v6306_v1, %v274_v20 }
  0x4c   : > { %v1202_v39 = vshll.u32 %v1112_v9, 16  ;;  %v1213_v40 = vor.u32 %v1212_v30, %v1209_v16  ;;  %v1487_v41 = vor.u32 %v1486_v32, %v6540_v5  ;;  %v1497_v42 = vrot.slane %v1495_v35, 4  ;;  %v1117_v30 = vld [vmem:[#allocation2 + $0x28] sm:$0xf] }
  0x4d   : > { %v1500_v43 = vrot.slane %v1498_v33, 5  ;;  %v1508_v44 = vshrl.u32 %v1150_v18, 16  ;;  %v1222_v45 = vrot.slane %v1220_v25, 4  ;;  %v1506_v50 = vrot.slane %v1504_v38, 5  ;;  %v1116_v18 = vld [vmem:[#allocation2 + $0x24] sm:$0xf] }
  0x4e   : > { %v1143_v47 = vld [vmem:[#allocation2 + $0x90] sm:$0xf]  ;;  %1546 = vrot.lane.b32.xlu0 %v1195_v7, %s6198_s6  ;;  %v6572_v48 = vrot.slane %v1202_v39, 5  ;;  %v1214_v49 = vrot.slane %v1213_v40, 4  ;;  %v1027_v51 = vsel %vm6515_vm10, %v842_v53, %v1026_v22  ;;  %v6578_v55 = vrot.slane %v1487_v41, 4  ;;  %v275_v40 = vld [vmem:[%s6314_s26 + $0xe8] sm:$0xff] }
  0x4f   : > { %v1447_v52 = vshrl.u32 %v1143_v47, 16  ;;  %v1450_v54 = vshll.u32 %v1143_v47, 16  ;;  %v1501_v56 = vor.u32 %v1500_v43, %v1497_v42  ;;  %1028 = vst [vmem:[#allocation2 + $0xb0] sm:$0x1] %v1027_v51  ;;  %v1223_v19 = vor.u32 %v1222_v45, %v1218_v36  ;;  %v949_v45 = vld [vmem:[#allocation2 + $0x2c] sm:$0x1] }
  0x50   : > { %v1144_v60 = vld [vmem:[#allocation2 + $0x94] sm:$0xf]  ;;  %v1145_v61 = vld [vmem:[#allocation2 + $0x98] sm:$0x1]  ;;  %v1205_v62 = vsel %vm6343_vm8, %v6564_v28, %v6572_v48  ;;  %v1219_v58 = vsel %vm6343_vm8, %v1214_v49, %v1218_v36  ;;  %v346_v31 = vadd.f32 %v6319_v2, %v310_v46  ;;  %v1510_v13 = vrot.slane %v1508_v44, 4 }
  0x51   : > { %v1449_v53 = vrot.slane %v1447_v52, 4  ;;  %v1452_v3 = vrot.slane %v1450_v54, 5  ;;  %v1456_v4 = vshll.u32 %v1144_v60, 16  ;;  %v1460_v5 = vshrl.u32 %v1144_v60, 16  ;;  %v1148_v6 = vld [vmem:[#allocation2 + $0xa4] sm:$0x1] }
  0x52   : > { %v1466_v7 = vshll.u32 %v1145_v61, 16  ;;  %1594 = vrot.lane.b32.xlu0 %v1483_v57, %s6198_s6  ;;  %v1490_v10 = vshll.u32 %v1148_v6, 16  ;;  %v1502_v11 = vrot.slane %v1501_v56, 4  ;;  %v1115_v12 = vld [vmem:[#allocation2 + $0x20] sm:$0x1]  ;;  %v6590_v23 = vrot.slane %v1223_v19, 4 }
  0x53   : > { %v1453_v14 = vor.u32 %v1452_v3, %v1449_v53  ;;  %v1458_v15 = vrot.slane %v1456_v4, 5  ;;  %v1462_v16 = vrot.slane %v1460_v5, 4  ;;  %v1226_v17 = vshll.u32 %v1115_v12, 16  ;;  %v252_v51 = vld [vmem:[%s6314_s26 + $0x30] sm:$0xff] }
  0x54   : > { %v1468_v20 = vrot.slane %v1466_v7, 5  ;;  %v6588_v21 = vrot.slane %v1490_v10, 5  ;;  %vm378_vm4 = vcmp.ge.f32.partialorder %v346_v31, 0.0  ;;  %v414_v27 = vmul.f32 %v6327_v8, %v346_v31  ;;  %v276_v61 = vld [vmem:[%s6314_s26 + $0xf0] sm:$0xff] }
  0x55   : > { %v1454_v24 = vrot.slane %v1453_v14, 4  ;;  %v1463_v25 = vor.u32 %v1462_v16, %v1458_v15  ;;  %v6592_v26 = vrot.slane %v1226_v17, 5  ;;  %v1507_v32 = vsel %vm6343_vm8, %v1502_v11, %v1506_v50  ;;  %v1029_v10 = vld [vmem:[#allocation2 + $0xb4] sm:$0xf] }
  0x56   : > { %1550 = vrot.lane.b32.xlu0 %v1219_v58, %s6198_s6  ;;  %v1151_v35 = vld [vmem:[#allocation2 + $0xb0] sm:$0x1]  ;;  %v1511_v22 = vor.u32 %v1510_v13, %v1506_v50  ;;  %v1231_v57 = vshrl.u32 %v1116_v18, 16  ;;  %v1234_v9 = vshll.u32 %v1116_v18, 16  ;;  %v1493_v38 = vsel %vm6343_vm8, %v6578_v55, %v6588_v21  ;;  %v253_v58 = vld [vmem:[%s6314_s26 + $0x38] sm:$0xff] }
  0x57   : > { %v1459_v36 = vsel %vm6343_vm8, %v1454_v24, %v1458_v15  ;;  %v1464_v33 = vrot.slane %v1463_v25, 4  ;;  %v446_v39 = vsel %vm378_vm4, %v346_v31, %v414_v27  ;;  %v1514_v43 = vshll.u32 %v1151_v35, 16  ;;  %v277_v13 = vld [vmem:[%s6314_s26 + $0xf8] sm:$0xff] }
  0x58   : > { %1590 = vrot.lane.b32.xlu1 %v1459_v36, %s6198_s6  ;;  %v5748_v41 = vpack.c.bf16 %v446_v39, %v446_v39  ;;  %v6606_v42 = vrot.slane %v1511_v22, 4  ;;  %v1233_v44 = vrot.slane %v1231_v57, 4  ;;  %v1236_v47 = vrot.slane %v1234_v9, 5 }
  0x59   : > { %v1469_v46 = vsel %vm6343_vm8, %v1464_v33, %v1468_v20  ;;  %v1240_v49 = vshll.u32 %v1117_v30, 16  ;;  %v1244_v50 = vshrl.u32 %v1117_v30, 16  ;;  %v6612_v56 = vrot.slane %v1514_v43, 5 }
  0x5a   : > { %1598 = vrot.lane.b32.xlu0 %v1507_v32, %s6198_s6  ;;  %v844_v52 = vshrl.u32 %v5748_v41, 16  ;;  %v847_v54 = vshll.u32 %v5748_v41, 16  ;;  %v311_v60 = vmul.f32 %v6306_v1, %v275_v40  ;;  %v1237_v19 = vor.u32 %v1236_v47, %v1233_v44  ;;  %v1033_v41 = vld [vmem:[#allocation2 + $0xbc] sm:$0x1] }
  0x5b   : > { %v6617_v31 = vrot.slane %v1240_v49, 5  ;;  %v950_v53 = vsel %vm6515_vm10, %v655_v29, %v949_v45  ;;  %v1246_v3 = vrot.slane %v1244_v50, 4  ;;  %v1229_v4 = vsel %vm6343_vm8, %v6590_v23, %v6592_v26  ;;  %v254_v45 = vld [vmem:[%s6314_s26 + $0x40] sm:$0xff]  ;;  %v1045_v50 = vld [vmem:[#allocation2 + $0xc] sm:$0xf] }
  0x5c   : > { %1592 = vrot.lane.b32.xlu1 %v1469_v46, %s6198_s6  ;;  %v6628_v5 = vrot.slane %v844_v52, 7  ;;  %v347_v6 = vadd.f32 %v6319_v2, %v311_v60  ;;  %951 = vst [vmem:[#allocation2 + $0x2c] sm:$0x1] %v950_v53  ;;  %v288_v7 = vmul.f32 %v6306_v1, %v252_v51  ;;  %v1517_v63 = vsel %vm6343_vm8, %v6606_v42, %v6612_v56  ;;  %v1068_v51 = vld [vmem:[#allocation2 + $0x94] sm:$0xf] }
  0x5d   : > { %v6636_v29 = vrot.slane %v1237_v19, 4  ;;  %v312_v11 = vmul.f32 %v6306_v1, %v276_v61  ;;  %v289_v12 = vmul.f32 %v6306_v1, %v253_v58  ;;  %v1247_v16 = vor.u32 %v1246_v3, %v6617_v31  ;;  %1077 = vst.msk [vmem:[#allocation3 + $0x28] sm:$0xf] %vm450_vm0, %v1045_v50  ;;  %1100 = vst.msk [vmem:[#allocation3 + $0x1f4] sm:$0xf] %vm450_vm0, %v1068_v51 }
  0x5e   : > { %v849_v14 = vor.u32 %v847_v54, %v6628_v5  ;;  %vm379_vm11 = vcmp.ge.f32.partialorder %v347_v6, 0.0  ;;  %v415_v15 = vmul.f32 %v6327_v8, %v347_v6  ;;  %v850_v18 = vrot.slane %v6628_v5, 4  ;;  %v1069_v54 = vld [vmem:[#allocation2 + $0x9c] sm:$0xf]  ;;  %v952_v58 = vld [vmem:[#allocation2 + $0x30] sm:$0xf] }
  0x5f   : > { %v1243_v17 = vsel %vm6343_vm8, %v6636_v29, %v6617_v31  ;;  %v324_v20 = vadd.f32 %v6319_v2, %v288_v7  ;;  %v348_v24 = vadd.f32 %v6319_v2, %v312_v11  ;;  %v325_v30 = vadd.f32 %v6319_v2, %v289_v12  ;;  %1101 = vst.msk [vmem:[#allocation3 + $0x208] sm:$0xf] %vm450_vm0, %v1069_v54  ;;  %v1046_v3 = vld [vmem:[#allocation2 + $0x10] sm:$0xf]  ;;  %v6694_v12 = vld [vmem:[%s8648_s1] ss:$0 sm:$0xff] }
  0x60   : > { %1548 = vrot.lane.b32.xlu1 %v1205_v62, %s6198_s6  ;;  %v1030_v25 = vsel %vm6363_vm12, %v849_v14, %v1029_v10  ;;  %v447_v27 = vsel %vm379_vm11, %v347_v6, %v415_v15  ;;  %v313_v32 = vmul.f32 %v6306_v1, %v277_v13  ;;  %v6665_v33 = vrot.slane %v1247_v16, 4  ;;  %1078 = vst.msk [vmem:[#allocation3 + $0x3c] sm:$0xf] %vm450_vm0, %v1046_v3  ;;  %v1036_v15 = vld [vmem:[#allocation2 + $0xc0] sm:$0xf] }
  0x61   : > { %1031 = vst [vmem:[#allocation2 + $0xb4] sm:$0xf] %v1030_v25  ;;  %v5749_v35 = vpack.c.bf16 %v447_v27, %v447_v27  ;;  %vm356_vm14 = vcmp.ge.f32.partialorder %v324_v20, 0.0  ;;  %v392_v22 = vmul.f32 %v6327_v8, %v324_v20  ;;  %vm380_vm15 = vcmp.ge.f32.partialorder %v348_v24, 0.0  ;;  %v956_v16 = vld [vmem:[#allocation2 + $0x38] sm:$0x1] }
  0x62   : > { %v416_v57 = vmul.f32 %v6327_v8, %v348_v24  ;;  %vm357_vm2 = vcmp.ge.f32.partialorder %v325_v30, 0.0  ;;  %v393_v28 = vmul.f32 %v6327_v8, %v325_v30  ;;  %v349_v48 = vadd.f32 %v6319_v2, %v313_v32  ;;  %v1067_v2 = vld [vmem:[#allocation2 + $0x90] sm:$0xf]  ;;  %v6739_v31 = vld [vmem:[%s8648_s1 + $0x1] ss:$0 sm:$0xff] }
  0x63   : > { %v852_v62 = vshrl.u32 %v5749_v35, 16  ;;  %v855_v9 = vshll.u32 %v5749_v35, 16  ;;  %v1118_v36 = vld [vmem:[#allocation2 + $0x2c] sm:$0x1]  ;;  %v424_v1 = vsel %vm356_vm14, %v324_v20, %v392_v22  ;;  %1099 = vst.msk [vmem:[#allocation3 + $0x1e0] sm:$0xf] %vm450_vm0, %v1067_v2  ;;  %v290_v13 = vmul.f32 %v6694_v12, %v254_v45 }
  0x64   : > { %1596 = vrot.lane.b32.xlu1 %v1493_v38, %s6198_s6  ;;  %v1250_v39 = vshll.u32 %v1118_v36, 16  ;;  %v5726_v40 = vpack.c.bf16 %v424_v1, %v424_v1  ;;  %v448_v43 = vsel %vm380_vm15, %v348_v24, %v416_v57  ;;  %v425_v44 = vsel %vm357_vm2, %v325_v30, %v393_v28  ;;  %v1047_v20 = vld [vmem:[#allocation2 + $0x18] sm:$0xf]  ;;  %v6708_v30 = vld [vmem:[#allocation2 + $0xc] sm:$0xe]  ;;  %v256_v45 = vld [vmem:[%s6314_s26 + $0x50] sm:$0xff] }
  0x65   : > { %v854_v46 = vrot.slane %v852_v62, 7  ;;  %v5750_v47 = vpack.c.bf16 %v448_v43, %v448_v43  ;;  %v6674_v49 = vpack.c.bf16 %v425_v44, %v425_v44  ;;  %vm381_vm3 = vcmp.ge.f32.partialorder %v349_v48, 0.0  ;;  %1079 = vst.msk [vmem:[#allocation3 + $0x50] sm:$0xf] %vm450_vm0, %v1047_v20  ;;  %v255_v57 = vld [vmem:[%s6314_s26 + $0x48] sm:$0xff] }
  0x66   : > { %v6677_v52 = vrot.slane %v1250_v39, 5  ;;  %v657_v55 = vshrl.u32 %v5726_v40, 16  ;;  %v660_v21 = vshll.u32 %v5726_v40, 16  ;;  %v417_v38 = vmul.f32 %v6327_v8, %v349_v48  ;;  %v1070_v28 = vld [vmem:[#allocation2 + $0xa0] sm:$0xf] }
  0x67   : > { %v857_v60 = vor.u32 %v855_v9, %v854_v46  ;;  %v859_v61 = vrot.slane %v854_v46, 4  ;;  %v861_v19 = vshrl.u32 %v5750_v47, 16  ;;  %v864_v53 = vshll.u32 %v5750_v47, 16  ;;  %1102 = vst.msk [vmem:[#allocation3 + $0x21c] sm:$0xf] %vm450_vm0, %v1070_v28 }
  0x68   : > { %vm1767_vm5 = vcmask 1042432   ;;  %vm1768_vm6 = vcmask 1046532   ;;  %1552 = vrot.lane.b32.xlu1 %v1229_v4, %s6198_s6  ;;  %v1974_v8 = vld [vmem:[#allocation2 + $0xb4] sm:$0xf]  ;;  %v659_v7 = vrot.slane %v657_v55, 7  ;;  %v665_v10 = vshrl.u32 %v6674_v49, 16 }
  0x69   : > { %v1152_v6 = vld [vmem:[#allocation2 + $0xb4] sm:$0xf]  ;;  %v449_v11 = vsel %vm381_vm3, %v349_v48, %v417_v38  ;;  %2066 = vrot.lane.b32.xlu0 %v1974_v8, %s6198_s6  ;;  %v858_v23 = vsel %vm6371_vm13, %v850_v18, %v857_v60  ;;  %v1034_v14 = vsel %vm6515_vm10, %v859_v61, %v1033_v41  ;;  %v6706_v25 = vrot.slane %v861_v19, 7  ;;  %v1071_v1 = vld [vmem:[#allocation2 + $0xa8] sm:$0xf]  ;;  %v257_v55 = vld [vmem:[%s6314_s26 + $0x58] sm:$0xff] }
  0x6a   : > { %v1519_v26 = vshrl.u32 %v1152_v6, 16  ;;  %v1522_v4 = vshll.u32 %v1152_v6, 16  ;;  %1032 = vst.msk [vmem:[#allocation2 + $0xb8] sm:$0xf] %vm450_vm0, %v858_v23  ;;  %v662_v24 = vor.u32 %v660_v21, %v659_v7  ;;  %1035 = vst [vmem:[#allocation2 + $0xbc] sm:$0x1] %v1034_v14  ;;  %v5751_v22 = vpack.c.bf16 %v449_v11, %v449_v11 }
  0x6b   : > { %v663_v27 = vrot.slane %v659_v7, 4  ;;  %v667_v5 = vrot.slane %v665_v10, 7  ;;  %v668_v35 = vshll.u32 %v6674_v49, 16  ;;  %v866_v62 = vor.u32 %v864_v53, %v6706_v25  ;;  %v1048_v39 = vld [vmem:[#allocation2 + $0x1c] sm:$0xf]  ;;  %vm6773_vm9 = vmor %vm1767_vm5, %vm1768_vm6 }
  0x6c   : > { %v1521_v18 = vrot.slane %v1519_v26, 4  ;;  %v1524_v32 = vrot.slane %v1522_v4, 5  ;;  %1600 = vrot.lane.b32.xlu1 %v1517_v63, %s6198_s6  ;;  %v953_v48 = vsel %vm6363_vm12, %v662_v24, %v952_v58  ;;  %v867_v36 = vrot.slane %v6706_v25, 4  ;;  %v2635_v41 = vld [vmem:[#allocation2 + $0x10] sm:$0xf]  ;;  %v258_v58 = vld [vmem:[%s6314_s26 + $0x60] sm:$0xff] }
  0x6d   : > { %v672_v9 = vrot.slane %v667_v5, 4  ;;  %1554 = vrot.lane.b32.xlu0 %v1243_v17, %s6198_s6  ;;  %954 = vst [vmem:[#allocation2 + $0x30] sm:$0xf] %v953_v48  ;;  %v670_v56 = vor.u32 %v668_v35, %v667_v5  ;;  %v869_v63 = vshrl.u32 %v5751_v22, 16  ;;  %v872_v40 = vshll.u32 %v5751_v22, 16 }
  0x6e   : > { %v1525_v42 = vor.u32 %v1524_v32, %v1521_v18  ;;  %1103 = vst.msk [vmem:[#allocation3 + $0x230] sm:$0xf] %vm450_vm0, %v1071_v1  ;;  %1080 = vst.msk [vmem:[#allocation3 + $0x64] sm:$0xf] %vm450_vm0, %v1048_v39  ;;  %v1037_v43 = vsel %vm6363_vm12, %v866_v62, %v1036_v15  ;;  %v326_v29 = vadd.f32 %v6739_v31, %v290_v13  ;;  %v1072_v2 = vld [vmem:[#allocation2 + $0xac] sm:$0xf] }
  0x6f   : > { %v957_v44 = vsel %vm6515_vm10, %v672_v9, %v956_v16  ;;  %v291_v17 = vmul.f32 %v6694_v12, %v255_v57  ;;  %v1049_v46 = vld [vmem:[#allocation2 + $0x24] sm:$0xf]  ;;  %1038 = vst [vmem:[#allocation2 + $0xc0] sm:$0xf] %v1037_v43  ;;  %v671_v49 = vsel %vm6371_vm13, %v663_v27, %v670_v56  ;;  %v6746_v50 = vrot.slane %v869_v63, 7 }
  0x70   : > { %v1526_v47 = vrot.slane %v1525_v42, 4  ;;  %958 = vst [vmem:[#allocation2 + $0x38] sm:$0x1] %v957_v44  ;;  %v5552_v51 = vrot.slane %v6708_v30, 9  ;;  %1104 = vst.msk [vmem:[#allocation3 + $0x244] sm:$0xf] %vm450_vm0, %v1072_v2  ;;  %v1253_v3 = vsel %vm6343_vm8, %v6665_v33, %v6677_v52  ;;  %v6768_v7 = vmul.f32 %v6694_v12, %v256_v45 }
  0x71   : > { %1081 = vst.msk [vmem:[#allocation3 + $0x78] sm:$0xf] %vm450_vm0, %v1049_v46  ;;  %v1073_v21 = vld [vmem:[#allocation2 + $0xb4] sm:$0xf]  ;;  %955 = vst.msk [vmem:[#allocation2 + $0x34] sm:$0xf] %vm450_vm0, %v671_v49  ;;  %v327_v60 = vadd.f32 %v6739_v31, %v291_v17  ;;  %v874_v6 = vor.u32 %v872_v40, %v6746_v50  ;;  %v6778_v26 = vmul.f32 %v6694_v12, %v257_v55 }
  0x72   : > { %vm358_vm7 = vcmp.ge.f32.partialorder %v326_v29, 0.0  ;;  %v6756_v38 = vld [vmem:[%s8648_s1 + $0x2] ss:$0 sm:$0xff]  ;;  %v2732_v61 = vrot.slane %v2635_v41, 5  ;;  %1105 = vst.msk [vmem:[#allocation3 + $0x258] sm:$0xf] %vm450_vm0, %v1073_v21  ;;  %v6789_v25 = vmul.f32 %v6694_v12, %v258_v58 }
  0x73   : > { %v394_v54 = vmul.f32 %v6756_v38, %v326_v29  ;;  %v1975_v19 = vld [vmem:[#allocation2 + $0xb8] sm:$0xf]  ;;  %v1154_v8 = vld [vmem:[#allocation2 + $0xbc] sm:$0x1]  ;;  %v1050_v33 = vld [vmem:[#allocation2 + $0x28] sm:$0xf]  ;;  %v875_v52 = vsel %vm6371_vm13, %v867_v36, %v874_v6  ;;  %v395_v14 = vmul.f32 %v6756_v38, %v327_v60 }
  0x74   : > { %v1153_v53 = vld [vmem:[#allocation2 + $0xb8] sm:$0xf]  ;;  %2068 = vrot.lane.b32.xlu1 %v1975_v19, %s6198_s6  ;;  %v1538_v13 = vshll.u32 %v1154_v8, 16  ;;  %vm359_vm4 = vcmp.ge.f32.partialorder %v327_v60, 0.0  ;;  %1082 = vst.msk [vmem:[#allocation3 + $0x8c] sm:$0xf] %vm450_vm0, %v1050_v33  ;;  %v6793_v18 = vsel %vm6773_vm9, %v5552_v51, %v2732_v61 }
  0x75   : > { %v1528_v10 = vshll.u32 %v1153_v53, 16  ;;  %v1532_v11 = vshrl.u32 %v1153_v53, 16  ;;  %v426_v4 = vsel %vm358_vm7, %v326_v29, %v394_v54  ;;  %1039 = vst.msk [vmem:[#allocation2 + $0xc4] sm:$0xf] %vm450_vm0, %v875_v52  ;;  %v6786_v24 = vld [vmem:[#allocation2 + $0x14] sm:$0x1]  ;;  %v427_v30 = vsel %vm359_vm4, %v327_v60, %v395_v14 }
  0x76   : > { %v5728_v20 = vpack.c.bf16 %v426_v4, %v426_v4  ;;  %v1540_v27 = vrot.slane %v1538_v13, 5  ;;  %v1119_v5 = vld [vmem:[#allocation2 + $0x30] sm:$0xf]  ;;  %v6795_v32 = vrot.slane %v2732_v61, 4  ;;  %v5729_v1 = vpack.c.bf16 %v427_v30, %v427_v30  ;;  %v3035_v45 = vld [vmem:[#allocation2 + $0x18] sm:$0xf] }
  0x77   : > { %v1530_v15 = vrot.slane %v1528_v10, 5  ;;  %v1534_v16 = vrot.slane %v1532_v11, 4  ;;  %v1255_v57 = vshrl.u32 %v1119_v5, 16  ;;  %v1258_v28 = vshll.u32 %v1119_v5, 16  ;;  %v1121_v48 = vld [vmem:[#allocation2 + $0x38] sm:$0x1] }
  0x78   : > { %1556 = vrot.lane.b32.xlu1 %v1253_v3, %s6198_s6  ;;  %v1120_v62 = vld [vmem:[#allocation2 + $0x34] sm:$0xf]  ;;  %v1274_v9 = vshll.u32 %v1121_v48, 16  ;;  %v674_v36 = vshrl.u32 %v5728_v20, 16  ;;  %v2735_v39 = vrot.slane %v6786_v24, 5  ;;  %v677_v17 = vshll.u32 %v5728_v20, 16 }
  0x79   : > { %v1531_v35 = vsel %vm6343_vm8, %v1526_v47, %v1530_v15  ;;  %v1535_v22 = vor.u32 %v1534_v16, %v1530_v15  ;;  %v1952_v42 = vld [vmem:[#allocation2 + $0x30] sm:$0xf]  ;;  %v1257_v63 = vrot.slane %v1255_v57, 4  ;;  %v1260_v40 = vrot.slane %v1258_v28, 5  ;;  %v959_v49 = vld [vmem:[#allocation2 + $0x3c] sm:$0xf] }
  0x7a   : > { %1602 = vrot.lane.b32.xlu0 %v1531_v35, %s6198_s6  ;;  %v1264_v41 = vshll.u32 %v1120_v62, 16  ;;  %v1268_v43 = vshrl.u32 %v1120_v62, 16  ;;  %v6802_v44 = vrot.slane %v1274_v9, 5  ;;  %v676_v29 = vrot.slane %v674_v36, 7  ;;  %v3036_v55 = vld [vmem:[#allocation2 + $0x1c] sm:$0xf] }
  0x7b   : > { %v1536_v56 = vrot.slane %v1535_v22, 4  ;;  %v1261_v46 = vor.u32 %v1260_v40, %v1257_v63  ;;  %v682_v51 = vshrl.u32 %v5729_v1, 16  ;;  %v1976_v21 = vld [vmem:[#allocation2 + $0xc0] sm:$0xf]  ;;  %v685_v58 = vshll.u32 %v5729_v1, 16  ;;  %v6092_v53 = vld [vmem:[%s8649_s2 + $0xf8] sm:$0xff]  }
  0x7c   : > { %v1266_v47 = vrot.slane %v1264_v41, 5  ;;  %v1270_v54 = vrot.slane %v1268_v43, 4  ;;  %v679_v60 = vor.u32 %v677_v17, %v676_v29  ;;  %v680_v61 = vrot.slane %v676_v29, 4  ;;  %v963_v19 = vld [vmem:[#allocation2 + $0x44] sm:$0x1]  ;;  %5864 = vmatprep.subr.bf16.mxu1 %v6092_v53 }
  0x7d   : > { %v1541_v2 = vsel %vm6343_vm8, %v1536_v56, %v1540_v27  ;;  %v1953_v3 = vld [vmem:[#allocation2 + $0x34] sm:$0xf]  ;;  %v1262_v8 = vrot.slane %v1261_v46, 4  ;;  %v684_v6 = vrot.slane %v682_v51, 7  ;;  %v3084_v10 = vshrl.u32 %v3035_v45, 16 }
  0x7e   : > { %2022 = vrot.lane.b32.xlu0 %v1952_v42, %s6198_s6  ;;  %1604 = vrot.lane.b32.xlu1 %v1541_v2, %s6198_s6  ;;  %v3087_v11 = vshll.u32 %v3035_v45, 16  ;;  %v1271_v13 = vor.u32 %v1270_v54, %v1266_v47  ;;  %v960_v33 = vsel %vm6363_vm12, %v679_v60, %v959_v49  ;;  %v3093_v52 = vshll.u32 %v3036_v55, 16  ;;  %v3037_v14 = vld [vmem:[#allocation2 + $0x20] sm:$0x1]  ;;  %v1074_v15 = vld [vmem:[#allocation2 + $0xb8] sm:$0xf] }
  0x7f   : > { %v3097_v4 = vshrl.u32 %v3036_v55, 16  ;;  %v1267_v16 = vsel %vm6343_vm8, %v1262_v8, %v1266_v47  ;;  %961 = vst [vmem:[#allocation2 + $0x3c] sm:$0xf] %v960_v33  ;;  %v687_v20 = vor.u32 %v685_v58, %v684_v6  ;;  %v689_v24 = vrot.slane %v684_v6, 4  ;;  %1106 = vst.msk [vmem:[#allocation3 + $0x26c] sm:$0xf] %vm450_vm0, %v1074_v15 }
  0x80   : > { %v3086_v27 = vrot.slane %v3084_v10, 4  ;;  %v1272_v5 = vrot.slane %v1271_v13, 4  ;;  %v3089_v30 = vrot.slane %v3087_v11, 5  ;;  %v6818_v35 = vrot.slane %v3093_v52, 5  ;;  %v2637_v57 = vld [vmem:[#allocation2 + $0x18] sm:$0xe] }
  0x81   : > { %v3099_v22 = vrot.slane %v3097_v4, 4  ;;  %v2638_v28 = vld [vmem:[#allocation2 + $0x1c] sm:$0xf]  ;;  %v1977_v48 = vld [vmem:[#allocation2 + $0xc4] sm:$0xf]  ;;  %v688_v62 = vsel %vm6371_vm13, %v680_v61, %v687_v20  ;;  %v3103_v9 = vshll.u32 %v3037_v14, 16  ;;  %v964_v36 = vsel %vm6515_vm10, %v689_v24, %v963_v19 }
  0x82   : > { %2070 = vrot.lane.b32.xlu0 %v1976_v21, %s6198_s6  ;;  %2024 = vrot.lane.b32.xlu1 %v1953_v3, %s6198_s6  ;;  %v328_v1 = vadd.f32 %v6739_v31, %v6768_v7  ;;  %962 = vst.msk [vmem:[#allocation2 + $0x40] sm:$0xf] %vm450_vm0, %v688_v62  ;;  %v6830_v42 = vsel %vm6773_vm9, %v6795_v32, %v2735_v39  ;;  %965 = vst [vmem:[#allocation2 + $0x44] sm:$0x1] %v964_v36  ;;  %v6835_v41 = vld [vmem:[#allocation2 + $0x24] sm:$0xf] }
  0x83   : > { %v3090_v56 = vor.u32 %v3089_v30, %v3086_v27  ;;  %v3100_v63 = vor.u32 %v3099_v22, %v6818_v35  ;;  %v329_v40 = vadd.f32 %v6739_v31, %v6778_v26  ;;  %v1277_v7 = vsel %vm6343_vm8, %v1272_v5, %v6802_v44  ;;  %v6843_v32 = vld [vmem:[#allocation2 + $0x20] sm:$0x1]  ;;  %v1051_v45 = vld [vmem:[#allocation2 + $0x30] sm:$0xf]  ;;  %v259_v11 = vld [vmem:[%s6314_s26 + $0x68] sm:$0xff] }
  0x84   : > { %v6840_v43 = vrot.slane %v3103_v9, 5  ;;  %vm360_vm11 = vcmp.ge.f32.partialorder %v328_v1, 0.0  ;;  %v396_v29 = vmul.f32 %v6756_v38, %v328_v1  ;;  %v5553_v2 = vrot.slane %v2637_v57, 9  ;;  %1083 = vst.msk [vmem:[#allocation3 + $0xa0] sm:$0xf] %vm450_vm0, %v1051_v45 }
  0x85   : > { %v6847_v39 = vrot.slane %v3090_v56, 4  ;;  %v6849_v26 = vrot.slane %v3100_v63, 4  ;;  %vm361_vm14 = vcmp.ge.f32.partialorder %v329_v40, 0.0  ;;  %v397_v17 = vmul.f32 %v6756_v38, %v329_v40  ;;  %v966_v22 = vld [vmem:[#allocation2 + $0x48] sm:$0xf] }
  0x86   : > { %2072 = vrot.lane.b32.xlu1 %v1977_v48, %s6198_s6  ;;  %1558 = vrot.lane.b32.xlu0 %v1267_v16, %s6198_s6  ;;  %v428_v44 = vsel %vm360_vm11, %v328_v1, %v396_v29  ;;  %v2739_v46 = vrot.slane %v2638_v28, 5  ;;  %v3108_v47 = vshrl.u32 %v6835_v41, 16  ;;  %v1954_v49 = vld [vmem:[#allocation2 + $0x3c] sm:$0xf]  ;;  %v2742_v60 = vrot.slane %v6843_v32, 5 }
  0x87   : > { %v3096_v51 = vsel %vm6343_vm8, %v6847_v39, %v6818_v35  ;;  %v1122_v55 = vld [vmem:[#allocation2 + $0x3c] sm:$0xf]  ;;  %v5730_v21 = vpack.c.bf16 %v428_v44, %v428_v44  ;;  %v429_v54 = vsel %vm361_vm14, %v329_v40, %v397_v17  ;;  %v3106_v61 = vsel %vm6343_vm8, %v6849_v26, %v6840_v43  ;;  %v3039_v28 = vld [vmem:[#allocation2 + $0x28] sm:$0xf]  ;;  %v970_v1 = vld [vmem:[#allocation2 + $0x50] sm:$0x1] }
  0x88   : > { %v1279_v58 = vshrl.u32 %v1122_v55, 16  ;;  %v1282_v19 = vshll.u32 %v1122_v55, 16  ;;  %v5731_v53 = vpack.c.bf16 %v429_v54, %v429_v54  ;;  %v2741_v6 = vrot.slane %v2739_v46, 4  ;;  %v3040_v29 = vld [vmem:[#allocation2 + $0x2c] sm:$0x1] }
  0x89   : > { %v691_v3 = vshrl.u32 %v5730_v21, 16  ;;  %v694_v8 = vshll.u32 %v5730_v21, 16  ;;  %v3110_v10 = vrot.slane %v3108_v47, 4  ;;  %v1955_v13 = vld [vmem:[#allocation2 + $0x40] sm:$0xf]  ;;  %v6868_v14 = vsel %vm6773_vm9, %v5553_v2, %v2739_v46 }
  0x8a   : > { %1560 = vrot.lane.b32.xlu1 %v1277_v7, %s6198_s6  ;;  %2026 = vrot.lane.b32.xlu0 %v1954_v49, %s6198_s6  ;;  %v1123_v33 = vld [vmem:[#allocation2 + $0x40] sm:$0xf]  ;;  %v1281_v52 = vrot.slane %v1279_v58, 4  ;;  %v1284_v4 = vrot.slane %v1282_v19, 5  ;;  %v6872_v15 = vadd.f32 %v6739_v31, %v6789_v25  ;;  %v1124_v24 = vld [vmem:[#allocation2 + $0x44] sm:$0x1]  ;;  %v295_v48 = vmul.f32 %v6694_v12, %v259_v11 }
  0x8b   : > { %v1288_v16 = vshll.u32 %v1123_v33, 16  ;;  %v1292_v20 = vshrl.u32 %v1123_v33, 16  ;;  %v693_v27 = vrot.slane %v691_v3, 7  ;;  %v699_v5 = vshrl.u32 %v5731_v53, 16  ;;  %v2640_v2 = vld [vmem:[#allocation2 + $0x24] sm:$0xe] }
  0x8c   : > { %v1285_v30 = vor.u32 %v1284_v4, %v1281_v52  ;;  %v1298_v35 = vshll.u32 %v1124_v24, 16  ;;  %v702_v57 = vshll.u32 %v5731_v53, 16  ;;  %v3111_v7 = vshll.u32 %v6835_v41, 16  ;;  %v1052_v46 = vld [vmem:[#allocation2 + $0x34] sm:$0xf] }
  0x8d   : > { %v1290_v62 = vrot.slane %v1288_v16, 5  ;;  %v1294_v25 = vrot.slane %v1292_v20, 4  ;;  %v696_v9 = vor.u32 %v694_v8, %v693_v27  ;;  %v697_v36 = vrot.slane %v693_v27, 4  ;;  %1084 = vst.msk [vmem:[#allocation3 + $0xb4] sm:$0xf] %vm450_vm0, %v1052_v46 }
  0x8e   : > { %2028 = vrot.lane.b32.xlu1 %v1955_v13, %s6198_s6  ;;  %2842 = vrot.lane.b32.xlu0 %v6793_v18, %s6198_s6  ;;  %v1286_v56 = vrot.slane %v1285_v30, 4  ;;  %v1300_v63 = vrot.slane %v1298_v35, 5  ;;  %v701_v40 = vrot.slane %v699_v5, 7  ;;  %v3117_v45 = vshll.u32 %v3039_v28, 16  ;;  %v2641_v19 = vld [vmem:[#allocation2 + $0x28] sm:$0xf] }
  0x8f   : > { %v1295_v39 = vor.u32 %v1294_v25, %v1290_v62  ;;  %v967_v17 = vsel %vm6363_vm12, %v696_v9, %v966_v22  ;;  %v3121_v44 = vshrl.u32 %v3039_v28, 16  ;;  %v3113_v55 = vrot.slane %v3111_v7, 5  ;;  %v3041_v11 = vld [vmem:[#allocation2 + $0x30] sm:$0xf]  ;;  %v6906_v33 = vld [vmem:[#allocation2 + $0x2c] sm:$0x1] }
  0x90   : > { %v1291_v18 = vsel %vm6343_vm8, %v1286_v56, %v1290_v62  ;;  %968 = vst [vmem:[#allocation2 + $0x48] sm:$0xf] %v967_v17  ;;  %v704_v47 = vor.u32 %v702_v57, %v701_v40  ;;  %v706_v49 = vrot.slane %v701_v40, 4  ;;  %v6887_v21 = vrot.slane %v3117_v45, 5  ;;  %v6927_v26 = vld [vmem:[#allocation2 + $0x34] sm:$0xf] }
  0x91   : > { %v1296_v41 = vrot.slane %v1295_v39, 4  ;;  %v3123_v54 = vrot.slane %v3121_v44, 4  ;;  %v3127_v58 = vshll.u32 %v3040_v29, 16  ;;  %v3114_v3 = vor.u32 %v3113_v55, %v3110_v10  ;;  %v260_v28 = vld [vmem:[%s6314_s26 + $0x70] sm:$0xff] }
  0x92   : > { %2844 = vrot.lane.b32.xlu1 %v6830_v42, %s6198_s6  ;;  %3467 = vrot.lane.b32.xlu0 %v3096_v51, %s6198_s6  ;;  %v705_v53 = vsel %vm6371_vm13, %v697_v36, %v704_v47  ;;  %v971_v8 = vsel %vm6515_vm10, %v706_v49, %v970_v1  ;;  %vm362_vm15 = vcmp.ge.f32.partialorder %v6872_v15, 0.0  ;;  %v6899_v42 = vsel %vm6773_vm9, %v2741_v6, %v2742_v60 }
  0x93   : > { %969 = vst.msk [vmem:[#allocation2 + $0x4c] sm:$0xf] %vm450_vm0, %v705_v53  ;;  %v3124_v51 = vor.u32 %v3123_v54, %v6887_v21  ;;  %v6902_v13 = vrot.slane %v3127_v58, 5  ;;  %972 = vst [vmem:[#allocation2 + $0x50] sm:$0x1] %v971_v8  ;;  %v398_v10 = vmul.f32 %v6756_v38, %v6872_v15  ;;  %v6908_v52 = vrot.slane %v3114_v3, 4 }
  0x94   : > { %v331_v4 = vadd.f32 %v6739_v31, %v295_v48  ;;  %v5554_v16 = vrot.slane %v2640_v2, 9  ;;  %v2746_v32 = vrot.slane %v2641_v19, 5  ;;  %v1301_v60 = vsel %vm6343_vm8, %v1296_v41, %v1300_v63 }
  0x95   : > { %v6920_v6 = vrot.slane %v3124_v51, 4  ;;  %v430_v20 = vsel %vm362_vm15, %v6872_v15, %v398_v10  ;;  %v3132_v24 = vshrl.u32 %v3041_v11, 16  ;;  %v2749_v43 = vrot.slane %v6906_v33, 5 }
  0x96   : > { %3469 = vrot.lane.b32.xlu1 %v3106_v61, %s6198_s6  ;;  %1562 = vrot.lane.b32.xlu0 %v1291_v18, %s6198_s6  ;;  %v5732_v27 = vpack.c.bf16 %v430_v20, %v430_v20  ;;  %vm363_vm2 = vcmp.ge.f32.partialorder %v331_v4, 0.0  ;;  %v399_v5 = vmul.f32 %v6756_v38, %v331_v4  ;;  %v3120_v30 = vsel %vm6343_vm8, %v6908_v52, %v6887_v21  ;;  %v973_v21 = vld [vmem:[#allocation2 + $0x54] sm:$0xf] }
  0x97   : > { %v1956_v61 = vld [vmem:[#allocation2 + $0x48] sm:$0xf]  ;;  %v3130_v15 = vsel %vm6343_vm8, %v6920_v6, %v6902_v13  ;;  %v6939_v22 = vsel %vm6773_vm9, %v5554_v16, %v2746_v32  ;;  %v2748_v57 = vrot.slane %v2746_v32, 4  ;;  %v3134_v9 = vrot.slane %v3132_v24, 4  ;;  %v1672_v16 = vld [vmem:[#allocation2 + $0x4] sm:$0xf] }
  0x98   : > { %v1125_v35 = vld [vmem:[#allocation2 + $0x48] sm:$0xf]  ;;  %v708_v25 = vshrl.u32 %v5732_v27, 16  ;;  %v711_v36 = vshll.u32 %v5732_v27, 16  ;;  %v431_v1 = vsel %vm363_vm2, %v331_v4, %v399_v5  ;;  %v3135_v56 = vshll.u32 %v3041_v11, 16 }
  0x99   : > { %v1303_v48 = vshrl.u32 %v1125_v35, 16  ;;  %v1306_v62 = vshll.u32 %v1125_v35, 16  ;;  %v3141_v63 = vshll.u32 %v6927_v26, 16  ;;  %v5733_v17 = vpack.c.bf16 %v431_v1, %v431_v1  ;;  %v977_v11 = vld [vmem:[#allocation2 + $0x5c] sm:$0x1] }
  0x9a   : > { %1564 = vrot.lane.b32.xlu1 %v1301_v60, %s6198_s6  ;;  %2030 = vrot.lane.b32.xlu0 %v1956_v61, %s6198_s6  ;;  %v1957_v40 = vld [vmem:[#allocation2 + $0x4c] sm:$0xf]  ;;  %v296_v44 = vmul.f32 %v6694_v12, %v260_v28  ;;  %v1127_v18 = vld [vmem:[#allocation2 + $0x50] sm:$0x1]  ;;  %v710_v47 = vrot.slane %v708_v25, 7  ;;  %v3137_v49 = vrot.slane %v3135_v56, 5  ;;  %v6959_v35 = vsel %vm6773_vm9, %v2748_v57, %v2749_v43 }
  0x9b   : > { %v1126_v7 = vld [vmem:[#allocation2 + $0x4c] sm:$0xf]  ;;  %v1305_v29 = vrot.slane %v1303_v48, 4  ;;  %v1308_v39 = vrot.slane %v1306_v62, 5  ;;  %v1543_v45 = vpop.permute.xlu0 %1542  ;;  %v1322_v41 = vshll.u32 %v1127_v18, 16  ;;  %v716_v54 = vshrl.u32 %v5733_v17, 16 }
  0x9c   : > { %v1312_v2 = vshll.u32 %v1126_v7, 16  ;;  %v1316_v46 = vshrl.u32 %v1126_v7, 16  ;;  %v719_v58 = vshll.u32 %v5733_v17, 16  ;;  %v713_v3 = vor.u32 %v711_v36, %v710_v47  ;;  %v3043_v4 = vld [vmem:[#allocation2 + $0x38] sm:$0x1] }
  0x9d   : > { %v1309_v55 = vor.u32 %v1308_v39, %v1305_v29  ;;  %v714_v8 = vrot.slane %v710_v47, 4  ;;  %v6950_v10 = vrot.slane %v1322_v41, 5  ;;  %v718_v33 = vrot.slane %v716_v54, 7  ;;  %v1673_v24 = vld [vmem:[#allocation2 + $0x8] sm:$0x1]  ;;  %v261_v62 = vld [vmem:[%s6314_s26 + $0x78] sm:$0xff] }
  0x9e   : > { %2032 = vrot.lane.b32.xlu1 %v1957_v40, %s6198_s6  ;;  %2846 = vrot.lane.b32.xlu0 %v6868_v14, %s6198_s6  ;;  %v1314_v19 = vrot.slane %v1312_v2, 5  ;;  %v1318_v53 = vrot.slane %v1316_v46, 4  ;;  %v3138_v52 = vor.u32 %v3137_v49, %v3134_v9  ;;  %v974_v60 = vsel %vm6363_vm12, %v713_v3, %v973_v21  ;;  %v1671_v27 = vld [vmem:[#allocation2] sm:$0xe]  ;;  %v6964_v25 = vld [vmem:[#allocation2 + $0x30] sm:$0xe] }
  0x9f   : > { %v1310_v51 = vrot.slane %v1309_v55, 4  ;;  %v6954_v20 = vrot.slane %v3141_v63, 5  ;;  %v3145_v14 = vshrl.u32 %v6927_v26, 16  ;;  %975 = vst [vmem:[#allocation2 + $0x54] sm:$0xf] %v974_v60  ;;  %v721_v5 = vor.u32 %v719_v58, %v718_v33  ;;  %v1545_v48 = vpop.permute.xlu0 %1544 }
  0xa0   : > { %v1319_v32 = vor.u32 %v1318_v53, %v1314_v19  ;;  %v723_v61 = vrot.slane %v718_v33, 4  ;;  %v6961_v28 = vrot.slane %v3138_v52, 4  ;;  %vm1638_vm3 = vcmask 1043968   ;;  %v6969_v1 = vld [vmem:[#allocation2 + $0x34] sm:$0xf] }
  0xa1   : > { %v3147_v9 = vrot.slane %v3145_v14, 4  ;;  %v3151_v36 = vshll.u32 %v3043_v4, 16  ;;  %v6971_v56 = vld [vmem:[#allocation2 + $0x94] sm:$0xf]  ;;  %v1315_v43 = vsel %vm6343_vm8, %v1310_v51, %v1314_v19  ;;  %v722_v57 = vsel %vm6371_vm13, %v714_v8, %v721_v5  ;;  %1639 = vst.msk [vmem:[#allocation3] sm:$0xf] %vm1638_vm3, %v1543_v45 }
  0xa2   : > { %2848 = vrot.lane.b32.xlu1 %v6899_v42, %s6198_s6  ;;  %3471 = vrot.lane.b32.xlu0 %v3120_v30, %s6198_s6  ;;  %v1320_v26 = vrot.slane %v1319_v32, 4  ;;  %1640 = vst.msk [vmem:[#allocation3 + $0x14] sm:$0xf] %vm1638_vm3, %v1545_v48  ;;  %v978_v42 = vsel %vm6515_vm10, %v723_v61, %v977_v11  ;;  %v332_v30 = vadd.f32 %v6739_v31, %v296_v44  ;;  %v2971_v63 = vld [vmem:[#allocation2 + $0x18] sm:$0xf]  ;;  %v1772_v39 = vrot.slane %v1672_v16, 5 }
  0xa3   : > { %976 = vst.msk [vmem:[#allocation2 + $0x58] sm:$0xf] %vm450_vm0, %v722_v57  ;;  %v3148_v7 = vor.u32 %v3147_v9, %v6954_v20  ;;  %v6987_v29 = vrot.slane %v3151_v36, 5  ;;  %979 = vst [vmem:[#allocation2 + $0x5c] sm:$0x1] %v978_v42  ;;  %v1775_v44 = vrot.slane %v1673_v24, 5  ;;  %v297_v47 = vmul.f32 %v6694_v12, %v261_v62 }
  0xa4   : > { %v1325_v40 = vsel %vm6343_vm8, %v1320_v26, %v6950_v10  ;;  %3003 = vst.msk [vmem:[#allocation3 + $0xc] sm:$0xf] %vm450_vm0, %v2971_v63  ;;  %v2972_v17 = vld [vmem:[#allocation2 + $0x1c] sm:$0xf]  ;;  %vm364_vm5 = vcmp.ge.f32.partialorder %v332_v30, 0.0  ;;  %v400_v45 = vmul.f32 %v6756_v38, %v332_v30  ;;  %v5536_v2 = vrot.slane %v1671_v27, 9  ;;  %v2011_v21 = vpop.permute.xlu0 %2010 }
  0xa5   : > { %3004 = vst.msk [vmem:[#allocation3 + $0x20] sm:$0xf] %vm450_vm0, %v2972_v17  ;;  %v6999_v46 = vrot.slane %v3148_v7, 4  ;;  %v1774_v18 = vrot.slane %v1772_v39, 4  ;;  %v5555_v49 = vrot.slane %v6964_v25, 9  ;;  %v2753_v54 = vrot.slane %v6969_v1, 5  ;;  %v2013_v8 = vpop.permute.xlu1 %2012 }
  0xa6   : > { %3473 = vrot.lane.b32.xlu1 %v3130_v15, %s6198_s6  ;;  %1566 = vrot.lane.b32.xlu0 %v1315_v43, %s6198_s6  ;;  %v432_v55 = vsel %vm364_vm5, %v332_v30, %v400_v45  ;;  %v1773_v41 = vsel %vm6773_vm9, %v5536_v2, %v1772_v39  ;;  %v1856_v13 = vrot.slane %v6971_v56, 5  ;;  %v1053_v6 = vld [vmem:[#allocation2 + $0x3c] sm:$0xf]  ;;  %v1958_v15 = vld [vmem:[#allocation2 + $0x54] sm:$0xf]  ;;  %v3144_v58 = vsel %vm6343_vm8, %v6961_v28, %v6954_v20  ;;  %v262_v51 = vld [vmem:[%s6314_s26 + $0x80] sm:$0xff] }
  0xa7   : > { %v1128_v19 = vld [vmem:[#allocation2 + $0x54] sm:$0xf]  ;;  %v5734_v53 = vpack.c.bf16 %v432_v55, %v432_v55  ;;  %v1776_v3 = vsel %vm6773_vm9, %v1774_v18, %v1775_v44  ;;  %1914 = vst.msk [vmem:[#allocation3 + $0x4] sm:$0xf] %vm450_vm0, %v1773_v41  ;;  %v333_v11 = vadd.f32 %v6739_v31, %v297_v47  ;;  %1085 = vst.msk [vmem:[#allocation3 + $0xc8] sm:$0xf] %vm450_vm0, %v1053_v6 }
  0xa8   : > { %v3154_v10 = vsel %vm6343_vm8, %v6999_v46, %v6987_v29  ;;  %v1327_v33 = vshrl.u32 %v1128_v19, 16  ;;  %v1330_v52 = vshll.u32 %v1128_v19, 16  ;;  %1915 = vst.msk [vmem:[#allocation3 + $0x18] sm:$0xf] %vm450_vm0, %v1776_v3  ;;  %v1709_v4 = vld [vmem:[#allocation2 + $0x98] sm:$0x1]  ;;  %v7034_v48 = vsel %vm6773_vm9, %v5555_v49, %v2753_v54  ;;  %v2059_v39 = vpop.permute.xlu0 %2058 }
  0xa9   : > { %2106 = vst.msk [vmem:[#allocation3 + $0x4] sm:$0xf] %vm1638_vm3, %v2011_v21  ;;  %v1858_v16 = vrot.slane %v1856_v13, 4  ;;  %v725_v31 = vshrl.u32 %v5734_v53, 16  ;;  %v728_v32 = vshll.u32 %v5734_v53, 16  ;;  %vm365_vm6 = vcmp.ge.f32.partialorder %v333_v11, 0.0  ;;  %v2061_v2 = vpop.permute.xlu1 %2060 }
  0xaa   : > { %1568 = vrot.lane.b32.xlu1 %v1325_v40, %s6198_s6  ;;  %2034 = vrot.lane.b32.xlu0 %v1958_v15, %s6198_s6  ;;  %2107 = vst.msk [vmem:[#allocation3 + $0x18] sm:$0xf] %vm1638_vm3, %v2013_v8  ;;  %v401_v60 = vmul.f32 %v6756_v38, %v333_v11  ;;  %v263_v14 = vld [vmem:[%s6314_s26 + $0x88] sm:$0xff]  ;;  %v1959_v24 = vld [vmem:[#allocation2 + $0x58] sm:$0xf]  ;;  %v1329_v5 = vrot.slane %v1327_v33, 4  ;;  %v7037_v62 = vmul.f32 %v6694_v12, %v262_v51 }
  0xab   : > { %v1129_v27 = vld [vmem:[#allocation2 + $0x58] sm:$0xf]  ;;  %v1332_v61 = vrot.slane %v1330_v52, 5  ;;  %v1130_v9 = vld [vmem:[#allocation2 + $0x5c] sm:$0x1]  ;;  %v7039_v36 = vrot.slane %v725_v31, 7  ;;  %v7048_v49 = vmul.f32 %v6694_v12, %v263_v14 }
  0xac   : > { %v1336_v25 = vshll.u32 %v1129_v27, 16  ;;  %v1340_v26 = vshrl.u32 %v1129_v27, 16  ;;  %v433_v43 = vsel %vm365_vm6, %v333_v11, %v401_v60  ;;  %v1346_v42 = vshll.u32 %v1130_v9, 16  ;;  %v980_v30 = vld [vmem:[#allocation2 + $0x60] sm:$0xf] }
  0xad   : > { %v1333_v57 = vor.u32 %v1332_v61, %v1329_v5  ;;  %v5735_v63 = vpack.c.bf16 %v433_v43, %v433_v43  ;;  %v1859_v40 = vrot.slane %v1709_v4, 5  ;;  %v1707_v7 = vld [vmem:[#allocation2 + $0x90] sm:$0xe]  ;;  %v730_v44 = vor.u32 %v728_v32, %v7039_v36  ;;  %v7045_v18 = vld [vmem:[#allocation2 + $0x38] sm:$0x1] }
  0xae   : > { %2036 = vrot.lane.b32.xlu1 %v1959_v24, %s6198_s6  ;;  %2850 = vrot.lane.b32.xlu0 %v6939_v22, %s6198_s6  ;;  %v1338_v17 = vrot.slane %v1336_v25, 5  ;;  %v1342_v45 = vrot.slane %v1340_v26, 4  ;;  %v3044_v47 = vld [vmem:[#allocation2 + $0x3c] sm:$0xf]  ;;  %v7050_v41 = vrot.slane %v1346_v42, 5  ;;  %v5548_v3 = vrot.slane %v1707_v7, 9 }
  0xaf   : > { %v1334_v55 = vrot.slane %v1333_v57, 4  ;;  %v733_v21 = vshrl.u32 %v5735_v63, 16  ;;  %v736_v6 = vshll.u32 %v5735_v63, 16  ;;  %v3045_v15 = vld [vmem:[#allocation2 + $0x40] sm:$0xf]  ;;  %v981_v22 = vsel %vm6363_vm12, %v730_v44, %v980_v30  ;;  %v6123_v5 = vld [vmem:[%s8649_s2 + $0x118] sm:$0xff]  }
  0xb0   : > { %v1343_v19 = vor.u32 %v1342_v45, %v1338_v17  ;;  %v1860_v53 = vsel %vm6773_vm9, %v1858_v16, %v1859_v40  ;;  %v7056_v8 = vld [vmem:[#allocation2 + $0x14] sm:$0x1]  ;;  %v7058_v11 = vld [vmem:[#allocation2 + $0x10] sm:$0xf]  ;;  %v1054_v12 = vld [vmem:[#allocation2 + $0x40] sm:$0xf]  ;;  %v1857_v1 = vsel %vm6773_vm9, %v5548_v3, %v1856_v13  ;;  %v2015_v13 = vpop.permute.xlu0 %2014  ;;  %5996 = vmatprep.subr.bf16.mxu0 %v6123_v5 }
  0xb1   : > { %v1339_v51 = vsel %vm6343_vm8, %v1334_v55, %v1338_v17  ;;  %982 = vst [vmem:[#allocation2 + $0x60] sm:$0xf] %v981_v22  ;;  %v731_v33 = vrot.slane %v7039_v36, 4  ;;  %v7063_v52 = vrot.slane %v733_v21, 7  ;;  %1939 = vst.msk [vmem:[#allocation3 + $0x1f8] sm:$0xf] %vm450_vm0, %v1860_v53  ;;  %v2017_v36 = vpop.permute.xlu1 %2016 }
  0xb2   : > { %v2755_v4 = vrot.slane %v2753_v54, 4  ;;  %v1674_v16 = vld [vmem:[#allocation2 + $0xc] sm:$0xe]  ;;  %v7068_v31 = vld [vmem:[#allocation2 + $0x44] sm:$0x1]  ;;  %2852 = vrot.lane.b32.xlu1 %v6959_v35, %s6198_s6  ;;  %3475 = vrot.lane.b32.xlu0 %v3144_v58, %s6198_s6  ;;  %v1344_v60 = vrot.slane %v1343_v19, 4 }
  0xb3   : > { %v6078_v32 = vld [vmem:[#allocation3] ss:$20 sps:$4 sm:$0xff]   ;;  %1086 = vst.msk [vmem:[#allocation3 + $0xdc] sm:$0xf] %vm450_vm0, %v1054_v12  ;;  %v3156_v54 = vshrl.u32 %v3044_v47, 16  ;;  %v3159_v14 = vshll.u32 %v3044_v47, 16  ;;  %v738_v20 = vor.u32 %v736_v6, %v7063_v52 }
  0xb4   : > { %2131 = vst.msk [vmem:[#allocation3 + $0x1f8] sm:$0xf] %vm1638_vm3, %v2061_v2  ;;  %v6080_v24 = vld [vmem:[#allocation3 + $0x4] ss:$20 sps:$4 sm:$0xff]   ;;  %v1711_v27 = vld [vmem:[#allocation2 + $0xa0] sm:$0xf]  ;;  %v1349_v61 = vsel %vm6343_vm8, %v1344_v60, %v7050_v41 }
  0xb5   : > { %v7084_v35 = vld [vmem:[#allocation2 + $0xa4] sm:$0x1]  ;;  %v740_v28 = vrot.slane %v7063_v52, 4  ;;  %1938 = vst.msk [vmem:[#allocation3 + $0x1e4] sm:$0xf] %vm450_vm0, %v1857_v1  ;;  %v2756_v56 = vrot.slane %v7045_v18, 5  ;;  %4732 = vmatprep.mubr.bf16.mxu0 %v6080_v24  ;;  %v739_v57 = vsel %vm6371_vm13, %v731_v33, %v738_v20 }
  0xb6   : > { %v3165_v58 = vshll.u32 %v3045_v15, 16  ;;  %2130 = vst.msk [vmem:[#allocation3 + $0x1e4] sm:$0xf] %vm1638_vm3, %v2059_v39  ;;  %v3158_v25 = vrot.slane %v3156_v54, 4  ;;  %v3161_v26 = vrot.slane %v3159_v14, 5  ;;  %v3169_v9 = vshrl.u32 %v3045_v15, 16  ;;  %4733 = vmatmul.mubr.bf16.vlgmr.msra.gmra.mxu0 %v6078_v32  ;;  %3477 = vrot.lane.b32.xlu1 %v3154_v10, %s6198_s6 }
  0xb7   : > { %v1710_v43 = vld [vmem:[#allocation2 + $0x9c] sm:$0xe]  ;;  %v1782_v30 = vrot.slane %v7056_v8, 5  ;;  %v1779_v63 = vrot.slane %v7058_v11, 5  ;;  %v984_v40 = vld [vmem:[#allocation2 + $0x68] sm:$0x1]  ;;  %1570 = vrot.lane.b32.xlu0 %v1339_v51, %s6198_s6  ;;  %5997 = vmatpush3.bf16.msra.mxu0 %v6123_v5  ;;  %v7117_v46 = vsel %vm6773_vm9, %v2755_v4, %v2756_v56  ;;  %v2065_v8 = vpop.permute.xlu1 %2064  ;;  %v2063_v11 = vpop.permute.xlu0 %2062 }
  0xb8   : > { %v7099_v42 = vrot.slane %v3165_v58, 5  ;;  %983 = vst.msk [vmem:[#allocation2 + $0x64] sm:$0xf] %vm450_vm0, %v739_v57  ;;  %v3162_v7 = vor.u32 %v3161_v26, %v3158_v25  ;;  %v5537_v39 = vrot.slane %v1674_v16, 9  ;;  %v3171_v17 = vrot.slane %v3169_v9, 4 }
  0xb9   : > { %v3175_v45 = vshll.u32 %v7068_v31, 16  ;;  %v1781_v44 = vrot.slane %v1779_v63, 4  ;;  %v1863_v2 = vrot.slane %v1711_v27, 5  ;;  %v1866_v18 = vrot.slane %v7084_v35, 5  ;;  %v1678_v55 = vld [vmem:[#allocation2 + $0x1c] sm:$0xf] }
  0xba   : > { %v5549_v47 = vrot.slane %v1710_v43, 9  ;;  %v7113_v41 = vld [vmem:[#allocation2 + $0x20] sm:$0x1]  ;;  %v7119_v10 = vrot.slane %v3162_v7, 4  ;;  %v1780_v21 = vsel %vm6773_vm9, %v5537_v39, %v1779_v63  ;;  %v3172_v6 = vor.u32 %v3171_v17, %v7099_v42  ;;  %v1677_v12 = vld [vmem:[#allocation2 + $0x18] sm:$0xe]  ;;  %1572 = vrot.lane.b32.xlu1 %v1349_v61, %s6198_s6 }
  0xbb   : > { %v1960_v29 = vld [vmem:[#allocation2 + $0x60] sm:$0xf]  ;;  %v1783_v19 = vsel %vm6773_vm9, %v1781_v44, %v1782_v30  ;;  %1916 = vst.msk [vmem:[#allocation3 + $0x2c] sm:$0xf] %vm450_vm0, %v1780_v21  ;;  %v1865_v3 = vrot.slane %v1863_v2, 4  ;;  %v7135_v33 = vrot.slane %v3175_v45, 5  ;;  %v985_v4 = vsel %vm6515_vm10, %v740_v28, %v984_v40  ;;  %v2021_v9 = vpop.permute.xlu1 %2020 }
  0xbc   : > { %v1131_v15 = vld [vmem:[#allocation2 + $0x60] sm:$0xf]  ;;  %2038 = vrot.lane.b32.xlu0 %v1960_v29, %s6198_s6  ;;  %v3168_v51 = vsel %vm6343_vm8, %v7119_v10, %v7099_v42  ;;  %1917 = vst.msk [vmem:[#allocation3 + $0x40] sm:$0xf] %vm450_vm0, %v1783_v19  ;;  %v1864_v52 = vsel %vm6773_vm9, %v5549_v47, %v1863_v2  ;;  %986 = vst [vmem:[#allocation2 + $0x68] sm:$0x1] %v985_v4 }
  0xbd   : > { %v1351_v22 = vshrl.u32 %v1131_v15, 16  ;;  %v1354_v53 = vshll.u32 %v1131_v15, 16  ;;  %2108 = vst.msk [vmem:[#allocation3 + $0x2c] sm:$0xf] %vm1638_vm3, %v2015_v13  ;;  %2109 = vst.msk [vmem:[#allocation3 + $0x40] sm:$0xf] %vm1638_vm3, %v2017_v36  ;;  %v1867_v32 = vsel %vm6773_vm9, %v1865_v3, %v1866_v18 }
  0xbe   : > { %1940 = vst.msk [vmem:[#allocation3 + $0x20c] sm:$0xf] %vm450_vm0, %v1864_v52  ;;  %v7148_v60 = vld [vmem:[%s8648_s1 + $0x1] ss:$0 sm:$0xff]  ;;  %v7152_v54 = vrot.slane %v3172_v6, 4  ;;  %v1786_v14 = vrot.slane %v1678_v55, 5 }
  0xbf   : > { %v1353_v16 = vrot.slane %v1351_v22, 4  ;;  %v1356_v31 = vrot.slane %v1354_v53, 5  ;;  %v334_v1 = vadd.f32 %v7148_v60, %v7037_v62  ;;  %1941 = vst.msk [vmem:[#allocation3 + $0x220] sm:$0xf] %vm450_vm0, %v1867_v32  ;;  %v1789_v24 = vrot.slane %v7113_v41, 5  ;;  %v264_v15 = vld [vmem:[%s6314_s26 + $0x90] sm:$0xff] }
  0xc0   : > { %2132 = vst.msk [vmem:[#allocation3 + $0x20c] sm:$0xf] %vm1638_vm3, %v2063_v11  ;;  %v5538_v27 = vrot.slane %v1677_v12, 9  ;;  %v1961_v35 = vld [vmem:[#allocation2 + $0x64] sm:$0xf]  ;;  %v335_v62 = vadd.f32 %v7148_v60, %v7048_v49  ;;  %2854 = vrot.lane.b32.xlu0 %v7034_v48, %s6198_s6  ;;  %v1788_v13 = vrot.slane %v1786_v14, 4  ;;  %v3178_v40 = vsel %vm6343_vm8, %v7152_v54, %v7135_v33 }
  0xc1   : > { %v1132_v5 = vld [vmem:[#allocation2 + $0x64] sm:$0xf]  ;;  %v1357_v20 = vor.u32 %v1356_v31, %v1353_v16  ;;  %2133 = vst.msk [vmem:[#allocation3 + $0x220] sm:$0xf] %vm1638_vm3, %v2065_v8  ;;  %vm366_vm7 = vcmp.ge.f32.partialorder %v334_v1, 0.0  ;;  %v402_v28 = vmul.f32 %v6756_v38, %v334_v1  ;;  %2040 = vrot.lane.b32.xlu1 %v1961_v35, %s6198_s6  ;;  %v2019_v38 = vpop.permute.xlu0 %2018 }
  0xc2   : > { %v1360_v56 = vshll.u32 %v1132_v5, 16  ;;  %v1364_v58 = vshrl.u32 %v1132_v5, 16  ;;  %v1787_v61 = vsel %vm6773_vm9, %v5538_v27, %v1786_v14  ;;  %vm367_vm4 = vcmp.ge.f32.partialorder %v335_v62, 0.0  ;;  %v7170_v49 = vld [vmem:[%s8648_s1 + $0x2] ss:$0 sm:$0xff] }
  0xc3   : > { %v1358_v25 = vrot.slane %v1357_v20, 4  ;;  %v434_v26 = vsel %vm366_vm7, %v334_v1, %v402_v28  ;;  %1918 = vst.msk [vmem:[#allocation3 + $0x54] sm:$0xf] %vm450_vm0, %v1787_v61  ;;  %v403_v48 = vmul.f32 %v7170_v49, %v335_v62  ;;  %v7173_v36 = vld [vmem:[#allocation2 + $0x3c] sm:$0xe]  ;;  %v1790_v30 = vsel %vm6773_vm9, %v1788_v13, %v1789_v24 }
  0xc4   : > { %v1362_v43 = vrot.slane %v1360_v56, 5  ;;  %v1366_v57 = vrot.slane %v1364_v58, 4  ;;  %v5736_v42 = vpack.c.bf16 %v434_v26, %v434_v26  ;;  %2110 = vst.msk [vmem:[#allocation3 + $0x54] sm:$0xf] %vm1638_vm3, %v2019_v38  ;;  %v7178_v63 = vld [vmem:[#allocation2 + $0x40] sm:$0xf]  ;;  %3479 = vrot.lane.b32.xlu0 %v3168_v51, %s6198_s6 }
  0xc5   : > { %1919 = vst.msk [vmem:[#allocation3 + $0x68] sm:$0xf] %vm450_vm0, %v1790_v30  ;;  %v435_v7 = vsel %vm367_vm4, %v335_v62, %v403_v48  ;;  %v7185_v39 = vld [vmem:[#allocation2 + $0x44] sm:$0x1]  ;;  %v3047_v17 = vld [vmem:[#allocation2 + $0x48] sm:$0xf]  ;;  %2856 = vrot.lane.b32.xlu1 %v7117_v46, %s6198_s6  ;;  %v1547_v46 = vpop.permute.xlu0 %1546 }
  0xc6   : > { %v2973_v45 = vld [vmem:[#allocation2 + $0x24] sm:$0xf]  ;;  %v1133_v44 = vld [vmem:[#allocation2 + $0x68] sm:$0x1]  ;;  %v1367_v2 = vor.u32 %v1366_v57, %v1362_v43  ;;  %v742_v18 = vshrl.u32 %v5736_v42, 16  ;;  %v745_v47 = vshll.u32 %v5736_v42, 16  ;;  %v1363_v41 = vsel %vm6343_vm8, %v1358_v25, %v1362_v43 }
  0xc7   : > { %2111 = vst.msk [vmem:[#allocation3 + $0x68] sm:$0xf] %vm1638_vm3, %v2021_v9  ;;  %v5556_v55 = vrot.slane %v7173_v36, 9  ;;  %v1370_v29 = vshll.u32 %v1133_v44, 16  ;;  %v5737_v10 = vpack.c.bf16 %v435_v7, %v435_v7  ;;  %v2760_v21 = vrot.slane %v7178_v63, 5  ;;  %v265_v20 = vld [vmem:[%s6314_s26 + $0x98] sm:$0xff] }
  0xc8   : > { %3005 = vst.msk [vmem:[#allocation3 + $0x34] sm:$0xf] %vm450_vm0, %v2973_v45  ;;  %v3048_v6 = vld [vmem:[#allocation2 + $0x4c] sm:$0xf]  ;;  %v2974_v19 = vld [vmem:[#allocation2 + $0x28] sm:$0xf]  ;;  %1574 = vrot.lane.b32.xlu0 %v1363_v41, %s6198_s6 }
  0xc9   : > { %v1368_v22 = vrot.slane %v1367_v2, 4  ;;  %v744_v53 = vrot.slane %v742_v18, 7  ;;  %1641 = vst.msk [vmem:[#allocation3 + $0x28] sm:$0xf] %vm1638_vm3, %v1547_v46  ;;  %v3180_v3 = vshrl.u32 %v3047_v17, 16  ;;  %v3183_v8 = vshll.u32 %v3047_v17, 16  ;;  %3481 = vrot.lane.b32.xlu1 %v3178_v40, %s6198_s6  ;;  %v1595_v5 = vpop.permute.xlu0 %1594 }
  0xca   : > { %3006 = vst.msk [vmem:[#allocation3 + $0x48] sm:$0xf] %vm450_vm0, %v2974_v19  ;;  %v1055_v11 = vld [vmem:[#allocation2 + $0x48] sm:$0xf]  ;;  %v1372_v12 = vrot.slane %v1370_v29, 5  ;;  %v750_v33 = vshrl.u32 %v5737_v10, 16  ;;  %v2761_v29 = vsel %vm6773_vm9, %v5556_v55, %v2760_v21 }
  0xcb   : > { %v987_v51 = vld [vmem:[#allocation2 + $0x6c] sm:$0xf]  ;;  %v753_v52 = vshll.u32 %v5737_v10, 16  ;;  %v2763_v4 = vrot.slane %v7185_v39, 5  ;;  %1087 = vst.msk [vmem:[#allocation3 + $0xf0] sm:$0xf] %vm450_vm0, %v1055_v11  ;;  %v747_v16 = vor.u32 %v745_v47, %v744_v53  ;;  %v1591_v10 = vpop.permute.xlu1 %1590 }
  0xcc   : > { %v748_v31 = vrot.slane %v744_v53, 4  ;;  %v3182_v32 = vrot.slane %v3180_v3, 4  ;;  %v3185_v1 = vrot.slane %v3183_v8, 5  ;;  %v3049_v54 = vld [vmem:[#allocation2 + $0x50] sm:$0x1]  ;;  %v1373_v14 = vsel %vm6343_vm8, %v1368_v22, %v1372_v12  ;;  %v266_v22 = vld [vmem:[%s6314_s26 + $0xa0] sm:$0xff] }
  0xcd   : > { %v752_v24 = vrot.slane %v750_v33, 7  ;;  %v3189_v27 = vshll.u32 %v3048_v6, 16  ;;  %v3193_v35 = vshrl.u32 %v3048_v6, 16  ;;  %v1056_v28 = vld [vmem:[#allocation2 + $0x4c] sm:$0xf]  ;;  %v988_v62 = vsel %vm6363_vm12, %v747_v16, %v987_v51  ;;  %1576 = vrot.lane.b32.xlu1 %v1373_v14, %s6198_s6  ;;  %v1551_v17 = vpop.permute.xlu0 %1550  ;;  %v6130_v41 = vld [vmem:[%s8649_s2 + $0x110] sm:$0xff]  }
  0xce   : > { %v2762_v56 = vrot.slane %v2760_v21, 4  ;;  %v3186_v58 = vor.u32 %v3185_v1, %v3182_v32  ;;  %1665 = vst.msk [vmem:[#allocation3 + $0x208] sm:$0xf] %vm1638_vm3, %v1595_v5  ;;  %v991_v13 = vld [vmem:[#allocation2 + $0x74] sm:$0x1]  ;;  %v3199_v43 = vshll.u32 %v3049_v54, 16  ;;  %5998 = vmatprep.subr.bf16.mxu0 %v6130_v41 }
  0xcf   : > { %v7214_v61 = vld [vmem:[%s8648_s1] ss:$0 sm:$0xff]  ;;  %1088 = vst.msk [vmem:[#allocation3 + $0x104] sm:$0xf] %vm450_vm0, %v1056_v28  ;;  %989 = vst [vmem:[#allocation2 + $0x6c] sm:$0xf] %v988_v62  ;;  %v755_v26 = vor.u32 %v753_v52, %v752_v24  ;;  %5999 = vmatpush3.bf16.msra.mxu0 %v6130_v41  ;;  %v1593_v1 = vpop.permute.xlu1 %1592 }
  0xd0   : > { %v300_v25 = vmul.f32 %v7214_v61, %v264_v15  ;;  %v757_v9 = vrot.slane %v752_v24, 4  ;;  %v7218_v38 = vrot.slane %v3189_v27, 5  ;;  %v3195_v48 = vrot.slane %v3193_v35, 4  ;;  %v1713_v30 = vld [vmem:[#allocation2 + $0xa8] sm:$0xe] }
  0xd1   : > { %v301_v42 = vmul.f32 %v7214_v61, %v265_v20  ;;  %v7223_v40 = vld [vmem:[#allocation2 + $0xac] sm:$0xf]  ;;  %v756_v7 = vsel %vm6371_vm13, %v748_v31, %v755_v26  ;;  %v7231_v44 = vrot.slane %v3186_v58, 4  ;;  %1643 = vst.msk [vmem:[#allocation3 + $0x50] sm:$0xf] %vm1638_vm3, %v1551_v17  ;;  %v7249_v46 = vsel %vm6773_vm9, %v2762_v56, %v2763_v4  ;;  %v1599_v8 = vpop.permute.xlu0 %1598 }
  0xd2   : > { %v336_v57 = vadd.f32 %v7148_v60, %v300_v25  ;;  %v3196_v39 = vor.u32 %v3195_v48, %v7218_v38  ;;  %v992_v45 = vsel %vm6515_vm10, %v757_v9, %v991_v13  ;;  %990 = vst.msk [vmem:[#allocation2 + $0x70] sm:$0xf] %vm450_vm0, %v756_v7  ;;  %v7236_v47 = vld [vmem:[#allocation2 + $0x48] sm:$0xe]  ;;  %v5550_v6 = vrot.slane %v1713_v30, 9 }
  0xd3   : > { %993 = vst [vmem:[#allocation2 + $0x74] sm:$0x1] %v992_v45  ;;  %v337_v18 = vadd.f32 %v7148_v60, %v301_v42  ;;  %v1870_v15 = vrot.slane %v7223_v40, 5  ;;  %v3050_v19 = vld [vmem:[#allocation2 + $0x54] sm:$0xf]  ;;  %v7254_v53 = vrot.slane %v3199_v43, 5  ;;  %v3192_v52 = vsel %vm6343_vm8, %v7231_v44, %v7218_v38 }
  0xd4   : > { %vm368_vm11 = vcmp.ge.f32.partialorder %v336_v57, 0.0  ;;  %v404_v2 = vmul.f32 %v7170_v49, %v336_v57  ;;  %1663 = vst.msk [vmem:[#allocation3 + $0x1e0] sm:$0xf] %vm1638_vm3, %v1591_v10  ;;  %v7257_v3 = vld [vmem:[#allocation2 + $0x4c] sm:$0xf]  ;;  %v7259_v55 = vrot.slane %v3196_v39, 4  ;;  %v302_v32 = vmul.f32 %v7214_v61, %v266_v22  ;;  %v1549_v39 = vpop.permute.xlu1 %1548 }
  0xd5   : > { %vm369_vm14 = vcmp.ge.f32.partialorder %v337_v18, 0.0  ;;  %v405_v36 = vmul.f32 %v7170_v49, %v337_v18  ;;  %v5557_v11 = vrot.slane %v7236_v47, 9  ;;  %v1871_v12 = vsel %vm6773_vm9, %v5550_v6, %v1870_v15  ;;  %v2975_v51 = vld [vmem:[#allocation2 + $0x30] sm:$0xf]  ;;  %1667 = vst.msk [vmem:[#allocation3 + $0x230] sm:$0xf] %vm1638_vm3, %v1599_v8 }
  0xd6   : > { %v436_v63 = vsel %vm368_vm11, %v336_v57, %v404_v2  ;;  %v1962_v33 = vld [vmem:[#allocation2 + $0x6c] sm:$0xf]  ;;  %1942 = vst.msk [vmem:[#allocation3 + $0x234] sm:$0xf] %vm450_vm0, %v1871_v12  ;;  %v3204_v31 = vshrl.u32 %v3050_v19, 16  ;;  %v2767_v27 = vrot.slane %v7257_v3, 5  ;;  %v3202_v58 = vsel %vm6343_vm8, %v7259_v55, %v7254_v53 }
  0xd7   : > { %v5738_v21 = vpack.c.bf16 %v436_v63, %v436_v63  ;;  %v1134_v4 = vld [vmem:[#allocation2 + $0x6c] sm:$0xf]  ;;  %v437_v16 = vsel %vm369_vm14, %v337_v18, %v405_v36  ;;  %3007 = vst.msk [vmem:[#allocation3 + $0x5c] sm:$0xf] %vm450_vm0, %v2975_v51  ;;  %2042 = vrot.lane.b32.xlu0 %v1962_v33, %s6198_s6  ;;  %v3207_v28 = vshll.u32 %v3050_v19, 16  ;;  %v7285_v38 = vadd.f32 %v7148_v60, %v302_v32  ;;  %v6093_v36 = vld [vmem:[%s8649_s2 + $0xb8] sm:$0xff]  }
  0xd8   : > { %v1375_v54 = vshrl.u32 %v1134_v4, 16  ;;  %v1378_v14 = vshll.u32 %v1134_v4, 16  ;;  %1664 = vst.msk [vmem:[#allocation3 + $0x1f4] sm:$0xf] %vm1638_vm3, %v1593_v1  ;;  %v5739_v5 = vpack.c.bf16 %v437_v16, %v437_v16  ;;  %v7277_v20 = vrot.slane %v3204_v31, 4  ;;  %v267_v62 = vld [vmem:[%s6314_s26 + $0xa8] sm:$0xff]  ;;  %v1597_v4 = vpop.permute.xlu1 %1596 }
  0xd9   : > { %v759_v24 = vshrl.u32 %v5738_v21, 16  ;;  %v762_v35 = vshll.u32 %v5738_v21, 16  ;;  %v1963_v56 = vld [vmem:[#allocation2 + $0x70] sm:$0xf]  ;;  %v994_v9 = vld [vmem:[#allocation2 + $0x78] sm:$0xf]  ;;  %v7293_v19 = vmul.f32 %v7214_v61, %v267_v62 }
  0xda   : > { %v1135_v13 = vld [vmem:[#allocation2 + $0x70] sm:$0xf]  ;;  %v1377_v25 = vrot.slane %v1375_v54, 4  ;;  %v1380_v26 = vrot.slane %v1378_v14, 5  ;;  %2044 = vrot.lane.b32.xlu1 %v1963_v56, %s6198_s6  ;;  %v1136_v57 = vld [vmem:[#allocation2 + $0x74] sm:$0x1]  ;;  %v406_v54 = vmul.f32 %v7170_v49, %v7285_v38 }
  0xdb   : > { %v1384_v48 = vshll.u32 %v1135_v13, 16  ;;  %v1388_v43 = vshrl.u32 %v1135_v13, 16  ;;  %v761_v42 = vrot.slane %v759_v24, 7  ;;  %v767_v30 = vshrl.u32 %v5739_v5, 16  ;;  %2858 = vrot.lane.b32.xlu0 %v2761_v29, %s6198_s6  ;;  %v3051_v44 = vld [vmem:[#allocation2 + $0x58] sm:$0xf] }
  0xdc   : > { %v1381_v7 = vor.u32 %v1380_v26, %v1377_v25  ;;  %v1394_v17 = vshll.u32 %v1136_v57, 16  ;;  %v770_v45 = vshll.u32 %v5739_v5, 16  ;;  %v7289_v2 = vrot.slane %v3207_v28, 5  ;;  %1642 = vst.msk [vmem:[#allocation3 + $0x3c] sm:$0xf] %vm1638_vm3, %v1549_v39  ;;  %v6095_v40 = vld [vmem:[%s8649_s2 + $0xb0] sm:$0xff]   ;;  %v1553_v57 = vpop.permute.xlu1 %1552 }
  0xdd   : > { %v1386_v18 = vrot.slane %v1384_v48, 5  ;;  %v1390_v41 = vrot.slane %v1388_v43, 4  ;;  %v764_v10 = vor.u32 %v762_v35, %v761_v42  ;;  %v1715_v6 = vld [vmem:[#allocation2 + $0xb0] sm:$0x1]  ;;  %v765_v29 = vrot.slane %v761_v42, 4 }
  0xde   : > { %v1382_v22 = vrot.slane %v1381_v7, 4  ;;  %v7295_v53 = vrot.slane %v1394_v17, 5  ;;  %v769_v63 = vrot.slane %v767_v30, 7  ;;  %2860 = vrot.lane.b32.xlu1 %v7249_v46, %s6198_s6  ;;  %v7304_v8 = vld [vmem:[#allocation2 + $0x50] sm:$0x1]  ;;  %v3213_v61 = vshll.u32 %v3051_v44, 16 }
  0xdf   : > { %v1391_v55 = vor.u32 %v1390_v41, %v1386_v18  ;;  %v995_v21 = vsel %vm6363_vm12, %v764_v10, %v994_v9  ;;  %v3217_v12 = vshrl.u32 %v3051_v44, 16  ;;  %v3052_v51 = vld [vmem:[#allocation2 + $0x5c] sm:$0x1]  ;;  %v998_v33 = vld [vmem:[#allocation2 + $0x80] sm:$0x1]  ;;  %3483 = vrot.lane.b32.xlu0 %v3192_v52, %s6198_s6  ;;  %v3210_v46 = vor.u32 %v7289_v2, %v7277_v20  ;;  %v6094_v20 = vld [vmem:[%s8649_s2 + $0xf0] sm:$0xff]   ;;  %v2067_v2 = vpop.permute.xlu0 %2066 }
  0xe0   : > { %996 = vst [vmem:[#allocation2 + $0x78] sm:$0xf] %v995_v21  ;;  %v772_v16 = vor.u32 %v770_v45, %v769_v63  ;;  %v774_v31 = vrot.slane %v769_v63, 4  ;;  %v6081_v32 = vld [vmem:[#allocation3 + $0x1e0] ss:$20 sps:$4 sm:$0xff]   ;;  %v1387_v24 = vsel %vm6343_vm8, %v1382_v22, %v1386_v18  ;;  %v7316_v52 = vrot.slane %v3213_v61, 5 }
  0xe1   : > { %v6083_v1 = vld [vmem:[#allocation3 + $0x1e4] ss:$20 sps:$4 sm:$0xff]   ;;  %v7311_v14 = vld [vmem:[#allocation2 + $0x24] sm:$0xe]  ;;  %v1392_v35 = vrot.slane %v1391_v55, 4  ;;  %v3219_v5 = vrot.slane %v3217_v12, 4  ;;  %v2768_v61 = vsel %vm6773_vm9, %v5557_v11, %v2767_v27 }
  0xe2   : > { %1666 = vst.msk [vmem:[#allocation3 + $0x21c] sm:$0xf] %vm1638_vm3, %v1597_v4  ;;  %v7318_v28 = vld [vmem:[#allocation2 + $0x28] sm:$0xf]  ;;  %v773_v62 = vsel %vm6371_vm13, %v765_v29, %v772_v16  ;;  %4828 = vmatprep.mubr.bf16.mxu1 %v6083_v1  ;;  %v3223_v56 = vshll.u32 %v3052_v51, 16  ;;  %v1872_v13 = vrot.slane %v1870_v15, 4  ;;  %3485 = vrot.lane.b32.xlu1 %v3202_v58, %s6198_s6  ;;  %v999_v45 = vsel %vm6515_vm10, %v774_v31, %v998_v33 }
  0xe3   : > { %v1873_v25 = vrot.slane %v1715_v6, 5  ;;  %v2976_v26 = vld [vmem:[#allocation2 + $0x34] sm:$0xf]  ;;  %v1397_v9 = vsel %vm6343_vm8, %v1392_v35, %v7295_v53  ;;  %997 = vst.msk [vmem:[#allocation2 + $0x7c] sm:$0xf] %vm450_vm0, %v773_v62  ;;  %4829 = vmatmul.mubr.bf16.vlgmr.msra.gmra.mxu1 %v6081_v32  ;;  %v2770_v48 = vrot.slane %v7304_v8, 5  ;;  %v3220_v43 = vor.u32 %v3219_v5, %v7316_v52  ;;  %1578 = vrot.lane.b32.xlu0 %v1387_v24, %s6198_s6  ;;  %v1555_v3 = vpop.permute.xlu0 %1554 }
  0xe4   : > { %vm370_vm15 = vcmp.ge.f32.partialorder %v7285_v38, 0.0  ;;  %v6096_v15 = vld [vmem:[%s8649_s2 + $0xe8] sm:$0xff]   ;;  %3008 = vst.msk [vmem:[#allocation3 + $0x70] sm:$0xf] %vm450_vm0, %v2976_v26  ;;  %v1057_v58 = vld [vmem:[#allocation2 + $0x54] sm:$0xf]  ;;  %5865 = vmatpush3.bf16.msra.mxu1 %v6093_v36  ;;  %v339_v36 = vadd.f32 %v7148_v60, %v7293_v19  ;;  %v1601_v60 = vpop.permute.xlu1 %1600 }
  0xe5   : > { %v2769_v42 = vrot.slane %v2767_v27, 4  ;;  %v3873_v30 = vld [vmem:[#allocation3 + $0x28] sm:$0xff]  ;;  %v3876_v7 = vld [vmem:[#allocation3 + $0x3c] sm:$0xff]  ;;  %v1874_v17 = vsel %vm6773_vm9, %v1872_v13, %v1873_v25  ;;  %v438_v44 = vsel %vm370_vm15, %v7285_v38, %v406_v54  ;;  %1089 = vst.msk [vmem:[#allocation3 + $0x118] sm:$0xf] %vm450_vm0, %v1057_v58  ;;  %v7352_v18 = vrot.slane %v3210_v46, 4  ;;  %5866 = vmatprep.subr.bf16.mxu1 %v6094_v20 }
  0xe6   : > { %v6084_v39 = vld [vmem:[#allocation3 + $0x2c] ss:$20 sps:$4 sm:$0xff]   ;;  %1644 = vst.msk [vmem:[#allocation3 + $0x64] sm:$0xf] %vm1638_vm3, %v1553_v57  ;;  %v5589_v41 = vcombine.low %v3873_v30, %v3876_v7  ;;  %1000 = vst [vmem:[#allocation2 + $0x80] sm:$0x1] %v999_v45  ;;  %v5740_v10 = vpack.c.bf16 %v438_v44, %v438_v44  ;;  %1580 = vrot.lane.b32.xlu1 %v1397_v9, %s6198_s6  ;;  %v407_v1 = vmul.f32 %v7170_v49, %v339_v36 }
  0xe7   : > { %1943 = vst.msk [vmem:[#allocation3 + $0x248] sm:$0xf] %vm450_vm0, %v1874_v17  ;;  %v5539_v6 = vrot.slane %v7311_v14, 9  ;;  %v7356_v22 = vld [vmem:[#allocation2 + $0x54] sm:$0xe]  ;;  %4740 = vmatprep.mubr.bf16.mxu0 %v6084_v39  ;;  %v7359_v38 = vrot.slane %v3220_v43, 4  ;;  %v2771_v5 = vsel %vm6773_vm9, %v2769_v42, %v2770_v48  ;;  %v3216_v43 = vsel %vm6343_vm8, %v7352_v18, %v7316_v52 }
  0xe8   : > { %2134 = vst.msk [vmem:[#allocation3 + $0x234] sm:$0xf] %vm1638_vm3, %v2067_v2  ;;  %v7361_v53 = vrot.slane %v3223_v56, 5  ;;  %v3945_v29 = vld [vmem:[#allocation3 + $0x208] sm:$0xff]  ;;  %v1793_v63 = vrot.slane %v7318_v28, 5  ;;  %v6097_v55 = vld [vmem:[%s8649_s2 + $0xa8] sm:$0xff]   ;;  %4741 = vmatmul.mubr.bf16.gmra.mxu0 %v5589_v41  ;;  %5867 = vmatpush3.bf16.msra.mxu1 %v6095_v40  ;;  %v2069_v52 = vpop.permute.xlu1 %2068 }
  0xe9   : > { %v1964_v21 = vld [vmem:[#allocation2 + $0x78] sm:$0xf]  ;;  %v776_v51 = vshrl.u32 %v5740_v10, 16  ;;  %v779_v33 = vshll.u32 %v5740_v10, 16  ;;  %v1001_v32 = vld [vmem:[#allocation2 + $0x84] sm:$0xf]  ;;  %5868 = vmatprep.subr.bf16.mxu1 %v6096_v15 }
  0xea   : > { %v1137_v12 = vld [vmem:[#allocation2 + $0x78] sm:$0xf]  ;;  %2046 = vrot.lane.b32.xlu0 %v1964_v21, %s6198_s6  ;;  %v1794_v47 = vsel %vm6773_vm9, %v5539_v6, %v1793_v63  ;;  %vm371_vm2 = vcmp.ge.f32.partialorder %v339_v36, 0.0  ;;  %1668 = vst.msk [vmem:[#allocation3 + $0x244] sm:$0xf] %vm1638_vm3, %v1601_v60  ;;  %v5558_v54 = vrot.slane %v7356_v22, 9 }
  0xeb   : > { %v1399_v19 = vshrl.u32 %v1137_v12, 16  ;;  %v1402_v4 = vshll.u32 %v1137_v12, 16  ;;  %v3948_v16 = vld [vmem:[#allocation3 + $0x21c] sm:$0xff]  ;;  %v7382_v27 = vrot.slane %v776_v51, 7  ;;  %1920 = vst.msk [vmem:[#allocation3 + $0x7c] sm:$0xf] %vm450_vm0, %v1794_v47  ;;  %v439_v9 = vsel %vm371_vm2, %v339_v36, %v407_v1 }
  0xec   : > { %v6086_v31 = vld [vmem:[#allocation3 + $0x20c] ss:$20 sps:$4 sm:$0xff]   ;;  %v5649_v11 = vcombine.low %v3945_v29, %v3948_v16  ;;  %v6137_v24 = vld [vmem:[%s8649_s2 + $0x108] sm:$0xff]   ;;  %v1965_v35 = vld [vmem:[#allocation2 + $0x7c] sm:$0xf]  ;;  %v5741_v42 = vpack.c.bf16 %v439_v9, %v439_v9  ;;  %5869 = vmatpush3.bf16.msra.mxu1 %v6097_v55  ;;  %v3226_v51 = vsel %vm6343_vm8, %v7359_v38, %v7361_v53  ;;  %v1557_v53 = vpop.permute.xlu1 %1556 }
  0xed   : > { %v7386_v46 = vld [vmem:[#allocation2 + $0x58] sm:$0xf]  ;;  %v6100_v14 = vld [vmem:[%s8649_s2 + $0xe0] sm:$0xff]   ;;  %1645 = vst.msk [vmem:[#allocation3 + $0x78] sm:$0xf] %vm1638_vm3, %v1555_v3  ;;  %v1401_v20 = vrot.slane %v1399_v19, 4  ;;  %4836 = vmatprep.mubr.bf16.mxu1 %v6086_v31  ;;  %2048 = vrot.lane.b32.xlu1 %v1965_v35, %s6198_s6  ;;  %v781_v26 = vor.u32 %v779_v33, %v7382_v27 }
  0xee   : > { %v1138_v49 = vld [vmem:[#allocation2 + $0x7c] sm:$0xf]  ;;  %v1404_v62 = vrot.slane %v1402_v4, 5  ;;  %v1716_v56 = vld [vmem:[#allocation2 + $0xb4] sm:$0xe]  ;;  %4837 = vmatmul.mubr.bf16.gmra.mxu1 %v5649_v11  ;;  %v6101_v48 = vld [vmem:[%s8649_s2 + $0xa0] sm:$0xff]   ;;  %2862 = vrot.lane.b32.xlu0 %v2768_v61, %s6198_s6 }
  0xef   : > { %v1408_v13 = vshll.u32 %v1138_v49, 16  ;;  %v1412_v25 = vshrl.u32 %v1138_v49, 16  ;;  %v7403_v8 = vld [vmem:[#allocation2 + $0xb8] sm:$0xf]  ;;  %v1139_v15 = vld [vmem:[#allocation2 + $0x80] sm:$0x1]  ;;  %v1002_v45 = vsel %vm6363_vm12, %v781_v26, %v1001_v32  ;;  %5870 = vmatprep.subr.bf16.mxu1 %v6100_v14  ;;  %6000 = vmatprep.subr.bf16.mxu0 %v6137_v24 }
  0xf0   : > { %v1405_v40 = vor.u32 %v1404_v62, %v1401_v20  ;;  %v3882_v58 = vld [vmem:[#allocation3 + $0x64] sm:$0xff]  ;;  %v2774_v30 = vrot.slane %v7386_v46, 5  ;;  %v1418_v17 = vshll.u32 %v1139_v15, 16  ;;  %v3879_v44 = vld [vmem:[#allocation3 + $0x50] sm:$0xff]  ;;  %1003 = vst [vmem:[#allocation2 + $0x84] sm:$0xf] %v1002_v45  ;;  %6001 = vmatpush3.bf16.msra.mxu0 %v6137_v24  ;;  %5871 = vmatpush3.bf16.msra.mxu1 %v6101_v48 }
  0xf1   : > { %v6088_v57 = vld [vmem:[#allocation3 + $0x54] ss:$20 sps:$4 sm:$0xff]   ;;  %v1410_v7 = vrot.slane %v1408_v13, 5  ;;  %v1414_v39 = vrot.slane %v1412_v25, 4  ;;  %v5594_v18 = vcombine.low %v3879_v44, %v3882_v58  ;;  %v784_v10 = vshrl.u32 %v5741_v42, 16  ;;  %v6104_v36 = vld [vmem:[%s8649_s2 + $0xd8] sm:$0xff]   ;;  %2864 = vrot.lane.b32.xlu1 %v2771_v5, %s6198_s6  ;;  %v1603_v5 = vpop.permute.xlu0 %1602 }
  0xf2   : > { %v3053_v2 = vld [vmem:[#allocation2 + $0x60] sm:$0xf]  ;;  %v1406_v41 = vrot.slane %v1405_v40, 4  ;;  %4748 = vmatprep.mubr.bf16.mxu0 %v6088_v57  ;;  %v787_v6 = vshll.u32 %v5741_v42, 16  ;;  %v3054_v29 = vld [vmem:[#allocation2 + $0x64] sm:$0xf]  ;;  %3487 = vrot.lane.b32.xlu0 %v3216_v43, %s6198_s6 }
  0xf3   : > { %2135 = vst.msk [vmem:[#allocation3 + $0x248] sm:$0xf] %vm1638_vm3, %v2069_v52  ;;  %v1415_v59 = vor.u32 %v1414_v39, %v1410_v7  ;;  %v7421_v55 = vrot.slane %v1418_v17, 5  ;;  %v5551_v21 = vrot.slane %v1716_v56, 9  ;;  %v1877_v61 = vrot.slane %v7403_v8, 5  ;;  %4749 = vmatmul.mubr.bf16.gmra.mxu0 %v5594_v18  ;;  %v6105_v38 = vld [vmem:[%s8649_s2 + $0x98] sm:$0xff]   ;;  %5872 = vmatprep.subr.bf16.mxu1 %v6104_v36 }
  0xf4   : > { %v1058_v12 = vld [vmem:[#allocation2 + $0x58] sm:$0xf]  ;;  %v1411_v33 = vsel %vm6343_vm8, %v1406_v41, %v1410_v7  ;;  %v782_v60 = vrot.slane %v7382_v27, 4  ;;  %v786_v19 = vrot.slane %v784_v10, 7  ;;  %v1682_v4 = vld [vmem:[#allocation2 + $0x2c] sm:$0x1]  ;;  %5873 = vmatpush3.bf16.msra.mxu1 %v6105_v38  ;;  %v1605_v10 = vpop.permute.xlu1 %1604 }
  0xf5   : > { %1090 = vst.msk [vmem:[#allocation3 + $0x12c] sm:$0xf] %vm450_vm0, %v1058_v12  ;;  %v1416_v16 = vrot.slane %v1415_v59, 4  ;;  %v1878_v31 = vsel %vm6773_vm9, %v5551_v21, %v1877_v61  ;;  %v3228_v32 = vshrl.u32 %v3053_v2, 16  ;;  %v3231_v47 = vshll.u32 %v3053_v2, 16  ;;  %v6106_v35 = vld [vmem:[%s8649_s2 + $0xd0] sm:$0xff]   ;;  %3489 = vrot.lane.b32.xlu1 %v3226_v51, %s6198_s6  ;;  %v2023_v18 = vpop.permute.xlu0 %2022 }
  0xf6   : > { %v1005_v3 = vld [vmem:[#allocation2 + $0x8c] sm:$0x1]  ;;  %v789_v11 = vor.u32 %v787_v6, %v786_v19  ;;  %v791_v1 = vrot.slane %v786_v19, 4  ;;  %1944 = vst.msk [vmem:[#allocation3 + $0x25c] sm:$0xf] %vm450_vm0, %v1878_v31  ;;  %v7441_v27 = vrot.slane %v2774_v30, 4  ;;  %1582 = vrot.lane.b32.xlu0 %v1411_v33, %s6198_s6  ;;  %5874 = vmatprep.subr.bf16.mxu1 %v6106_v35 }
  0xf7   : > { %v3237_v14 = vshll.u32 %v3054_v29, 16  ;;  %v3055_v24 = vld [vmem:[#allocation2 + $0x68] sm:$0x1]  ;;  %v1421_v49 = vsel %vm6343_vm8, %v1416_v16, %v7421_v55  ;;  %1646 = vst.msk [vmem:[#allocation3 + $0x8c] sm:$0xf] %vm1638_vm3, %v1557_v53  ;;  %v3230_v20 = vrot.slane %v3228_v32, 4 }
  0xf8   : > { %v3233_v62 = vrot.slane %v3231_v47, 5  ;;  %v3241_v56 = vshrl.u32 %v3054_v29, 16  ;;  %v1718_v13 = vld [vmem:[#allocation2 + $0xbc] sm:$0x1]  ;;  %v7451_v25 = vld [vmem:[#allocation2 + $0x30] sm:$0xe]  ;;  %v790_v26 = vsel %vm6371_vm13, %v782_v60, %v789_v11  ;;  %v1006_v17 = vsel %vm6515_vm10, %v791_v1, %v1005_v3 }
  0xf9   : > { %1669 = vst.msk [vmem:[#allocation3 + $0x258] sm:$0xf] %vm1638_vm3, %v1603_v5  ;;  %v7457_v9 = vld [vmem:[#allocation2 + $0x5c] sm:$0x1]  ;;  %v7459_v8 = vrot.slane %v3237_v14, 5  ;;  %v3951_v48 = vld [vmem:[#allocation3 + $0x230] sm:$0xff]  ;;  %1584 = vrot.lane.b32.xlu1 %v1421_v49, %s6198_s6 }
  0xfa   : > { %v1795_v43 = vrot.slane %v1793_v63, 4  ;;  %v1796_v40 = vrot.slane %v1682_v4, 5  ;;  %v1684_v15 = vld [vmem:[#allocation2 + $0x34] sm:$0xf]  ;;  %v1966_v57 = vld [vmem:[#allocation2 + $0x84] sm:$0xf]  ;;  %v3234_v42 = vor.u32 %v3233_v62, %v3230_v20  ;;  %v2775_v4 = vsel %vm6773_vm9, %v5558_v54, %v2774_v30  ;;  %v2071_v54 = vpop.permute.xlu0 %2070  ;;  %v2025_v30 = vpop.permute.xlu1 %2024 }
  0xfb   : > { %v6107_v58 = vld [vmem:[%s8649_s2 + $0x90] sm:$0xff]   ;;  %1004 = vst.msk [vmem:[#allocation2 + $0x88] sm:$0xf] %vm450_vm0, %v790_v26  ;;  %v3243_v0 = vrot.slane %v3241_v56, 4  ;;  %v3247_v7 = vshll.u32 %v3055_v24, 16  ;;  %v3954_v28 = vld [vmem:[#allocation3 + $0x244] sm:$0xff]  ;;  %2050 = vrot.lane.b32.xlu0 %v1966_v57, %s6198_s6 }
  0xfc   : > { %v1140_v39 = vld [vmem:[#allocation2 + $0x84] sm:$0xf]  ;;  %v7469_v45 = vld [vmem:[#allocation2 + $0x38] sm:$0x1]  ;;  %v6090_v63 = vld [vmem:[#allocation3 + $0x234] ss:$20 sps:$4 sm:$0xff]   ;;  %v1797_v44 = vsel %vm6773_vm9, %v1795_v43, %v1796_v40  ;;  %v5654_v36 = vcombine.low %v3951_v48, %v3954_v28  ;;  %5875 = vmatpush3.bf16.msra.mxu1 %v6107_v58 }
  0xfd   : > { %v1423_v2 = vshrl.u32 %v1140_v39, 16  ;;  %v1426_v41 = vshll.u32 %v1140_v39, 16  ;;  %v1879_v52 = vrot.slane %v1877_v61, 4  ;;  %1007 = vst [vmem:[#allocation2 + $0x8c] sm:$0x1] %v1006_v17  ;;  %v2777_v6 = vrot.slane %v7457_v9, 5  ;;  %4844 = vmatprep.mubr.bf16.mxu1 %v6090_v63 }
  0xfe   : > { %v7475_v29 = vrot.slane %v3234_v42, 4  ;;  %1921 = vst.msk [vmem:[#allocation3 + $0x90] sm:$0xf] %vm450_vm0, %v1797_v44  ;;  %v3244_v59 = vor.u32 %v3243_v0, %v7459_v8  ;;  %v2138_v55 = vld [vmem:[#allocation2 + $0xc] sm:$0xf]  ;;  %v1880_v51 = vrot.slane %v1718_v13, 5  ;;  %4845 = vmatmul.mubr.bf16.gmra.mxu1 %v5654_v36  ;;  %v1559_v39 = vpop.permute.xlu0 %1558 }
  0xff   : > { %v6110_v21 = vld [vmem:[%s8649_s2 + $0xc8] sm:$0xff]   ;;  %2112 = vst.msk [vmem:[#allocation3 + $0x7c] sm:$0xf] %vm1638_vm3, %v2023_v18  ;;  %1670 = vst.msk [vmem:[#allocation3 + $0x26c] sm:$0xf] %vm1638_vm3, %v1605_v10  ;;  %v1425_v61 = vrot.slane %v1423_v2, 4  ;;  %2866 = vrot.lane.b32.xlu0 %v2775_v4, %s6198_s6  ;;  %v2778_v20 = vsel %vm6773_vm9, %v7441_v27, %v2777_v6 }
 0x100   : > { %v1428_v12 = vrot.slane %v1426_v41, 5  ;;  %v5540_v33 = vrot.slane %v7451_v25, 9  ;;  %v7486_v60 = vld [vmem:[#allocation2 + $0x60] sm:$0xe]  ;;  %v876_v19 = vrot.slane %v6746_v50, 4  ;;  %v7495_v16 = vrot.slane %v3247_v7, 5  ;;  %5876 = vmatprep.subr.bf16.mxu1 %v6110_v21  ;;  %v2073_v7 = vpop.permute.xlu1 %2072 }
 0x101   : > { %v1800_v31 = vrot.slane %v1684_v15, 5  ;;  %v7497_v32 = vld [vmem:[#allocation2 + $0x10] sm:$0xf]  ;;  %v7499_v47 = vrot.slane %v3244_v59, 4  ;;  %v1881_v38 = vsel %vm6773_vm9, %v1879_v52, %v1880_v51  ;;  %v7503_v53 = vld [vmem:[#allocation2 + $0x64] sm:$0xf]  ;;  %v3240_v62 = vsel %vm6343_vm8, %v7475_v29, %v7459_v8 }
 0x102   : > { %v1429_v3 = vor.u32 %v1428_v12, %v1425_v61  ;;  %v1803_v46 = vrot.slane %v7469_v45, 5  ;;  %v6111_v22 = vld [vmem:[%s8649_s2 + $0x88] sm:$0xff]   ;;  %1945 = vst.msk [vmem:[#allocation3 + $0x270] sm:$0xf] %vm450_vm0, %v1881_v38  ;;  %v5559_v1 = vrot.slane %v7486_v60, 9  ;;  %v2187_v24 = vshrl.u32 %v2138_v55, 16  ;;  %v2027_v38 = vpop.permute.xlu0 %2026 }
 0x103   : > { %v1801_v11 = vsel %vm6773_vm9, %v5540_v33, %v1800_v31  ;;  %v1802_v14 = vrot.slane %v1800_v31, 4  ;;  %v7513_v35 = vld [vmem:[#allocation2 + $0x6c] sm:$0xf]  ;;  %v6112_v5 = vld [vmem:[%s8649_s2 + $0xc0] sm:$0xff]   ;;  %v1967_v49 = vld [vmem:[#allocation2 + $0x88] sm:$0xf]  ;;  %5877 = vmatpush3.bf16.msra.mxu1 %v6111_v22  ;;  %v3250_v42 = vsel %vm6343_vm8, %v7499_v47, %v7495_v16  ;;  %3491 = vrot.lane.b32.xlu0 %v3240_v62, %s6198_s6 }
 0x104   : > { %2136 = vst.msk [vmem:[#allocation3 + $0x25c] sm:$0xf] %vm1638_vm3, %v2071_v54  ;;  %2113 = vst.msk [vmem:[#allocation3 + $0x90] sm:$0xf] %vm1638_vm3, %v2025_v30  ;;  %v1141_v56 = vld [vmem:[#allocation2 + $0x88] sm:$0xf]  ;;  %2052 = vrot.lane.b32.xlu1 %v1967_v49, %s6198_s6  ;;  %5878 = vmatprep.subr.bf16.mxu1 %v6112_v5 }
 0x105   : > { %v1430_v13 = vrot.slane %v1429_v3, 4  ;;  %1922 = vst.msk [vmem:[#allocation3 + $0xa4] sm:$0xf] %vm450_vm0, %v1801_v11  ;;  %v2190_v25 = vshll.u32 %v2138_v55, 16  ;;  %v1432_v26 = vshll.u32 %v1141_v56, 16  ;;  %v1436_v9 = vshrl.u32 %v1141_v56, 16  ;;  %v1561_v3 = vpop.permute.xlu1 %1560 }
 0x106   : > { %v1142_v48 = vld [vmem:[#allocation2 + $0x8c] sm:$0x1]  ;;  %v1804_v27 = vsel %vm6773_vm9, %v1802_v14, %v1803_v46  ;;  %v2189_v43 = vrot.slane %v2187_v24, 4  ;;  %v2781_v15 = vrot.slane %v7503_v53, 5  ;;  %v2196_v58 = vshll.u32 %v7497_v32, 16  ;;  %v6113_v57 = vld [vmem:[%s8649_s2 + $0x80] sm:$0xff]  }
 0x107   : > { %v1442_v40 = vshll.u32 %v1142_v48, 16  ;;  %1923 = vst.msk [vmem:[#allocation3 + $0xb8] sm:$0xf] %vm450_vm0, %v1804_v27  ;;  %v2192_v8 = vrot.slane %v2190_v25, 5  ;;  %v1434_v0 = vrot.slane %v1432_v26, 5  ;;  %v1438_v17 = vrot.slane %v1436_v9, 4  ;;  %5879 = vmatpush3.bf16.msra.mxu1 %v6113_v57 }
 0x108   : > { %v2200_v45 = vshrl.u32 %v7497_v32, 16  ;;  %v3057_v28 = vld [vmem:[#allocation2 + $0x70] sm:$0xf]  ;;  %2137 = vst.msk [vmem:[#allocation3 + $0x270] sm:$0xf] %vm1638_vm3, %v2073_v7  ;;  %v2783_v41 = vrot.slane %v2781_v15, 4  ;;  %2868 = vrot.lane.b32.xlu1 %v2778_v20, %s6198_s6  ;;  %v7568_v53 = vsel %vm6773_vm9, %v5559_v1, %v2781_v15  ;;  %v2843_v15 = vpop.permute.xlu0 %2842 }
 0x109   : > { %1647 = vst.msk [vmem:[#allocation3 + $0xa0] sm:$0xf] %vm1638_vm3, %v1559_v39  ;;  %v7546_v63 = vrot.slane %v1442_v40, 5  ;;  %v2193_v44 = vor.u32 %v2192_v8, %v2189_v43  ;;  %v2657_v2 = vld [vmem:[#allocation2 + $0x68] sm:$0x1]  ;;  %v3252_v52 = vshrl.u32 %v7513_v35, 16  ;;  %v1435_v10 = vsel %vm6343_vm8, %v1430_v13, %v1434_v0  ;;  %v2029_v40 = vpop.permute.xlu1 %2028 }
 0x10a   : > { %v2140_v18 = vld [vmem:[#allocation2 + $0x14] sm:$0x1]  ;;  %v1439_v6 = vor.u32 %v1438_v17, %v1434_v0  ;;  %v7552_v36 = vrot.slane %v2196_v58, 5  ;;  %v3255_v59 = vshll.u32 %v7513_v35, 16  ;;  %v7557_v21 = vld [vmem:[#allocation2 + $0x6c] sm:$0xe]  ;;  %1586 = vrot.lane.b32.xlu0 %v1435_v10, %s6198_s6 }
 0x10b   : > { %v3885_v29 = vld [vmem:[#allocation3 + $0x78] sm:$0xff]  ;;  %v6144_v12 = vld [vmem:[%s8649_s2 + $0x100] sm:$0xff]   ;;  %v2194_v51 = vrot.slane %v2193_v44, 4  ;;  %v3254_v33 = vrot.slane %v3252_v52, 4  ;;  %v3261_v4 = vshll.u32 %v3057_v28, 16  ;;  %v3265_v16 = vshrl.u32 %v3057_v28, 16 }
 0x10c   : > { %v7555_v55 = vld [vmem:[#allocation2 + $0x74] sm:$0x1]  ;;  %v7559_v61 = vld [vmem:[#allocation2 + $0x70] sm:$0xf]  ;;  %v2977_v31 = vld [vmem:[#allocation2 + $0x3c] sm:$0xf]  ;;  %6002 = vmatprep.subr.bf16.mxu0 %v6144_v12  ;;  %3493 = vrot.lane.b32.xlu1 %v3250_v42, %s6198_s6 }
 0x10d   : > { %v1440_v32 = vrot.slane %v1439_v6, 4  ;;  %v1968_v47 = vld [vmem:[#allocation2 + $0x90] sm:$0xf]  ;;  %v3888_v46 = vld [vmem:[#allocation3 + $0x8c] sm:$0xff]  ;;  %v2784_v54 = vrot.slane %v2657_v2, 5  ;;  %v3257_v30 = vrot.slane %v3255_v59, 5  ;;  %v2199_v60 = vsel %vm6343_vm8, %v2194_v51, %v7552_v36  ;;  %6003 = vmatpush3.bf16.msra.mxu0 %v6144_v12 }
 0x10e   : > { %v6098_v22 = vld [vmem:[#allocation3 + $0x7c] ss:$20 sps:$4 sm:$0xff]   ;;  %3009 = vst.msk [vmem:[#allocation3 + $0x84] sm:$0xf] %vm450_vm0, %v2977_v31  ;;  %v5599_v11 = vcombine.low %v3885_v29, %v3888_v46  ;;  %v7577_v1 = vrot.slane %v3261_v4, 5  ;;  %v2202_v14 = vrot.slane %v2200_v45, 4  ;;  %2054 = vrot.lane.b32.xlu0 %v1968_v47, %s6198_s6  ;;  %v3468_v4 = vpop.permute.xlu0 %3467 }
 0x10f   : > { %1648 = vst.msk [vmem:[#allocation3 + $0xb4] sm:$0xf] %vm1638_vm3, %v1561_v3  ;;  %2114 = vst.msk [vmem:[#allocation3 + $0xa4] sm:$0xf] %vm1638_vm3, %v2027_v38  ;;  %v7579_v24 = vld [vmem:[#allocation2 + $0x74] sm:$0x1]  ;;  %v1445_v5 = vsel %vm6343_vm8, %v1440_v32, %v7546_v63  ;;  %4756 = vmatprep.mubr.bf16.mxu0 %v6098_v22  ;;  %v3258_v49 = vor.u32 %v3257_v30, %v3254_v33  ;;  %v7597_v8 = vsel %vm6773_vm9, %v2783_v41, %v2784_v54  ;;  %v2845_v33 = vpop.permute.xlu1 %2844 }
 0x110   : > { %v7581_v35 = vld [vmem:[#allocation2 + $0x78] sm:$0xf]  ;;  %2602 = vst.msk [vmem:[#allocation3 + $0x8] sm:$0xf] %vm450_vm0, %v2199_v60  ;;  %v2206_v20 = vshll.u32 %v2140_v18, 16  ;;  %v3267_v62 = vrot.slane %v3265_v16, 4  ;;  %4757 = vmatmul.mubr.bf16.gmra.mxu0 %v5599_v11  ;;  %v2203_v25 = vor.u32 %v2202_v14, %v7552_v36  ;;  %1588 = vrot.lane.b32.xlu1 %v1445_v5, %s6198_s6 }
 0x111   : > { %v3060_v56 = vld [vmem:[#allocation2 + $0x7c] sm:$0xf]  ;;  %v2978_v13 = vld [vmem:[#allocation2 + $0x40] sm:$0xf]  ;;  %v3271_v26 = vshll.u32 %v7555_v55, 16  ;;  %v5560_v9 = vrot.slane %v7557_v21, 9 }
 0x112   : > { %v2788_v48 = vrot.slane %v7559_v61, 5  ;;  %v7592_v27 = vld [vmem:[#allocation2 + $0x3c] sm:$0xe]  ;;  %3010 = vst.msk [vmem:[#allocation3 + $0x98] sm:$0xf] %vm450_vm0, %v2978_v13  ;;  %v7599_v58 = vrot.slane %v3258_v49, 4  ;;  %v3268_v39 = vor.u32 %v3267_v62, %v7577_v1  ;;  %2870 = vrot.lane.b32.xlu0 %v7568_v53, %s6198_s6  ;;  %v1563_v62 = vpop.permute.xlu0 %1562 }
 0x113   : > { %v1059_v43 = vld [vmem:[#allocation2 + $0x60] sm:$0xf]  ;;  %v3957_v57 = vld [vmem:[#allocation3 + $0x258] sm:$0xff]  ;;  %v3960_v42 = vld [vmem:[#allocation3 + $0x26c] sm:$0xff]  ;;  %v2208_v7 = vrot.slane %v2206_v20, 5  ;;  %v2204_v28 = vrot.slane %v2203_v25, 4  ;;  %v3470_v20 = vpop.permute.xlu1 %3469 }
 0x114   : > { %v6102_v0 = vld [vmem:[#allocation3 + $0x25c] ss:$20 sps:$4 sm:$0xff]   ;;  %v1687_v17 = vld [vmem:[#allocation2 + $0x40] sm:$0xf]  ;;  %1091 = vst.msk [vmem:[#allocation3 + $0x140] sm:$0xf] %vm450_vm0, %v1059_v43  ;;  %v5659_v63 = vcombine.low %v3957_v57, %v3960_v42  ;;  %v3264_v18 = vsel %vm6343_vm8, %v7599_v58, %v7577_v1  ;;  %v7620_v6 = vsel %vm6773_vm9, %v5560_v9, %v2788_v48 }
 0x115   : > { %v1969_v45 = vld [vmem:[#allocation2 + $0x94] sm:$0xf]  ;;  %2115 = vst.msk [vmem:[#allocation3 + $0xb8] sm:$0xf] %vm1638_vm3, %v2029_v40  ;;  %2938 = vst.msk [vmem:[#allocation3 + $0x8] sm:$0xf] %vm1638_vm3, %v2843_v15  ;;  %4852 = vmatprep.mubr.bf16.mxu1 %v6102_v0  ;;  %v2209_v55 = vsel %vm6343_vm8, %v2204_v28, %v2208_v7 }
 0x116   : > { %v7606_v44 = vrot.slane %v3271_v26, 5  ;;  %v2791_v2 = vrot.slane %v7579_v24, 5  ;;  %v7609_v41 = vld [vmem:[#allocation2 + $0x78] sm:$0xe]  ;;  %v1688_v52 = vld [vmem:[#allocation2 + $0x44] sm:$0x1]  ;;  %4853 = vmatmul.mubr.bf16.gmra.mxu1 %v5659_v63  ;;  %2056 = vrot.lane.b32.xlu1 %v1969_v45, %s6198_s6 }
 0x117   : > { %v7616_v10 = vrot.slane %v3268_v39, 4  ;;  %v3276_v29 = vshrl.u32 %v7581_v35, 16  ;;  %v3061_v36 = vld [vmem:[#allocation2 + $0x80] sm:$0x1]  ;;  %v7623_v59 = vld [vmem:[#allocation2 + $0x7c] sm:$0xf]  ;;  %3495 = vrot.lane.b32.xlu0 %v3264_v18, %s6198_s6  ;;  %v1565_v18 = vpop.permute.xlu1 %1564 }
 0x118   : > { %v3279_v21 = vshll.u32 %v7581_v35, 16  ;;  %v3285_v61 = vshll.u32 %v3060_v56, 16  ;;  %v3289_v12 = vshrl.u32 %v3060_v56, 16  ;;  %v1060_v51 = vld [vmem:[#allocation2 + $0x64] sm:$0xf]  ;;  %v2790_v31 = vrot.slane %v2788_v48, 4 }
 0x119   : > { %2603 = vst.msk [vmem:[#allocation3 + $0x1c] sm:$0xf] %vm450_vm0, %v2209_v55  ;;  %v3274_v16 = vsel %vm6343_vm8, %v7616_v10, %v7606_v44  ;;  %v3278_v32 = vrot.slane %v3276_v29, 4  ;;  %v5541_v47 = vrot.slane %v7592_v27, 9  ;;  %1092 = vst.msk [vmem:[#allocation3 + $0x154] sm:$0xf] %vm450_vm0, %v1060_v51  ;;  %v2031_v29 = vpop.permute.xlu0 %2030 }
 0x11a   : > { %2939 = vst.msk [vmem:[#allocation3 + $0x1c] sm:$0xf] %vm1638_vm3, %v2845_v33  ;;  %3563 = vst.msk [vmem:[#allocation3 + $0xc] sm:$0xf] %vm1638_vm3, %v3468_v4  ;;  %v3281_v3 = vrot.slane %v3279_v21, 5  ;;  %v7639_v38 = vrot.slane %v3285_v61, 5  ;;  %v7649_v56 = vsel %vm6773_vm9, %v2790_v31, %v2791_v2  ;;  %2872 = vrot.lane.b32.xlu1 %v7597_v8, %s6198_s6 }
 0x11b   : > { %v1807_v46 = vrot.slane %v1687_v17, 5  ;;  %v3291_v22 = vrot.slane %v3289_v12, 4  ;;  %v2141_v54 = vld [vmem:[#allocation2 + $0x18] sm:$0xf]  ;;  %v3295_v30 = vshll.u32 %v3061_v36, 16  ;;  %v5561_v60 = vrot.slane %v7609_v41, 9  ;;  %2874 = vrot.lane.b32.xlu0 %v7620_v6, %s6198_s6 }
 0x11c   : > { %v2795_v11 = vrot.slane %v7623_v59, 5  ;;  %v1810_v1 = vrot.slane %v1688_v52, 5  ;;  %v3282_v14 = vor.u32 %v3281_v3, %v3278_v32  ;;  %v3891_v53 = vld [vmem:[#allocation3 + $0xa0] sm:$0xff]  ;;  %v3894_v13 = vld [vmem:[#allocation3 + $0xb4] sm:$0xff]  ;;  %v2211_v9 = vshrl.u32 %v2141_v54, 16 }
 0x11d   : > { %v1808_v24 = vsel %vm6773_vm9, %v5541_v47, %v1807_v46  ;;  %v3292_v35 = vor.u32 %v3291_v22, %v7639_v38  ;;  %v1809_v5 = vrot.slane %v1807_v46, 4  ;;  %v2142_v49 = vld [vmem:[#allocation2 + $0x1c] sm:$0xf]  ;;  %v7652_v26 = vrot.slane %v3295_v30, 5  ;;  %3564 = vst.msk [vmem:[#allocation3 + $0x20] sm:$0xf] %vm1638_vm3, %v3470_v20 }
 0x11e   : > { %v6108_v25 = vld [vmem:[#allocation3 + $0xa4] ss:$20 sps:$4 sm:$0xff]   ;;  %1924 = vst.msk [vmem:[#allocation3 + $0xcc] sm:$0xf] %vm450_vm0, %v1808_v24  ;;  %v2214_v48 = vshll.u32 %v2141_v54, 16  ;;  %v3283_v27 = vrot.slane %v3282_v14, 4  ;;  %v5604_v43 = vcombine.low %v3891_v53, %v3894_v13  ;;  %v7673_v8 = vsel %vm6773_vm9, %v5561_v60, %v2795_v11  ;;  %3497 = vrot.lane.b32.xlu1 %v3274_v16, %s6198_s6  ;;  %v2847_v53 = vpop.permute.xlu0 %2846 }
 0x11f   : > { %1649 = vst.msk [vmem:[#allocation3 + $0xc8] sm:$0xf] %vm1638_vm3, %v1563_v62  ;;  %v7657_v40 = vrot.slane %v3292_v35, 4  ;;  %v1811_v15 = vsel %vm6773_vm9, %v1809_v5, %v1810_v1  ;;  %v2663_v58 = vld [vmem:[#allocation2 + $0x80] sm:$0x1]  ;;  %4764 = vmatprep.mubr.bf16.mxu0 %v6108_v25  ;;  %v2213_v0 = vrot.slane %v2211_v9, 4  ;;  %v2033_v1 = vpop.permute.xlu1 %2032 }
 0x120   : > { %v3062_v57 = vld [vmem:[#allocation2 + $0x84] sm:$0xf]  ;;  %v2143_v42 = vld [vmem:[#allocation2 + $0x20] sm:$0x1]  ;;  %1925 = vst.msk [vmem:[#allocation3 + $0xe0] sm:$0xf] %vm450_vm0, %v1811_v15  ;;  %v3288_v28 = vsel %vm6343_vm8, %v3283_v27, %v7639_v38  ;;  %4765 = vmatmul.mubr.bf16.gmra.mxu0 %v5604_v43 }
 0x121   : > { %v2216_v7 = vrot.slane %v2214_v48, 5  ;;  %v2220_v39 = vshll.u32 %v2142_v49, 16  ;;  %v2224_v17 = vshrl.u32 %v2142_v49, 16  ;;  %v3063_v45 = vld [vmem:[#allocation2 + $0x88] sm:$0xf]  ;;  %v3298_v63 = vsel %vm6343_vm8, %v7657_v40, %v7652_v26  ;;  %3499 = vrot.lane.b32.xlu0 %v3288_v28, %s6198_s6 }
 0x122   : > { %v2797_v2 = vrot.slane %v2795_v11, 4  ;;  %v3064_v41 = vld [vmem:[#allocation2 + $0x8c] sm:$0x1]  ;;  %v1040_v52 = vld [vmem:[#allocation2 + $0xc8] sm:$0x1]  ;;  %v3300_v55 = vshrl.u32 %v3062_v57, 16  ;;  %2876 = vrot.lane.b32.xlu1 %v7649_v56, %s6198_s6 }
 0x123   : > { %v2217_v36 = vor.u32 %v2216_v7, %v2213_v0  ;;  %v2222_v59 = vrot.slane %v2220_v39, 5  ;;  %v3303_v21 = vshll.u32 %v3062_v57, 16  ;;  %v7675_v61 = vld [vmem:[#allocation2 + $0x84] sm:$0xe]  ;;  %1650 = vst.msk [vmem:[#allocation3 + $0xdc] sm:$0xf] %vm1638_vm3, %v1565_v18  ;;  %v1041_v35 = vsel %vm6515_vm10, %v876_v19, %v1040_v52 }
 0x124   : > { %2116 = vst.msk [vmem:[#allocation3 + $0xcc] sm:$0xf] %vm1638_vm3, %v2031_v29  ;;  %v2798_v12 = vrot.slane %v2663_v58, 5  ;;  %v3309_v51 = vshll.u32 %v3063_v45, 16  ;;  %v3313_v33 = vshrl.u32 %v3063_v45, 16  ;;  %v2226_v4 = vrot.slane %v2224_v17, 4  ;;  %v2849_v17 = vpop.permute.xlu1 %2848  ;;  %v3472_v45 = vpop.permute.xlu0 %3471 }
 0x125   : > { %v7681_v31 = vld [vmem:[#allocation2 + $0x90] sm:$0xf]  ;;  %v2218_v32 = vrot.slane %v2217_v36, 4  ;;  %v3302_v47 = vrot.slane %v3300_v55, 4  ;;  %v3305_v6 = vrot.slane %v3303_v21, 5  ;;  %v2230_v3 = vshll.u32 %v2143_v42, 16  ;;  %2878 = vrot.lane.b32.xlu0 %v7673_v8, %s6198_s6 }
 0x126   : > { %v2665_v38 = vld [vmem:[#allocation2 + $0x88] sm:$0xf]  ;;  %v7689_v46 = vld [vmem:[#allocation2 + $0x94] sm:$0xf]  ;;  %v7691_v22 = vrot.slane %v3309_v51, 5  ;;  %v2227_v54 = vor.u32 %v2226_v4, %v2222_v59  ;;  %v3315_v30 = vrot.slane %v3313_v33, 4  ;;  %v7705_v5 = vsel %vm6773_vm9, %v2797_v2, %v2798_v12  ;;  %3501 = vrot.lane.b32.xlu1 %v3298_v63, %s6198_s6 }
 0x127   : > { %v3319_v60 = vshll.u32 %v3064_v41, 16  ;;  %v2979_v11 = vld [vmem:[#allocation2 + $0x48] sm:$0xf]  ;;  %v2223_v14 = vsel %vm6343_vm8, %v2218_v32, %v2222_v59  ;;  %v3306_v44 = vor.u32 %v3305_v6, %v3302_v47  ;;  %v6114_v10 = vld [vmem:[#allocation3 + $0x8] ss:$20 sps:$4 sm:$0xff]   ;;  %v2232_v24 = vrot.slane %v2230_v3, 5 }
 0x128   : > { %v6116_v16 = vld [vmem:[#allocation3 + $0xc] ss:$20 sps:$4 sm:$0xff]   ;;  %3011 = vst.msk [vmem:[#allocation3 + $0xac] sm:$0xf] %vm450_vm0, %v2979_v11  ;;  %2604 = vst.msk [vmem:[#allocation3 + $0x30] sm:$0xf] %vm450_vm0, %v2223_v14  ;;  %v3316_v20 = vor.u32 %v3315_v30, %v7691_v22  ;;  %v3474_v6 = vpop.permute.xlu1 %3473  ;;  %v1567_v26 = vpop.permute.xlu0 %1566 }
 0x129   : > { %2117 = vst.msk [vmem:[#allocation3 + $0xe0] sm:$0xf] %vm1638_vm3, %v2033_v1  ;;  %v2228_v49 = vrot.slane %v2227_v54, 4  ;;  %v5562_v50 = vrot.slane %v7675_v61, 9  ;;  %v2666_v62 = vld [vmem:[#allocation2 + $0x8c] sm:$0x1]  ;;  %4893 = vmatprep.mubr.bf16.mxu1 %v6116_v16 }
 0x12a   : > { %v1689_v37 = vld [vmem:[#allocation2 + $0x48] sm:$0xe]  ;;  %v1690_v19 = vld [vmem:[#allocation2 + $0x4c] sm:$0xf]  ;;  %v7709_v13 = vld [vmem:[#allocation2 + $0x98] sm:$0x1]  ;;  %4894 = vmatmul.mubr.bf16.vlgmr.msra.gmra.mxu1 %v6114_v10  ;;  %2880 = vrot.lane.b32.xlu1 %v7705_v5, %s6198_s6 }
 0x12b   : > { %1042 = vst [vmem:[#allocation2 + $0xc8] sm:$0x1] %v1041_v35  ;;  %2940 = vst.msk [vmem:[#allocation3 + $0x30] sm:$0xf] %vm1638_vm3, %v2847_v53  ;;  %v3307_v25 = vrot.slane %v3306_v44, 4  ;;  %v7714_v9 = vrot.slane %v3319_v60, 5  ;;  %v2233_v57 = vsel %vm6343_vm8, %v2228_v49, %v2232_v24 }
 0x12c   : > { %v2802_v48 = vrot.slane %v2665_v38, 5  ;;  %v3324_v27 = vshrl.u32 %v7681_v31, 16  ;;  %v7717_v43 = vld [vmem:[#allocation2 + $0x90] sm:$0xe]  ;;  %v7719_v15 = vld [vmem:[#allocation2 + $0x94] sm:$0xf] }
 0x12d   : > { %v2980_v58 = vld [vmem:[#allocation2 + $0x4c] sm:$0xf]  ;;  %v7723_v42 = vrot.slane %v3316_v20, 4  ;;  %v3327_v56 = vshll.u32 %v7681_v31, 16  ;;  %v3333_v0 = vshll.u32 %v7689_v46, 16  ;;  %v3312_v39 = vsel %vm6343_vm8, %v3307_v25, %v7691_v22  ;;  %v3897_v63 = vld [vmem:[#allocation3 + $0xc8] sm:$0xff] }
 0x12e   : > { %3012 = vst.msk [vmem:[#allocation3 + $0xc0] sm:$0xf] %vm450_vm0, %v2980_v58  ;;  %v1061_v7 = vld [vmem:[#allocation2 + $0x6c] sm:$0xf]  ;;  %2605 = vst.msk [vmem:[#allocation3 + $0x44] sm:$0xf] %vm450_vm0, %v2233_v57  ;;  %v2803_v18 = vsel %vm6773_vm9, %v5562_v50, %v2802_v48  ;;  %3503 = vrot.lane.b32.xlu0 %v3312_v39, %s6198_s6 }
 0x12f   : > { %v2804_v28 = vrot.slane %v2802_v48, 4  ;;  %v2805_v2 = vrot.slane %v2666_v62, 5  ;;  %v3326_v41 = vrot.slane %v3324_v27, 4  ;;  %1093 = vst.msk [vmem:[#allocation3 + $0x168] sm:$0xf] %vm450_vm0, %v1061_v7  ;;  %v3329_v29 = vrot.slane %v3327_v56, 5 }
 0x130   : > { %v1062_v52 = vld [vmem:[#allocation2 + $0x70] sm:$0xf]  ;;  %2941 = vst.msk [vmem:[#allocation3 + $0x44] sm:$0xf] %vm1638_vm3, %v2849_v17  ;;  %3565 = vst.msk [vmem:[#allocation3 + $0x34] sm:$0xf] %vm1638_vm3, %v3472_v45  ;;  %v3322_v8 = vsel %vm6343_vm8, %v7723_v42, %v7714_v9 }
 0x131   : > { %v7739_v36 = vrot.slane %v3333_v0, 5  ;;  %v3337_v59 = vshrl.u32 %v7689_v46, 16  ;;  %v1691_v55 = vld [vmem:[#allocation2 + $0x50] sm:$0x1]  ;;  %1094 = vst.msk [vmem:[#allocation3 + $0x17c] sm:$0xf] %vm450_vm0, %v1062_v52  ;;  %v3330_v33 = vor.u32 %v3329_v29, %v3326_v41  ;;  %v7758_v40 = vsel %vm6773_vm9, %v2804_v28, %v2805_v2  ;;  %3505 = vrot.lane.b32.xlu1 %v3322_v8, %s6198_s6 }
 0x132   : > { %v5542_v21 = vrot.slane %v1689_v37, 9  ;;  %v1814_v61 = vrot.slane %v1690_v19, 5  ;;  %v3343_v12 = vshll.u32 %v7709_v13, 16  ;;  %v2144_v51 = vld [vmem:[#allocation2 + $0x24] sm:$0xf]  ;;  %v5563_v31 = vrot.slane %v7717_v43, 9  ;;  %v1569_v37 = vpop.permute.xlu1 %1568  ;;  %v2035_v19 = vpop.permute.xlu0 %2034  ;;  %2882 = vrot.lane.b32.xlu0 %v2803_v18, %s6198_s6 }
 0x133   : > { %v3339_v4 = vrot.slane %v3337_v59, 4  ;;  %v2809_v32 = vrot.slane %v7719_v15, 5  ;;  %v2145_v47 = vld [vmem:[#allocation2 + $0x28] sm:$0xf]  ;;  %v3900_v3 = vld [vmem:[#allocation3 + $0xdc] sm:$0xff]  ;;  %v1817_v54 = vrot.slane %v1691_v55, 5 }
 0x134   : > { %v6117_v38 = vld [vmem:[#allocation3 + $0xcc] ss:$20 sps:$4 sm:$0xff]   ;;  %v1815_v46 = vsel %vm6773_vm9, %v5542_v21, %v1814_v61  ;;  %v1816_v22 = vrot.slane %v1814_v61, 4  ;;  %3566 = vst.msk [vmem:[#allocation3 + $0x48] sm:$0xf] %vm1638_vm3, %v3474_v6  ;;  %v7765_v30 = vrot.slane %v3330_v33, 4  ;;  %v5609_v60 = vcombine.low %v3897_v63, %v3900_v3 }
 0x135   : > { %1651 = vst.msk [vmem:[#allocation3 + $0xf0] sm:$0xf] %vm1638_vm3, %v1567_v26  ;;  %v3340_v11 = vor.u32 %v3339_v4, %v7739_v36  ;;  %v7769_v1 = vrot.slane %v3343_v12, 5  ;;  %v7771_v14 = vld [vmem:[#allocation2 + $0x98] sm:$0x1]  ;;  %4772 = vmatprep.mubr.bf16.mxu0 %v6117_v38  ;;  %v2235_v10 = vshrl.u32 %v2144_v51, 16  ;;  %v7785_v50 = vsel %vm6773_vm9, %v5563_v31, %v2809_v32  ;;  %2884 = vrot.lane.b32.xlu1 %v7758_v40, %s6198_s6 }
 0x136   : > { %1926 = vst.msk [vmem:[#allocation3 + $0xf4] sm:$0xf] %vm450_vm0, %v1815_v46  ;;  %v3068_v53 = vld [vmem:[#allocation2 + $0x9c] sm:$0xf]  ;;  %v1818_v44 = vsel %vm6773_vm9, %v1816_v22, %v1817_v54  ;;  %v2238_v16 = vshll.u32 %v2144_v51, 16  ;;  %v2244_v24 = vshll.u32 %v2145_v47, 16  ;;  %v3336_v49 = vsel %vm6343_vm8, %v7765_v30, %v7739_v36  ;;  %4773 = vmatmul.mubr.bf16.gmra.mxu0 %v5609_v60  ;;  %v2037_v8 = vpop.permute.xlu1 %2036  ;;  %v2851_v61 = vpop.permute.xlu0 %2850 }
 0x137   : > { %v3069_v35 = vld [vmem:[#allocation2 + $0xa0] sm:$0xf]  ;;  %v7781_v20 = vrot.slane %v3340_v11, 4  ;;  %1927 = vst.msk [vmem:[#allocation3 + $0x108] sm:$0xf] %vm450_vm0, %v1818_v44  ;;  %v2248_v5 = vshrl.u32 %v2145_v47, 16  ;;  %3507 = vrot.lane.b32.xlu0 %v3336_v49, %s6198_s6 }
 0x138   : > { %v2146_v62 = vld [vmem:[#allocation2 + $0x2c] sm:$0x1]  ;;  %v2237_v13 = vrot.slane %v2235_v10, 4  ;;  %v2240_v25 = vrot.slane %v2238_v16, 5  ;;  %v2246_v9 = vrot.slane %v2244_v24, 5  ;;  %v2811_v48 = vrot.slane %v2809_v32, 4 }
 0x139   : > { %v3070_v27 = vld [vmem:[#allocation2 + $0xa4] sm:$0x1]  ;;  %1652 = vst.msk [vmem:[#allocation3 + $0x104] sm:$0xf] %vm1638_vm3, %v1569_v37  ;;  %2118 = vst.msk [vmem:[#allocation3 + $0xf4] sm:$0xf] %vm1638_vm3, %v2035_v19  ;;  %v3346_v56 = vsel %vm6343_vm8, %v7781_v20, %v7769_v1 }
 0x13a   : > { %v2812_v43 = vrot.slane %v7771_v14, 5  ;;  %v3348_v15 = vshrl.u32 %v3068_v53, 16  ;;  %v3351_v58 = vshll.u32 %v3068_v53, 16  ;;  %v3357_v57 = vshll.u32 %v3069_v35, 16  ;;  %v7792_v42 = vld [vmem:[#allocation2 + $0x9c] sm:$0xe]  ;;  %v2853_v24 = vpop.permute.xlu1 %2852  ;;  %3509 = vrot.lane.b32.xlu1 %v3346_v56, %s6198_s6 }
 0x13b   : > { %v2241_v0 = vor.u32 %v2240_v25, %v2237_v13  ;;  %v3361_v7 = vshrl.u32 %v3069_v35, 16  ;;  %v3874_v39 = vld [vmem:[#allocation3 + $0x30] sm:$0xff]  ;;  %v2250_v17 = vrot.slane %v2248_v5, 4  ;;  %v7799_v45 = vld [vmem:[#allocation2 + $0xa0] sm:$0xf]  ;;  %v2254_v36 = vshll.u32 %v2146_v62, 16  ;;  %v3476_v35 = vpop.permute.xlu0 %3475  ;;  %2886 = vrot.lane.b32.xlu0 %v7785_v50, %s6198_s6 }
 0x13c   : > { %v7801_v28 = vld [vmem:[#allocation2 + $0xa8] sm:$0xf]  ;;  %v2981_v2 = vld [vmem:[#allocation2 + $0x54] sm:$0xf]  ;;  %v2982_v41 = vld [vmem:[#allocation2 + $0x58] sm:$0xf]  ;;  %v7816_v47 = vsel %vm6773_vm9, %v2811_v48, %v2812_v43 }
 0x13d   : > { %v3350_v52 = vrot.slane %v3348_v15, 4  ;;  %v3353_v18 = vrot.slane %v3351_v58, 5  ;;  %v7803_v29 = vrot.slane %v3357_v57, 5  ;;  %v7805_v59 = vld [vmem:[#allocation2 + $0xac] sm:$0xf]  ;;  %v2242_v21 = vrot.slane %v2241_v0, 4 }
 0x13e   : > { %3013 = vst.msk [vmem:[#allocation3 + $0xd4] sm:$0xf] %vm450_vm0, %v2981_v2  ;;  %3014 = vst.msk [vmem:[#allocation3 + $0xe8] sm:$0xf] %vm450_vm0, %v2982_v41  ;;  %v1063_v55 = vld [vmem:[#allocation2 + $0x78] sm:$0xf]  ;;  %v2251_v33 = vor.u32 %v2250_v17, %v2246_v9  ;;  %2888 = vrot.lane.b32.xlu1 %v7816_v47, %s6198_s6 }
 0x13f   : > { %v3877_v12 = vld [vmem:[#allocation3 + $0x44] sm:$0xff]  ;;  %v3363_v4 = vrot.slane %v3361_v7, 4  ;;  %v3367_v31 = vshll.u32 %v3070_v27, 16  ;;  %v7809_v32 = vld [vmem:[#allocation2 + $0xa4] sm:$0x1]  ;;  %v3354_v6 = vor.u32 %v3353_v18, %v3350_v52  ;;  %v2256_v26 = vrot.slane %v2254_v36, 5  ;;  %v1571_v17 = vpop.permute.xlu0 %1570 }
 0x140   : > { %v6119_v51 = vld [vmem:[#allocation3 + $0x34] ss:$20 sps:$4 sm:$0xff]   ;;  %1095 = vst.msk [vmem:[#allocation3 + $0x190] sm:$0xf] %vm450_vm0, %v1063_v55  ;;  %v5591_v63 = vcombine.low %v3874_v39, %v3877_v12  ;;  %v2247_v3 = vsel %vm6343_vm8, %v2242_v21, %v2246_v9  ;;  %v2252_v38 = vrot.slane %v2251_v33, 4  ;;  %v5564_v22 = vrot.slane %v7792_v42, 9  ;;  %v3478_v39 = vpop.permute.xlu1 %3477 }
 0x141   : > { %2119 = vst.msk [vmem:[#allocation3 + $0x108] sm:$0xf] %vm1638_vm3, %v2037_v8  ;;  %4901 = vmatprep.mubr.bf16.mxu1 %v6119_v51  ;;  %v3364_v46 = vor.u32 %v3363_v4, %v7803_v29  ;;  %v1692_v54 = vld [vmem:[#allocation2 + $0x54] sm:$0xe]  ;;  %v1693_v30 = vld [vmem:[#allocation2 + $0x58] sm:$0xf] }
 0x142   : > { %v7824_v60 = vld [vmem:[#allocation2 + $0xb0] sm:$0x1]  ;;  %v1064_v11 = vld [vmem:[#allocation2 + $0x7c] sm:$0xf]  ;;  %2606 = vst.msk [vmem:[#allocation3 + $0x58] sm:$0xf] %vm450_vm0, %v2247_v3  ;;  %4902 = vmatmul.mubr.bf16.gmra.mxu1 %v5591_v63  ;;  %v2257_v16 = vsel %vm6343_vm8, %v2252_v38, %v2256_v26 }
 0x143   : > { %v3355_v14 = vrot.slane %v3354_v6, 4  ;;  %v7827_v53 = vrot.slane %v3367_v31, 5  ;;  %v2816_v40 = vrot.slane %v7799_v45, 5  ;;  %v3372_v44 = vshrl.u32 %v7801_v28, 16  ;;  %v7831_v10 = vld [vmem:[#allocation2 + $0xa8] sm:$0xe] }
 0x144   : > { %1096 = vst.msk [vmem:[#allocation3 + $0x1a4] sm:$0xf] %vm450_vm0, %v1064_v11  ;;  %v7837_v49 = vrot.slane %v3364_v46, 4  ;;  %v3375_v5 = vshll.u32 %v7801_v28, 16  ;;  %v3381_v62 = vshll.u32 %v7805_v59, 16  ;;  %v2819_v25 = vrot.slane %v7809_v32, 5  ;;  %v1573_v38 = vpop.permute.xlu1 %1572  ;;  %v2039_v46 = vpop.permute.xlu0 %2038 }
 0x145   : > { %2942 = vst.msk [vmem:[#allocation3 + $0x58] sm:$0xf] %vm1638_vm3, %v2851_v61  ;;  %v7841_v37 = vld [vmem:[#allocation2 + $0xac] sm:$0xf]  ;;  %v3360_v19 = vsel %vm6343_vm8, %v3355_v14, %v7803_v29  ;;  %3567 = vst.msk [vmem:[#allocation3 + $0x5c] sm:$0xf] %vm1638_vm3, %v3476_v35  ;;  %v2817_v50 = vsel %vm6773_vm9, %v5564_v22, %v2816_v40 }
 0x146   : > { %2607 = vst.msk [vmem:[#allocation3 + $0x6c] sm:$0xf] %vm450_vm0, %v2257_v16  ;;  %v2818_v13 = vrot.slane %v2816_v40, 4  ;;  %v3374_v9 = vrot.slane %v3372_v44, 4  ;;  %v1694_v48 = vld [vmem:[#allocation2 + $0x5c] sm:$0x1]  ;;  %v3370_v42 = vsel %vm6343_vm8, %v7837_v49, %v7827_v53  ;;  %3511 = vrot.lane.b32.xlu0 %v3360_v19, %s6198_s6 }
 0x147   : > { %2943 = vst.msk [vmem:[#allocation3 + $0x6c] sm:$0xf] %vm1638_vm3, %v2853_v24  ;;  %v3377_v27 = vrot.slane %v3375_v5, 5  ;;  %v7860_v43 = vrot.slane %v3381_v62, 5  ;;  %v3385_v15 = vshrl.u32 %v7805_v59, 16  ;;  %v3903_v1 = vld [vmem:[#allocation3 + $0xf0] sm:$0xff]  ;;  %3513 = vrot.lane.b32.xlu1 %v3370_v42, %s6198_s6 }
 0x148   : > { %v2147_v58 = vld [vmem:[#allocation2 + $0x30] sm:$0xf]  ;;  %v7863_v57 = vld [vmem:[#allocation2 + $0x34] sm:$0xf]  ;;  %v5543_v20 = vrot.slane %v1692_v54, 9  ;;  %v1821_v56 = vrot.slane %v1693_v30, 5  ;;  %v7878_v36 = vsel %vm6773_vm9, %v2818_v13, %v2819_v25 }
 0x149   : > { %v3391_v0 = vshll.u32 %v7824_v60, 16  ;;  %v2983_v7 = vld [vmem:[#allocation2 + $0x60] sm:$0xf]  ;;  %v3378_v45 = vor.u32 %v3377_v27, %v3374_v9  ;;  %v3387_v41 = vrot.slane %v3385_v15, 4  ;;  %v5565_v52 = vrot.slane %v7831_v10, 9  ;;  %v2855_v27 = vpop.permute.xlu0 %2854 }
 0x14a   : > { %v3906_v28 = vld [vmem:[#allocation3 + $0x104] sm:$0xff]  ;;  %v2823_v18 = vrot.slane %v7841_v37, 5  ;;  %v2675_v29 = vld [vmem:[#allocation2 + $0xb0] sm:$0x1]  ;;  %3015 = vst.msk [vmem:[#allocation3 + $0xfc] sm:$0xf] %vm450_vm0, %v2983_v7  ;;  %v1822_v59 = vsel %vm6773_vm9, %v5543_v20, %v1821_v56  ;;  %2890 = vrot.lane.b32.xlu0 %v2817_v50, %s6198_s6  ;;  %v2041_v50 = vpop.permute.xlu1 %2040 }
 0x14b   : > { %v6121_v2 = vld [vmem:[#allocation3 + $0xf4] ss:$20 sps:$4 sm:$0xff]   ;;  %3568 = vst.msk [vmem:[#allocation3 + $0x70] sm:$0xf] %vm1638_vm3, %v3478_v39  ;;  %1653 = vst.msk [vmem:[#allocation3 + $0x118] sm:$0xf] %vm1638_vm3, %v1571_v17  ;;  %v5614_v55 = vcombine.low %v3903_v1, %v3906_v28  ;;  %v3388_v33 = vor.u32 %v3387_v41, %v7860_v43  ;;  %2892 = vrot.lane.b32.xlu1 %v7878_v36, %s6198_s6 }
 0x14c   : > { %v1823_v8 = vrot.slane %v1821_v56, 4  ;;  %v3074_v21 = vld [vmem:[#allocation2 + $0xb4] sm:$0xf]  ;;  %v2984_v61 = vld [vmem:[#allocation2 + $0x64] sm:$0xf]  ;;  %v3379_v51 = vrot.slane %v3378_v45, 4  ;;  %4780 = vmatprep.mubr.bf16.mxu0 %v6121_v2  ;;  %v7897_v54 = vsel %vm6773_vm9, %v5565_v52, %v2823_v18 }
 0x14d   : > { %v1065_v12 = vld [vmem:[#allocation2 + $0x84] sm:$0xf]  ;;  %1928 = vst.msk [vmem:[#allocation3 + $0x11c] sm:$0xf] %vm450_vm0, %v1822_v59  ;;  %v7886_v4 = vrot.slane %v3391_v0, 5  ;;  %v1824_v31 = vrot.slane %v1694_v48, 5  ;;  %4781 = vmatmul.mubr.bf16.gmra.mxu0 %v5614_v55 }
 0x14e   : > { %3016 = vst.msk [vmem:[#allocation3 + $0x110] sm:$0xf] %vm450_vm0, %v2984_v61  ;;  %1097 = vst.msk [vmem:[#allocation3 + $0x1b8] sm:$0xf] %vm450_vm0, %v1065_v12  ;;  %v1066_v32 = vld [vmem:[#allocation2 + $0x88] sm:$0xf]  ;;  %v3384_v24 = vsel %vm6343_vm8, %v3379_v51, %v7860_v43  ;;  %v2857_v12 = vpop.permute.xlu1 %2856  ;;  %v3480_v51 = vpop.permute.xlu0 %3479 }
 0x14f   : > { %v2259_v6 = vshrl.u32 %v2147_v58, 16  ;;  %v2262_v26 = vshll.u32 %v2147_v58, 16  ;;  %v2268_v63 = vshll.u32 %v7863_v57, 16  ;;  %v2272_v47 = vshrl.u32 %v7863_v57, 16  ;;  %v3075_v3 = vld [vmem:[#allocation2 + $0xb8] sm:$0xf]  ;;  %3515 = vrot.lane.b32.xlu0 %v3384_v24, %s6198_s6 }
 0x150   : > { %1098 = vst.msk [vmem:[#allocation3 + $0x1cc] sm:$0xf] %vm450_vm0, %v1066_v32  ;;  %v7893_v22 = vrot.slane %v3388_v33, 4  ;;  %v1825_v30 = vsel %vm6773_vm9, %v1823_v8, %v1824_v31  ;;  %v2825_v60 = vrot.slane %v2823_v18, 4  ;;  %v2149_v11 = vld [vmem:[#allocation2 + $0x38] sm:$0x1] }
 0x151   : > { %1654 = vst.msk [vmem:[#allocation3 + $0x12c] sm:$0xf] %vm1638_vm3, %v1573_v38  ;;  %2120 = vst.msk [vmem:[#allocation3 + $0x11c] sm:$0xf] %vm1638_vm3, %v2039_v46  ;;  %v2261_v14 = vrot.slane %v2259_v6, 4  ;;  %v2264_v53 = vrot.slane %v2262_v26, 5 }
 0x152   : > { %1929 = vst.msk [vmem:[#allocation3 + $0x130] sm:$0xf] %vm450_vm0, %v1825_v30  ;;  %v2270_v40 = vrot.slane %v2268_v63, 5  ;;  %v2826_v44 = vrot.slane %v2675_v29, 5  ;;  %v3076_v10 = vld [vmem:[#allocation2 + $0xbc] sm:$0x1]  ;;  %v3394_v19 = vsel %vm6343_vm8, %v7893_v22, %v7886_v4 }
 0x153   : > { %v2676_v16 = vld [vmem:[#allocation2 + $0xb4] sm:$0xe]  ;;  %v3396_v35 = vshrl.u32 %v3074_v21, 16  ;;  %v3399_v49 = vshll.u32 %v3074_v21, 16  ;;  %v3405_v5 = vshll.u32 %v3075_v3, 16  ;;  %v2265_v13 = vor.u32 %v2264_v53, %v2261_v14  ;;  %v3883_v42 = vld [vmem:[#allocation3 + $0x6c] sm:$0xff]  ;;  %2894 = vrot.lane.b32.xlu0 %v7897_v54, %s6198_s6  ;;  %3517 = vrot.lane.b32.xlu1 %v3394_v19, %s6198_s6 }
 0x154   : > { %v3880_v62 = vld [vmem:[#allocation3 + $0x58] sm:$0xff]  ;;  %v2677_v37 = vld [vmem:[#allocation2 + $0xb8] sm:$0xf]  ;;  %v3409_v25 = vshrl.u32 %v3075_v3, 16  ;;  %v2274_v9 = vrot.slane %v2272_v47, 4  ;;  %v7917_v43 = vsel %vm6773_vm9, %v2825_v60, %v2826_v44  ;;  %v2278_v7 = vshll.u32 %v2149_v11, 16 }
 0x155   : > { %v7913_v48 = vld [vmem:[#allocation2 + $0xbc] sm:$0x1]  ;;  %v3398_v15 = vrot.slane %v3396_v35, 4  ;;  %v3401_v58 = vrot.slane %v3399_v49, 5  ;;  %v7919_v57 = vrot.slane %v3405_v5, 5  ;;  %v2266_v56 = vrot.slane %v2265_v13, 4  ;;  %v3482_v49 = vpop.permute.xlu1 %3481  ;;  %v1575_v5 = vpop.permute.xlu0 %1574 }
 0x156   : > { %v6124_v1 = vld [vmem:[#allocation3 + $0x5c] ss:$20 sps:$4 sm:$0xff]   ;;  %v7921_v20 = vld [vmem:[#allocation2 + $0xc0] sm:$0xf]  ;;  %2121 = vst.msk [vmem:[#allocation3 + $0x130] sm:$0xf] %vm1638_vm3, %v2041_v50  ;;  %v2275_v0 = vor.u32 %v2274_v9, %v2270_v40  ;;  %v5596_v39 = vcombine.low %v3880_v62, %v3883_v42 }
 0x157   : > { %v7925_v17 = vld [vmem:[#allocation2 + $0xc4] sm:$0xf]  ;;  %v2985_v45 = vld [vmem:[#allocation2 + $0x6c] sm:$0xf]  ;;  %v3402_v28 = vor.u32 %v3401_v58, %v3398_v15  ;;  %4909 = vmatprep.mubr.bf16.mxu1 %v6124_v1  ;;  %v3411_v2 = vrot.slane %v3409_v25, 4  ;;  %v3415_v41 = vshll.u32 %v3076_v10, 16  ;;  %v2271_v59 = vsel %vm6343_vm8, %v2266_v56, %v2270_v40  ;;  %2896 = vrot.lane.b32.xlu1 %v7917_v43, %s6198_s6 }
 0x158   : > { %v5566_v52 = vrot.slane %v2676_v16, 9  ;;  %v7929_v18 = vld [vmem:[#allocation2 + $0x60] sm:$0xe]  ;;  %3017 = vst.msk [vmem:[#allocation3 + $0x124] sm:$0xf] %vm450_vm0, %v2985_v45  ;;  %v2276_v55 = vrot.slane %v2275_v0, 4  ;;  %4910 = vmatmul.mubr.bf16.gmra.mxu1 %v5596_v39 }
 0x159   : > { %v2986_v29 = vld [vmem:[#allocation2 + $0x70] sm:$0xf]  ;;  %v2280_v8 = vrot.slane %v2278_v7, 5  ;;  %v2830_v21 = vrot.slane %v2677_v37, 5  ;;  %v1696_v61 = vld [vmem:[#allocation2 + $0x64] sm:$0xf]  ;;  %v3412_v33 = vor.u32 %v3411_v2, %v7919_v57  ;;  %v1577_v43 = vpop.permute.xlu1 %1576 }
 0x15a   : > { %3018 = vst.msk [vmem:[#allocation3 + $0x138] sm:$0xf] %vm450_vm0, %v2986_v29  ;;  %2608 = vst.msk [vmem:[#allocation3 + $0x80] sm:$0xf] %vm450_vm0, %v2271_v59  ;;  %v3403_v36 = vrot.slane %v3402_v28, 4  ;;  %v7937_v4 = vrot.slane %v3415_v41, 5 }
 0x15b   : > { %v2833_v31 = vrot.slane %v7913_v48, 5  ;;  %v2679_v32 = vld [vmem:[#allocation2 + $0xc0] sm:$0xe]  ;;  %2944 = vst.msk [vmem:[#allocation3 + $0x80] sm:$0xf] %vm1638_vm3, %v2855_v27  ;;  %v2281_v6 = vsel %vm6343_vm8, %v2276_v55, %v2280_v8  ;;  %v2831_v26 = vsel %vm6773_vm9, %v5566_v52, %v2830_v21  ;;  %v2832_v63 = vrot.slane %v2830_v21, 4 }
 0x15c   : > { %3569 = vst.msk [vmem:[#allocation3 + $0x84] sm:$0xf] %vm1638_vm3, %v3480_v51  ;;  %v3420_v47 = vshrl.u32 %v7921_v20, 16  ;;  %v3079_v3 = vld [vmem:[#allocation2 + $0xc8] sm:$0x1]  ;;  %v3408_v22 = vsel %vm6343_vm8, %v3403_v36, %v7919_v57  ;;  %v3413_v54 = vrot.slane %v3412_v33, 4 }
 0x15d   : > { %v7949_v38 = vld [vmem:[#allocation2 + $0xc4] sm:$0xf]  ;;  %v2987_v46 = vld [vmem:[#allocation2 + $0x78] sm:$0xf]  ;;  %2609 = vst.msk [vmem:[#allocation3 + $0x94] sm:$0xf] %vm450_vm0, %v2281_v6  ;;  %v7962_v53 = vsel %vm6773_vm9, %v2832_v63, %v2833_v31  ;;  %3519 = vrot.lane.b32.xlu0 %v3408_v22, %s6198_s6 }
 0x15e   : > { %v3423_v30 = vshll.u32 %v7921_v20, 16  ;;  %v3429_v60 = vshll.u32 %v7925_v17, 16  ;;  %v1697_v11 = vld [vmem:[#allocation2 + $0x68] sm:$0x1]  ;;  %3019 = vst.msk [vmem:[#allocation3 + $0x14c] sm:$0xf] %vm450_vm0, %v2987_v46  ;;  %v3418_v35 = vsel %vm6343_vm8, %v3413_v54, %v7937_v4 }
 0x15f   : > { %v2988_v14 = vld [vmem:[#allocation2 + $0x7c] sm:$0xf]  ;;  %2945 = vst.msk [vmem:[#allocation3 + $0x94] sm:$0xf] %vm1638_vm3, %v2857_v12  ;;  %v3422_v40 = vrot.slane %v3420_v47, 4  ;;  %v3433_v44 = vshrl.u32 %v7925_v17, 16  ;;  %3521 = vrot.lane.b32.xlu1 %v3418_v35, %s6198_s6 }
 0x160   : > { %v3909_v10 = vld [vmem:[#allocation3 + $0x118] sm:$0xff]  ;;  %v5544_v16 = vrot.slane %v7929_v18, 9  ;;  %v2150_v24 = vld [vmem:[#allocation2 + $0x3c] sm:$0xf]  ;;  %3020 = vst.msk [vmem:[#allocation3 + $0x160] sm:$0xf] %vm450_vm0, %v2988_v14 }
 0x161   : > { %v3425_v62 = vrot.slane %v3423_v30, 5  ;;  %v3431_v37 = vrot.slane %v3429_v60, 5  ;;  %v3912_v19 = vld [vmem:[#allocation3 + $0x12c] sm:$0xff]  ;;  %v1828_v25 = vrot.slane %v1696_v61, 5  ;;  %3570 = vst.msk [vmem:[#allocation3 + $0x98] sm:$0xf] %vm1638_vm3, %v3482_v49  ;;  %2898 = vrot.lane.b32.xlu0 %v2831_v26, %s6198_s6 }
 0x162   : > { %v6126_v13 = vld [vmem:[#allocation3 + $0x11c] ss:$20 sps:$4 sm:$0xff]   ;;  %1655 = vst.msk [vmem:[#allocation3 + $0x140] sm:$0xf] %vm1638_vm3, %v1575_v5  ;;  %v5619_v9 = vcombine.low %v3909_v10, %v3912_v19  ;;  %v3435_v48 = vrot.slane %v3433_v44, 4  ;;  %v3439_v50 = vshll.u32 %v3079_v3, 16 }
 0x163   : > { %v5567_v27 = vrot.slane %v2679_v32, 9  ;;  %v2151_v15 = vld [vmem:[#allocation2 + $0x40] sm:$0xf]  ;;  %v3426_v58 = vor.u32 %v3425_v62, %v3422_v40  ;;  %4788 = vmatprep.mubr.bf16.mxu0 %v6126_v13  ;;  %v1829_v57 = vsel %vm6773_vm9, %v5544_v16, %v1828_v25  ;;  %v2837_v42 = vrot.slane %v7949_v38, 5  ;;  %v3080_v20 = vld [vmem:[#allocation2 + $0xcc] sm:$0xf]  ;;  %2900 = vrot.lane.b32.xlu1 %v7962_v53, %s6198_s6 }
 0x164   : > { %v1830_v1 = vrot.slane %v1828_v25, 4  ;;  %1930 = vst.msk [vmem:[#allocation3 + $0x144] sm:$0xf] %vm450_vm0, %v1829_v57  ;;  %4789 = vmatmul.mubr.bf16.gmra.mxu0 %v5619_v9  ;;  %v3436_v56 = vor.u32 %v3435_v48, %v3431_v37  ;;  %v7979_v0 = vrot.slane %v3439_v50, 5  ;;  %v1831_v7 = vrot.slane %v1697_v11, 5  ;;  %v3886_v40 = vld [vmem:[#allocation3 + $0x80] sm:$0xff] }
 0x165   : > { %v2283_v39 = vshrl.u32 %v2150_v24, 16  ;;  %v3081_v17 = vld [vmem:[#allocation2 + $0xd0] sm:$0xf]  ;;  %v3427_v45 = vrot.slane %v3426_v58, 4  ;;  %v2838_v28 = vsel %vm6773_vm9, %v5567_v27, %v2837_v42  ;;  %v2286_v2 = vshll.u32 %v2150_v24, 16 }
 0x166   : > { %v2292_v41 = vshll.u32 %v2151_v15, 16  ;;  %v2681_v52 = vld [vmem:[#allocation2 + $0xc8] sm:$0x1]  ;;  %v2152_v18 = vld [vmem:[#allocation2 + $0x44] sm:$0x1]  ;;  %v3437_v29 = vrot.slane %v3436_v56, 4  ;;  %v1832_v59 = vsel %vm6773_vm9, %v1830_v1, %v1831_v7 }
 0x167   : > { %1656 = vst.msk [vmem:[#allocation3 + $0x154] sm:$0xf] %vm1638_vm3, %v1577_v43  ;;  %v2285_v55 = vrot.slane %v2283_v39, 4  ;;  %v2296_v8 = vshrl.u32 %v2151_v15, 16  ;;  %v2989_v21 = vld [vmem:[#allocation2 + $0x84] sm:$0xf]  ;;  %v3432_v61 = vsel %vm6343_vm8, %v3427_v45, %v3431_v37  ;;  %v2043_v37 = vpop.permute.xlu0 %2042 }
 0x168   : > { %1931 = vst.msk [vmem:[#allocation3 + $0x158] sm:$0xf] %vm450_vm0, %v1832_v59  ;;  %v2288_v36 = vrot.slane %v2286_v2, 5  ;;  %v2294_v12 = vrot.slane %v2292_v41, 5  ;;  %v2839_v51 = vrot.slane %v2837_v42, 4  ;;  %v3442_v4 = vsel %vm6343_vm8, %v3437_v29, %v7979_v0  ;;  %v3889_v46 = vld [vmem:[#allocation3 + $0x94] sm:$0xff]  ;;  %3523 = vrot.lane.b32.xlu0 %v3432_v61, %s6198_s6  ;;  %v2045_v0 = vpop.permute.xlu1 %2044 }
 0x169   : > { %v3082_v33 = vld [vmem:[#allocation2 + $0xd4] sm:$0x1]  ;;  %3021 = vst.msk [vmem:[#allocation3 + $0x174] sm:$0xf] %vm450_vm0, %v2989_v21  ;;  %v2840_v31 = vrot.slane %v2681_v52, 5  ;;  %v3444_v32 = vshrl.u32 %v3080_v20, 16  ;;  %v5601_v49 = vcombine.low %v3886_v40, %v3889_v46  ;;  %3525 = vrot.lane.b32.xlu1 %v3442_v4, %s6198_s6 }
 0x16a   : > { %v3447_v6 = vshll.u32 %v3080_v20, 16  ;;  %v1698_v26 = vld [vmem:[#allocation2 + $0x6c] sm:$0xe]  ;;  %v1699_v63 = vld [vmem:[#allocation2 + $0x70] sm:$0xf]  ;;  %v2289_v47 = vor.u32 %v2288_v36, %v2285_v55  ;;  %v3453_v3 = vshll.u32 %v3081_v17, 16 }
 0x16b   : > { %v3457_v38 = vshrl.u32 %v3081_v17, 16  ;;  %v6128_v22 = vld [vmem:[#allocation3 + $0x84] ss:$20 sps:$4 sm:$0xff]   ;;  %v2298_v54 = vrot.slane %v2296_v8, 4  ;;  %v1700_v30 = vld [vmem:[#allocation2 + $0x74] sm:$0x1]  ;;  %v7998_v60 = vsel %vm6773_vm9, %v2839_v51, %v2840_v31  ;;  %v2859_v2 = vpop.permute.xlu0 %2858 }
 0x16c   : > { %v3446_v11 = vrot.slane %v3444_v32, 4  ;;  %v3449_v14 = vrot.slane %v3447_v6, 5  ;;  %v2302_v44 = vshll.u32 %v2152_v18, 16  ;;  %v2153_v10 = vld [vmem:[#allocation2 + $0x48] sm:$0xf]  ;;  %v2290_v16 = vrot.slane %v2289_v47, 4  ;;  %4917 = vmatprep.mubr.bf16.mxu1 %v6128_v22  ;;  %2902 = vrot.lane.b32.xlu0 %v2838_v28, %s6198_s6  ;;  %v2861_v32 = vpop.permute.xlu1 %2860 }
 0x16d   : > { %v3455_v24 = vrot.slane %v3453_v3, 5  ;;  %v2299_v35 = vor.u32 %v2298_v54, %v2294_v12  ;;  %v2154_v5 = vld [vmem:[#allocation2 + $0x4c] sm:$0xf]  ;;  %v2990_v62 = vld [vmem:[#allocation2 + $0x88] sm:$0xf]  ;;  %v3459_v25 = vrot.slane %v3457_v38, 4  ;;  %4918 = vmatmul.mubr.bf16.gmra.mxu1 %v5601_v49  ;;  %2904 = vrot.lane.b32.xlu1 %v7998_v60, %s6198_s6 }
 0x16e   : > { %v3450_v19 = vor.u32 %v3449_v14, %v3446_v11  ;;  %v2304_v13 = vrot.slane %v2302_v44, 5  ;;  %v3463_v9 = vshll.u32 %v3082_v33, 16  ;;  %v2155_v48 = vld [vmem:[#allocation2 + $0x50] sm:$0x1]  ;;  %3022 = vst.msk [vmem:[#allocation3 + $0x188] sm:$0xf] %vm450_vm0, %v2990_v62  ;;  %v2295_v53 = vsel %vm6343_vm8, %v2290_v16, %v2294_v12 }
 0x16f   : > { %2122 = vst.msk [vmem:[#allocation3 + $0x144] sm:$0xf] %vm1638_vm3, %v2043_v37  ;;  %v2300_v50 = vrot.slane %v2299_v35, 4  ;;  %v5545_v27 = vrot.slane %v1698_v26, 9  ;;  %v1835_v15 = vrot.slane %v1699_v63, 5  ;;  %v3460_v42 = vor.u32 %v3459_v25, %v3455_v24  ;;  %v3484_v38 = vpop.permute.xlu0 %3483 }
 0x170   : > { %v1701_v58 = vld [vmem:[#allocation2 + $0x78] sm:$0xe]  ;;  %2610 = vst.msk [vmem:[#allocation3 + $0xa8] sm:$0xf] %vm450_vm0, %v2295_v53  ;;  %v3451_v57 = vrot.slane %v3450_v19, 4  ;;  %v8008_v1 = vrot.slane %v3463_v9, 5  ;;  %v3486_v19 = vpop.permute.xlu1 %3485 }
 0x171   : > { %v1838_v20 = vrot.slane %v1700_v30, 5  ;;  %v1702_v56 = vld [vmem:[#allocation2 + $0x7c] sm:$0xf]  ;;  %v2305_v7 = vsel %vm6343_vm8, %v2300_v50, %v2304_v13  ;;  %v1836_v39 = vsel %vm6773_vm9, %v5545_v27, %v1835_v15  ;;  %v1837_v17 = vrot.slane %v1835_v15, 4  ;;  %v1703_v43 = vld [vmem:[#allocation2 + $0x80] sm:$0x1] }
 0x172   : > { %v2307_v45 = vshrl.u32 %v2153_v10, 16  ;;  %v2156_v28 = vld [vmem:[#allocation2 + $0x54] sm:$0xf]  ;;  %2123 = vst.msk [vmem:[#allocation3 + $0x158] sm:$0xf] %vm1638_vm3, %v2045_v0  ;;  %v3456_v41 = vsel %vm6343_vm8, %v3451_v57, %v3455_v24  ;;  %v3461_v52 = vrot.slane %v3460_v42, 4 }
 0x173   : > { %2611 = vst.msk [vmem:[#allocation3 + $0xbc] sm:$0xf] %vm450_vm0, %v2305_v7  ;;  %1932 = vst.msk [vmem:[#allocation3 + $0x16c] sm:$0xf] %vm450_vm0, %v1836_v39  ;;  %v2310_v18 = vshll.u32 %v2153_v10, 16  ;;  %v2316_v29 = vshll.u32 %v2154_v5, 16  ;;  %v1839_v55 = vsel %vm6773_vm9, %v1837_v17, %v1838_v20  ;;  %3527 = vrot.lane.b32.xlu0 %v3456_v41, %s6198_s6  ;;  %v1579_v27 = vpop.permute.xlu0 %1578 }
 0x174   : > { %v2991_v59 = vld [vmem:[#allocation2 + $0x90] sm:$0xf]  ;;  %2946 = vst.msk [vmem:[#allocation3 + $0xa8] sm:$0xf] %vm1638_vm3, %v2859_v2  ;;  %v2309_v8 = vrot.slane %v2307_v45, 4  ;;  %v2320_v21 = vshrl.u32 %v2154_v5, 16  ;;  %v3466_v12 = vsel %vm6343_vm8, %v3461_v52, %v8008_v1  ;;  %v1581_v41 = vpop.permute.xlu1 %1580 }
 0x175   : > { %v2326_v61 = vshll.u32 %v2155_v48, 16  ;;  %v2157_v36 = vld [vmem:[#allocation2 + $0x58] sm:$0xf]  ;;  %3023 = vst.msk [vmem:[#allocation3 + $0x19c] sm:$0xf] %vm450_vm0, %v2991_v59  ;;  %v2312_v51 = vrot.slane %v2310_v18, 5  ;;  %3529 = vrot.lane.b32.xlu1 %v3466_v12, %s6198_s6 }
 0x176   : > { %1933 = vst.msk [vmem:[#allocation3 + $0x180] sm:$0xf] %vm450_vm0, %v1839_v55  ;;  %v2318_v33 = vrot.slane %v2316_v29, 5  ;;  %v5546_v4 = vrot.slane %v1701_v58, 9  ;;  %v2158_v31 = vld [vmem:[#allocation2 + $0x5c] sm:$0x1] }
 0x177   : > { %v2322_v6 = vrot.slane %v2320_v21, 4  ;;  %v2328_v26 = vrot.slane %v2326_v61, 5  ;;  %v1842_v63 = vrot.slane %v1702_v56, 5  ;;  %v1845_v47 = vrot.slane %v1703_v43, 5  ;;  %v1704_v3 = vld [vmem:[#allocation2 + $0x84] sm:$0xe] }
 0x178   : > { %2947 = vst.msk [vmem:[#allocation3 + $0xbc] sm:$0xf] %vm1638_vm3, %v2861_v32  ;;  %v2313_v46 = vor.u32 %v2312_v51, %v2309_v8  ;;  %v2331_v22 = vshrl.u32 %v2156_v28, 16  ;;  %v2334_v54 = vshll.u32 %v2156_v28, 16  ;;  %v2340_v30 = vshll.u32 %v2157_v36, 16  ;;  %v3915_v35 = vld [vmem:[#allocation3 + $0x140] sm:$0xff]  ;;  %v2047_v8 = vpop.permute.xlu0 %2046 }
 0x179   : > { %v1705_v11 = vld [vmem:[#allocation2 + $0x88] sm:$0xf]  ;;  %v2992_v14 = vld [vmem:[#allocation2 + $0x94] sm:$0xf]  ;;  %3571 = vst.msk [vmem:[#allocation3 + $0xac] sm:$0xf] %vm1638_vm3, %v3484_v38  ;;  %v2323_v40 = vor.u32 %v2322_v6, %v2318_v33  ;;  %v1843_v60 = vsel %vm6773_vm9, %v5546_v4, %v1842_v63 }
 0x17a   : > { %v1844_v44 = vrot.slane %v1842_v63, 4  ;;  %v2344_v10 = vshrl.u32 %v2157_v36, 16  ;;  %v1706_v16 = vld [vmem:[#allocation2 + $0x8c] sm:$0x1]  ;;  %v2159_v24 = vld [vmem:[#allocation2 + $0x60] sm:$0xf] }
 0x17b   : > { %3024 = vst.msk [vmem:[#allocation3 + $0x1b0] sm:$0xf] %vm450_vm0, %v2992_v14  ;;  %v2314_v49 = vrot.slane %v2313_v46, 4  ;;  %1934 = vst.msk [vmem:[#allocation3 + $0x194] sm:$0xf] %vm450_vm0, %v1843_v60  ;;  %v2333_v5 = vrot.slane %v2331_v22, 4 }
 0x17c   : > { %v2336_v62 = vrot.slane %v2334_v54, 5  ;;  %v2342_v37 = vrot.slane %v2340_v30, 5  ;;  %v3918_v13 = vld [vmem:[#allocation3 + $0x154] sm:$0xff]  ;;  %v2324_v9 = vrot.slane %v2323_v40, 4  ;;  %v1846_v48 = vsel %vm6773_vm9, %v1844_v44, %v1845_v47  ;;  %3572 = vst.msk [vmem:[#allocation3 + $0xc0] sm:$0xf] %vm1638_vm3, %v3486_v19  ;;  %v2049_v54 = vpop.permute.xlu1 %2048  ;;  %v2863_v44 = vpop.permute.xlu0 %2862 }
 0x17d   : > { %v6131_v25 = vld [vmem:[#allocation3 + $0x144] ss:$20 sps:$4 sm:$0xff]   ;;  %v2346_v53 = vrot.slane %v2344_v10, 4  ;;  %v2350_v50 = vshll.u32 %v2158_v31, 16  ;;  %v5624_v15 = vcombine.low %v3915_v35, %v3918_v13  ;;  %v2319_v58 = vsel %vm6343_vm8, %v2314_v49, %v2318_v33  ;;  %1935 = vst.msk [vmem:[#allocation3 + $0x1a8] sm:$0xf] %vm450_vm0, %v1846_v48 }
 0x17e   : > { %v2337_v57 = vor.u32 %v2336_v62, %v2333_v5  ;;  %v5547_v42 = vrot.slane %v1704_v3, 9  ;;  %v2160_v1 = vld [vmem:[#allocation2 + $0x64] sm:$0xf]  ;;  %1657 = vst.msk [vmem:[#allocation3 + $0x168] sm:$0xf] %vm1638_vm3, %v1579_v27  ;;  %4796 = vmatprep.mubr.bf16.mxu0 %v6131_v25  ;;  %v2329_v20 = vsel %vm6343_vm8, %v2324_v9, %v2328_v26  ;;  %v1849_v7 = vrot.slane %v1705_v11, 5 }
 0x17f   : > { %2612 = vst.msk [vmem:[#allocation3 + $0xd0] sm:$0xf] %vm450_vm0, %v2319_v58  ;;  %v2347_v56 = vor.u32 %v2346_v53, %v2342_v37  ;;  %v2352_v0 = vrot.slane %v2350_v50, 5  ;;  %v2993_v39 = vld [vmem:[#allocation2 + $0x9c] sm:$0xf]  ;;  %4797 = vmatmul.mubr.bf16.gmra.mxu0 %v5624_v15  ;;  %v1852_v45 = vrot.slane %v1706_v16, 5 }
 0x180   : > { %2613 = vst.msk [vmem:[#allocation3 + $0xe4] sm:$0xf] %vm450_vm0, %v2329_v20  ;;  %v2338_v17 = vrot.slane %v2337_v57, 4  ;;  %v2355_v43 = vshrl.u32 %v2159_v24, 16  ;;  %v2358_v28 = vshll.u32 %v2159_v24, 16  ;;  %v1850_v18 = vsel %vm6773_vm9, %v5547_v42, %v1849_v7  ;;  %v3892_v63 = vld [vmem:[#allocation3 + $0xa8] sm:$0xff]  ;;  %v2865_v15 = vpop.permute.xlu1 %2864 }
 0x181   : > { %v2161_v2 = vld [vmem:[#allocation2 + $0x68] sm:$0x1]  ;;  %3025 = vst.msk [vmem:[#allocation3 + $0x1c4] sm:$0xf] %vm450_vm0, %v2993_v39  ;;  %v2348_v52 = vrot.slane %v2347_v56, 4  ;;  %v1851_v29 = vrot.slane %v1849_v7, 4 }
 0x182   : > { %v2364_v59 = vshll.u32 %v2160_v1, 16  ;;  %v2162_v55 = vld [vmem:[#allocation2 + $0x6c] sm:$0xf]  ;;  %1658 = vst.msk [vmem:[#allocation3 + $0x17c] sm:$0xf] %vm1638_vm3, %v1581_v41  ;;  %v2343_v21 = vsel %vm6343_vm8, %v2338_v17, %v2342_v37  ;;  %v2357_v61 = vrot.slane %v2355_v43, 4 }
 0x183   : > { %1936 = vst.msk [vmem:[#allocation3 + $0x1bc] sm:$0xf] %vm450_vm0, %v1850_v18  ;;  %v2360_v36 = vrot.slane %v2358_v28, 5  ;;  %v2368_v12 = vshrl.u32 %v2160_v1, 16  ;;  %v2163_v51 = vld [vmem:[#allocation2 + $0x70] sm:$0xf]  ;;  %v2353_v33 = vsel %vm6343_vm8, %v2348_v52, %v2352_v0  ;;  %v1853_v4 = vsel %vm6773_vm9, %v1851_v29, %v1852_v45  ;;  %v3488_v0 = vpop.permute.xlu0 %3487 }
 0x184   : > { %2124 = vst.msk [vmem:[#allocation3 + $0x16c] sm:$0xf] %vm1638_vm3, %v2047_v8  ;;  %v2366_v31 = vrot.slane %v2364_v59, 5  ;;  %v2374_v32 = vshll.u32 %v2161_v2, 16  ;;  %v2164_v6 = vld [vmem:[#allocation2 + $0x74] sm:$0x1] }
 0x185   : > { %2614 = vst.msk [vmem:[#allocation3 + $0xf8] sm:$0xf] %vm450_vm0, %v2343_v21  ;;  %v2994_v26 = vld [vmem:[#allocation2 + $0xa0] sm:$0xf]  ;;  %2615 = vst.msk [vmem:[#allocation3 + $0x10c] sm:$0xf] %vm450_vm0, %v2353_v33  ;;  %v2361_v47 = vor.u32 %v2360_v36, %v2357_v61  ;;  %v3490_v36 = vpop.permute.xlu1 %3489 }
 0x186   : > { %1937 = vst.msk [vmem:[#allocation3 + $0x1d0] sm:$0xf] %vm450_vm0, %v1853_v4  ;;  %v2370_v3 = vrot.slane %v2368_v12, 4  ;;  %v2379_v38 = vshrl.u32 %v2162_v55, 16  ;;  %v2382_v46 = vshll.u32 %v2162_v55, 16  ;;  %v3895_v30 = vld [vmem:[#allocation3 + $0xbc] sm:$0xff] }
 0x187   : > { %v2165_v22 = vld [vmem:[#allocation2 + $0x78] sm:$0xf]  ;;  %3026 = vst.msk [vmem:[#allocation3 + $0x1d8] sm:$0xf] %vm450_vm0, %v2994_v26  ;;  %v2376_v14 = vrot.slane %v2374_v32, 5  ;;  %v2388_v40 = vshll.u32 %v2163_v51, 16  ;;  %v5606_v10 = vcombine.low %v3892_v63, %v3895_v30  ;;  %v1583_v63 = vpop.permute.xlu0 %1582 }
 0x188   : > { %v6133_v11 = vld [vmem:[#allocation3 + $0xac] ss:$20 sps:$4 sm:$0xff]   ;;  %v2392_v60 = vshrl.u32 %v2163_v51, 16  ;;  %2125 = vst.msk [vmem:[#allocation3 + $0x180] sm:$0xf] %vm1638_vm3, %v2049_v54  ;;  %v2362_v16 = vrot.slane %v2361_v47, 4  ;;  %v2371_v24 = vor.u32 %v2370_v3, %v2366_v31 }
 0x189   : > { %v2381_v35 = vrot.slane %v2379_v38, 4  ;;  %v2166_v49 = vld [vmem:[#allocation2 + $0x7c] sm:$0xf]  ;;  %v3595_v5 = vld [vmem:[#allocation2 + $0x18] sm:$0xe]  ;;  %4925 = vmatprep.mubr.bf16.mxu1 %v6133_v11  ;;  %v2384_v62 = vrot.slane %v2382_v46, 5 }
 0x18a   : > { %2948 = vst.msk [vmem:[#allocation3 + $0xd0] sm:$0xf] %vm1638_vm3, %v2863_v44  ;;  %v2390_v37 = vrot.slane %v2388_v40, 5  ;;  %v2394_v19 = vrot.slane %v2392_v60, 4  ;;  %v2398_v13 = vshll.u32 %v2164_v6, 16  ;;  %4926 = vmatmul.mubr.bf16.gmra.mxu1 %v5606_v10  ;;  %v2367_v9 = vsel %vm6343_vm8, %v2362_v16, %v2366_v31 }
 0x18b   : > { %v3596_v25 = vld [vmem:[#allocation2 + $0x1c] sm:$0xf]  ;;  %v2372_v48 = vrot.slane %v2371_v24, 4  ;;  %v2403_v53 = vshrl.u32 %v2165_v22, 16  ;;  %v2406_v50 = vshll.u32 %v2165_v22, 16  ;;  %v2385_v58 = vor.u32 %v2384_v62, %v2381_v35  ;;  %v3921_v12 = vld [vmem:[#allocation3 + $0x168] sm:$0xff] }
 0x18c   : > { %v3597_v27 = vld [vmem:[#allocation2 + $0x20] sm:$0x1]  ;;  %2616 = vst.msk [vmem:[#allocation3 + $0x120] sm:$0xf] %vm450_vm0, %v2367_v9  ;;  %v2395_v57 = vor.u32 %v2394_v19, %v2390_v37  ;;  %v2400_v42 = vrot.slane %v2398_v13, 5  ;;  %v2412_v1 = vshll.u32 %v2166_v49, 16  ;;  %v2051_v9 = vpop.permute.xlu0 %2050 }
 0x18d   : > { %v2167_v20 = vld [vmem:[#allocation2 + $0x80] sm:$0x1]  ;;  %v2995_v56 = vld [vmem:[#allocation2 + $0xa8] sm:$0xf]  ;;  %2949 = vst.msk [vmem:[#allocation3 + $0xe4] sm:$0xf] %vm1638_vm3, %v2865_v15  ;;  %v2377_v7 = vsel %vm6343_vm8, %v2372_v48, %v2376_v14 }
 0x18e   : > { %v2405_v39 = vrot.slane %v2403_v53, 4  ;;  %v2408_v17 = vrot.slane %v2406_v50, 5  ;;  %v2416_v45 = vshrl.u32 %v2166_v49, 16  ;;  %v3598_v43 = vld [vmem:[#allocation2 + $0x24] sm:$0xe]  ;;  %v2386_v2 = vrot.slane %v2385_v58, 4 }
 0x18f   : > { %v3599_v28 = vld [vmem:[#allocation2 + $0x28] sm:$0xf]  ;;  %3027 = vst.msk [vmem:[#allocation3 + $0x1ec] sm:$0xf] %vm450_vm0, %v2995_v56  ;;  %2617 = vst.msk [vmem:[#allocation3 + $0x134] sm:$0xf] %vm450_vm0, %v2377_v7 }
 0x190   : > { %3573 = vst.msk [vmem:[#allocation3 + $0xd4] sm:$0xf] %vm1638_vm3, %v3488_v0  ;;  %v2396_v41 = vrot.slane %v2395_v57, 4  ;;  %v2414_v52 = vrot.slane %v2412_v1, 5  ;;  %v5568_v18 = vrot.slane %v3595_v5, 9  ;;  %v2409_v59 = vor.u32 %v2408_v17, %v2405_v39  ;;  %v3924_v51 = vld [vmem:[#allocation3 + $0x17c] sm:$0xff]  ;;  %v1585_v5 = vpop.permute.xlu1 %1584 }
 0x191   : > { %v3600_v29 = vld [vmem:[#allocation2 + $0x2c] sm:$0x1]  ;;  %v3693_v55 = vrot.slane %v3596_v25, 5  ;;  %v3696_v8 = vrot.slane %v3597_v27, 5  ;;  %v2168_v21 = vld [vmem:[#allocation2 + $0x84] sm:$0xf]  ;;  %v2391_v4 = vsel %vm6343_vm8, %v2386_v2, %v2390_v37  ;;  %v5629_v47 = vcombine.low %v3921_v12, %v3924_v51 }
 0x192   : > { %v2996_v61 = vld [vmem:[#allocation2 + $0xac] sm:$0xf]  ;;  %v6135_v33 = vld [vmem:[#allocation3 + $0x16c] ss:$20 sps:$4 sm:$0xff]   ;;  %v2401_v31 = vsel %vm6343_vm8, %v2396_v41, %v2400_v42  ;;  %v2418_v32 = vrot.slane %v2416_v45, 4  ;;  %v2422_v6 = vshll.u32 %v2167_v20, 16 }
 0x193   : > { %v2169_v26 = vld [vmem:[#allocation2 + $0x88] sm:$0xf]  ;;  %3028 = vst.msk [vmem:[#allocation3 + $0x200] sm:$0xf] %vm450_vm0, %v2996_v61  ;;  %2618 = vst.msk [vmem:[#allocation3 + $0x148] sm:$0xf] %vm450_vm0, %v2391_v4  ;;  %v3694_v38 = vsel %vm6773_vm9, %v5568_v18, %v3693_v55  ;;  %4804 = vmatprep.mubr.bf16.mxu0 %v6135_v33 }
 0x194   : > { %3574 = vst.msk [vmem:[#allocation3 + $0xe8] sm:$0xf] %vm1638_vm3, %v3490_v36  ;;  %v2410_v3 = vrot.slane %v2409_v59, 4  ;;  %v3695_v46 = vrot.slane %v3693_v55, 4  ;;  %v3601_v22 = vld [vmem:[#allocation2 + $0x30] sm:$0xe]  ;;  %v2419_v30 = vor.u32 %v2418_v32, %v2414_v52  ;;  %4805 = vmatmul.mubr.bf16.gmra.mxu0 %v5629_v47  ;;  %v2867_v59 = vpop.permute.xlu0 %2866  ;;  %v2053_v12 = vpop.permute.xlu1 %2052 }
 0x195   : > { %2619 = vst.msk [vmem:[#allocation3 + $0x15c] sm:$0xf] %vm450_vm0, %v2401_v31  ;;  %v3602_v54 = vld [vmem:[#allocation2 + $0x34] sm:$0xf]  ;;  %3835 = vst.msk [vmem:[#allocation3 + $0x10] sm:$0xf] %vm450_vm0, %v3694_v38 }
 0x196   : > { %1659 = vst.msk [vmem:[#allocation3 + $0x190] sm:$0xf] %vm1638_vm3, %v1583_v63  ;;  %v2424_v11 = vrot.slane %v2422_v6, 5  ;;  %v5569_v14 = vrot.slane %v3598_v43, 9  ;;  %v3700_v40 = vrot.slane %v3599_v28, 5  ;;  %v2415_v44 = vsel %vm6343_vm8, %v2410_v3, %v2414_v52 }
 0x197   : > { %v3603_v60 = vld [vmem:[#allocation2 + $0x38] sm:$0x1]  ;;  %v3697_v10 = vsel %vm6773_vm9, %v3695_v46, %v3696_v8  ;;  %v3703_v16 = vrot.slane %v3600_v29, 5  ;;  %v2427_v24 = vshrl.u32 %v2168_v21, 16  ;;  %v2170_v35 = vld [vmem:[#allocation2 + $0x8c] sm:$0x1] }
 0x198   : > { %v8092_v49 = vld [vmem:[#allocation2 + $0x3c] sm:$0xe]  ;;  %2620 = vst.msk [vmem:[#allocation3 + $0x170] sm:$0xf] %vm450_vm0, %v2415_v44  ;;  %3836 = vst.msk [vmem:[#allocation3 + $0x24] sm:$0xf] %vm450_vm0, %v3697_v10  ;;  %v3701_v37 = vsel %vm6773_vm9, %v5569_v14, %v3700_v40  ;;  %v3492_v14 = vpop.permute.xlu0 %3491 }
 0x199   : > { %v2420_v62 = vrot.slane %v2419_v30, 4  ;;  %v3702_v19 = vrot.slane %v3700_v40, 4  ;;  %v2430_v13 = vshll.u32 %v2168_v21, 16  ;;  %v3605_v25 = vld [vmem:[#allocation2 + $0x40] sm:$0xf]  ;;  %v2429_v48 = vrot.slane %v2427_v24, 4 }
 0x19a   : > { %1660 = vst.msk [vmem:[#allocation3 + $0x1a4] sm:$0xf] %vm1638_vm3, %v1585_v5  ;;  %v2436_v53 = vshll.u32 %v2169_v26, 16  ;;  %v2440_v50 = vshrl.u32 %v2169_v26, 16  ;;  %v5570_v27 = vrot.slane %v3601_v22, 9  ;;  %v3707_v1 = vrot.slane %v3602_v54, 5 }
 0x19b   : > { %3837 = vst.msk [vmem:[#allocation3 + $0x38] sm:$0xf] %vm450_vm0, %v3701_v37  ;;  %v3606_v15 = vld [vmem:[#allocation2 + $0x44] sm:$0x1]  ;;  %v2425_v58 = vsel %vm6343_vm8, %v2420_v62, %v2424_v11  ;;  %v3704_v57 = vsel %vm6773_vm9, %v3702_v19, %v3703_v16  ;;  %v2432_v42 = vrot.slane %v2430_v13, 5  ;;  %v3710_v7 = vrot.slane %v3603_v60, 5 }
 0x19c   : > { %2126 = vst.msk [vmem:[#allocation3 + $0x194] sm:$0xf] %vm1638_vm3, %v2051_v9  ;;  %v2171_v20 = vld [vmem:[#allocation2 + $0x90] sm:$0xf]  ;;  %v2997_v56 = vld [vmem:[#allocation2 + $0xb4] sm:$0xf]  ;;  %v3708_v52 = vsel %vm6773_vm9, %v5570_v27, %v3707_v1 }
 0x19d   : > { %2621 = vst.msk [vmem:[#allocation3 + $0x184] sm:$0xf] %vm450_vm0, %v2425_v58  ;;  %3838 = vst.msk [vmem:[#allocation3 + $0x4c] sm:$0xf] %vm450_vm0, %v3704_v57  ;;  %v2438_v0 = vrot.slane %v2436_v53, 5  ;;  %v2442_v39 = vrot.slane %v2440_v50, 4  ;;  %v2433_v41 = vor.u32 %v2432_v42, %v2429_v48 }
 0x19e   : > { %v2446_v17 = vshll.u32 %v2170_v35, 16  ;;  %v2172_v45 = vld [vmem:[#allocation2 + $0x94] sm:$0xf]  ;;  %3029 = vst.msk [vmem:[#allocation3 + $0x214] sm:$0xf] %vm450_vm0, %v2997_v56  ;;  %v3898_v43 = vld [vmem:[#allocation3 + $0xd0] sm:$0xff]  ;;  %v2869_v35 = vpop.permute.xlu1 %2868 }
 0x19f   : > { %v3901_v28 = vld [vmem:[#allocation3 + $0xe4] sm:$0xff]  ;;  %v3709_v18 = vrot.slane %v3707_v1, 4  ;;  %v5571_v29 = vrot.slane %v8092_v49, 9  ;;  %3839 = vst.msk [vmem:[#allocation3 + $0x60] sm:$0xf] %vm450_vm0, %v3708_v52  ;;  %v2443_v8 = vor.u32 %v2442_v39, %v2438_v0  ;;  %v3714_v61 = vrot.slane %v3605_v25, 5 }
 0x1a0   : > { %v6138_v2 = vld [vmem:[#allocation3 + $0xd4] ss:$20 sps:$4 sm:$0xff]   ;;  %v5611_v55 = vcombine.low %v3898_v43, %v3901_v28  ;;  %v2448_v21 = vrot.slane %v2446_v17, 5  ;;  %v3607_v36 = vld [vmem:[#allocation2 + $0x48] sm:$0xe]  ;;  %v2434_v51 = vrot.slane %v2433_v41, 4 }
 0x1a1   : > { %2950 = vst.msk [vmem:[#allocation3 + $0xf8] sm:$0xf] %vm1638_vm3, %v2867_v59  ;;  %4933 = vmatprep.mubr.bf16.mxu1 %v6138_v2  ;;  %v3711_v33 = vsel %vm6773_vm9, %v3709_v18, %v3710_v7  ;;  %v3717_v4 = vrot.slane %v3606_v15, 5  ;;  %v2451_v31 = vshrl.u32 %v2171_v20, 16  ;;  %v3608_v32 = vld [vmem:[#allocation2 + $0x4c] sm:$0xf]  ;;  %v3715_v3 = vsel %vm6773_vm9, %v5571_v29, %v3714_v61  ;;  %v1587_v15 = vpop.permute.xlu0 %1586 }
 0x1a2   : > { %v3609_v6 = vld [vmem:[#allocation2 + $0x50] sm:$0x1]  ;;  %v2173_v26 = vld [vmem:[#allocation2 + $0x98] sm:$0x1]  ;;  %2127 = vst.msk [vmem:[#allocation3 + $0x1a8] sm:$0xf] %vm1638_vm3, %v2053_v12  ;;  %4934 = vmatmul.mubr.bf16.gmra.mxu1 %v5611_v55  ;;  %v2439_v22 = vsel %vm6343_vm8, %v2434_v51, %v2438_v0  ;;  %v3494_v0 = vpop.permute.xlu1 %3493 }
 0x1a3   : > { %v2998_v63 = vld [vmem:[#allocation2 + $0xb8] sm:$0xf]  ;;  %3840 = vst.msk [vmem:[#allocation3 + $0x74] sm:$0xf] %vm450_vm0, %v3711_v33  ;;  %v2444_v47 = vrot.slane %v2443_v8, 4  ;;  %v3716_v38 = vrot.slane %v3714_v61, 4 }
 0x1a4   : > { %v3610_v46 = vld [vmem:[#allocation2 + $0x54] sm:$0xe]  ;;  %3030 = vst.msk [vmem:[#allocation3 + $0x228] sm:$0xf] %vm450_vm0, %v2998_v63  ;;  %3841 = vst.msk [vmem:[#allocation3 + $0x88] sm:$0xf] %vm450_vm0, %v3715_v3  ;;  %v5768_v3 = vpop.f32.mrf.mxu0 }
 0x1a5   : > { %v2453_v54 = vrot.slane %v2451_v31, 4  ;;  %v2454_v30 = vshll.u32 %v2171_v20, 16  ;;  %v2460_v11 = vshll.u32 %v2172_v45, 16  ;;  %2622 = vst.msk [vmem:[#allocation3 + $0x198] sm:$0xf] %vm450_vm0, %v2439_v22  ;;  %v2449_v40 = vsel %vm6343_vm8, %v2444_v47, %v2448_v21  ;;  %v3927_v58 = vld [vmem:[#allocation3 + $0x190] sm:$0xff]  ;;  %v2055_v12 = vpop.permute.xlu0 %2054 }
 0x1a6   : > { %v3718_v60 = vsel %vm6773_vm9, %v3716_v38, %v3717_v4  ;;  %v2464_v44 = vshrl.u32 %v2172_v45, 16  ;;  %v5572_v10 = vrot.slane %v3607_v36, 9  ;;  %v3611_v16 = vld [vmem:[#allocation2 + $0x58] sm:$0xf]  ;;  %v3612_v24 = vld [vmem:[#allocation2 + $0x5c] sm:$0x1] }
 0x1a7   : > { %3575 = vst.msk [vmem:[#allocation3 + $0xfc] sm:$0xf] %vm1638_vm3, %v3492_v14  ;;  %v2456_v49 = vrot.slane %v2454_v30, 5  ;;  %v2462_v5 = vrot.slane %v2460_v11, 5  ;;  %2951 = vst.msk [vmem:[#allocation3 + $0x10c] sm:$0xf] %vm1638_vm3, %v2869_v35  ;;  %v5769_v35 = vpop.f32.mrf.mxu0 }
 0x1a8   : > { %2623 = vst.msk [vmem:[#allocation3 + $0x1ac] sm:$0xf] %vm450_vm0, %v2449_v40  ;;  %3842 = vst.msk [vmem:[#allocation3 + $0x9c] sm:$0xf] %vm450_vm0, %v3718_v60  ;;  %v3721_v62 = vrot.slane %v3608_v32, 5  ;;  %v3724_v37 = vrot.slane %v3609_v6, 5  ;;  %v1589_v32 = vpop.permute.xlu1 %1588 }
 0x1a9   : > { %v2466_v19 = vrot.slane %v2464_v44, 4  ;;  %v2470_v13 = vshll.u32 %v2173_v26, 16  ;;  %v2174_v25 = vld [vmem:[#allocation2 + $0x9c] sm:$0xf]  ;;  %v2175_v9 = vld [vmem:[#allocation2 + $0xa0] sm:$0xf]  ;;  %v2457_v48 = vor.u32 %v2456_v49, %v2453_v54 }
 0x1aa   : > { %v5573_v53 = vrot.slane %v3610_v46, 9  ;;  %v3728_v50 = vrot.slane %v3611_v16, 5  ;;  %v3731_v27 = vrot.slane %v3612_v24, 5  ;;  %v3722_v57 = vsel %vm6773_vm9, %v5572_v10, %v3721_v62  ;;  %v3613_v56 = vld [vmem:[#allocation2 + $0x60] sm:$0xe]  ;;  %v2871_v16 = vpop.permute.xlu0 %2870 }
 0x1ab   : > { %v3723_v42 = vrot.slane %v3721_v62, 4  ;;  %v2467_v1 = vor.u32 %v2466_v19, %v2462_v5  ;;  %v2472_v20 = vrot.slane %v2470_v13, 5  ;;  %1661 = vst.msk [vmem:[#allocation3 + $0x1b8] sm:$0xf] %vm1638_vm3, %v1587_v15  ;;  %v3930_v7 = vld [vmem:[#allocation3 + $0x1a4] sm:$0xff]  ;;  %v2458_v17 = vrot.slane %v2457_v48, 4 }
 0x1ac   : > { %v6140_v39 = vld [vmem:[#allocation3 + $0x194] ss:$20 sps:$4 sm:$0xff]   ;;  %3843 = vst.msk [vmem:[#allocation3 + $0xb0] sm:$0xf] %vm450_vm0, %v3722_v57  ;;  %v3729_v45 = vsel %vm6773_vm9, %v5573_v53, %v3728_v50  ;;  %v3614_v43 = vld [vmem:[#allocation2 + $0x64] sm:$0xf]  ;;  %v5634_v41 = vcombine.low %v3927_v58, %v3930_v7  ;;  %v2057_v19 = vpop.permute.xlu1 %2056  ;;  %v5771_v57 = vpop.f32.mrf.mxu0 }
 0x1ad   : > { %v8138_v28 = vld [vmem:[#allocation2 + $0x68] sm:$0x1]  ;;  %v2176_v2 = vld [vmem:[#allocation2 + $0xa4] sm:$0x1]  ;;  %3576 = vst.msk [vmem:[#allocation3 + $0x110] sm:$0xf] %vm1638_vm3, %v3494_v0  ;;  %v3725_v52 = vsel %vm6773_vm9, %v3723_v42, %v3724_v37  ;;  %4812 = vmatprep.mubr.bf16.mxu0 %v6140_v39  ;;  %v2463_v55 = vsel %vm6343_vm8, %v2458_v17, %v2462_v5 }
 0x1ae   : > { %v2468_v18 = vrot.slane %v2467_v1, 4  ;;  %v3730_v29 = vrot.slane %v3728_v50, 4  ;;  %3845 = vst.msk [vmem:[#allocation3 + $0xd8] sm:$0xf] %vm450_vm0, %v3729_v45  ;;  %v3616_v59 = vld [vmem:[#allocation2 + $0x6c] sm:$0xe]  ;;  %4813 = vmatmul.mubr.bf16.gmra.mxu0 %v5634_v41 }
 0x1af   : > { %3844 = vst.msk [vmem:[#allocation3 + $0xc4] sm:$0xf] %vm450_vm0, %v3725_v52  ;;  %v2475_v8 = vshrl.u32 %v2174_v25, 16  ;;  %v2478_v21 = vshll.u32 %v2174_v25, 16  ;;  %v2484_v61 = vshll.u32 %v2175_v9, 16  ;;  %v2488_v4 = vshrl.u32 %v2175_v9, 16 }
 0x1b0   : > { %v3617_v36 = vld [vmem:[#allocation2 + $0x70] sm:$0xf]  ;;  %2624 = vst.msk [vmem:[#allocation3 + $0x1c0] sm:$0xf] %vm450_vm0, %v2463_v55  ;;  %v2473_v51 = vsel %vm6343_vm8, %v2468_v18, %v2472_v20  ;;  %v3732_v33 = vsel %vm6773_vm9, %v3730_v29, %v3731_v27  ;;  %v8152_v31 = vld [vmem:[#allocation2 + $0x74] sm:$0x1]  ;;  %v8164_v9 = vadd.f32 %v5769_v35, %v5768_v3 }
 0x1b1   : > { %2128 = vst.msk [vmem:[#allocation3 + $0x1bc] sm:$0xf] %vm1638_vm3, %v2055_v12  ;;  %v2477_v6 = vrot.slane %v2475_v8, 4  ;;  %v2480_v26 = vrot.slane %v2478_v21, 5  ;;  %v2486_v63 = vrot.slane %v2484_v61, 5  ;;  %v5574_v47 = vrot.slane %v3613_v56, 9 }
 0x1b2   : > { %2625 = vst.msk [vmem:[#allocation3 + $0x1d4] sm:$0xf] %vm450_vm0, %v2473_v51  ;;  %3846 = vst.msk [vmem:[#allocation3 + $0xec] sm:$0xf] %vm450_vm0, %v3732_v33  ;;  %v3735_v38 = vrot.slane %v3614_v43, 5  ;;  %v3738_v46 = vrot.slane %v8138_v28, 5  ;;  %v3496_v28 = vpop.permute.xlu0 %3495 }
 0x1b3   : > { %1662 = vst.msk [vmem:[#allocation3 + $0x1cc] sm:$0xf] %vm1638_vm3, %v1589_v32  ;;  %v2490_v22 = vrot.slane %v2488_v4, 4  ;;  %v2494_v54 = vshll.u32 %v2176_v2, 16  ;;  %v2177_v30 = vld [vmem:[#allocation2 + $0xa8] sm:$0xf]  ;;  %v2481_v14 = vor.u32 %v2480_v26, %v2477_v6  ;;  %v5772_v2 = vpop.f32.mrf.mxu0 }
 0x1b4   : > { %v2999_v11 = vld [vmem:[#allocation2 + $0xc0] sm:$0xf]  ;;  %v5575_v40 = vrot.slane %v3616_v59, 9  ;;  %v3742_v60 = vrot.slane %v3617_v36, 5  ;;  %v3745_v44 = vrot.slane %v8152_v31, 5  ;;  %v3904_v24 = vld [vmem:[#allocation3 + $0xf8] sm:$0xff]  ;;  %v3736_v49 = vsel %vm6773_vm9, %v5574_v47, %v3735_v38  ;;  %v2873_v59 = vpop.permute.xlu1 %2872 }
 0x1b5   : > { %v2178_v10 = vld [vmem:[#allocation2 + $0xac] sm:$0xf]  ;;  %3031 = vst.msk [vmem:[#allocation3 + $0x23c] sm:$0xf] %vm450_vm0, %v2999_v11  ;;  %v3737_v5 = vrot.slane %v3735_v38, 4  ;;  %v2491_v62 = vor.u32 %v2490_v22, %v2486_v63  ;;  %v2496_v37 = vrot.slane %v2494_v54, 5  ;;  %v8186_v55 = vadd.f32 %v5772_v2, %v5771_v57 }
 0x1b6   : > { %2952 = vst.msk [vmem:[#allocation3 + $0x120] sm:$0xf] %vm1638_vm3, %v2871_v16  ;;  %v3907_v13 = vld [vmem:[#allocation3 + $0x10c] sm:$0xff]  ;;  %v2482_v48 = vrot.slane %v2481_v14, 4  ;;  %v3743_v53 = vsel %vm6773_vm9, %v5575_v40, %v3742_v60  ;;  %v3619_v50 = vld [vmem:[#allocation2 + $0x78] sm:$0xe]  ;;  %v2875_v38 = vpop.permute.xlu0 %2874 }
 0x1b7   : > { %v6142_v25 = vld [vmem:[#allocation3 + $0xfc] ss:$20 sps:$4 sm:$0xff]   ;;  %3847 = vst.msk [vmem:[#allocation3 + $0x100] sm:$0xf] %vm450_vm0, %v3736_v49  ;;  %v3620_v27 = vld [vmem:[#allocation2 + $0x7c] sm:$0xf]  ;;  %v5616_v58 = vcombine.low %v3904_v24, %v3907_v13  ;;  %v3739_v42 = vsel %vm6773_vm9, %v3737_v5, %v3738_v46 }
 0x1b8   : > { %v8169_v15 = vld [vmem:[#allocation2 + $0x80] sm:$0x1]  ;;  %2129 = vst.msk [vmem:[#allocation3 + $0x1d0] sm:$0xf] %vm1638_vm3, %v2057_v19  ;;  %v2492_v1 = vrot.slane %v2491_v62, 4  ;;  %v3744_v20 = vrot.slane %v3742_v60, 4  ;;  %4941 = vmatprep.mubr.bf16.mxu1 %v6142_v25  ;;  %v2487_v7 = vsel %vm6343_vm8, %v2482_v48, %v2486_v63  ;;  %v3498_v14 = vpop.permute.xlu1 %3497 }
 0x1b9   : > { %3849 = vst.msk [vmem:[#allocation3 + $0x128] sm:$0xf] %vm450_vm0, %v3743_v53  ;;  %v2179_v56 = vld [vmem:[#allocation2 + $0xb0] sm:$0x1]  ;;  %v3622_v0 = vld [vmem:[#allocation2 + $0x84] sm:$0xe]  ;;  %4942 = vmatmul.mubr.bf16.gmra.mxu1 %v5616_v58 }
 0x1ba   : > { %3848 = vst.msk [vmem:[#allocation3 + $0x114] sm:$0xf] %vm450_vm0, %v3739_v42  ;;  %v2499_v39 = vshrl.u32 %v2177_v30, 16  ;;  %v2502_v17 = vshll.u32 %v2177_v30, 16  ;;  %v2508_v45 = vshll.u32 %v2178_v10, 16  ;;  %vm4651_vm12 = vcmask 523264  }
 0x1bb   : > { %v3623_v43 = vld [vmem:[#allocation2 + $0x88] sm:$0xf]  ;;  %2626 = vst.msk [vmem:[#allocation3 + $0x1e8] sm:$0xf] %vm450_vm0, %v2487_v7  ;;  %v2497_v41 = vsel %vm6343_vm8, %v2492_v1, %v2496_v37  ;;  %v3746_v52 = vsel %vm6773_vm9, %v3744_v20, %v3745_v44  ;;  %v2512_v18 = vshrl.u32 %v2178_v10, 16  ;;  %v5576_v12 = vrot.slane %v3619_v50, 9 }
 0x1bc   : > { %v8183_v29 = vld [vmem:[#allocation2 + $0x8c] sm:$0x1]  ;;  %3577 = vst.msk [vmem:[#allocation3 + $0x124] sm:$0xf] %vm1638_vm3, %v3496_v28  ;;  %v2501_v8 = vrot.slane %v2499_v39, 4  ;;  %v2504_v21 = vrot.slane %v2502_v17, 5  ;;  %v2877_v42 = vpop.permute.xlu1 %2876 }
 0x1bd   : > { %2627 = vst.msk [vmem:[#allocation3 + $0x1fc] sm:$0xf] %vm450_vm0, %v2497_v41  ;;  %3850 = vst.msk [vmem:[#allocation3 + $0x13c] sm:$0xf] %vm450_vm0, %v3746_v52  ;;  %v2510_v61 = vrot.slane %v2508_v45, 5  ;;  %v3749_v51 = vrot.slane %v3620_v27, 5  ;;  %v3500_v27 = vpop.permute.xlu0 %3499 }
 0x1be   : > { %v3000_v36 = vld [vmem:[#allocation2 + $0xc4] sm:$0xf]  ;;  %2953 = vst.msk [vmem:[#allocation3 + $0x134] sm:$0xf] %vm1638_vm3, %v2873_v59  ;;  %v3752_v33 = vrot.slane %v8169_v15, 5  ;;  %v2514_v4 = vrot.slane %v2512_v18, 4  ;;  %v2505_v6 = vor.u32 %v2504_v21, %v2501_v8 }
 0x1bf   : > { %v2180_v31 = vld [vmem:[#allocation2 + $0xb4] sm:$0xf]  ;;  %3032 = vst.msk [vmem:[#allocation3 + $0x250] sm:$0xf] %vm450_vm0, %v3000_v36  ;;  %v6149_v32 = vld [vmem:[#allocation3 + $0x10] ss:$20 sps:$4 sm:$0xff]   ;;  %v3750_v22 = vsel %vm6773_vm9, %v5576_v12, %v3749_v51 }
 0x1c0   : > { %v2518_v26 = vshll.u32 %v2179_v56, 16  ;;  %v5577_v63 = vrot.slane %v3622_v0, 9  ;;  %v3756_v47 = vrot.slane %v3623_v43, 5  ;;  %v2181_v3 = vld [vmem:[#allocation2 + $0xb8] sm:$0xf]  ;;  %v3933_v46 = vld [vmem:[#allocation3 + $0x1b8] sm:$0xff]  ;;  %v2515_v30 = vor.u32 %v2514_v4, %v2510_v61 }
 0x1c1   : > { %v3751_v54 = vrot.slane %v3749_v51, 4  ;;  %v3759_v11 = vrot.slane %v8183_v29, 5  ;;  %2954 = vst.msk [vmem:[#allocation3 + $0x148] sm:$0xf] %vm1638_vm3, %v2875_v38  ;;  %v3936_v40 = vld [vmem:[#allocation3 + $0x1cc] sm:$0xff]  ;;  %v2506_v44 = vrot.slane %v2505_v6, 4  ;;  %v2879_v36 = vpop.permute.xlu0 %2878  ;;  %v3502_v6 = vpop.permute.xlu1 %3501 }
 0x1c2   : > { %v6145_v60 = vld [vmem:[#allocation3 + $0x1bc] ss:$20 sps:$4 sm:$0xff]   ;;  %3851 = vst.msk [vmem:[#allocation3 + $0x150] sm:$0xf] %vm450_vm0, %v3750_v22  ;;  %v3757_v10 = vsel %vm6773_vm9, %v5577_v63, %v3756_v47  ;;  %v3625_v16 = vld [vmem:[#allocation2 + $0x90] sm:$0xe]  ;;  %v5639_v49 = vcombine.low %v3933_v46, %v3936_v40 }
 0x1c3   : > { %v3626_v24 = vld [vmem:[#allocation2 + $0x94] sm:$0xf]  ;;  %v8200_v35 = vld [vmem:[#allocation2 + $0x98] sm:$0x1]  ;;  %3578 = vst.msk [vmem:[#allocation3 + $0x138] sm:$0xf] %vm1638_vm3, %v3498_v14  ;;  %v3753_v5 = vsel %vm6773_vm9, %v3751_v54, %v3752_v33  ;;  %4820 = vmatprep.mubr.bf16.mxu0 %v6145_v60  ;;  %v2511_v13 = vsel %vm6343_vm8, %v2506_v44, %v2510_v61 }
 0x1c4   : > { %v2516_v62 = vrot.slane %v2515_v30, 4  ;;  %v2520_v37 = vrot.slane %v2518_v26, 5  ;;  %3853 = vst.msk [vmem:[#allocation3 + $0x178] sm:$0xf] %vm450_vm0, %v3757_v10  ;;  %v2182_v19 = vld [vmem:[#allocation2 + $0xbc] sm:$0x1]  ;;  %4821 = vmatmul.mubr.bf16.gmra.mxu0 %v5639_v49 }
 0x1c5   : > { %3852 = vst.msk [vmem:[#allocation3 + $0x164] sm:$0xf] %vm450_vm0, %v3753_v5  ;;  %v3758_v25 = vrot.slane %v3756_v47, 4  ;;  %v2523_v48 = vshrl.u32 %v2180_v31, 16  ;;  %v2526_v53 = vshll.u32 %v2180_v31, 16  ;;  %v2532_v58 = vshll.u32 %v2181_v3, 16  ;;  %6004 = vmatprep.mubr.msk.bf16.mxu0 %vm4651_vm12, %v6149_v32  ;;  %v3504_v10 = vpop.permute.xlu0 %3503 }
 0x1c6   : > { %v3628_v50 = vld [vmem:[#allocation2 + $0x9c] sm:$0xe]  ;;  %2628 = vst.msk [vmem:[#allocation3 + $0x210] sm:$0xf] %vm450_vm0, %v2511_v13  ;;  %v2521_v15 = vsel %vm6343_vm8, %v2516_v62, %v2520_v37  ;;  %v3629_v57 = vld [vmem:[#allocation2 + $0xa0] sm:$0xf]  ;;  %v2881_v62 = vpop.permute.xlu1 %2880 }
 0x1c7   : > { %3579 = vst.msk [vmem:[#allocation3 + $0x14c] sm:$0xf] %vm1638_vm3, %v3500_v27  ;;  %v3760_v1 = vsel %vm6773_vm9, %v3758_v25, %v3759_v11  ;;  %v2525_v20 = vrot.slane %v2523_v48, 4  ;;  %v2528_v56 = vrot.slane %v2526_v53, 5  ;;  %v2536_v0 = vshrl.u32 %v2181_v3, 16  ;;  %v3910_v12 = vld [vmem:[#allocation3 + $0x120] sm:$0xff] }
 0x1c8   : > { %2629 = vst.msk [vmem:[#allocation3 + $0x224] sm:$0xf] %vm450_vm0, %v2521_v15  ;;  %v3630_v7 = vld [vmem:[#allocation2 + $0xa4] sm:$0x1]  ;;  %3854 = vst.msk [vmem:[#allocation3 + $0x18c] sm:$0xf] %vm450_vm0, %v3760_v1 }
 0x1c9   : > { %2955 = vst.msk [vmem:[#allocation3 + $0x15c] sm:$0xf] %vm1638_vm3, %v2877_v42  ;;  %v6150_v39 = vld [vmem:[#allocation3 + $0x38] ss:$20 sps:$4 sm:$0xff]   ;;  %v2534_v17 = vrot.slane %v2532_v58, 5  ;;  %v5578_v45 = vrot.slane %v3625_v16, 9  ;;  %v2529_v52 = vor.u32 %v2528_v56, %v2525_v20 }
 0x1ca   : > { %v3763_v43 = vrot.slane %v3626_v24, 5  ;;  %v3766_v28 = vrot.slane %v8200_v35, 5  ;;  %v2183_v2 = vld [vmem:[#allocation2 + $0xc0] sm:$0xf]  ;;  %v6153_v41 = vld [vmem:[#allocation3 + $0x60] ss:$20 sps:$4 sm:$0xff]  }
 0x1cb   : > { %v2538_v18 = vrot.slane %v2536_v0, 4  ;;  %v2542_v29 = vshll.u32 %v2182_v19, 16  ;;  %v5579_v59 = vrot.slane %v3628_v50, 9  ;;  %v2184_v8 = vld [vmem:[#allocation2 + $0xc4] sm:$0xf]  ;;  %v3770_v4 = vrot.slane %v3629_v57, 5 }
 0x1cc   : > { %v3631_v21 = vld [vmem:[#allocation2 + $0xa8] sm:$0xe]  ;;  %v3001_v61 = vld [vmem:[#allocation2 + $0xcc] sm:$0xf]  ;;  %v3764_v51 = vsel %vm6773_vm9, %v5578_v45, %v3763_v43  ;;  %v3765_v33 = vrot.slane %v3763_v43, 4  ;;  %v3773_v31 = vrot.slane %v3630_v7, 5  ;;  %6005 = vmatmul.mubr.msk.bf16.vlgmr.msra.gmra.mxu0 %vm4651_vm12, %v6150_v39  ;;  %v2883_v39 = vpop.permute.xlu0 %2882 }
 0x1cd   : > { %v3632_v32 = vld [vmem:[#allocation2 + $0xac] sm:$0xf]  ;;  %3033 = vst.msk [vmem:[#allocation3 + $0x264] sm:$0xf] %vm450_vm0, %v3001_v61  ;;  %v6147_v63 = vld [vmem:[#allocation3 + $0x124] ss:$20 sps:$4 sm:$0xff]   ;;  %v2539_v3 = vor.u32 %v2538_v18, %v2534_v17  ;;  %v3771_v54 = vsel %vm6773_vm9, %v5579_v59, %v3770_v4  ;;  %6008 = vmatprep.mubr.msk.bf16.mxu0 %vm4651_vm12, %v6153_v41  ;;  %v3506_v41 = vpop.permute.xlu1 %3505 }
 0x1ce   : > { %2956 = vst.msk [vmem:[#allocation3 + $0x170] sm:$0xf] %vm1638_vm3, %v2879_v36  ;;  %v3913_v26 = vld [vmem:[#allocation3 + $0x134] sm:$0xff]  ;;  %v2530_v47 = vrot.slane %v2529_v52, 4  ;;  %3580 = vst.msk [vmem:[#allocation3 + $0x160] sm:$0xf] %vm1638_vm3, %v3502_v6  ;;  %v3767_v46 = vsel %vm6773_vm9, %v3765_v33, %v3766_v28  ;;  %4949 = vmatprep.mubr.bf16.mxu1 %v6147_v63 }
 0x1cf   : > { %3855 = vst.msk [vmem:[#allocation3 + $0x1a0] sm:$0xf] %vm450_vm0, %v3764_v51  ;;  %v5621_v38 = vcombine.low %v3910_v12, %v3913_v26  ;;  %v2544_v22 = vrot.slane %v2542_v29, 5  ;;  %v3633_v30 = vld [vmem:[#allocation2 + $0xb0] sm:$0x1]  ;;  %v2540_v14 = vrot.slane %v2539_v3, 4 }
 0x1d0   : > { %v2535_v11 = vsel %vm6343_vm8, %v2530_v47, %v2534_v17  ;;  %3856 = vst.msk [vmem:[#allocation3 + $0x1b4] sm:$0xf] %vm450_vm0, %v3767_v46  ;;  %v3772_v40 = vrot.slane %v3770_v4, 4  ;;  %3857 = vst.msk [vmem:[#allocation3 + $0x1c8] sm:$0xf] %vm450_vm0, %v3771_v54  ;;  %v2547_v60 = vshrl.u32 %v2183_v2, 16 }
 0x1d1   : > { %v2185_v44 = vld [vmem:[#allocation2 + $0xc8] sm:$0x1]  ;;  %4950 = vmatmul.mubr.bf16.gmra.mxu1 %v5621_v38  ;;  %2630 = vst.msk [vmem:[#allocation3 + $0x238] sm:$0xf] %vm450_vm0, %v2535_v11  ;;  %v2550_v16 = vshll.u32 %v2183_v2, 16  ;;  %v2556_v24 = vshll.u32 %v2184_v8, 16  ;;  %v2545_v37 = vsel %vm6343_vm8, %v2540_v14, %v2544_v22  ;;  %v2885_v63 = vpop.permute.xlu1 %2884 }
 0x1d2   : > { %v2560_v35 = vshrl.u32 %v2184_v8, 16  ;;  %v5580_v49 = vrot.slane %v3631_v21, 9  ;;  %v3634_v5 = vld [vmem:[#allocation2 + $0xb4] sm:$0xe]  ;;  %3581 = vst.msk [vmem:[#allocation3 + $0x174] sm:$0xf] %vm1638_vm3, %v3504_v10  ;;  %v3774_v19 = vsel %vm6773_vm9, %v3772_v40, %v3773_v31  ;;  %v3508_v31 = vpop.permute.xlu0 %3507 }
 0x1d3   : > { %v2549_v13 = vrot.slane %v2547_v60, 4  ;;  %v3777_v25 = vrot.slane %v3632_v32, 5  ;;  %2957 = vst.msk [vmem:[#allocation3 + $0x184] sm:$0xf] %vm1638_vm3, %v2881_v62  ;;  %v6154_v48 = vld [vmem:[#allocation3 + $0x88] ss:$20 sps:$4 sm:$0xff]  }
 0x1d4   : > { %2631 = vst.msk [vmem:[#allocation3 + $0x24c] sm:$0xf] %vm450_vm0, %v2545_v37  ;;  %3858 = vst.msk [vmem:[#allocation3 + $0x1dc] sm:$0xf] %vm450_vm0, %v3774_v19  ;;  %v2552_v53 = vrot.slane %v2550_v16, 5  ;;  %v2558_v50 = vrot.slane %v2556_v24, 5  ;;  %6009 = vmatmul.mubr.msk.bf16.gmra.mxu0 %vm4651_vm12, %v6154_v48 }
 0x1d5   : > { %v3780_v27 = vrot.slane %v3633_v30, 5  ;;  %v2562_v15 = vrot.slane %v2560_v35, 4  ;;  %v3635_v58 = vld [vmem:[#allocation2 + $0xb8] sm:$0xf]  ;;  %v3916_v57 = vld [vmem:[#allocation3 + $0x148] sm:$0xff]  ;;  %v3778_v1 = vsel %vm6773_vm9, %v5580_v49, %v3777_v25  ;;  %v3779_v20 = vrot.slane %v3777_v25, 4  ;;  %v3510_v35 = vpop.permute.xlu1 %3509 }
 0x1d6   : > { %v6157_v42 = vld [vmem:[#allocation3 + $0xb0] ss:$20 sps:$4 sm:$0xff]   ;;  %v2566_v56 = vshll.u32 %v2185_v44, 16  ;;  %v5581_v7 = vrot.slane %v3634_v5, 9  ;;  %v2553_v17 = vor.u32 %v2552_v53, %v2549_v13  ;;  %3859 = vst.msk [vmem:[#allocation3 + $0x1f0] sm:$0xf] %vm450_vm0, %v3778_v1  ;;  %v2887_v60 = vpop.permute.xlu0 %2886  ;;  %v5840_v53 = vpop.f32.mrf.mxu1 }
 0x1d7   : > { %v3636_v0 = vld [vmem:[#allocation2 + $0xbc] sm:$0x1]  ;;  %v2563_v45 = vor.u32 %v2562_v15, %v2558_v50  ;;  %v3784_v43 = vrot.slane %v3635_v58, 5  ;;  %v3002_v2 = vld [vmem:[#allocation2 + $0xd0] sm:$0xf]  ;;  %v3919_v52 = vld [vmem:[#allocation3 + $0x15c] sm:$0xff]  ;;  %v3781_v29 = vsel %vm6773_vm9, %v3779_v20, %v3780_v27  ;;  %6012 = vmatprep.mubr.msk.bf16.mxu0 %vm4651_vm12, %v6157_v42 }
 0x1d8   : > { %v3787_v28 = vrot.slane %v3636_v0, 5  ;;  %2958 = vst.msk [vmem:[#allocation3 + $0x198] sm:$0xf] %vm1638_vm3, %v2883_v39  ;;  %v6151_v18 = vld [vmem:[#allocation3 + $0x14c] ss:$20 sps:$4 sm:$0xff]   ;;  %v2568_v59 = vrot.slane %v2566_v56, 5  ;;  %v5626_v21 = vcombine.low %v3916_v57, %v3919_v52  ;;  %v5841_v27 = vpop.f32.mrf.mxu1 }
 0x1d9   : > { %3034 = vst.msk [vmem:[#allocation3 + $0x278] sm:$0xf] %vm450_vm0, %v3002_v2  ;;  %v3637_v8 = vld [vmem:[#allocation2 + $0xc0] sm:$0xe]  ;;  %3860 = vst.msk [vmem:[#allocation3 + $0x204] sm:$0xf] %vm450_vm0, %v3781_v29  ;;  %v3785_v61 = vsel %vm6773_vm9, %v5581_v7, %v3784_v43  ;;  %4957 = vmatprep.mubr.bf16.mxu1 %v6151_v18  ;;  %v2889_v48 = vpop.permute.xlu1 %2888  ;;  %v8288_v23 = vadd.f32 %v5841_v27, %v5840_v53  ;;  %v5774_v7 = vpop.f32.mrf.mxu0 }
 0x1da   : > { %3582 = vst.msk [vmem:[#allocation3 + $0x188] sm:$0xf] %vm1638_vm3, %v3506_v41  ;;  %v2554_v36 = vrot.slane %v2553_v17, 4  ;;  %v2564_v12 = vrot.slane %v2563_v45, 4  ;;  %v3786_v51 = vrot.slane %v3784_v43, 4  ;;  %v5582_v4 = vrot.slane %v3637_v8, 9  ;;  %4958 = vmatmul.mubr.bf16.gmra.mxu1 %v5626_v21  ;;  %v3512_v25 = vpop.permute.xlu0 %3511  ;;  %v5843_v56 = vpop.f32.mrf.mxu1 }
 0x1db   : > { %3861 = vst.msk [vmem:[#allocation3 + $0x218] sm:$0xf] %vm450_vm0, %v3785_v61  ;;  %v3638_v33 = vld [vmem:[#allocation2 + $0xc4] sm:$0xf]  ;;  %v3639_v32 = vld [vmem:[#allocation2 + $0xc8] sm:$0x1]  ;;  %v5775_v45 = vpop.f32.mrf.mxu0 }
 0x1dc   : > { %v3791_v6 = vrot.slane %v3638_v33, 5  ;;  %v3640_v26 = vld [vmem:[#allocation2 + $0xcc] sm:$0xe]  ;;  %3583 = vst.msk [vmem:[#allocation3 + $0x19c] sm:$0xf] %vm1638_vm3, %v3508_v31  ;;  %v2559_v47 = vsel %vm6343_vm8, %v2554_v36, %v2558_v50  ;;  %v2569_v3 = vsel %vm6343_vm8, %v2564_v12, %v2568_v59  ;;  %v3788_v38 = vsel %vm6773_vm9, %v3786_v51, %v3787_v28  ;;  %8664 = vst [vmem:[#allocation4_spill] sm:$0xff] %v8288_v23  ;;  %v5844_v39 = vpop.f32.mrf.mxu1 }
 0x1dd   : > { %v3794_v46 = vrot.slane %v3639_v32, 5  ;;  %2959 = vst.msk [vmem:[#allocation3 + $0x1ac] sm:$0xf] %vm1638_vm3, %v2885_v63  ;;  %v3641_v30 = vld [vmem:[#allocation2 + $0xd0] sm:$0xf]  ;;  %v5583_v34 = vrot.slane %v3640_v26, 9  ;;  %v3514_v42 = vpop.permute.xlu1 %3513  ;;  %v8293_v43 = vadd.f32 %v5844_v39, %v5843_v56  ;;  %v8297_v2 = vadd.f32 %v5775_v45, %v5774_v7  ;;  %v5777_v52 = vpop.f32.mrf.mxu0 }
 0x1de   : > { %2632 = vst.msk [vmem:[#allocation3 + $0x260] sm:$0xf] %vm450_vm0, %v2559_v47  ;;  %2633 = vst.msk [vmem:[#allocation3 + $0x274] sm:$0xf] %vm450_vm0, %v2569_v3  ;;  %v3792_v22 = vsel %vm6773_vm9, %v5582_v4, %v3791_v6  ;;  %v3793_v54 = vrot.slane %v3791_v6, 4  ;;  %v3798_v14 = vrot.slane %v3641_v30, 5  ;;  %v2891_v15 = vpop.permute.xlu0 %2890  ;;  %v5846_v41 = vpop.f32.mrf.mxu1 }
 0x1df   : > { %3862 = vst.msk [vmem:[#allocation3 + $0x22c] sm:$0xf] %vm450_vm0, %v3788_v38  ;;  %v3642_v11 = vld [vmem:[#allocation2 + $0xd4] sm:$0x1]  ;;  %3863 = vst.msk [vmem:[#allocation3 + $0x240] sm:$0xf] %vm450_vm0, %v3792_v22  ;;  %v5778_v8 = vpop.f32.mrf.mxu0 }
 0x1e0   : > { %v3801_v40 = vrot.slane %v3642_v11, 5  ;;  %v3922_v44 = vld [vmem:[#allocation3 + $0x170] sm:$0xff]  ;;  %v6158_v10 = vld [vmem:[#allocation3 + $0xd8] ss:$20 sps:$4 sm:$0xff]   ;;  %v3795_v24 = vsel %vm6773_vm9, %v3793_v54, %v3794_v46  ;;  %2960 = vst.msk [vmem:[#allocation3 + $0x1c0] sm:$0xf] %vm1638_vm3, %v2887_v60  ;;  %v3799_v62 = vsel %vm6773_vm9, %v5583_v34, %v3798_v14  ;;  %v5847_v18 = vpop.f32.mrf.mxu1  ;;  %v8303_v4 = vadd.f32 %v5778_v8, %v5777_v52 }
 0x1e1   : > { %v6161_v16 = vld [vmem:[#allocation3 + $0x100] ss:$20 sps:$4 sm:$0xff]   ;;  %v3925_v49 = vld [vmem:[#allocation3 + $0x184] sm:$0xff]  ;;  %3864 = vst.msk [vmem:[#allocation3 + $0x254] sm:$0xf] %vm450_vm0, %v3795_v24  ;;  %v3800_v37 = vrot.slane %v3798_v14, 4  ;;  %6013 = vmatmul.mubr.msk.bf16.gmra.mxu0 %vm4651_vm12, %v6158_v10  ;;  %v2893_v28 = vpop.permute.xlu1 %2892  ;;  %v8300_v21 = vadd.f32 %v5847_v18, %v5846_v41  ;;  %v5780_v6 = vpop.f32.mrf.mxu0 }
 0x1e2   : > { %v6155_v5 = vld [vmem:[#allocation3 + $0x174] ss:$20 sps:$4 sm:$0xff]   ;;  %3584 = vst.msk [vmem:[#allocation3 + $0x1b0] sm:$0xf] %vm1638_vm3, %v3510_v35  ;;  %v5631_v19 = vcombine.low %v3922_v44, %v3925_v49  ;;  %3585 = vst.msk [vmem:[#allocation3 + $0x1c4] sm:$0xf] %vm1638_vm3, %v3512_v25  ;;  %6016 = vmatprep.mubr.msk.bf16.mxu0 %vm4651_vm12, %v6161_v16  ;;  %v3516_v17 = vpop.permute.xlu0 %3515  ;;  %v5849_v31 = vpop.f32.mrf.mxu1 }
 0x1e3   : > { %3865 = vst.msk [vmem:[#allocation3 + $0x268] sm:$0xf] %vm450_vm0, %v3799_v62  ;;  %4965 = vmatprep.mubr.bf16.mxu1 %v6155_v5  ;;  %v3802_v13 = vsel %vm6773_vm9, %v3800_v37, %v3801_v40  ;;  %v6162_v50 = vld [vmem:[#allocation3 + $0x128] ss:$20 sps:$4 sm:$0xff]   ;;  %v6165_v57 = vld [vmem:[#allocation3 + $0x150] ss:$20 sps:$4 sm:$0xff]   ;;  %v5781_v47 = vpop.f32.mrf.mxu0 }
 0x1e4   : > { %4966 = vmatmul.mubr.bf16.gmra.mxu1 %v5631_v19  ;;  %3866 = vst.msk [vmem:[#allocation3 + $0x27c] sm:$0xf] %vm450_vm0, %v3802_v13  ;;  %v3928_v58 = vld [vmem:[#allocation3 + $0x198] sm:$0xff]  ;;  %8665 = vst [vmem:[#allocation5_spill] sm:$0xff] %v8293_v43  ;;  %v6169_v61 = vld [vmem:[#allocation3 + $0x1a0] ss:$20 sps:$4 sm:$0xff]   ;;  %v5850_v26 = vpop.f32.mrf.mxu1  ;;  %v8311_v46 = vadd.f32 %v5781_v47, %v5780_v6 }
 0x1e5   : > { %2961 = vst.msk [vmem:[#allocation3 + $0x1d4] sm:$0xf] %vm1638_vm3, %v2889_v48  ;;  %2962 = vst.msk [vmem:[#allocation3 + $0x1e8] sm:$0xf] %vm1638_vm3, %v2891_v15  ;;  %v6166_v59 = vld [vmem:[#allocation3 + $0x178] ss:$20 sps:$4 sm:$0xff]   ;;  %v3518_v36 = vpop.permute.xlu1 %3517  ;;  %v8307_v3 = vadd.f32 %v5850_v26, %v5849_v31  ;;  %v5783_v22 = vpop.f32.mrf.mxu0 }
 0x1e6   : > { %3586 = vst.msk [vmem:[#allocation3 + $0x1d8] sm:$0xf] %vm1638_vm3, %v3514_v42  ;;  %3587 = vst.msk [vmem:[#allocation3 + $0x1ec] sm:$0xf] %vm1638_vm3, %v3516_v17  ;;  %v2895_v29 = vpop.permute.xlu0 %2894  ;;  %v6170_v30 = vld [vmem:[#allocation3 + $0x1c8] ss:$20 sps:$4 sm:$0xff]   ;;  %v5852_v24 = vpop.f32.mrf.mxu1 }
 0x1e7   : > { %2963 = vst.msk [vmem:[#allocation3 + $0x1fc] sm:$0xf] %vm1638_vm3, %v2893_v28  ;;  %8666 = vst [vmem:[#allocation6_spill] sm:$0xff] %v8300_v21  ;;  %v5784_v11 = vpop.f32.mrf.mxu0  ;;  %v6173_v34 = vld [vmem:[#allocation3 + $0x1f0] ss:$20 sps:$4 sm:$0xff]  }
 0x1e8   : > { %2964 = vst.msk [vmem:[#allocation3 + $0x210] sm:$0xf] %vm1638_vm3, %v2895_v29  ;;  %3588 = vst.msk [vmem:[#allocation3 + $0x200] sm:$0xf] %vm1638_vm3, %v3518_v36  ;;  %v8315_v10 = vadd.f32 %v5784_v11, %v5783_v22  ;;  %v5853_v5 = vpop.f32.mrf.mxu1  ;;  %v6174_v13 = vld [vmem:[#allocation3 + $0x218] ss:$20 sps:$4 sm:$0xff]  }
 0x1e9   : > { %v3931_v1 = vld [vmem:[#allocation3 + $0x1ac] sm:$0xff]  ;;  %6017 = vmatmul.mubr.msk.bf16.gmra.mxu0 %vm4651_vm12, %v6162_v50  ;;  %v3934_v12 = vld [vmem:[#allocation3 + $0x1c0] sm:$0xff]  ;;  %8667 = vst [vmem:[#allocation7_spill] sm:$0xff] %v8307_v3  ;;  %v2897_v38 = vpop.permute.xlu1 %2896  ;;  %v8322_v62 = vadd.f32 %v5853_v5, %v5852_v24  ;;  %v5786_v56 = vpop.f32.mrf.mxu0 }
 0x1ea   : > { %v6159_v20 = vld [vmem:[#allocation3 + $0x19c] ss:$20 sps:$4 sm:$0xff]   ;;  %v5636_v0 = vcombine.low %v3928_v58, %v3931_v1  ;;  %6020 = vmatprep.mubr.msk.bf16.mxu0 %vm4651_vm12, %v6165_v57  ;;  %v3520_v63 = vpop.permute.xlu0 %3519  ;;  %2965 = vst.msk [vmem:[#allocation3 + $0x224] sm:$0xf] %vm1638_vm3, %v2897_v38  ;;  %v5855_v37 = vpop.f32.mrf.mxu1  ;;  %v6178_v25 = vld [vmem:[#allocation3 + $0x240] ss:$20 sps:$4 sm:$0xff]  }
 0x1eb   : > { %4973 = vmatprep.mubr.bf16.mxu1 %v6159_v20  ;;  %3589 = vst.msk [vmem:[#allocation3 + $0x214] sm:$0xf] %vm1638_vm3, %v3520_v63  ;;  %8668 = vst [vmem:[#allocation8_spill] sm:$0xff] %v8322_v62  ;;  %v6179_v20 = vld [vmem:[#allocation3 + $0x268] ss:$20 sps:$4 sm:$0xff]   ;;  %v5787_v17 = vpop.f32.mrf.mxu0 }
 0x1ec   : > { %4974 = vmatmul.mubr.bf16.gmra.mxu1 %v5636_v0  ;;  %v5856_v15 = vpop.f32.mrf.mxu1  ;;  %v8333_v45 = vadd.f32 %v5787_v17, %v5786_v56 }
 0x1ed   : > { %v3937_v51 = vld [vmem:[#allocation3 + $0x1d4] sm:$0xff]  ;;  %v3522_v14 = vpop.permute.xlu1 %3521  ;;  %v3940_v40 = vld [vmem:[#allocation3 + $0x1e8] sm:$0xff]  ;;  %v8326_v57 = vadd.f32 %v5856_v15, %v5855_v37  ;;  %v5789_v28 = vpop.f32.mrf.mxu0 }
 0x1ee   : > { %v6163_v33 = vld [vmem:[#allocation3 + $0x1c4] ss:$20 sps:$4 sm:$0xff]   ;;  %v5641_v32 = vcombine.low %v3934_v12, %v3937_v51  ;;  %v2899_v54 = vpop.permute.xlu0 %2898  ;;  %3590 = vst.msk [vmem:[#allocation3 + $0x228] sm:$0xf] %vm1638_vm3, %v3522_v14  ;;  %v5858_v41 = vpop.f32.mrf.mxu1 }
 0x1ef   : > { %4981 = vmatprep.mubr.bf16.mxu1 %v6163_v33  ;;  %2966 = vst.msk [vmem:[#allocation3 + $0x238] sm:$0xf] %vm1638_vm3, %v2899_v54  ;;  %v3943_v60 = vld [vmem:[#allocation3 + $0x1fc] sm:$0xff]  ;;  %8669 = vst [vmem:[#allocation9_spill] sm:$0xff] %v8326_v57  ;;  %v5790_v52 = vpop.f32.mrf.mxu0 }
 0x1f0   : > { %v6167_v44 = vld [vmem:[#allocation3 + $0x1ec] ss:$20 sps:$4 sm:$0xff]   ;;  %v5646_v16 = vcombine.low %v3940_v40, %v3943_v60  ;;  %v5859_v18 = vpop.f32.mrf.mxu1  ;;  %v8336_v29 = vadd.f32 %v5790_v52, %v5789_v28 }
 0x1f1   : > { %6021 = vmatmul.mubr.msk.bf16.gmra.mxu0 %vm4651_vm12, %v6166_v59  ;;  %v2901_v49 = vpop.permute.xlu1 %2900  ;;  %v8338_v59 = vadd.f32 %v5859_v18, %v5858_v41  ;;  %v5792_v33 = vpop.f32.mrf.mxu0 }
 0x1f2   : > { %6024 = vmatprep.mubr.msk.bf16.mxu0 %vm4651_vm12, %v6169_v61  ;;  %v3524_v35 = vpop.permute.xlu0 %3523  ;;  %2967 = vst.msk [vmem:[#allocation3 + $0x24c] sm:$0xf] %vm1638_vm3, %v2901_v49  ;;  %v3946_v53 = vld [vmem:[#allocation3 + $0x210] sm:$0xff]  ;;  %v5861_v8 = vpop.f32.mrf.mxu1 }
 0x1f3   : > { %3591 = vst.msk [vmem:[#allocation3 + $0x23c] sm:$0xf] %vm1638_vm3, %v3524_v35  ;;  %8670 = vst [vmem:[#allocation10_spill] sm:$0xff] %v8338_v59  ;;  %v5793_v31 = vpop.f32.mrf.mxu0 }
 0x1f4   : > { %4982 = vmatmul.mubr.bf16.gmra.mxu1 %v5641_v32  ;;  %v5862_v12 = vpop.f32.mrf.mxu1  ;;  %v8342_v32 = vadd.f32 %v5793_v31, %v5792_v33 }
 0x1f5   : > { %4989 = vmatprep.mubr.bf16.mxu1 %v6167_v44  ;;  %v3526_v48 = vpop.permute.xlu1 %3525  ;;  %v3949_v50 = vld [vmem:[#allocation3 + $0x224] sm:$0xff]  ;;  %v8340_v51 = vadd.f32 %v5862_v12, %v5861_v8  ;;  %v5795_v6 = vpop.f32.mrf.mxu0 }
 0x1f6   : > { %v2903_v19 = vpop.permute.xlu0 %2902  ;;  %v6171_v27 = vld [vmem:[#allocation3 + $0x214] ss:$20 sps:$4 sm:$0xff]   ;;  %3592 = vst.msk [vmem:[#allocation3 + $0x250] sm:$0xf] %vm1638_vm3, %v3526_v48  ;;  %v5651_v58 = vcombine.low %v3946_v53, %v3949_v50 }
 0x1f7   : > { %2968 = vst.msk [vmem:[#allocation3 + $0x260] sm:$0xf] %vm1638_vm3, %v2903_v19  ;;  %8671 = vst [vmem:[#allocation11_spill] sm:$0xff] %v8340_v51  ;;  %v5796_v26 = vpop.f32.mrf.mxu0 }
 0x1f8   : > { %v8344_v63 = vadd.f32 %v5796_v26, %v5795_v6 }
 0x1f9   : > { %6025 = vmatmul.mubr.msk.bf16.gmra.mxu0 %vm4651_vm12, %v6170_v30  ;;  %v2905_v1 = vpop.permute.xlu1 %2904  ;;  %v6177_v39 = vld [vmem:[#allocation3 + $0x238] ss:$20 sps:$4 sm:$0xff]   ;;  %v5798_v47 = vpop.f32.mrf.mxu0 }
 0x1fa   : > { %6028 = vmatprep.mubr.msk.bf16.mxu0 %vm4651_vm12, %v6173_v34  ;;  %v3528_v42 = vpop.permute.xlu0 %3527  ;;  %2969 = vst.msk [vmem:[#allocation3 + $0x274] sm:$0xf] %vm1638_vm3, %v2905_v1  ;;  %v5880_v34 = vpop.f32.mrf.mxu1 }
 0x1fb   : > { %3593 = vst.msk [vmem:[#allocation3 + $0x264] sm:$0xf] %vm1638_vm3, %v3528_v42  ;;  %v5799_v38 = vpop.f32.mrf.mxu0 }
 0x1fc   : > { %4990 = vmatmul.mubr.bf16.gmra.mxu1 %v5646_v16  ;;  %v8346_v22 = vadd.f32 %v5799_v38, %v5798_v47  ;;  %v5881_v40 = vpop.f32.mrf.mxu1 }
 0x1fd   : > { %4997 = vmatprep.mubr.bf16.mxu1 %v6171_v27  ;;  %v3530_v0 = vpop.permute.xlu1 %3529  ;;  %v6175_v7 = vld [vmem:[#allocation3 + $0x23c] ss:$20 sps:$4 sm:$0xff]   ;;  %v5801_v54 = vpop.f32.mrf.mxu0  ;;  %v5882_v43 = vadd.f32 %v5881_v40, %v5880_v34 }
 0x1fe   : > { %3594 = vst.msk [vmem:[#allocation3 + $0x278] sm:$0xf] %vm1638_vm3, %v3530_v0  ;;  %v5883_v24 = vpop.f32.mrf.mxu1 }
 0x1ff   : > { %v5802_v30 = vpop.f32.mrf.mxu0  ;;  %v4896_v34 = vadd.f32 %v5882_v43, %v8164_v9 }
 0x200   : > { %v8348_v11 = vadd.f32 %v5802_v30, %v5801_v54  ;;  %v5884_v5 = vpop.f32.mrf.mxu1 }
 0x201   : > { %6029 = vmatmul.mubr.msk.bf16.gmra.mxu0 %vm4651_vm12, %v6174_v13  ;;  %v6182_v36 = vld [vmem:[#allocation3 + $0x260] ss:$20 sps:$4 sm:$0xff]   ;;  %v5885_v40 = vadd.f32 %v5884_v5, %v5883_v24 }
 0x202   : > { %6032 = vmatprep.mubr.msk.bf16.mxu0 %vm4651_vm12, %v6178_v25  ;;  %v5886_v37 = vpop.f32.mrf.mxu1 }
 0x203   : > { %v4899_v24 = vadd.f32 %v5885_v40, %v8186_v55 }
 0x204   : > { %4998 = vmatmul.mubr.bf16.gmra.mxu1 %v5651_v58  ;;  %v5887_v19 = vpop.f32.mrf.mxu1 }
 0x205   : > { %5005 = vmatprep.mubr.bf16.mxu1 %v6175_v7  ;;  %v6180_v61 = vld [vmem:[#allocation3 + $0x264] ss:$20 sps:$4 sm:$0xff]   ;;  %v5888_v62 = vadd.f32 %v5887_v19, %v5886_v37 }
 0x206   : > { %v5889_v13 = vpop.f32.mrf.mxu1 }
 0x208   : > { %v5890_v25 = vpop.f32.mrf.mxu1 }
 0x209   : > { %6033 = vmatmul.mubr.msk.bf16.gmra.mxu0 %vm4651_vm12, %v6179_v20 }
 0x20c   : > { %5006 = vmatmul.mubr.bf16.gmra.mxu1 %v6177_v39 }
 0x20d   : > { %5013 = vmatprep.mubr.bf16.mxu1 %v6180_v61  ;;  %v5804_v14 = vpop.f32.mrf.mxu0 }
 0x20f   : > { %v5805_v60 = vpop.f32.mrf.mxu0 }
 0x210   : > { %v8350_v44 = vadd.f32 %v5805_v60, %v5804_v14 }
 0x211   : > { %v5807_v16 = vpop.f32.mrf.mxu0 }
 0x212   : > { %8672 = vst [vmem:[#allocation12_spill] sm:$0xff] %v8350_v44 }
 0x213   : > { %v5808_v35 = vpop.f32.mrf.mxu0 }
 0x214   : > { %5014 = vmatmul.mubr.bf16.gmra.mxu1 %v6182_v36  ;;  %v8352_v49 = vadd.f32 %v5808_v35, %v5807_v16 }
 0x216   : > { %8673 = vst [vmem:[#allocation13_spill] sm:$0xff] %v8352_v49  ;;  %v4904_v49 = vadd.f32 %v5888_v62, %v8297_v2 }
 0x218   : > { %v5892_v48 = vpop.f32.mrf.mxu1 }
 0x21a   : > { %v5893_v53 = vpop.f32.mrf.mxu1 }
 0x21c   : > { %v5895_v27 = vpop.f32.mrf.mxu1 }
 0x21e   : > { %v5896_v58 = vpop.f32.mrf.mxu1 }
 0x21f   : > { %v5897_v2 = vadd.f32 %v5896_v58, %v5895_v27 }
 0x224   : > { %v8354_v50 = vpop.f32.mrf.mxu0 }
 0x226   : > { %v8356_v15 = vpop.f32.mrf.mxu0 }
 0x228   : > { %v8358_v42 = vpop.f32.mrf.mxu0 }
 0x22a   : > { %v5814_v20 = vpop.f32.mrf.mxu0 }
 0x22d   : > { %v5898_v1 = vpop.f32.mrf.mxu1 }
 0x22f   : > { %v5899_v56 = vpop.f32.mrf.mxu1 }
 0x230   : > { %v5900_v62 = vadd.f32 %v5899_v56, %v5898_v1 }
 0x231   : > { %v5901_v7 = vpop.f32.mrf.mxu1 }
 0x232   : > { %v4920_v27 = vadd.f32 %v5900_v62, %v8333_v45 }
 0x233   : > { %v5902_v17 = vpop.f32.mrf.mxu1 }
 0x23f   : > { %v8360_v0 = vpop.f32.mrf.mxu0 }
 0x241   : > { %v5817_v39 = vpop.f32.mrf.mxu0 }
 0x242   : > { %v8440_v58 = vadd.f32 %v5817_v39, %v8360_v0 }
 0x243   : > { %v8362_v28 = vpop.f32.mrf.mxu0 }
 0x245   : > { %v8364_v52 = vpop.f32.mrf.mxu0 }
 0x24a   : > { %v5904_v41 = vpop.f32.mrf.mxu1 }
 0x24c   : > { %v5905_v18 = vpop.f32.mrf.mxu1 }
 0x24e   : > { %v5907_v61 = vpop.f32.mrf.mxu1 }
 0x250   : > { %v5908_v12 = vpop.f32.mrf.mxu1 }
 0x254   : > { %v8366_v8 = vpop.f32.mrf.mxu0 }
 0x256   : > { %v8368_v36 = vpop.f32.mrf.mxu0 }
 0x258   : > { %v8370_v33 = vpop.f32.mrf.mxu0 }
 0x25a   : > { %v8374_v6 = vpop.f32.mrf.mxu0 }
 0x262   : > { %v8372_v31 = vpop.f32.mrf.mxu1 }
 0x264   : > { %v8376_v26 = vpop.f32.mrf.mxu1 }
 0x266   : > { %v8380_v38 = vpop.f32.mrf.mxu1 }
 0x268   : > { %v5914_v30 = vpop.f32.mrf.mxu1 }
 0x26e   : > { %v8378_v47 = vpop.f32.mrf.mxu0 }
 0x270   : > { %v8382_v54 = vpop.f32.mrf.mxu0 }
 0x271   : > { %8674 = vst [vmem:[#allocation14_spill] sm:$0xff] %v8382_v54 }
 0x272   : > { %v8384_v14 = vpop.f32.mrf.mxu0 }
 0x273   : > { %8675 = vst [vmem:[#allocation15_spill] sm:$0xff] %v8384_v14  ;;  %v5891_v14 = vadd.f32 %v5890_v25, %v5889_v13 }
 0x274   : > { %v8388_v16 = vpop.f32.mrf.mxu0 }
 0x275   : > { %8676 = vst [vmem:[#allocation16_spill] sm:$0xff] %v8388_v16 }
 0x279   : > { %v8386_v60 = vpop.f32.mrf.mxu1 }
 0x27b   : > { %v8390_v35 = vpop.f32.mrf.mxu1 }
 0x27d   : > { %v8394_v59 = vpop.f32.mrf.mxu1 }
 0x27f   : > { %v8400_v21 = vpop.f32.mrf.mxu1 }
 0x284   : > { %v8392_v51 = vpop.f32.mrf.mxu0 }
 0x285   : > { %8677 = vst [vmem:[#allocation17_spill] sm:$0xff] %v8392_v51  ;;  %v5903_v51 = vadd.f32 %v5902_v17, %v5901_v7  ;;  %v5915_v17 = vadd.f32 %v5914_v30, %v8380_v38  ;;  %v8469_v30 = vadd.f32 %v8368_v36, %v8366_v8 }
 0x286   : > { %v8396_v57 = vpop.f32.mrf.mxu0 }
 0x287   : > { %8678 = vst [vmem:[#allocation18_spill] sm:$0xff] %v8396_v57  ;;  %v4907_v57 = vadd.f32 %v5891_v14, %v8303_v4  ;;  %v8433_v4 = vadd.f32 %v5814_v20, %v8358_v42  ;;  %v5909_v42 = vadd.f32 %v5908_v12, %v5907_v61 }
 0x288   : > { %v8398_v3 = vpop.f32.mrf.mxu0 }
 0x289   : > { %8679 = vst [vmem:[#allocation19_spill] sm:$0xff] %v8398_v3  ;;  %v5894_v3 = vadd.f32 %v5893_v53, %v5892_v48  ;;  %v8430_v53 = vadd.f32 %v8356_v15, %v8354_v50  ;;  %v4923_v50 = vadd.f32 %v5903_v51, %v8336_v29  ;;  %v8447_v15 = vadd.f32 %v8364_v52, %v8362_v28 }
 0x28a   : > { %v8402_v23 = vpop.f32.mrf.mxu0  ;;  %v5912_v51 = vadd.f32 %v8376_v26, %v8372_v31  ;;  %v4931_v38 = vadd.f32 %v5909_v42, %v8344_v63 }
 0x28b   : > { %8680 = vst [vmem:[#allocation20_spill] sm:$0xff] %v8402_v23  ;;  %v4912_v48 = vadd.f32 %v5894_v3, %v8311_v46 }
 0x28c   : > { %v6006_v37 = vpop.f32.mrf.mxu0  ;;  %v4936_v8 = vadd.f32 %v5912_v51, %v8346_v22 }
 0x28d   : > { %v5065_v19 = vadd.f32 %v6006_v37, %v4904_v49  ;;  %v5906_v49 = vadd.f32 %v5905_v18, %v5904_v41 }
 0x28e   : > { %v5056_v13 = vpop.f32.mrf.mxu0 }
 0x28f   : > { %5185 = vst.msk [vmem:[%s8412_s10 + $0x10] sm:$0xff] %vm4651_vm12, %v5065_v19  ;;  %v5057_v25 = vadd.f32 %v5056_v13, %v4896_v34  ;;  %v4928_v45 = vadd.f32 %v5906_v49, %v8342_v32  ;;  %v5218_v28 = vsel %vm4651_vm12, %v5065_v19, 0.0 }
 0x290   : > { %v6007_v54 = vpop.f32.mrf.mxu0 }
 0x291   : > { %v8405_v16 = vpop.f32.mrf.mxu1  ;;  %5183 = vst.msk [vmem:[%s8412_s10] sm:$0xff] %vm4651_vm12, %v5057_v25  ;;  %v5068_v9 = vadd.f32 %v6007_v54, %v4907_v57  ;;  %v4915_v57 = vadd.f32 %v5897_v2, %v8315_v10  ;;  %v5285_v55 = vmul.f32 %v5057_v25, %v5057_v25  ;;  %v5287_v10 = vmul.f32 %v5065_v19, %v5065_v19 }
 0x292   : > { %v5059_v5 = vpop.f32.mrf.mxu0  ;;  %v5215_v56 = vsel %vm4651_vm12, %v5057_v25, 0.0  ;;  %v8479_v2 = vadd.f32 %v8374_v6, %v8370_v33  ;;  %v5918_v33 = vadd.f32 %v8390_v35, %v8386_v60 }
 0x293   : > { %v8415_v23 = vpop.f32.mrf.mxu1  ;;  %5186 = vst.msk [vmem:[%s8412_s10 + $0x18] sm:$0xff] %vm4651_vm12, %v5068_v9  ;;  %v5060_v1 = vadd.f32 %v5059_v5, %v4899_v24  ;;  %v5317_v41 = vsel %vm4651_vm12, %v5285_v55, 0.0  ;;  %v5288_v52 = vmul.f32 %v5068_v9, %v5068_v9  ;;  %v5320_v37 = vsel %vm4651_vm12, %v5287_v10, 0.0 }
 0x294   : > { %v6010_v46 = vpop.f32.mrf.mxu0  ;;  %v5220_v19 = vsel %vm4651_vm12, %v5068_v9, 0.0  ;;  %v4939_v5 = vadd.f32 %v5915_v17, %v8348_v11  ;;  %v5921_v11 = vadd.f32 %v8400_v21, %v8394_v59  ;;  %v5924_v42 = vadd.f32 %v8415_v23, %v8405_v16  ;;  %v8681_v16 = vld [vmem:[#allocation14_spill] sm:$0xff] }
 0x295   : > { %v8420_v44 = vpop.f32.mrf.mxu1  ;;  %v5081_v20 = vadd.f32 %v6010_v46, %v4920_v27  ;;  %5184 = vst.msk [vmem:[%s8412_s10 + $0x8] sm:$0xff] %vm4651_vm12, %v5060_v1  ;;  %v5216_v0 = vsel %vm4651_vm12, %v5060_v1, 0.0  ;;  %v5286_v7 = vmul.f32 %v5060_v1, %v5060_v1  ;;  %v5322_v36 = vsel %vm4651_vm12, %v5288_v52, 0.0 }
 0x296   : > { %v5072_v29 = vpop.f32.mrf.mxu0  ;;  %v5217_v32 = vadd.f32 %v5216_v0, %v5215_v56 }
 0x297   : > { %v8424_v43 = vpop.f32.mrf.mxu1  ;;  %5189 = vst.msk [vmem:[%s8412_s10 + $0x30] sm:$0xff] %vm4651_vm12, %v5081_v20  ;;  %v5318_v18 = vsel %vm4651_vm12, %v5286_v7, 0.0  ;;  %v5073_v61 = vadd.f32 %v5072_v29, %v4912_v48  ;;  %v5291_v55 = vmul.f32 %v5081_v20, %v5081_v20  ;;  %v5226_v10 = vsel %vm4651_vm12, %v5081_v20, 0.0 }
 0x298   : > { %v6011_v54 = vpop.f32.mrf.mxu0  ;;  %v5219_v14 = vadd.f32 %v5218_v28, %v5217_v32  ;;  %v5319_v31 = vadd.f32 %v5318_v18, %v5317_v41  ;;  %v5927_v21 = vadd.f32 %v8424_v43, %v8420_v44  ;;  %v8505_v28 = vadd.f32 %v8681_v16, %v8378_v47  ;;  %v8682_v43 = vld [vmem:[#allocation12_spill] sm:$0xff] }
 0x299   : > { %v5084_v26 = vadd.f32 %v6011_v54, %v4923_v50  ;;  %5187 = vst.msk [vmem:[%s8412_s10 + $0x20] sm:$0xff] %vm4651_vm12, %v5073_v61  ;;  %v5289_v34 = vmul.f32 %v5073_v61, %v5073_v61  ;;  %v5222_v25 = vsel %vm4651_vm12, %v5073_v61, 0.0  ;;  %v5328_v32 = vsel %vm4651_vm12, %v5291_v55, 0.0 }
 0x29a   : > { %v8442_v3 = vpop.f32.mrf.mxu1  ;;  %v5075_v13 = vpop.f32.mrf.mxu0  ;;  %v5321_v62 = vadd.f32 %v5320_v37, %v5319_v31  ;;  %v5221_v63 = vadd.f32 %v5220_v19, %v5219_v14  ;;  %v4952_v44 = vadd.f32 %v5924_v42, %v8430_v53  ;;  %v4944_v54 = vadd.f32 %v5918_v33, %v8682_v43  ;;  %v8683_v19 = vld [vmem:[#allocation13_spill] sm:$0xff] }
 0x29b   : > { %5190 = vst.msk [vmem:[%s8412_s10 + $0x38] sm:$0xff] %vm4651_vm12, %v5084_v26  ;;  %v5076_v49 = vadd.f32 %v5075_v13, %v4915_v57  ;;  %v5324_v1 = vsel %vm4651_vm12, %v5289_v34, 0.0  ;;  %v5292_v56 = vmul.f32 %v5084_v26, %v5084_v26  ;;  %v5228_v20 = vsel %vm4651_vm12, %v5084_v26, 0.0 }
 0x29c   : > { %v8454_v39 = vpop.f32.mrf.mxu1  ;;  %v5223_v6 = vadd.f32 %v5222_v25, %v5221_v63  ;;  %v5323_v48 = vadd.f32 %v5322_v36, %v5321_v62  ;;  %v4947_v34 = vadd.f32 %v5921_v11, %v8683_v19 }
 0x29d   : > { %5188 = vst.msk [vmem:[%s8412_s10 + $0x28] sm:$0xff] %vm4651_vm12, %v5076_v49  ;;  %v5224_v22 = vsel %vm4651_vm12, %v5076_v49, 0.0  ;;  %v5290_v46 = vmul.f32 %v5076_v49, %v5076_v49  ;;  %v5330_v47 = vsel %vm4651_vm12, %v5292_v56, 0.0 }
 0x29e   : > { %v8464_v12 = vpop.f32.mrf.mxu1  ;;  %v5325_v60 = vadd.f32 %v5324_v1, %v5323_v48  ;;  %v5225_v35 = vadd.f32 %v5224_v22, %v5223_v6 }
 0x29f   : > { %v5326_v0 = vsel %vm4651_vm12, %v5290_v46, 0.0 }
 0x2a0   : > { %v8475_v40 = vpop.f32.mrf.mxu1  ;;  %v5227_v59 = vadd.f32 %v5226_v10, %v5225_v35  ;;  %v5327_v17 = vadd.f32 %v5326_v0, %v5325_v60 }
 0x2a1   : > { %v6014_v24 = vpop.f32.mrf.mxu0 }
 0x2a2   : > { %v5097_v27 = vadd.f32 %v6014_v24, %v4936_v8  ;;  %v5329_v18 = vadd.f32 %v5328_v32, %v5327_v17  ;;  %v5229_v61 = vadd.f32 %v5228_v20, %v5227_v59  ;;  %v4955_v8 = vadd.f32 %v5927_v21, %v8433_v4 }
 0x2a3   : > { %v5088_v50 = vpop.f32.mrf.mxu0  ;;  %v5933_v59 = vadd.f32 %v8475_v40, %v8464_v12 }
 0x2a4   : > { %v5934_v9 = vpop.f32.mrf.mxu1  ;;  %5193 = vst.msk [vmem:[%s8412_s10 + $0x50] sm:$0xff] %vm4651_vm12, %v5097_v27  ;;  %v5089_v7 = vadd.f32 %v5088_v50, %v4928_v45  ;;  %v5331_v62 = vadd.f32 %v5330_v47, %v5329_v18  ;;  %v5295_v36 = vmul.f32 %v5097_v27, %v5097_v27  ;;  %v5234_v4 = vsel %vm4651_vm12, %v5097_v27, 0.0 }
 0x2a5   : > { %v6015_v51 = vpop.f32.mrf.mxu0 }
 0x2a6   : > { %v5935_v57 = vpop.f32.mrf.mxu1  ;;  %v5100_v23 = vadd.f32 %v6015_v51, %v4939_v5  ;;  %5191 = vst.msk [vmem:[%s8412_s10 + $0x40] sm:$0xff] %vm4651_vm12, %v5089_v7  ;;  %v5293_v45 = vmul.f32 %v5089_v7, %v5089_v7  ;;  %v5230_v14 = vsel %vm4651_vm12, %v5089_v7, 0.0  ;;  %v5930_v5 = vadd.f32 %v8454_v39, %v8442_v3  ;;  %v8684_v39 = vld [vmem:[#allocation17_spill] sm:$0xff] }
 0x2a7   : > { %v5091_v52 = vpop.f32.mrf.mxu0  ;;  %v5231_v13 = vadd.f32 %v5230_v14, %v5229_v61  ;;  %v5936_v33 = vadd.f32 %v5935_v57, %v5934_v9  ;;  %v8685_v9 = vld [vmem:[#allocation18_spill] sm:$0xff]  ;;  %v5336_v35 = vsel %vm4651_vm12, %v5295_v36, 0.0 }
 0x2a8   : > { %v5937_v29 = vpop.f32.mrf.mxu1  ;;  %5194 = vst.msk [vmem:[%s8412_s10 + $0x58] sm:$0xff] %vm4651_vm12, %v5100_v23  ;;  %v5092_v31 = vadd.f32 %v5091_v52, %v4931_v38  ;;  %v5332_v53 = vsel %vm4651_vm12, %v5293_v45, 0.0  ;;  %v5296_v55 = vmul.f32 %v5100_v23, %v5100_v23  ;;  %v5836_v57 = vadd.f32 %v8685_v9, %v8684_v39 }
 0x2a9   : > { %v6018_v37 = vpop.f32.mrf.mxu0  ;;  %v5333_v6 = vadd.f32 %v5332_v53, %v5331_v62  ;;  %v5236_v10 = vsel %vm4651_vm12, %v5100_v23, 0.0  ;;  %v4960_v21 = vadd.f32 %v5930_v5, %v8440_v58  ;;  %v8686_v62 = vld [vmem:[#allocation19_spill] sm:$0xff]  ;;  %v4963_v5 = vadd.f32 %v5933_v59, %v8447_v15 }
 0x2aa   : > { %v5938_v41 = vpop.f32.mrf.mxu1  ;;  %v5113_v63 = vadd.f32 %v6018_v37, %v4952_v44  ;;  %5192 = vst.msk [vmem:[%s8412_s10 + $0x48] sm:$0xff] %vm4651_vm12, %v5092_v31  ;;  %v5232_v25 = vsel %vm4651_vm12, %v5092_v31, 0.0  ;;  %v5294_v49 = vmul.f32 %v5092_v31, %v5092_v31  ;;  %v5338_v17 = vsel %vm4651_vm12, %v5296_v55, 0.0 }
 0x2ab   : > { %v5104_v38 = vpop.f32.mrf.mxu0  ;;  %v5233_v48 = vadd.f32 %v5232_v25, %v5231_v13  ;;  %v5939_v11 = vadd.f32 %v5938_v41, %v5937_v29  ;;  %v4968_v29 = vadd.f32 %v5936_v33, %v8469_v30 }
 0x2ac   : > { %v5940_v26 = vpop.f32.mrf.mxu1  ;;  %5197 = vst.msk [vmem:[%s8412_s10 + $0x70] sm:$0xff] %vm4651_vm12, %v5113_v63  ;;  %v5334_v1 = vsel %vm4651_vm12, %v5294_v49, 0.0  ;;  %v5105_v22 = vadd.f32 %v5104_v38, %v4944_v54  ;;  %v5299_v61 = vmul.f32 %v5113_v63, %v5113_v63  ;;  %v5242_v43 = vsel %vm4651_vm12, %v5113_v63, 0.0 }
 0x2ad   : > { %v6019_v50 = vpop.f32.mrf.mxu0  ;;  %v5235_v42 = vadd.f32 %v5234_v4, %v5233_v48  ;;  %v5335_v60 = vadd.f32 %v5334_v1, %v5333_v6  ;;  %v4971_v18 = vadd.f32 %v5939_v11, %v8479_v2 }
 0x2ae   : > { %v5941_v24 = vpop.f32.mrf.mxu1  ;;  %v5116_v3 = vadd.f32 %v6019_v50, %v4955_v8  ;;  %5195 = vst.msk [vmem:[%s8412_s10 + $0x60] sm:$0xff] %vm4651_vm12, %v5105_v22  ;;  %v5297_v27 = vmul.f32 %v5105_v22, %v5105_v22  ;;  %v5238_v23 = vsel %vm4651_vm12, %v5105_v22, 0.0  ;;  %v8687_v8 = vld [vmem:[#allocation20_spill] sm:$0xff] }
 0x2af   : > { %v5107_v0 = vpop.f32.mrf.mxu0  ;;  %v5337_v7 = vadd.f32 %v5336_v35, %v5335_v60  ;;  %v5237_v51 = vadd.f32 %v5236_v10, %v5235_v42  ;;  %v5942_v54 = vadd.f32 %v5941_v24, %v5940_v26  ;;  %v5839_v36 = vadd.f32 %v8687_v8, %v8686_v62  ;;  %v8690_v62 = vld [vmem:[#allocation4_spill] sm:$0xff] }
 0x2b0   : > { %v8529_v46 = vpop.f32.mrf.mxu1  ;;  %5198 = vst.msk [vmem:[%s8412_s10 + $0x78] sm:$0xff] %vm4651_vm12, %v5116_v3  ;;  %v5108_v16 = vadd.f32 %v5107_v0, %v4947_v34  ;;  %v5340_v30 = vsel %vm4651_vm12, %v5297_v27, 0.0  ;;  %v5300_v31 = vmul.f32 %v5116_v3, %v5116_v3  ;;  %v5344_v26 = vsel %vm4651_vm12, %v5299_v61, 0.0 }
 0x2b1   : > { %v6022_v20 = vpop.f32.mrf.mxu0  ;;  %v5239_v45 = vadd.f32 %v5238_v23, %v5237_v51  ;;  %v5339_v41 = vadd.f32 %v5338_v17, %v5337_v7  ;;  %v5244_v49 = vsel %vm4651_vm12, %v5116_v3, 0.0  ;;  %v4976_v55 = vadd.f32 %v5942_v54, %v8505_v28  ;;  %v8688_v7 = vld [vmem:[#allocation15_spill] sm:$0xff]  ;;  %v8689_v51 = vld [vmem:[#allocation16_spill] sm:$0xff] }
 0x2b2   : > { %v5944_v56 = vpop.f32.mrf.mxu1  ;;  %v5129_v52 = vadd.f32 %v6022_v20, %v4968_v29  ;;  %5196 = vst.msk [vmem:[%s8412_s10 + $0x68] sm:$0xff] %vm4651_vm12, %v5108_v16  ;;  %v5240_v58 = vsel %vm4651_vm12, %v5108_v16, 0.0  ;;  %v5298_v12 = vmul.f32 %v5108_v16, %v5108_v16  ;;  %v5346_v1 = vsel %vm4651_vm12, %v5300_v31, 0.0 }
 0x2b3   : > { %v5120_v44 = vpop.f32.mrf.mxu0  ;;  %v5341_v47 = vadd.f32 %v5340_v30, %v5339_v41  ;;  %v5241_v14 = vadd.f32 %v5240_v58, %v5239_v45  ;;  %v5945_v15 = vadd.f32 %v5944_v56, %v8529_v46  ;;  %v5833_v29 = vadd.f32 %v8689_v51, %v8688_v7 }
 0x2b4   : > { %v5946_v32 = vpop.f32.mrf.mxu1  ;;  %5201 = vst.msk [vmem:[%s8412_s10 + $0x90] sm:$0xff] %vm4651_vm12, %v5129_v52  ;;  %v5342_v2 = vsel %vm4651_vm12, %v5298_v12, 0.0  ;;  %v5121_v19 = vadd.f32 %v5120_v44, %v4960_v21  ;;  %v5303_v35 = vmul.f32 %v5129_v52, %v5129_v52  ;;  %v5250_v56 = vsel %vm4651_vm12, %v5129_v52, 0.0 }
 0x2b5   : > { %v6023_v13 = vpop.f32.mrf.mxu0  ;;  %v5243_v53 = vadd.f32 %v5242_v43, %v5241_v14  ;;  %v5343_v25 = vadd.f32 %v5342_v2, %v5341_v47  ;;  %v4979_v52 = vadd.f32 %v5945_v15, %v5833_v29 }
 0x2b6   : > { %v5947_v40 = vpop.f32.mrf.mxu1  ;;  %v5132_v63 = vadd.f32 %v6023_v13, %v4971_v18  ;;  %5199 = vst.msk [vmem:[%s8412_s10 + $0x80] sm:$0xff] %vm4651_vm12, %v5121_v19  ;;  %v5301_v24 = vmul.f32 %v5121_v19, %v5121_v19  ;;  %v5246_v22 = vsel %vm4651_vm12, %v5121_v19, 0.0  ;;  %v5352_v30 = vsel %vm4651_vm12, %v5303_v35, 0.0  ;;  %v8692_v35 = vld [vmem:[#allocation5_spill] sm:$0xff] }
 0x2b7   : > { %v5948_v37 = vadd.f32 %v5947_v40, %v5946_v32  ;;  %v5123_v33 = vpop.f32.mrf.mxu0  ;;  %v5345_v6 = vadd.f32 %v5344_v26, %v5343_v25  ;;  %v5245_v48 = vadd.f32 %v5244_v49, %v5243_v53 }
 0x2b8   : > { %v5949_v34 = vpop.f32.mrf.mxu1  ;;  %5202 = vst.msk [vmem:[%s8412_s10 + $0x98] sm:$0xff] %vm4651_vm12, %v5132_v63  ;;  %v5124_v11 = vadd.f32 %v5123_v33, %v4963_v5  ;;  %v5348_v10 = vsel %vm4651_vm12, %v5301_v24, 0.0  ;;  %v5304_v17 = vmul.f32 %v5132_v63, %v5132_v63  ;;  %v5252_v58 = vsel %vm4651_vm12, %v5132_v63, 0.0 }
 0x2b9   : > { %v4984_v4 = vadd.f32 %v5948_v37, %v5836_v57  ;;  %v6026_v60 = vpop.f32.mrf.mxu0  ;;  %v5247_v3 = vadd.f32 %v5246_v22, %v5245_v48  ;;  %v5347_v39 = vadd.f32 %v5346_v1, %v5345_v6 }
 0x2ba   : > { %v5950_v38 = vpop.f32.mrf.mxu1  ;;  %5200 = vst.msk [vmem:[%s8412_s10 + $0x88] sm:$0xff] %vm4651_vm12, %v5124_v11  ;;  %v5248_v28 = vsel %vm4651_vm12, %v5124_v11, 0.0  ;;  %v5302_v57 = vmul.f32 %v5124_v11, %v5124_v11  ;;  %v5354_v47 = vsel %vm4651_vm12, %v5304_v17, 0.0  ;;  %v8691_v11 = vld [vmem:[#allocation6_spill] sm:$0xff]  ;;  %v8693_v17 = vld [vmem:[#allocation7_spill] sm:$0xff] }
 0x2bb   : > { %v5951_v50 = vadd.f32 %v5950_v38, %v5949_v34  ;;  %v5145_v9 = vadd.f32 %v6026_v60, %v4984_v4  ;;  %v5136_v0 = vpop.f32.mrf.mxu0  ;;  %v5349_v21 = vadd.f32 %v5348_v10, %v5347_v39  ;;  %v5249_v59 = vadd.f32 %v5248_v28, %v5247_v3 }
 0x2bc   : > { %v5952_v42 = vpop.f32.mrf.mxu1  ;;  %v5350_v23 = vsel %vm4651_vm12, %v5302_v57, 0.0  ;;  %v5137_v16 = vadd.f32 %v5136_v0, %v4976_v55 }
 0x2bd   : > { %5205 = vst.msk [vmem:[%s8412_s10 + $0xb0] sm:$0xff] %vm4651_vm12, %v5145_v9  ;;  %v4987_v46 = vadd.f32 %v5951_v50, %v5839_v36  ;;  %v6027_v20 = vpop.f32.mrf.mxu0  ;;  %v5251_v45 = vadd.f32 %v5250_v56, %v5249_v59  ;;  %v5351_v41 = vadd.f32 %v5350_v23, %v5349_v21  ;;  %v5307_v19 = vmul.f32 %v5145_v9, %v5145_v9 }
 0x2be   : > { %v5953_v27 = vpop.f32.mrf.mxu1  ;;  %5203 = vst.msk [vmem:[%s8412_s10 + $0xa0] sm:$0xff] %vm4651_vm12, %v5137_v16  ;;  %v5305_v12 = vmul.f32 %v5137_v16, %v5137_v16  ;;  %v5254_v14 = vsel %vm4651_vm12, %v5137_v16, 0.0  ;;  %v5258_v6 = vsel %vm4651_vm12, %v5145_v9, 0.0 }
 0x2bf   : > { %v5954_v18 = vadd.f32 %v5953_v27, %v5952_v42  ;;  %v5148_v61 = vadd.f32 %v6027_v20, %v4987_v46  ;;  %v5139_v44 = vpop.f32.mrf.mxu0  ;;  %v5353_v43 = vadd.f32 %v5352_v30, %v5351_v41  ;;  %v5253_v54 = vadd.f32 %v5252_v58, %v5251_v45 }
 0x2c0   : > { %v5955_v32 = vpop.f32.mrf.mxu1  ;;  %v5140_v31 = vadd.f32 %v5139_v44, %v4979_v52  ;;  %v5356_v36 = vsel %vm4651_vm12, %v5305_v12, 0.0  ;;  %v5360_v60 = vsel %vm4651_vm12, %v5307_v19, 0.0 }
 0x2c1   : > { %5206 = vst.msk [vmem:[%s8412_s10 + $0xb8] sm:$0xff] %vm4651_vm12, %v5148_v61  ;;  %v6030_v37 = vpop.f32.mrf.mxu0  ;;  %v5255_v34 = vadd.f32 %v5254_v14, %v5253_v54  ;;  %v5355_v13 = vadd.f32 %v5354_v47, %v5353_v43  ;;  %v4992_v8 = vadd.f32 %v5954_v18, %v8690_v62  ;;  %v5308_v48 = vmul.f32 %v5148_v61, %v5148_v61 }
 0x2c2   : > { %v5956_v40 = vpop.f32.mrf.mxu1  ;;  %5204 = vst.msk [vmem:[%s8412_s10 + $0xa8] sm:$0xff] %vm4651_vm12, %v5140_v31  ;;  %v5256_v25 = vsel %vm4651_vm12, %v5140_v31, 0.0  ;;  %v5306_v63 = vmul.f32 %v5140_v31, %v5140_v31  ;;  %v5260_v15 = vsel %vm4651_vm12, %v5148_v61, 0.0 }
 0x2c3   : > { %v5957_v53 = vadd.f32 %v5956_v40, %v5955_v32  ;;  %v5152_v49 = vpop.f32.mrf.mxu0  ;;  %v5357_v24 = vadd.f32 %v5356_v36, %v5355_v13  ;;  %v5257_v38 = vadd.f32 %v5256_v25, %v5255_v34  ;;  %v5362_v7 = vsel %vm4651_vm12, %v5308_v48, 0.0 }
 0x2c4   : > { %v5958_v2 = vpop.f32.mrf.mxu1  ;;  %v5153_v33 = vadd.f32 %v5152_v49, %v4992_v8  ;;  %v5358_v4 = vsel %vm4651_vm12, %v5306_v63, 0.0 }
 0x2c5   : > { %v6031_v1 = vpop.f32.mrf.mxu0  ;;  %v5259_v22 = vadd.f32 %v5258_v6, %v5257_v38  ;;  %v5359_v50 = vadd.f32 %v5358_v4, %v5357_v24  ;;  %v4995_v9 = vadd.f32 %v5957_v53, %v8692_v35 }
 0x2c6   : > { %v5959_v26 = vpop.f32.mrf.mxu1  ;;  %5207 = vst.msk [vmem:[%s8412_s10 + $0xc0] sm:$0xff] %vm4651_vm12, %v5153_v33  ;;  %v5309_v3 = vmul.f32 %v5153_v33, %v5153_v33  ;;  %v5262_v51 = vsel %vm4651_vm12, %v5153_v33, 0.0 }
 0x2c7   : > { %v5960_v5 = vadd.f32 %v5959_v26, %v5958_v2  ;;  %v5155_v10 = vpop.f32.mrf.mxu0  ;;  %v5361_v28 = vadd.f32 %v5360_v60, %v5359_v50  ;;  %v5261_v27 = vadd.f32 %v5260_v15, %v5259_v22  ;;  %v8694_v2 = vld [vmem:[#allocation8_spill] sm:$0xff]  ;;  %v8695_v26 = vld [vmem:[#allocation9_spill] sm:$0xff] }
 0x2c8   : > { %v5961_v55 = vpop.f32.mrf.mxu1  ;;  %v5156_v29 = vadd.f32 %v5155_v10, %v4995_v9  ;;  %v5364_v32 = vsel %vm4651_vm12, %v5309_v3, 0.0 }
 0x2c9   : > { %v5000_v42 = vadd.f32 %v5960_v5, %v8691_v11  ;;  %v6034_v59 = vpop.f32.mrf.mxu0  ;;  %v5263_v46 = vadd.f32 %v5262_v51, %v5261_v27  ;;  %v5363_v56 = vadd.f32 %v5362_v7, %v5361_v28  ;;  %v8697_v27 = vld [vmem:[#allocation11_spill] sm:$0xff] }
 0x2ca   : > { %v5962_v39 = vpop.f32.mrf.mxu1  ;;  %5208 = vst.msk [vmem:[%s8412_s10 + $0xc8] sm:$0xff] %vm4651_vm12, %v5156_v29  ;;  %v5264_v20 = vsel %vm4651_vm12, %v5156_v29, 0.0  ;;  %v5310_v45 = vmul.f32 %v5156_v29, %v5156_v29 }
 0x2cb   : > { %v5161_v57 = vadd.f32 %v6030_v37, %v5000_v42  ;;  %v5963_v0 = vadd.f32 %v5962_v39, %v5961_v55  ;;  %v5168_v18 = vpop.f32.mrf.mxu0  ;;  %v5365_v61 = vadd.f32 %v5364_v32, %v5363_v56  ;;  %v5265_v58 = vadd.f32 %v5264_v20, %v5263_v46  ;;  %v8696_v42 = vld [vmem:[#allocation10_spill] sm:$0xff] }
 0x2cc   : > { %v5964_v21 = vpop.f32.mrf.mxu1  ;;  %v5366_v40 = vsel %vm4651_vm12, %v5310_v45, 0.0 }
 0x2cd   : > { %5209 = vst.msk [vmem:[%s8412_s10 + $0xd0] sm:$0xff] %vm4651_vm12, %v5161_v57  ;;  %v5003_v23 = vadd.f32 %v5963_v0, %v8693_v17  ;;  %v5311_v16 = vmul.f32 %v5161_v57, %v5161_v57  ;;  %v5266_v12 = vsel %vm4651_vm12, %v5161_v57, 0.0  ;;  %v5367_v47 = vadd.f32 %v5366_v40, %v5365_v61  ;;  %v6035_v34 = vpop.f32.mrf.mxu0 }
 0x2ce   : > { %v5965_v41 = vpop.f32.mrf.mxu1  ;;  %v5267_v54 = vadd.f32 %v5266_v12, %v5265_v58 }
 0x2cf   : > { %v5164_v30 = vadd.f32 %v6031_v1, %v5003_v23  ;;  %v5966_v52 = vadd.f32 %v5965_v41, %v5964_v21  ;;  %v5368_v31 = vsel %vm4651_vm12, %v5311_v16, 0.0  ;;  %v5171_v5 = vpop.f32.mrf.mxu0 }
 0x2d0   : > { %v5967_v44 = vpop.f32.mrf.mxu1  ;;  %v5369_v13 = vadd.f32 %v5368_v31, %v5367_v47 }
 0x2d1   : > { %5210 = vst.msk [vmem:[%s8412_s10 + $0xd8] sm:$0xff] %vm4651_vm12, %v5164_v30  ;;  %v5312_v43 = vmul.f32 %v5164_v30, %v5164_v30  ;;  %v5268_v14 = vsel %vm4651_vm12, %v5164_v30, 0.0  ;;  %v5008_v37 = vadd.f32 %v5966_v52, %v8694_v2 }
 0x2d2   : > { %v5968_v19 = vpop.f32.mrf.mxu1  ;;  %v5269_v62 = vadd.f32 %v5268_v14, %v5267_v54 }
 0x2d3   : > { %v5370_v8 = vsel %vm4651_vm12, %v5312_v43, 0.0  ;;  %v5969_v36 = vadd.f32 %v5968_v19, %v5967_v44  ;;  %v5169_v53 = vadd.f32 %v5168_v18, %v5008_v37 }
 0x2d4   : > { %v5970_v25 = vpop.f32.mrf.mxu1  ;;  %v5371_v63 = vadd.f32 %v5370_v8, %v5369_v13 }
 0x2d5   : > { %v5011_v49 = vadd.f32 %v5969_v36, %v8695_v26  ;;  %5211 = vst.msk [vmem:[%s8412_s10 + $0xe0] sm:$0xff] %vm4651_vm12, %v5169_v53  ;;  %v5270_v24 = vsel %vm4651_vm12, %v5169_v53, 0.0  ;;  %v5313_v38 = vmul.f32 %v5169_v53, %v5169_v53 }
 0x2d6   : > { %v5971_v33 = vpop.f32.mrf.mxu1  ;;  %v5271_v6 = vadd.f32 %v5270_v24, %v5269_v62 }
 0x2d7   : > { %v5172_v48 = vadd.f32 %v5171_v5, %v5011_v49  ;;  %v5972_v4 = vadd.f32 %v5971_v33, %v5970_v25  ;;  %v5372_v55 = vsel %vm4651_vm12, %v5313_v38, 0.0 }
 0x2d8   : > { %v5973_v1 = vpop.f32.mrf.mxu1  ;;  %v5373_v22 = vadd.f32 %v5372_v55, %v5371_v63 }
 0x2d9   : > { %5212 = vst.msk [vmem:[%s8412_s10 + $0xe8] sm:$0xff] %vm4651_vm12, %v5172_v48  ;;  %v5272_v50 = vsel %vm4651_vm12, %v5172_v48, 0.0  ;;  %v5314_v11 = vmul.f32 %v5172_v48, %v5172_v48  ;;  %v5016_v60 = vadd.f32 %v5972_v4, %v8696_v42 }
 0x2da   : > { %v5273_v15 = vadd.f32 %v5272_v50, %v5271_v6  ;;  %v5974_v3 = vpop.f32.mrf.mxu1 }
 0x2db   : > { %v5374_v39 = vsel %vm4651_vm12, %v5314_v11, 0.0  ;;  %v5177_v35 = vadd.f32 %v6034_v59, %v5016_v60  ;;  %v5975_v9 = vadd.f32 %v5974_v3, %v5973_v1 }
 0x2dc   : > { %v5375_v10 = vadd.f32 %v5374_v39, %v5373_v22 }
 0x2dd   : > { %5213 = vst.msk [vmem:[%s8412_s10 + $0xf0] sm:$0xff] %vm4651_vm12, %v5177_v35  ;;  %v5274_v28 = vsel %vm4651_vm12, %v5177_v35, 0.0  ;;  %v5315_v57 = vmul.f32 %v5177_v35, %v5177_v35  ;;  %v5019_v0 = vadd.f32 %v5975_v9, %v8697_v27 }
 0x2de   : > { %v5275_v7 = vadd.f32 %v5274_v28, %v5273_v15 }
 0x2df   : > { %v5376_v51 = vsel %vm4651_vm12, %v5315_v57, 0.0  ;;  %v5180_v29 = vadd.f32 %v6035_v34, %v5019_v0 }
 0x2e0   : > { %v5377_v21 = vadd.f32 %v5376_v51, %v5375_v10 }
 0x2e1   : > { %5214 = vst.msk [vmem:[%s8412_s10 + $0xf8] sm:$0xff] %vm4651_vm12, %v5180_v29  ;;  %v5276_v46 = vsel %vm4651_vm12, %v5180_v29, 0.0  ;;  %v5316_v59 = vmul.f32 %v5180_v29, %v5180_v29 }
 0x2e2   : > { %v5277_v56 = vadd.f32 %v5276_v46, %v5275_v7 }
 0x2e3   : > { %v5378_v17 = vsel %vm4651_vm12, %v5316_v59, 0.0 }
 0x2e4   : > { %v5278_v23 = vrot.slane %v5277_v56, 4  ;;  %v5379_v16 = vadd.f32 %v5378_v17, %v5377_v21 }
 0x2e6   : > { %v5279_v32 = vadd.f32 %v5278_v23, %v5277_v56  ;;  %v5380_v20 = vrot.slane %v5379_v16, 4 }
 0x2e8   : > { %v5280_v45 = vrot.slane %v5279_v32, 2  ;;  %v5381_v41 = vadd.f32 %v5380_v20, %v5379_v16 }
 0x2ea   : > { %v5281_v18 = vadd.f32 %v5280_v45, %v5279_v32  ;;  %v5382_v61 = vrot.slane %v5381_v41, 2 }
 0x2ec   : > { %v5282_v30 = vrot.slane %v5281_v18, 1  ;;  %v5383_v58 = vadd.f32 %v5382_v61, %v5381_v41 }
 0x2ee   : > { %v5283_v12 = vadd.f32 %v5282_v30, %v5281_v18  ;;  %v5384_v40 = vrot.slane %v5383_v58, 1 }
 0x2f0   : > { %5284 = vst.msk [vmem:[%s238_s12] sm:$0x1] %vm453_vm1, %v5283_v12  ;;  %v5385_v52 = vadd.f32 %v5384_v40, %v5383_v58 }
 0x2f2   : > { %5386 = vst.msk [vmem:[%s241_s15] sm:$0x1] %vm453_vm1, %v5385_v52 }
 0x2f3 PF: > { %s16_s18 = sadd.s32 1, %s6195_s18  }
 0x2f4   : > { %p13_p4 = scmp.ge.s32.totalorder %s16_s18, 4  }
 0x2f6   :  { %15 = sbr.rel (!%p13_p4) target bundleno = 1 (0x1), region = 88 }

</bundles_post_ra>
